<compile_context>
chip_gen: v6e
topology: v6e:2x2x1
jax: 0.10.0
libtpu: 0.0.40
codegen_flags: <defaults>
</compile_context>

<pallas_src>
import functools

import jax
import jax.numpy as jnp
from jax.experimental import pallas as pl
from jax.experimental.pallas import tpu as pltpu

H_DIM = 50            # self.h_dim in the module
STACK_LAYERS = 2      # stack_layers = 2 in the script
LANE_PAD = 128        # hp: hidden dim padded to a full 128-lane vreg width

# Fused gate-column layout of the 8*hp-wide preactivation (each block is hp lanes,
# 128-lane aligned):   [ i0 | i1 | f0 | f1 | o0 | o1 | g0 | g1 ]
_GATE_BLOCKS = {"i": (0, 1), "f": (2, 3), "o": (4, 5), "g": (6, 7)}
_PT_GATE_ROW = {"i": 0, "f": 1, "g": 2, "o": 3}          # PyTorch LSTM row order (i, f, g, o)
_GATE_SCALE = {"i": 0.5, "f": 0.5, "o": 0.5, "g": 1.0}   # sigmoid(z) = 0.5*tanh(0.5*z) + 0.5


def _lstm_wavefront_kernel(x_ref, wext_ref, bext_ref, wblk_ref, wg_ref, bg_ref,
                           out_ref, ext_ref, hs_ref, *, seq_len, batch, hp):
    """Wavefront-fused 2-layer LSTM recurrence + goal projection + log_softmax."""
    B = batch
    hp2, hp4, hp6 = 2 * hp, 4 * hp, 6 * hp

    # ---- hoisted input-side preactivations for ALL wavefront steps (off the serial chain) ----
    # ext[s] = [ x_s @ W_ih0 + b0 (layer-0 blocks) | b1 (layer-1 blocks) ], i/f/o pre-scaled by 0.5.
    ext_ref[...] = (jnp.dot(x_ref[...], wext_ref[...],
                            preferred_element_type=jnp.float32) + bext_ref[...])

    def gates(pre, c_prev):
        # pre: (B, 8*hp); one EUP tanh pass covers every gate of both layers.
        t = jnp.tanh(pre)
        sig = 0.5 * t[:, :hp6] + 0.5              # [i0 i1 f0 f1 o0 o1] (weights pre-scaled)
        g = t[:, hp6:]                            # [g0 g1]
        c_new = sig[:, hp2:hp4] * c_prev + sig[:, :hp2] * g
        h_new = sig[:, hp4:] * jnp.tanh(c_new)
        return h_new, c_new                       # layout [layer0 | layer1], each hp lanes

    # Mask selecting the layer-0 half of the (.., 2*hp) state vectors.
    lane = jax.lax.broadcasted_iota(jnp.int32, (1, hp2), 1)
    l0_mask = (lane < hp).astype(jnp.float32)

    # ---- wavefront step 0: only layer 0 (time 0) is real; h_cat == 0 so the recurrent
    # term vanishes and we just gate ext[0], then zero the (junk) layer-1 half. ----
    h_cat, c_cat = gates(ext_ref[pl.ds(0, B), :], jnp.zeros((B, hp2), jnp.float32))
    h_cat = h_cat * l0_mask
    c_cat = c_cat * l0_mask

    # ---- wavefront steps 1..seq_len: layer 0 processes time s, layer 1 processes time s-1.
    # h_cat = [h0_{s-1} | h1_{s-2}], c_cat = [c0_{s-1} | c1_{s-2}].  Fully unrolled. ----
    for s in range(1, seq_len + 1):
        pre = ext_ref[pl.ds(s * B, B), :] + jnp.dot(
            h_cat, wblk_ref[...], preferred_element_type=jnp.float32)
        h_cat, c_cat = gates(pre, c_cat)
        # row group s-1 holds [h0_s (unused) | h1_{s-1}]; the goal weight zeroes the layer-0 half.
        hs_ref[pl.ds((s - 1) * B, B), :] = h_cat

    # ---- hidden_to_goal + log_softmax, batched over all (time, batch) rows ----
    goal = jnp.dot(hs_ref[...], wg_ref[...],
                   preferred_element_type=jnp.float32) + bg_ref[...]
    m = jnp.max(goal, axis=-1, keepdims=True)
    z = goal - m
    out_ref[...] = z - jnp.log(jnp.sum(jnp.exp(z), axis=-1, keepdims=True))


def lstm_baseline_forward_batched(seq, packed):
    """seq: (seq_len, B, num_actions) of B independent sequences -> (seq_len, B, num_goals)."""
    seq_len, B, num_actions = seq.shape
    wext, bext, wblk, wg, bg = packed
    hp = wblk.shape[0] // 2
    num_goals = wg.shape[1]

    x = seq.astype(jnp.float32).reshape(seq_len * B, num_actions)
    # one extra zero wavefront row-group so layer 1 can finish time seq_len-1
    x = jnp.concatenate([x, jnp.zeros((B, num_actions), jnp.float32)], axis=0)

    kernel = functools.partial(_lstm_wavefront_kernel, seq_len=seq_len, batch=B, hp=hp)
    vmem = pl.BlockSpec(memory_space=pltpu.MemorySpace.VMEM)
    out = pl.pallas_call(
        kernel,
        out_shape=jax.ShapeDtypeStruct((seq_len * B, num_goals), jnp.float32),
        in_specs=[vmem] * 6,
        out_specs=vmem,
        scratch_shapes=[
            pltpu.VMEM(((seq_len + 1) * B, 8 * hp), jnp.float32),  # hoisted input preactivations
            pltpu.VMEM((seq_len * B, 2 * hp), jnp.float32),        # wavefront [h0_t | h1_{t-1}]
        ],
    )(x, wext, bext, wblk, wg, bg)
    return out.reshape(seq_len, B, num_goals)


def lstm_baseline_forward(seq, packed):
    """Module-equivalent forward: (seq_len, 1, num_actions) -> (seq_len, num_goals) log-probs."""
    return lstm_baseline_forward_batched(seq, packed)[:, 0, :]


def init_params(key, num_actions, num_goals, h_dim=H_DIM):
    """PyTorch-layout parameters: uniform(-1/sqrt(h_dim), 1/sqrt(h_dim))."""
    bound = 1.0 / (h_dim ** 0.5)

    def uni(k, shape):
        return jax.random.uniform(k, shape, jnp.float32, -bound, bound)

    keys = jax.random.split(key, 10)
    return {
        "weight_ih_l0": uni(keys[0], (4 * h_dim, num_actions)),
        "weight_hh_l0": uni(keys[1], (4 * h_dim, h_dim)),
        "bias_ih_l0":   uni(keys[2], (4 * h_dim,)),
        "bias_hh_l0":   uni(keys[3], (4 * h_dim,)),
        "weight_ih_l1": uni(keys[4], (4 * h_dim, h_dim)),
        "weight_hh_l1": uni(keys[5], (4 * h_dim, h_dim)),
        "bias_ih_l1":   uni(keys[6], (4 * h_dim,)),
        "bias_hh_l1":   uni(keys[7], (4 * h_dim,)),
        "goal_weight":  uni(keys[8], (num_goals, h_dim)),
        "goal_bias":    uni(keys[9], (num_goals,)),
    }


def pack_params(raw, h_dim, num_actions, num_goals, hp=LANE_PAD):
    """Repack PyTorch-layout weights into the fused, 128-lane-padded wavefront form.

    wext : (num_actions, 8*hp)  layer-0 input weights in the layer-0 gate blocks, zeros elsewhere
    bext : (1, 8*hp)            b0 (= b_ih0+b_hh0) in layer-0 blocks, b1 in layer-1 blocks
    wblk : (2*hp, 8*hp)         block-diagonal [[W_hh0 | W_ih1], [0 | W_hh1]] recurrence weight
    wg   : (2*hp, num_goals)    goal weight on the layer-1 half only (layer-0 rows are zero)

    i/f/o columns are pre-scaled by 0.5 so the kernel's single tanh implements sigmoid.
    Padded lanes (h_dim..hp of every block) are all-zero, so padded h/c lanes stay exactly 0:
    pre=0 -> sigmoid=0.5, tanh(g)=0 -> c_pad = 0.5*c_pad + 0 = 0, h_pad = 0.5*tanh(0) = 0.
    Everything stays f32 for parity with the f32 reference (kernel is latency-bound).
    """
    wext = jnp.zeros((num_actions, 8 * hp), jnp.float32)
    bext = jnp.zeros((1, 8 * hp), jnp.float32)
    wblk = jnp.zeros((2 * hp, 8 * hp), jnp.float32)

    b0 = raw["bias_ih_l0"] + raw["bias_hh_l0"]
    b1 = raw["bias_ih_l1"] + raw["bias_hh_l1"]

    for gate in ("i", "f", "o", "g"):
        r = _PT_GATE_ROW[gate]
        rows = slice(r * h_dim, (r + 1) * h_dim)
        s = _GATE_SCALE[gate]
        blk0, blk1 = _GATE_BLOCKS[gate]
        c0 = slice(blk0 * hp, blk0 * hp + h_dim)
        c1 = slice(blk1 * hp, blk1 * hp + h_dim)
        wext = wext.at[:, c0].set(s * raw["weight_ih_l0"][rows, :].T)
        bext = bext.at[0, c0].set(s * b0[rows])
        bext = bext.at[0, c1].set(s * b1[rows])
        wblk = wblk.at[:h_dim, c0].set(s * raw["weight_hh_l0"][rows, :].T)
        wblk = wblk.at[:h_dim, c1].set(s * raw["weight_ih_l1"][rows, :].T)
        wblk = wblk.at[hp:hp + h_dim, c1].set(s * raw["weight_hh_l1"][rows, :].T)

    wg = (jnp.zeros((2 * hp, num_goals), jnp.float32)
          .at[hp:hp + h_dim, :].set(raw["goal_weight"].T))
    bg = raw["goal_bias"][None, :].astype(jnp.float32)
    return (wext, bext, wblk, wg, bg)


def lstm_baseline_reference(seq, raw, h_dim=H_DIM):
    """Pure-JAX f32 reference with PyTorch nn.LSTM semantics (zero initial state)."""
    S, B, _ = seq.shape

    def layer(inp, w_ih, w_hh, b_ih, b_hh):
        h = jnp.zeros((B, h_dim), jnp.float32)
        c = jnp.zeros((B, h_dim), jnp.float32)
        outs = []
        for t in range(S):
            z = inp[t] @ w_ih.T + h @ w_hh.T + b_ih + b_hh
            i = jax.nn.sigmoid(z[:, 0 * h_dim:1 * h_dim])
            f = jax.nn.sigmoid(z[:, 1 * h_dim:2 * h_dim])
            g = jnp.tanh(z[:, 2 * h_dim:3 * h_dim])
            o = jax.nn.sigmoid(z[:, 3 * h_dim:4 * h_dim])
            c = f * c + i * g
            h = o * jnp.tanh(c)
            outs.append(h)
        return jnp.stack(outs, axis=0)

    h0 = layer(seq.astype(jnp.float32), raw["weight_ih_l0"], raw["weight_hh_l0"],
               raw["bias_ih_l0"], raw["bias_hh_l0"])
    h1 = layer(h0, raw["weight_ih_l1"], raw["weight_hh_l1"],
               raw["bias_ih_l1"], raw["bias_hh_l1"])
    goal = h1 @ raw["goal_weight"].T + raw["goal_bias"]
    return jax.nn.log_softmax(goal, axis=-1)


if __name__ == "__main__":
    seq_len = 8
    num_actions = 16
    num_goals = 8
    batch = 4          # independent sequences folded into the recurrence M dimension

    key = jax.random.PRNGKey(0)
    k_param, k_seq = jax.random.split(key)

    raw = init_params(k_param, num_actions, num_goals, H_DIM)
    packed = pack_params(raw, H_DIM, num_actions, num_goals)

    # batch of independent one-hot action sequences: (seq_len, batch, num_actions)
    action_ids = jax.random.randint(k_seq, (seq_len, batch), 0, num_actions)
    seqs = jax.nn.one_hot(action_ids, num_actions, dtype=jnp.float32)

    # batched kernel call (review item 1)
    fwd_batched = jax.jit(lstm_baseline_forward_batched)
    out_b = fwd_batched(seqs, packed)                       # (seq_len, batch, num_goals)
    jax.block_until_ready(out_b)

    # module-shaped single-sequence call: (seq_len, 1, num_actions) -> (seq_len, num_goals)
    fwd = jax.jit(lstm_baseline_forward)
    out_1 = fwd(seqs[:, :1, :], packed)
    jax.block_until_ready(out_1)

    ref = lstm_baseline_reference(seqs, raw, H_DIM)         # pure-JAX f32 reference

    assert out_b.shape == (seq_len, batch, num_goals)
    assert out_1.shape == (seq_len, num_goals)
    assert bool(jnp.all(jnp.isfinite(out_b)))
    # each row must be a valid log-probability distribution (logsumexp == 0)
    lse = jax.scipy.special.logsumexp(out_b, axis=-1)
    assert bool(jnp.allclose(lse, 0.0, atol=1e-3))
    # numerical parity with the f32 reference (tolerance covers TPU matmul precision paths)
    assert bool(jnp.allclose(out_b, ref, atol=5e-2, rtol=5e-2))
    # batched and single-sequence kernel paths agree
    assert bool(jnp.allclose(out_1, out_b[:, 0, :], atol=1e-4, rtol=1e-4))
    print("KERNEL_OK")
</pallas_src>

<mosaic_0001>
module attributes {stable_mosaic.version = 11 : i64} {
  func.func @_lstm_wavefront_kernel(%arg0: memref<36x16xf32, #tpu.memory_space<vmem>>, %arg1: memref<16x1024xf32, #tpu.memory_space<vmem>>, %arg2: memref<1x1024xf32, #tpu.memory_space<vmem>>, %arg3: memref<256x1024xf32, #tpu.memory_space<vmem>>, %arg4: memref<256x8xf32, #tpu.memory_space<vmem>>, %arg5: memref<1x8xf32, #tpu.memory_space<vmem>>, %arg6: memref<32x8xf32, #tpu.memory_space<vmem>>, %arg7: memref<36x1024xf32, #tpu.memory_space<vmem>>, %arg8: memref<32x256xf32, #tpu.memory_space<vmem>>) attributes {dimension_semantics = [], scalar_prefetch = 0 : i64, scratch_operands = 2 : i64, tpu.core_type = #tpu.core_type<tc>} {
    %c0 = arith.constant 0 : index
    %c0_0 = arith.constant 0 : index
    %0 = vector.load %arg0[%c0, %c0_0] : memref<36x16xf32, #tpu.memory_space<vmem>>, vector<36x16xf32>
    %c0_1 = arith.constant 0 : index
    %c0_2 = arith.constant 0 : index
    %1 = vector.load %arg1[%c0_1, %c0_2] : memref<16x1024xf32, #tpu.memory_space<vmem>>, vector<16x1024xf32>
    %cst = arith.constant dense<0.000000e+00> : vector<36x1024xf32>
    %2 = tpu.matmul %0, %1, %cst {dimension_numbers = #tpu.dot_dimension_numbers<[1], [0], [0], [1], [0, 0, 1, 1], [], []>} : vector<36x16xf32>, vector<16x1024xf32>, vector<36x1024xf32> -> vector<36x1024xf32>
    %c0_3 = arith.constant 0 : index
    %c0_4 = arith.constant 0 : index
    %3 = vector.load %arg2[%c0_3, %c0_4] : memref<1x1024xf32, #tpu.memory_space<vmem>>, vector<1x1024xf32>
    %4 = vector.broadcast %3 : vector<1x1024xf32> to vector<36x1024xf32>
    %5 = arith.addf %2, %4 : vector<36x1024xf32>
    %c0_5 = arith.constant 0 : index
    %c0_6 = arith.constant 0 : index
    %6 = vector.load %arg7[%c0_5, %c0_6] : memref<36x1024xf32, #tpu.memory_space<vmem>>, vector<36x1024xf32>
    tpu.vector_store %arg7[%c0_5, %c0_6], %5 {strides = array<i32>} : memref<36x1024xf32, #tpu.memory_space<vmem>>, vector<36x1024xf32>,
    %7 = tpu.iota {dimensions = array<i32: 1>} : vector<1x256xi32>
    %c128_i32 = arith.constant 128 : i32
    %8 = vector.broadcast %c128_i32 : i32 to vector<1x256xi32>
    %9 = arith.cmpi slt, %7, %8 : vector<1x256xi32>
    %10 = arith.extui %9 : vector<1x256xi1> to vector<1x256xi32>
    %11 = arith.sitofp %10 : vector<1x256xi32> to vector<1x256xf32>
    %c0_7 = arith.constant 0 : index
    %c0_8 = arith.constant 0 : index
    %12 = vector.load %arg7[%c0_7, %c0_8] : memref<36x1024xf32, #tpu.memory_space<vmem>>, vector<4x1024xf32>
    %cst_9 = arith.constant 0.000000e+00 : f32
    %13 = vector.broadcast %cst_9 : f32 to vector<4x256xf32>
    %14 = math.tanh %12 : vector<4x1024xf32>
    %15 = vector.extract_strided_slice %14 {offsets = [0, 0], sizes = [4, 768], strides = [1, 1]} : vector<4x1024xf32> to vector<4x768xf32>
    %cst_10 = arith.constant 5.000000e-01 : f32
    %16 = vector.broadcast %cst_10 : f32 to vector<4x768xf32>
    %17 = arith.mulf %16, %15 : vector<4x768xf32>
    %cst_11 = arith.constant 5.000000e-01 : f32
    %18 = vector.broadcast %cst_11 : f32 to vector<4x768xf32>
    %19 = arith.addf %17, %18 : vector<4x768xf32>
    %20 = vector.extract_strided_slice %14 {offsets = [0, 768], sizes = [4, 256], strides = [1, 1]} : vector<4x1024xf32> to vector<4x256xf32>
    %21 = vector.extract_strided_slice %19 {offsets = [0, 256], sizes = [4, 256], strides = [1, 1]} : vector<4x768xf32> to vector<4x256xf32>
    %22 = arith.mulf %21, %13 : vector<4x256xf32>
    %23 = vector.extract_strided_slice %19 {offsets = [0, 0], sizes = [4, 256], strides = [1, 1]} : vector<4x768xf32> to vector<4x256xf32>
    %24 = arith.mulf %23, %20 : vector<4x256xf32>
    %25 = arith.addf %22, %24 : vector<4x256xf32>
    %26 = vector.extract_strided_slice %19 {offsets = [0, 512], sizes = [4, 256], strides = [1, 1]} : vector<4x768xf32> to vector<4x256xf32>
    %27 = math.tanh %25 : vector<4x256xf32>
    %28 = arith.mulf %26, %27 : vector<4x256xf32>
    %29 = vector.broadcast %11 : vector<1x256xf32> to vector<4x256xf32>
    %30 = arith.mulf %28, %29 : vector<4x256xf32>
    %31 = vector.broadcast %11 : vector<1x256xf32> to vector<4x256xf32>
    %32 = arith.mulf %25, %31 : vector<4x256xf32>
    %c4 = arith.constant 4 : index
    %c0_12 = arith.constant 0 : index
    %33 = vector.load %arg7[%c4, %c0_12] : memref<36x1024xf32, #tpu.memory_space<vmem>>, vector<4x1024xf32>
    %c0_13 = arith.constant 0 : index
    %c0_14 = arith.constant 0 : index
    %34 = vector.load %arg3[%c0_13, %c0_14] : memref<256x1024xf32, #tpu.memory_space<vmem>>, vector<256x1024xf32>
    %cst_15 = arith.constant dense<0.000000e+00> : vector<4x1024xf32>
    %35 = tpu.matmul %30, %34, %cst_15 {dimension_numbers = #tpu.dot_dimension_numbers<[1], [0], [0], [1], [0, 0, 1, 1], [], []>} : vector<4x256xf32>, vector<256x1024xf32>, vector<4x1024xf32> -> vector<4x1024xf32>
    %36 = arith.addf %33, %35 : vector<4x1024xf32>
    %37 = math.tanh %36 : vector<4x1024xf32>
    %38 = vector.extract_strided_slice %37 {offsets = [0, 0], sizes = [4, 768], strides = [1, 1]} : vector<4x1024xf32> to vector<4x768xf32>
    %cst_16 = arith.constant 5.000000e-01 : f32
    %39 = vector.broadcast %cst_16 : f32 to vector<4x768xf32>
    %40 = arith.mulf %39, %38 : vector<4x768xf32>
    %cst_17 = arith.constant 5.000000e-01 : f32
    %41 = vector.broadcast %cst_17 : f32 to vector<4x768xf32>
    %42 = arith.addf %40, %41 : vector<4x768xf32>
    %43 = vector.extract_strided_slice %37 {offsets = [0, 768], sizes = [4, 256], strides = [1, 1]} : vector<4x1024xf32> to vector<4x256xf32>
    %44 = vector.extract_strided_slice %42 {offsets = [0, 256], sizes = [4, 256], strides = [1, 1]} : vector<4x768xf32> to vector<4x256xf32>
    %45 = arith.mulf %44, %32 : vector<4x256xf32>
    %46 = vector.extract_strided_slice %42 {offsets = [0, 0], sizes = [4, 256], strides = [1, 1]} : vector<4x768xf32> to vector<4x256xf32>
    %47 = arith.mulf %46, %43 : vector<4x256xf32>
    %48 = arith.addf %45, %47 : vector<4x256xf32>
    %49 = vector.extract_strided_slice %42 {offsets = [0, 512], sizes = [4, 256], strides = [1, 1]} : vector<4x768xf32> to vector<4x256xf32>
    %50 = math.tanh %48 : vector<4x256xf32>
    %51 = arith.mulf %49, %50 : vector<4x256xf32>
    %c0_18 = arith.constant 0 : index
    %c0_19 = arith.constant 0 : index
    %52 = vector.load %arg8[%c0_18, %c0_19] : memref<32x256xf32, #tpu.memory_space<vmem>>, vector<4x256xf32>
    tpu.vector_store %arg8[%c0_18, %c0_19], %51 {strides = array<i32>} : memref<32x256xf32, #tpu.memory_space<vmem>>, vector<4x256xf32>,
    %c8 = arith.constant 8 : index
    %c0_20 = arith.constant 0 : index
    %53 = vector.load %arg7[%c8, %c0_20] : memref<36x1024xf32, #tpu.memory_space<vmem>>, vector<4x1024xf32>
    %c0_21 = arith.constant 0 : index
    %c0_22 = arith.constant 0 : index
    %54 = vector.load %arg3[%c0_21, %c0_22] : memref<256x1024xf32, #tpu.memory_space<vmem>>, vector<256x1024xf32>
    %cst_23 = arith.constant dense<0.000000e+00> : vector<4x1024xf32>
    %55 = tpu.matmul %51, %54, %cst_23 {dimension_numbers = #tpu.dot_dimension_numbers<[1], [0], [0], [1], [0, 0, 1, 1], [], []>} : vector<4x256xf32>, vector<256x1024xf32>, vector<4x1024xf32> -> vector<4x1024xf32>
    %56 = arith.addf %53, %55 : vector<4x1024xf32>
    %57 = math.tanh %56 : vector<4x1024xf32>
    %58 = vector.extract_strided_slice %57 {offsets = [0, 0], sizes = [4, 768], strides = [1, 1]} : vector<4x1024xf32> to vector<4x768xf32>
    %cst_24 = arith.constant 5.000000e-01 : f32
    %59 = vector.broadcast %cst_24 : f32 to vector<4x768xf32>
    %60 = arith.mulf %59, %58 : vector<4x768xf32>
    %cst_25 = arith.constant 5.000000e-01 : f32
    %61 = vector.broadcast %cst_25 : f32 to vector<4x768xf32>
    %62 = arith.addf %60, %61 : vector<4x768xf32>
    %63 = vector.extract_strided_slice %57 {offsets = [0, 768], sizes = [4, 256], strides = [1, 1]} : vector<4x1024xf32> to vector<4x256xf32>
    %64 = vector.extract_strided_slice %62 {offsets = [0, 256], sizes = [4, 256], strides = [1, 1]} : vector<4x768xf32> to vector<4x256xf32>
    %65 = arith.mulf %64, %48 : vector<4x256xf32>
    %66 = vector.extract_strided_slice %62 {offsets = [0, 0], sizes = [4, 256], strides = [1, 1]} : vector<4x768xf32> to vector<4x256xf32>
    %67 = arith.mulf %66, %63 : vector<4x256xf32>
    %68 = arith.addf %65, %67 : vector<4x256xf32>
    %69 = vector.extract_strided_slice %62 {offsets = [0, 512], sizes = [4, 256], strides = [1, 1]} : vector<4x768xf32> to vector<4x256xf32>
    %70 = math.tanh %68 : vector<4x256xf32>
    %71 = arith.mulf %69, %70 : vector<4x256xf32>
    %c4_26 = arith.constant 4 : index
    %c0_27 = arith.constant 0 : index
    %72 = vector.load %arg8[%c4_26, %c0_27] : memref<32x256xf32, #tpu.memory_space<vmem>>, vector<4x256xf32>
    tpu.vector_store %arg8[%c4_26, %c0_27], %71 {strides = array<i32>} : memref<32x256xf32, #tpu.memory_space<vmem>>, vector<4x256xf32>,
    %c12 = arith.constant 12 : index
    %c0_28 = arith.constant 0 : index
    %73 = vector.load %arg7[%c12, %c0_28] : memref<36x1024xf32, #tpu.memory_space<vmem>>, vector<4x1024xf32>
    %c0_29 = arith.constant 0 : index
    %c0_30 = arith.constant 0 : index
    %74 = vector.load %arg3[%c0_29, %c0_30] : memref<256x1024xf32, #tpu.memory_space<vmem>>, vector<256x1024xf32>
    %cst_31 = arith.constant dense<0.000000e+00> : vector<4x1024xf32>
    %75 = tpu.matmul %71, %74, %cst_31 {dimension_numbers = #tpu.dot_dimension_numbers<[1], [0], [0], [1], [0, 0, 1, 1], [], []>} : vector<4x256xf32>, vector<256x1024xf32>, vector<4x1024xf32> -> vector<4x1024xf32>
    %76 = arith.addf %73, %75 : vector<4x1024xf32>
    %77 = math.tanh %76 : vector<4x1024xf32>
    %78 = vector.extract_strided_slice %77 {offsets = [0, 0], sizes = [4, 768], strides = [1, 1]} : vector<4x1024xf32> to vector<4x768xf32>
    %cst_32 = arith.constant 5.000000e-01 : f32
    %79 = vector.broadcast %cst_32 : f32 to vector<4x768xf32>
    %80 = arith.mulf %79, %78 : vector<4x768xf32>
    %cst_33 = arith.constant 5.000000e-01 : f32
    %81 = vector.broadcast %cst_33 : f32 to vector<4x768xf32>
    %82 = arith.addf %80, %81 : vector<4x768xf32>
    %83 = vector.extract_strided_slice %77 {offsets = [0, 768], sizes = [4, 256], strides = [1, 1]} : vector<4x1024xf32> to vector<4x256xf32>
    %84 = vector.extract_strided_slice %82 {offsets = [0, 256], sizes = [4, 256], strides = [1, 1]} : vector<4x768xf32> to vector<4x256xf32>
    %85 = arith.mulf %84, %68 : vector<4x256xf32>
    %86 = vector.extract_strided_slice %82 {offsets = [0, 0], sizes = [4, 256], strides = [1, 1]} : vector<4x768xf32> to vector<4x256xf32>
    %87 = arith.mulf %86, %83 : vector<4x256xf32>
    %88 = arith.addf %85, %87 : vector<4x256xf32>
    %89 = vector.extract_strided_slice %82 {offsets = [0, 512], sizes = [4, 256], strides = [1, 1]} : vector<4x768xf32> to vector<4x256xf32>
    %90 = math.tanh %88 : vector<4x256xf32>
    %91 = arith.mulf %89, %90 : vector<4x256xf32>
    %c8_34 = arith.constant 8 : index
    %c0_35 = arith.constant 0 : index
    %92 = vector.load %arg8[%c8_34, %c0_35] : memref<32x256xf32, #tpu.memory_space<vmem>>, vector<4x256xf32>
    tpu.vector_store %arg8[%c8_34, %c0_35], %91 {strides = array<i32>} : memref<32x256xf32, #tpu.memory_space<vmem>>, vector<4x256xf32>,
    %c16 = arith.constant 16 : index
    %c0_36 = arith.constant 0 : index
    %93 = vector.load %arg7[%c16, %c0_36] : memref<36x1024xf32, #tpu.memory_space<vmem>>, vector<4x1024xf32>
    %c0_37 = arith.constant 0 : index
    %c0_38 = arith.constant 0 : index
    %94 = vector.load %arg3[%c0_37, %c0_38] : memref<256x1024xf32, #tpu.memory_space<vmem>>, vector<256x1024xf32>
    %cst_39 = arith.constant dense<0.000000e+00> : vector<4x1024xf32>
    %95 = tpu.matmul %91, %94, %cst_39 {dimension_numbers = #tpu.dot_dimension_numbers<[1], [0], [0], [1], [0, 0, 1, 1], [], []>} : vector<4x256xf32>, vector<256x1024xf32>, vector<4x1024xf32> -> vector<4x1024xf32>
    %96 = arith.addf %93, %95 : vector<4x1024xf32>
    %97 = math.tanh %96 : vector<4x1024xf32>
    %98 = vector.extract_strided_slice %97 {offsets = [0, 0], sizes = [4, 768], strides = [1, 1]} : vector<4x1024xf32> to vector<4x768xf32>
    %cst_40 = arith.constant 5.000000e-01 : f32
    %99 = vector.broadcast %cst_40 : f32 to vector<4x768xf32>
    %100 = arith.mulf %99, %98 : vector<4x768xf32>
    %cst_41 = arith.constant 5.000000e-01 : f32
    %101 = vector.broadcast %cst_41 : f32 to vector<4x768xf32>
    %102 = arith.addf %100, %101 : vector<4x768xf32>
    %103 = vector.extract_strided_slice %97 {offsets = [0, 768], sizes = [4, 256], strides = [1, 1]} : vector<4x1024xf32> to vector<4x256xf32>
    %104 = vector.extract_strided_slice %102 {offsets = [0, 256], sizes = [4, 256], strides = [1, 1]} : vector<4x768xf32> to vector<4x256xf32>
    %105 = arith.mulf %104, %88 : vector<4x256xf32>
    %106 = vector.extract_strided_slice %102 {offsets = [0, 0], sizes = [4, 256], strides = [1, 1]} : vector<4x768xf32> to vector<4x256xf32>
    %107 = arith.mulf %106, %103 : vector<4x256xf32>
    %108 = arith.addf %105, %107 : vector<4x256xf32>
    %109 = vector.extract_strided_slice %102 {offsets = [0, 512], sizes = [4, 256], strides = [1, 1]} : vector<4x768xf32> to vector<4x256xf32>
    %110 = math.tanh %108 : vector<4x256xf32>
    %111 = arith.mulf %109, %110 : vector<4x256xf32>
    %c12_42 = arith.constant 12 : index
    %c0_43 = arith.constant 0 : index
    %112 = vector.load %arg8[%c12_42, %c0_43] : memref<32x256xf32, #tpu.memory_space<vmem>>, vector<4x256xf32>
    tpu.vector_store %arg8[%c12_42, %c0_43], %111 {strides = array<i32>} : memref<32x256xf32, #tpu.memory_space<vmem>>, vector<4x256xf32>,
    %c20 = arith.constant 20 : index
    %c0_44 = arith.constant 0 : index
    %113 = vector.load %arg7[%c20, %c0_44] : memref<36x1024xf32, #tpu.memory_space<vmem>>, vector<4x1024xf32>
    %c0_45 = arith.constant 0 : index
    %c0_46 = arith.constant 0 : index
    %114 = vector.load %arg3[%c0_45, %c0_46] : memref<256x1024xf32, #tpu.memory_space<vmem>>, vector<256x1024xf32>
    %cst_47 = arith.constant dense<0.000000e+00> : vector<4x1024xf32>
    %115 = tpu.matmul %111, %114, %cst_47 {dimension_numbers = #tpu.dot_dimension_numbers<[1], [0], [0], [1], [0, 0, 1, 1], [], []>} : vector<4x256xf32>, vector<256x1024xf32>, vector<4x1024xf32> -> vector<4x1024xf32>
    %116 = arith.addf %113, %115 : vector<4x1024xf32>
    %117 = math.tanh %116 : vector<4x1024xf32>
    %118 = vector.extract_strided_slice %117 {offsets = [0, 0], sizes = [4, 768], strides = [1, 1]} : vector<4x1024xf32> to vector<4x768xf32>
    %cst_48 = arith.constant 5.000000e-01 : f32
    %119 = vector.broadcast %cst_48 : f32 to vector<4x768xf32>
    %120 = arith.mulf %119, %118 : vector<4x768xf32>
    %cst_49 = arith.constant 5.000000e-01 : f32
    %121 = vector.broadcast %cst_49 : f32 to vector<4x768xf32>
    %122 = arith.addf %120, %121 : vector<4x768xf32>
    %123 = vector.extract_strided_slice %117 {offsets = [0, 768], sizes = [4, 256], strides = [1, 1]} : vector<4x1024xf32> to vector<4x256xf32>
    %124 = vector.extract_strided_slice %122 {offsets = [0, 256], sizes = [4, 256], strides = [1, 1]} : vector<4x768xf32> to vector<4x256xf32>
    %125 = arith.mulf %124, %108 : vector<4x256xf32>
    %126 = vector.extract_strided_slice %122 {offsets = [0, 0], sizes = [4, 256], strides = [1, 1]} : vector<4x768xf32> to vector<4x256xf32>
    %127 = arith.mulf %126, %123 : vector<4x256xf32>
    %128 = arith.addf %125, %127 : vector<4x256xf32>
    %129 = vector.extract_strided_slice %122 {offsets = [0, 512], sizes = [4, 256], strides = [1, 1]} : vector<4x768xf32> to vector<4x256xf32>
    %130 = math.tanh %128 : vector<4x256xf32>
    %131 = arith.mulf %129, %130 : vector<4x256xf32>
    %c16_50 = arith.constant 16 : index
    %c0_51 = arith.constant 0 : index
    %132 = vector.load %arg8[%c16_50, %c0_51] : memref<32x256xf32, #tpu.memory_space<vmem>>, vector<4x256xf32>
    tpu.vector_store %arg8[%c16_50, %c0_51], %131 {strides = array<i32>} : memref<32x256xf32, #tpu.memory_space<vmem>>, vector<4x256xf32>,
    %c24 = arith.constant 24 : index
    %c0_52 = arith.constant 0 : index
    %133 = vector.load %arg7[%c24, %c0_52] : memref<36x1024xf32, #tpu.memory_space<vmem>>, vector<4x1024xf32>
    %c0_53 = arith.constant 0 : index
    %c0_54 = arith.constant 0 : index
    %134 = vector.load %arg3[%c0_53, %c0_54] : memref<256x1024xf32, #tpu.memory_space<vmem>>, vector<256x1024xf32>
    %cst_55 = arith.constant dense<0.000000e+00> : vector<4x1024xf32>
    %135 = tpu.matmul %131, %134, %cst_55 {dimension_numbers = #tpu.dot_dimension_numbers<[1], [0], [0], [1], [0, 0, 1, 1], [], []>} : vector<4x256xf32>, vector<256x1024xf32>, vector<4x1024xf32> -> vector<4x1024xf32>
    %136 = arith.addf %133, %135 : vector<4x1024xf32>
    %137 = math.tanh %136 : vector<4x1024xf32>
    %138 = vector.extract_strided_slice %137 {offsets = [0, 0], sizes = [4, 768], strides = [1, 1]} : vector<4x1024xf32> to vector<4x768xf32>
    %cst_56 = arith.constant 5.000000e-01 : f32
    %139 = vector.broadcast %cst_56 : f32 to vector<4x768xf32>
    %140 = arith.mulf %139, %138 : vector<4x768xf32>
    %cst_57 = arith.constant 5.000000e-01 : f32
    %141 = vector.broadcast %cst_57 : f32 to vector<4x768xf32>
    %142 = arith.addf %140, %141 : vector<4x768xf32>
    %143 = vector.extract_strided_slice %137 {offsets = [0, 768], sizes = [4, 256], strides = [1, 1]} : vector<4x1024xf32> to vector<4x256xf32>
    %144 = vector.extract_strided_slice %142 {offsets = [0, 256], sizes = [4, 256], strides = [1, 1]} : vector<4x768xf32> to vector<4x256xf32>
    %145 = arith.mulf %144, %128 : vector<4x256xf32>
    %146 = vector.extract_strided_slice %142 {offsets = [0, 0], sizes = [4, 256], strides = [1, 1]} : vector<4x768xf32> to vector<4x256xf32>
    %147 = arith.mulf %146, %143 : vector<4x256xf32>
    %148 = arith.addf %145, %147 : vector<4x256xf32>
    %149 = vector.extract_strided_slice %142 {offsets = [0, 512], sizes = [4, 256], strides = [1, 1]} : vector<4x768xf32> to vector<4x256xf32>
    %150 = math.tanh %148 : vector<4x256xf32>
    %151 = arith.mulf %149, %150 : vector<4x256xf32>
    %c20_58 = arith.constant 20 : index
    %c0_59 = arith.constant 0 : index
    %152 = vector.load %arg8[%c20_58, %c0_59] : memref<32x256xf32, #tpu.memory_space<vmem>>, vector<4x256xf32>
    tpu.vector_store %arg8[%c20_58, %c0_59], %151 {strides = array<i32>} : memref<32x256xf32, #tpu.memory_space<vmem>>, vector<4x256xf32>,
    %c28 = arith.constant 28 : index
    %c0_60 = arith.constant 0 : index
    %153 = vector.load %arg7[%c28, %c0_60] : memref<36x1024xf32, #tpu.memory_space<vmem>>, vector<4x1024xf32>
    %c0_61 = arith.constant 0 : index
    %c0_62 = arith.constant 0 : index
    %154 = vector.load %arg3[%c0_61, %c0_62] : memref<256x1024xf32, #tpu.memory_space<vmem>>, vector<256x1024xf32>
    %cst_63 = arith.constant dense<0.000000e+00> : vector<4x1024xf32>
    %155 = tpu.matmul %151, %154, %cst_63 {dimension_numbers = #tpu.dot_dimension_numbers<[1], [0], [0], [1], [0, 0, 1, 1], [], []>} : vector<4x256xf32>, vector<256x1024xf32>, vector<4x1024xf32> -> vector<4x1024xf32>
    %156 = arith.addf %153, %155 : vector<4x1024xf32>
    %157 = math.tanh %156 : vector<4x1024xf32>
    %158 = vector.extract_strided_slice %157 {offsets = [0, 0], sizes = [4, 768], strides = [1, 1]} : vector<4x1024xf32> to vector<4x768xf32>
    %cst_64 = arith.constant 5.000000e-01 : f32
    %159 = vector.broadcast %cst_64 : f32 to vector<4x768xf32>
    %160 = arith.mulf %159, %158 : vector<4x768xf32>
    %cst_65 = arith.constant 5.000000e-01 : f32
    %161 = vector.broadcast %cst_65 : f32 to vector<4x768xf32>
    %162 = arith.addf %160, %161 : vector<4x768xf32>
    %163 = vector.extract_strided_slice %157 {offsets = [0, 768], sizes = [4, 256], strides = [1, 1]} : vector<4x1024xf32> to vector<4x256xf32>
    %164 = vector.extract_strided_slice %162 {offsets = [0, 256], sizes = [4, 256], strides = [1, 1]} : vector<4x768xf32> to vector<4x256xf32>
    %165 = arith.mulf %164, %148 : vector<4x256xf32>
    %166 = vector.extract_strided_slice %162 {offsets = [0, 0], sizes = [4, 256], strides = [1, 1]} : vector<4x768xf32> to vector<4x256xf32>
    %167 = arith.mulf %166, %163 : vector<4x256xf32>
    %168 = arith.addf %165, %167 : vector<4x256xf32>
    %169 = vector.extract_strided_slice %162 {offsets = [0, 512], sizes = [4, 256], strides = [1, 1]} : vector<4x768xf32> to vector<4x256xf32>
    %170 = math.tanh %168 : vector<4x256xf32>
    %171 = arith.mulf %169, %170 : vector<4x256xf32>
    %c24_66 = arith.constant 24 : index
    %c0_67 = arith.constant 0 : index
    %172 = vector.load %arg8[%c24_66, %c0_67] : memref<32x256xf32, #tpu.memory_space<vmem>>, vector<4x256xf32>
    tpu.vector_store %arg8[%c24_66, %c0_67], %171 {strides = array<i32>} : memref<32x256xf32, #tpu.memory_space<vmem>>, vector<4x256xf32>,
    %c32 = arith.constant 32 : index
    %c0_68 = arith.constant 0 : index
    %173 = vector.load %arg7[%c32, %c0_68] : memref<36x1024xf32, #tpu.memory_space<vmem>>, vector<4x1024xf32>
    %c0_69 = arith.constant 0 : index
    %c0_70 = arith.constant 0 : index
    %174 = vector.load %arg3[%c0_69, %c0_70] : memref<256x1024xf32, #tpu.memory_space<vmem>>, vector<256x1024xf32>
    %cst_71 = arith.constant dense<0.000000e+00> : vector<4x1024xf32>
    %175 = tpu.matmul %171, %174, %cst_71 {dimension_numbers = #tpu.dot_dimension_numbers<[1], [0], [0], [1], [0, 0, 1, 1], [], []>} : vector<4x256xf32>, vector<256x1024xf32>, vector<4x1024xf32> -> vector<4x1024xf32>
    %176 = arith.addf %173, %175 : vector<4x1024xf32>
    %177 = math.tanh %176 : vector<4x1024xf32>
    %178 = vector.extract_strided_slice %177 {offsets = [0, 0], sizes = [4, 768], strides = [1, 1]} : vector<4x1024xf32> to vector<4x768xf32>
    %cst_72 = arith.constant 5.000000e-01 : f32
    %179 = vector.broadcast %cst_72 : f32 to vector<4x768xf32>
    %180 = arith.mulf %179, %178 : vector<4x768xf32>
    %cst_73 = arith.constant 5.000000e-01 : f32
    %181 = vector.broadcast %cst_73 : f32 to vector<4x768xf32>
    %182 = arith.addf %180, %181 : vector<4x768xf32>
    %183 = vector.extract_strided_slice %177 {offsets = [0, 768], sizes = [4, 256], strides = [1, 1]} : vector<4x1024xf32> to vector<4x256xf32>
    %184 = vector.extract_strided_slice %182 {offsets = [0, 256], sizes = [4, 256], strides = [1, 1]} : vector<4x768xf32> to vector<4x256xf32>
    %185 = arith.mulf %184, %168 : vector<4x256xf32>
    %186 = vector.extract_strided_slice %182 {offsets = [0, 0], sizes = [4, 256], strides = [1, 1]} : vector<4x768xf32> to vector<4x256xf32>
    %187 = arith.mulf %186, %183 : vector<4x256xf32>
    %188 = arith.addf %185, %187 : vector<4x256xf32>
    %189 = vector.extract_strided_slice %182 {offsets = [0, 512], sizes = [4, 256], strides = [1, 1]} : vector<4x768xf32> to vector<4x256xf32>
    %190 = math.tanh %188 : vector<4x256xf32>
    %191 = arith.mulf %189, %190 : vector<4x256xf32>
    %c28_74 = arith.constant 28 : index
    %c0_75 = arith.constant 0 : index
    %192 = vector.load %arg8[%c28_74, %c0_75] : memref<32x256xf32, #tpu.memory_space<vmem>>, vector<4x256xf32>
    tpu.vector_store %arg8[%c28_74, %c0_75], %191 {strides = array<i32>} : memref<32x256xf32, #tpu.memory_space<vmem>>, vector<4x256xf32>,
    %c0_76 = arith.constant 0 : index
    %c0_77 = arith.constant 0 : index
    %193 = vector.load %arg8[%c0_76, %c0_77] : memref<32x256xf32, #tpu.memory_space<vmem>>, vector<32x256xf32>
    %c0_78 = arith.constant 0 : index
    %c0_79 = arith.constant 0 : index
    %194 = vector.load %arg4[%c0_78, %c0_79] : memref<256x8xf32, #tpu.memory_space<vmem>>, vector<256x8xf32>
    %cst_80 = arith.constant dense<0.000000e+00> : vector<32x8xf32>
    %195 = tpu.matmul %193, %194, %cst_80 {dimension_numbers = #tpu.dot_dimension_numbers<[1], [0], [0], [1], [0, 0, 1, 1], [], []>} : vector<32x256xf32>, vector<256x8xf32>, vector<32x8xf32> -> vector<32x8xf32>
    %c0_81 = arith.constant 0 : index
    %c0_82 = arith.constant 0 : index
    %196 = vector.load %arg5[%c0_81, %c0_82] : memref<1x8xf32, #tpu.memory_space<vmem>>, vector<1x8xf32>
    %197 = vector.broadcast %196 : vector<1x8xf32> to vector<32x8xf32>
    %198 = arith.addf %195, %197 : vector<32x8xf32>
    %cst_83 = arith.constant dense<0xFF800000> : vector<32xf32>
    %199 = vector.multi_reduction <maximumf>, %198, %cst_83 [1] : vector<32x8xf32> to vector<32xf32>
    %200 = vector.shape_cast %199 : vector<32xf32> to vector<32x1xf32>
    %201 = vector.broadcast %200 : vector<32x1xf32> to vector<32x8xf32>
    %202 = arith.subf %198, %201 : vector<32x8xf32>
    %203 = math.exp %202 : vector<32x8xf32>
    %cst_84 = arith.constant dense<0.000000e+00> : vector<32xf32>
    %204 = vector.multi_reduction <add>, %203, %cst_84 [1] : vector<32x8xf32> to vector<32xf32>
    %205 = vector.shape_cast %204 : vector<32xf32> to vector<32x1xf32>
    %206 = math.log %205 : vector<32x1xf32>
    %207 = vector.broadcast %206 : vector<32x1xf32> to vector<32x8xf32>
    %208 = arith.subf %202, %207 : vector<32x8xf32>
    %c0_85 = arith.constant 0 : index
    %c0_86 = arith.constant 0 : index
    %209 = vector.load %arg6[%c0_85, %c0_86] : memref<32x8xf32, #tpu.memory_space<vmem>>, vector<32x8xf32>
    tpu.vector_store %arg6[%c0_85, %c0_86], %208 {strides = array<i32>} : memref<32x8xf32, #tpu.memory_space<vmem>>, vector<32x8xf32>,
    return
  }
}

</mosaic_0001>

<bundles_post_ra>
// kernel: lstm_baseline_forward_batched.1
= control target key start
LH: loop header
LB: loop body
LE: loop exit
PB: predicated region body
PF: predicated region fallthrough
CT: control target
= control target key end

     0   :  { %11 = vsyncpa [#allocation5], 0  ;;  %s6416_s0 = inlined_call_operand.vmem [shape: f32[36,16], index: 0, kind: input, shape index: {}]   ;;  %s6417_s1 = inlined_call_operand.vmem [shape: f32[16,1024], index: 1, kind: input, shape index: {}]   ;;  %s6418_s2 = inlined_call_operand.vmem [shape: f32[1,1024], index: 2, kind: input, shape index: {}]   ;;  %s6419_s3 = inlined_call_operand.hbm [shape: f32[256,1024], index: 3, kind: input, shape index: {}]   ;;  %s6420_s4 = inlined_call_operand.vmem [shape: f32[256,8], index: 4, kind: input, shape index: {}]   ;;  %s6421_s5 = inlined_call_operand.vmem [shape: f32[1,8], index: 5, kind: input, shape index: {}]   ;;  %s6422_s6 = inlined_call_operand.hbm [shape: f32[32,8], index: 6, kind: output, shape index: {}]  }
   0x1   :  { %12 = vsyncpa [#allocation6], 0  ;;  %s5998_s21 = smov [#allocation4]  }
   0x2   :  { %s24_s22 = sshll.u32 %s5998_s21, 4  ;;  %s25_s22 = int_to_ptr.vmem [resolvable:$true] %s24_s22 }
   0x3   :  { %s5962_s23 = scalar_lea.vmem %s25_s22, 32768  ;;  %p5967_p1 = scmp.lt.s32.totalorder %s25_s22, %s25_s22 }
   0x4   :  { %p5963_p0 = scmp.ne.s32.totalorder %s25_s22, %s5962_s23  ;;  %p5968_p2 = scmp.lt.s32.totalorder %s5962_s23, %s5962_s23 }
   0x6   :  { %p5969_p3 = por %p5968_p2, %p5967_p1 }
   0x8   :  { %p5970_p4 = pnand %p5969_p3, %p5963_p0 }
   0xa   :  { %5973 = shalt.err (!%p5970_p4)
}
   0xb   :  { %s5999_s24 = smov 1024   ;;  %s6000_s25 = smov 64  }
   0xc   :  { %30 = dma.hbm_to_vmem [thread:$0]  %s6419_s3, 32768, %s25_s22, [#allocation5], %s5999_s24, %s5999_s24, %s6000_s25  }
   0xd   :  { %5994 = dma.done.wait [#allocation5], 32768  }
   0xe   :  { %5995 = vsyncadd [#allocation5], 4294934528  ;;  %v6001_v0 = vmov 0.0   ;;  %v52_v1 = vld [vmem:[%s6417_s1 + $0x48] sm:$0xff]  ;;  %v51_v2 = vld [vmem:[%s6417_s1 + $0x40] sm:$0xff]  ;;  %vm101_vm0 = vcmask 130048  }
   0xf   :  { %181 = vmatprep.mubr.f32.mxu1 %v6001_v0  ;;  %371 = vmatprep.mubr.f32.mxu0 %v6001_v0  ;;  %v44_v3 = vld [vmem:[%s6417_s1 + $0x8] sm:$0xff]  ;;  %v43_v4 = vld [vmem:[%s6417_s1] sm:$0xff]  ;;  %v54_v6 = vld [vmem:[%s6417_s1 + $0x58] sm:$0xff]  ;;  %vm5616_vm1 = vcmask 64512  }
  0x10   :  { %145 = vmatprep.subr.mxu1 %v52_v1  ;;  %v38_v5 = vld [vmem:[%s6416_s0] sm:$0xff]  ;;  %v53_v7 = vld [vmem:[%s6417_s1 + $0x50] sm:$0xff]  ;;  %v46_v8 = vld [vmem:[%s6417_s1 + $0x18] sm:$0xff] }
  0x11   :  { %146 = vmatpush1.msra.mxu1 %v51_v2  ;;  %v45_v9 = vld [vmem:[%s6417_s1 + $0x10] sm:$0xff]  ;;  %v56_v10 = vld [vmem:[%s6417_s1 + $0x68] sm:$0xff]  ;;  %v58_v12 = vld [vmem:[%s6417_s1 + $0x78] sm:$0xff] }
  0x12   :  { %147 = vmatprep.subr.mxu1 %v44_v3  ;;  %v39_v11 = vld [vmem:[%s6416_s0 + $0x8] sm:$0xff]  ;;  %v55_v13 = vld [vmem:[%s6417_s1 + $0x60] sm:$0xff]  ;;  %335 = vmatprep.subr.mxu0 %v56_v10  ;;  %v40_v16 = vld [vmem:[%s6416_s0 + $0x10] sm:$0xff] }
  0x13   :  { %148 = vmatpush1.msra.mxu1 %v43_v4  ;;  %v48_v14 = vld [vmem:[%s6417_s1 + $0x28] sm:$0xff]  ;;  %336 = vmatpush1.msra.mxu0 %v55_v13  ;;  %v47_v15 = vld [vmem:[%s6417_s1 + $0x20] sm:$0xff]  ;;  %v41_v17 = vld [vmem:[%s6416_s0 + $0x18] sm:$0xff] }
  0x14   :  { %5686 = vmatmul.mubr.msk.f32.vlgmr.msra.gmra.mxu1 %vm101_vm0, %v38_v5  ;;  %240 = vmatprep.subr.mxu1 %v54_v6  ;;  %v42_v18 = vld [vmem:[%s6416_s0 + $0x20] sm:$0xf]  ;;  %v57_v19 = vld [vmem:[%s6417_s1 + $0x70] sm:$0xff]  ;;  %v50_v20 = vld [vmem:[%s6417_s1 + $0x38] sm:$0xff] }
  0x15   :  { %241 = vmatpush1.msra.mxu1 %v53_v7  ;;  %187 = vmatprep.mubr.f32.mxu1 %v6001_v0  ;;  %v49_v21 = vld [vmem:[%s6417_s1 + $0x30] sm:$0xff]  ;;  %v717_v22 = vld [vmem:[#allocation4 + $0x3c8] sm:$0xff]  ;;  %v719_v23 = vld [vmem:[#allocation4 + $0x3d8] sm:$0xff] }
  0x16   :  { %242 = vmatprep.subr.mxu1 %v46_v8  ;;  %337 = vmatprep.subr.mxu0 %v48_v14  ;;  %v716_v24 = vld [vmem:[#allocation4 + $0x3c0] sm:$0xff]  ;;  %v718_v25 = vld [vmem:[#allocation4 + $0x3d0] sm:$0xff]  ;;  %v709_v26 = vld [vmem:[#allocation4 + $0x388] sm:$0xff] }
  0x17   :  { %243 = vmatpush1.msra.mxu1 %v45_v9  ;;  %338 = vmatpush1.msra.mxu0 %v47_v15  ;;  %v711_v27 = vld [vmem:[#allocation4 + $0x398] sm:$0xff]  ;;  %v708_v28 = vld [vmem:[#allocation4 + $0x380] sm:$0xff]  ;;  %v710_v29 = vld [vmem:[#allocation4 + $0x390] sm:$0xff] }
  0x18   :  { %5687 = vmatmul.mubr.msk.f32.gmra.mxu1 %vm101_vm0, %v39_v11  ;;  %430 = vmatprep.subr.mxu1 %v58_v12  ;;  %v701_v30 = vld [vmem:[#allocation4 + $0x348] sm:$0xff]  ;;  %v703_v31 = vld [vmem:[#allocation4 + $0x358] sm:$0xff]  ;;  %v700_v32 = vld [vmem:[#allocation4 + $0x340] sm:$0xff] }
  0x19   :  { %193 = vmatprep.mubr.f32.mxu1 %v6001_v0  ;;  %5696 = vmatmul.mubr.msk.f32.vlgmr.msra.gmra.mxu0 %vm101_vm0, %v38_v5  ;;  %v702_v33 = vld [vmem:[#allocation4 + $0x350] sm:$0xff]  ;;  %v693_v34 = vld [vmem:[#allocation4 + $0x308] sm:$0xff]  ;;  %v695_v35 = vld [vmem:[#allocation4 + $0x318] sm:$0xff] }
  0x1a   :  { %377 = vmatprep.mubr.f32.mxu0 %v6001_v0  ;;  %852 = vmatprep.subr.mxu0 %v717_v22  ;;  %v692_v36 = vld [vmem:[#allocation4 + $0x300] sm:$0xff]  ;;  %v694_v37 = vld [vmem:[#allocation4 + $0x310] sm:$0xff]  ;;  %v685_v38 = vld [vmem:[#allocation4 + $0x2c8] sm:$0xff] }
  0x1b   :  { %853 = vmatpush1.msra.mxu0 %v716_v24  ;;  %v687_v39 = vld [vmem:[#allocation4 + $0x2d8] sm:$0xff]  ;;  %v684_v40 = vld [vmem:[#allocation4 + $0x2c0] sm:$0xff]  ;;  %v686_v41 = vld [vmem:[#allocation4 + $0x2d0] sm:$0xff] }
  0x1c   :  { %5688 = vmatmul.mubr.msk.f32.gmra.mxu1 %vm101_vm0, %v40_v16  ;;  %854 = vmatprep.subr.mxu0 %v709_v26  ;;  %v677_v42 = vld [vmem:[#allocation4 + $0x288] sm:$0xff]  ;;  %v679_v43 = vld [vmem:[#allocation4 + $0x298] sm:$0xff]  ;;  %v676_v44 = vld [vmem:[#allocation4 + $0x280] sm:$0xff] }
  0x1d   :  { %199 = vmatprep.mubr.f32.mxu1 %v6001_v0  ;;  %5697 = vmatmul.mubr.msk.f32.gmra.mxu0 %vm101_vm0, %v39_v11  ;;  %v678_v45 = vld [vmem:[#allocation4 + $0x290] sm:$0xff]  ;;  %v669_v46 = vld [vmem:[#allocation4 + $0x248] sm:$0xff]  ;;  %v671_v47 = vld [vmem:[#allocation4 + $0x258] sm:$0xff] }
  0x1e   :  { %383 = vmatprep.mubr.f32.mxu0 %v6001_v0  ;;  %855 = vmatpush1.msra.mxu0 %v708_v28  ;;  %v668_v48 = vld [vmem:[#allocation4 + $0x240] sm:$0xff]  ;;  %v670_v49 = vld [vmem:[#allocation4 + $0x250] sm:$0xff]  ;;  %v661_v50 = vld [vmem:[#allocation4 + $0x208] sm:$0xff] }
  0x1f   :  { %856 = vmatprep.subr.mxu0 %v701_v30  ;;  %v663_v51 = vld [vmem:[#allocation4 + $0x218] sm:$0xff]  ;;  %v660_v52 = vld [vmem:[#allocation4 + $0x200] sm:$0xff]  ;;  %v662_v53 = vld [vmem:[#allocation4 + $0x210] sm:$0xff] }
  0x20   :  { %5689 = vmatmul.mubr.msk.f32.gmra.mxu1 %vm101_vm0, %v41_v17  ;;  %857 = vmatpush1.msra.mxu0 %v700_v32  ;;  %v653_v54 = vld [vmem:[#allocation4 + $0x1c8] sm:$0xff]  ;;  %v655_v55 = vld [vmem:[#allocation4 + $0x1d8] sm:$0xff]  ;;  %v652_v56 = vld [vmem:[#allocation4 + $0x1c0] sm:$0xff] }
  0x21   :  { %205 = vmatprep.mubr.f32.mxu1 %v6001_v0  ;;  %5698 = vmatmul.mubr.msk.f32.gmra.mxu0 %vm101_vm0, %v40_v16  ;;  %v654_v57 = vld [vmem:[#allocation4 + $0x1d0] sm:$0xff]  ;;  %v645_v58 = vld [vmem:[#allocation4 + $0x188] sm:$0xff]  ;;  %v647_v59 = vld [vmem:[#allocation4 + $0x198] sm:$0xff] }
  0x22   :  { %389 = vmatprep.mubr.f32.mxu0 %v6001_v0  ;;  %858 = vmatprep.subr.mxu0 %v693_v34  ;;  %v644_v60 = vld [vmem:[#allocation4 + $0x180] sm:$0xff]  ;;  %v646_v61 = vld [vmem:[#allocation4 + $0x190] sm:$0xff]  ;;  %v637_v62 = vld [vmem:[#allocation4 + $0x148] sm:$0xff] }
  0x23   :  { %859 = vmatpush1.msra.mxu0 %v692_v36  ;;  %v639_v63 = vld [vmem:[#allocation4 + $0x158] sm:$0xff]  ;;  %v638_v1 = vld [vmem:[#allocation4 + $0x150] sm:$0xff]  ;;  %v629_v2 = vld [vmem:[#allocation4 + $0x108] sm:$0xff] }
  0x24   :  { %5690 = vmatmul.mubr.msk.f32.gmra.mxu1 %vm101_vm0, %v42_v18  ;;  %860 = vmatprep.subr.mxu0 %v685_v38  ;;  %v631_v3 = vld [vmem:[#allocation4 + $0x118] sm:$0xff]  ;;  %v628_v4 = vld [vmem:[#allocation4 + $0x100] sm:$0xff]  ;;  %v621_v6 = vld [vmem:[#allocation4 + $0xc8] sm:$0xff] }
  0x25   :  { %276 = vmatprep.mubr.f32.mxu1 %v6001_v0  ;;  %5699 = vmatmul.mubr.msk.f32.gmra.mxu0 %vm101_vm0, %v41_v17  ;;  %v623_v7 = vld [vmem:[#allocation4 + $0xd8] sm:$0xff]  ;;  %v620_v8 = vld [vmem:[#allocation4 + $0xc0] sm:$0xff]  ;;  %v622_v9 = vld [vmem:[#allocation4 + $0xd0] sm:$0xff] }
  0x26   :  { %395 = vmatprep.mubr.f32.mxu0 %v6001_v0  ;;  %861 = vmatpush1.msra.mxu0 %v684_v40  ;;  %v613_v10 = vld [vmem:[#allocation4 + $0x88] sm:$0xff]  ;;  %v612_v12 = vld [vmem:[#allocation4 + $0x80] sm:$0xff]  ;;  %v614_v13 = vld [vmem:[#allocation4 + $0x90] sm:$0xff] }
  0x27   :  { %862 = vmatprep.subr.mxu0 %v677_v42  ;;  %v605_v14 = vld [vmem:[#allocation4 + $0x48] sm:$0xff]  ;;  %v607_v15 = vld [vmem:[#allocation4 + $0x58] sm:$0xff]  ;;  %v844_v24 = vld [vmem:[#allocation4 + $0x7c0] sm:$0xff] }
  0x28   :  { %5691 = vmatmul.mubr.msk.f32.vlgmr.msra.gmra.mxu1 %vm101_vm0, %v38_v5  ;;  %863 = vmatpush1.msra.mxu0 %v676_v44  ;;  %v845_v22 = vld [vmem:[#allocation4 + $0x7c8] sm:$0xff]  ;;  %v836_v28 = vld [vmem:[#allocation4 + $0x780] sm:$0xff] }
  0x29   :  { %431 = vmatpush1.msra.mxu1 %v57_v19  ;;  %282 = vmatprep.mubr.f32.mxu1 %v6001_v0  ;;  %v599_v19 = vld [vmem:[#allocation4 + $0x18] sm:$0xff]  ;;  %v837_v26 = vld [vmem:[#allocation4 + $0x788] sm:$0xff]  ;;  %v828_v32 = vld [vmem:[#allocation4 + $0x740] sm:$0xff] }
  0x2a   :  { %432 = vmatprep.subr.mxu1 %v50_v20  ;;  %5700 = vmatmul.mubr.msk.f32.gmra.mxu0 %vm101_vm0, %v42_v18  ;;  %v596_v20 = vld [vmem:[#allocation4] sm:$0xff]  ;;  %v829_v30 = vld [vmem:[#allocation4 + $0x748] sm:$0xff] }
  0x2b   :  { %433 = vmatpush1.msra.mxu1 %v49_v21  ;;  %864 = vmatprep.subr.mxu0 %v669_v46  ;;  %v598_v21 = vld [vmem:[#allocation4 + $0x10] sm:$0xff]  ;;  %v821_v34 = vld [vmem:[#allocation4 + $0x708] sm:$0xff]  ;;  %v820_v36 = vld [vmem:[#allocation4 + $0x700] sm:$0xff] }
  0x2c   :  { %5692 = vmatmul.mubr.msk.f32.gmra.mxu1 %vm101_vm0, %v39_v11  ;;  %923 = vmatprep.subr.mxu1 %v719_v23  ;;  %v847_v23 = vld [vmem:[#allocation4 + $0x7d8] sm:$0xff]  ;;  %v813_v38 = vld [vmem:[#allocation4 + $0x6c8] sm:$0xff]  ;;  %v812_v40 = vld [vmem:[#allocation4 + $0x6c0] sm:$0xff] }
  0x2d   :  { %288 = vmatprep.mubr.f32.mxu1 %v6001_v0  ;;  %865 = vmatpush1.msra.mxu0 %v668_v48  ;;  %v805_v42 = vld [vmem:[#allocation4 + $0x688] sm:$0xff]  ;;  %v804_v44 = vld [vmem:[#allocation4 + $0x680] sm:$0xff] }
  0x2e   :  { %866 = vmatprep.subr.mxu0 %v661_v50  ;;  %v797_v46 = vld [vmem:[#allocation4 + $0x648] sm:$0xff]  ;;  %v796_v48 = vld [vmem:[#allocation4 + $0x640] sm:$0xff] }
  0x2f   :  { %867 = vmatpush1.msra.mxu0 %v660_v52  ;;  %v789_v50 = vld [vmem:[#allocation4 + $0x608] sm:$0xff]  ;;  %v788_v52 = vld [vmem:[#allocation4 + $0x600] sm:$0xff] }
  0x30   :  { %5693 = vmatmul.mubr.msk.f32.gmra.mxu1 %vm101_vm0, %v40_v16  ;;  %868 = vmatprep.subr.mxu0 %v653_v54  ;;  %v781_v54 = vld [vmem:[#allocation4 + $0x5c8] sm:$0xff] }
  0x31   :  { %294 = vmatprep.mubr.f32.mxu1 %v6001_v0  ;;  %869 = vmatpush1.msra.mxu0 %v652_v56  ;;  %v780_v56 = vld [vmem:[#allocation4 + $0x5c0] sm:$0xff] }
  0x32   :  { %870 = vmatprep.subr.mxu0 %v645_v58  ;;  %v773_v58 = vld [vmem:[#allocation4 + $0x588] sm:$0xff] }
  0x33   :  { %871 = vmatpush1.msra.mxu0 %v644_v60  ;;  %v772_v60 = vld [vmem:[#allocation4 + $0x580] sm:$0xff] }
  0x34   :  { %5694 = vmatmul.mubr.msk.f32.gmra.mxu1 %vm101_vm0, %v41_v17  ;;  %872 = vmatprep.subr.mxu0 %v637_v62  ;;  %v765_v62 = vld [vmem:[#allocation4 + $0x548] sm:$0xff] }
  0x35   :  { %300 = vmatprep.mubr.f32.mxu1 %v6001_v0 }
  0x38   :  { %5695 = vmatmul.mubr.msk.f32.gmra.mxu1 %vm101_vm0, %v42_v18 }
  0x39   :  { %466 = vmatprep.mubr.f32.mxu1 %v6001_v0 }
  0x3c   :  { %5701 = vmatmul.mubr.msk.f32.vlgmr.msra.gmra.mxu1 %vm101_vm0, %v38_v5  ;;  %v630_v5 = vld [vmem:[#allocation4 + $0x110] sm:$0xff] }
  0x3d   :  { %472 = vmatprep.mubr.f32.mxu1 %v6001_v0  ;;  %924 = vmatpush1.msra.mxu1 %v718_v25  ;;  %v846_v25 = vld [vmem:[#allocation4 + $0x7d0] sm:$0xff] }
  0x3e   :  { %925 = vmatprep.subr.mxu1 %v711_v27  ;;  %v839_v27 = vld [vmem:[#allocation4 + $0x798] sm:$0xff] }
  0x3f   :  { %926 = vmatpush1.msra.mxu1 %v710_v29  ;;  %v838_v29 = vld [vmem:[#allocation4 + $0x790] sm:$0xff] }
  0x40   :  { %5702 = vmatmul.mubr.msk.f32.gmra.mxu1 %vm101_vm0, %v39_v11  ;;  %927 = vmatprep.subr.mxu1 %v703_v31  ;;  %v615_v11 = vld [vmem:[#allocation4 + $0x98] sm:$0xff] }
  0x41   :  { %478 = vmatprep.mubr.f32.mxu1 %v6001_v0  ;;  %928 = vmatpush1.msra.mxu1 %v702_v33  ;;  %v831_v31 = vld [vmem:[#allocation4 + $0x758] sm:$0xff]  ;;  %v830_v33 = vld [vmem:[#allocation4 + $0x750] sm:$0xff] }
  0x42   :  { %929 = vmatprep.subr.mxu1 %v695_v35  ;;  %v823_v35 = vld [vmem:[#allocation4 + $0x718] sm:$0xff] }
  0x43   :  { %930 = vmatpush1.msra.mxu1 %v694_v37  ;;  %v822_v37 = vld [vmem:[#allocation4 + $0x710] sm:$0xff] }
  0x44   :  { %5703 = vmatmul.mubr.msk.f32.gmra.mxu1 %vm101_vm0, %v40_v16  ;;  %931 = vmatprep.subr.mxu1 %v687_v39  ;;  %v604_v16 = vld [vmem:[#allocation4 + $0x40] sm:$0xff]  ;;  %v815_v39 = vld [vmem:[#allocation4 + $0x6d8] sm:$0xff] }
  0x45   :  { %484 = vmatprep.mubr.f32.mxu1 %v6001_v0  ;;  %932 = vmatpush1.msra.mxu1 %v686_v41  ;;  %v814_v41 = vld [vmem:[#allocation4 + $0x6d0] sm:$0xff] }
  0x46   :  { %933 = vmatprep.subr.mxu1 %v679_v43  ;;  %v807_v43 = vld [vmem:[#allocation4 + $0x698] sm:$0xff] }
  0x47   :  { %934 = vmatpush1.msra.mxu1 %v678_v45  ;;  %v806_v45 = vld [vmem:[#allocation4 + $0x690] sm:$0xff] }
  0x48   :  { %5704 = vmatmul.mubr.msk.f32.gmra.mxu1 %vm101_vm0, %v41_v17  ;;  %935 = vmatprep.subr.mxu1 %v671_v47  ;;  %v606_v17 = vld [vmem:[#allocation4 + $0x50] sm:$0xff]  ;;  %v799_v47 = vld [vmem:[#allocation4 + $0x658] sm:$0xff] }
  0x49   :  { %490 = vmatprep.mubr.f32.mxu1 %v6001_v0  ;;  %936 = vmatpush1.msra.mxu1 %v670_v49  ;;  %v636_v0 = vld [vmem:[#allocation4 + $0x140] sm:$0xff]  ;;  %v798_v49 = vld [vmem:[#allocation4 + $0x650] sm:$0xff] }
  0x4a   :  { %937 = vmatprep.subr.mxu1 %v663_v51  ;;  %873 = vmatpush1.msra.mxu0 %v636_v0  ;;  %v791_v51 = vld [vmem:[#allocation4 + $0x618] sm:$0xff]  ;;  %v764_v0 = vld [vmem:[#allocation4 + $0x540] sm:$0xff] }
  0x4b   :  { %938 = vmatpush1.msra.mxu1 %v662_v53  ;;  %874 = vmatprep.subr.mxu0 %v629_v2  ;;  %v790_v53 = vld [vmem:[#allocation4 + $0x610] sm:$0xff]  ;;  %v757_v2 = vld [vmem:[#allocation4 + $0x508] sm:$0xff] }
  0x4c   :  { %5705 = vmatmul.mubr.msk.f32.gmra.mxu1 %vm101_vm0, %v42_v18  ;;  %939 = vmatprep.subr.mxu1 %v655_v55  ;;  %v597_v18 = vld [vmem:[#allocation4 + $0x8] sm:$0xff]  ;;  %v783_v55 = vld [vmem:[#allocation4 + $0x5d8] sm:$0xff] }
  0x4d   :  { %940 = vmatpush1.msra.mxu1 %v654_v57  ;;  %875 = vmatpush1.msra.mxu0 %v628_v4  ;;  %v782_v57 = vld [vmem:[#allocation4 + $0x5d0] sm:$0xff]  ;;  %v756_v4 = vld [vmem:[#allocation4 + $0x500] sm:$0xff] }
  0x4e   :  { %941 = vmatprep.subr.mxu1 %v647_v59  ;;  %876 = vmatprep.subr.mxu0 %v621_v6  ;;  %v775_v59 = vld [vmem:[#allocation4 + $0x598] sm:$0xff]  ;;  %v749_v6 = vld [vmem:[#allocation4 + $0x4c8] sm:$0xff] }
  0x4f   :  { %942 = vmatpush1.msra.mxu1 %v646_v61  ;;  %877 = vmatpush1.msra.mxu0 %v620_v8  ;;  %v774_v61 = vld [vmem:[#allocation4 + $0x590] sm:$0xff]  ;;  %v748_v8 = vld [vmem:[#allocation4 + $0x4c0] sm:$0xff] }
  0x50   :  { %943 = vmatprep.subr.mxu1 %v639_v63  ;;  %878 = vmatprep.subr.mxu0 %v613_v10  ;;  %v767_v63 = vld [vmem:[#allocation4 + $0x558] sm:$0xff]  ;;  %v741_v10 = vld [vmem:[#allocation4 + $0x488] sm:$0xff] }
  0x51   :  { %944 = vmatpush1.msra.mxu1 %v638_v1  ;;  %879 = vmatpush1.msra.mxu0 %v612_v12  ;;  %v766_v1 = vld [vmem:[#allocation4 + $0x550] sm:$0xff]  ;;  %v740_v12 = vld [vmem:[#allocation4 + $0x480] sm:$0xff] }
  0x52   :  { %945 = vmatprep.subr.mxu1 %v631_v3  ;;  %880 = vmatprep.subr.mxu0 %v605_v14  ;;  %v759_v3 = vld [vmem:[#allocation4 + $0x518] sm:$0xff]  ;;  %v733_v14 = vld [vmem:[#allocation4 + $0x448] sm:$0xff] }
  0x53   :  { %946 = vmatpush1.msra.mxu1 %v630_v5  ;;  %881 = vmatpush1.msra.mxu0 %v604_v16  ;;  %v758_v5 = vld [vmem:[#allocation4 + $0x510] sm:$0xff]  ;;  %v732_v16 = vld [vmem:[#allocation4 + $0x440] sm:$0xff] }
  0x54   :  { %947 = vmatprep.subr.mxu1 %v623_v7  ;;  %882 = vmatprep.subr.mxu0 %v597_v18  ;;  %v751_v7 = vld [vmem:[#allocation4 + $0x4d8] sm:$0xff]  ;;  %v725_v18 = vld [vmem:[#allocation4 + $0x408] sm:$0xff] }
  0x55   :  { %948 = vmatpush1.msra.mxu1 %v622_v9  ;;  %883 = vmatpush1.msra.mxu0 %v596_v20  ;;  %v750_v9 = vld [vmem:[#allocation4 + $0x4d0] sm:$0xff]  ;;  %v724_v20 = vld [vmem:[#allocation4 + $0x400] sm:$0xff] }
  0x56   :  { %949 = vmatprep.subr.mxu1 %v615_v11  ;;  %884 = vmatprep.subr.mxu0 %v845_v22  ;;  %v743_v11 = vld [vmem:[#allocation4 + $0x498] sm:$0xff]  ;;  %v721_v22 = vld [vmem:[#allocation4 + $0x3e8] sm:$0xff] }
  0x57   :  { %950 = vmatpush1.msra.mxu1 %v614_v13  ;;  %885 = vmatpush2.msra.mxu0 %v844_v24  ;;  %v742_v13 = vld [vmem:[#allocation4 + $0x490] sm:$0xff]  ;;  %v61_v24 = vlaneseq }
  0x58   :  { %951 = vmatprep.subr.mxu1 %v607_v15  ;;  %886 = vmatprep.subr.mxu0 %v837_v26  ;;  %v735_v15 = vld [vmem:[#allocation4 + $0x458] sm:$0xff] }
  0x59   :  { %952 = vmatpush1.msra.mxu1 %v606_v17  ;;  %887 = vmatpush2.msra.mxu0 %v836_v28  ;;  %v734_v17 = vld [vmem:[#allocation4 + $0x450] sm:$0xff] }
  0x5a   :  { %953 = vmatprep.subr.mxu1 %v599_v19  ;;  %888 = vmatprep.subr.mxu0 %v829_v30  ;;  %v727_v19 = vld [vmem:[#allocation4 + $0x418] sm:$0xff] }
  0x5b   :  { %954 = vmatpush1.msra.mxu1 %v598_v21  ;;  %889 = vmatpush2.msra.mxu0 %v828_v32  ;;  %v726_v21 = vld [vmem:[#allocation4 + $0x410] sm:$0xff] }
  0x5c   :  { %955 = vmatprep.subr.mxu1 %v847_v23  ;;  %890 = vmatprep.subr.mxu0 %v821_v34  ;;  %v723_v23 = vld [vmem:[#allocation4 + $0x3f8] sm:$0xff] }
  0x5d   :  { %956 = vmatpush2.msra.mxu1 %v846_v25  ;;  %891 = vmatpush2.msra.mxu0 %v820_v36  ;;  %v6146_v25 = vshrl.u32 %v61_v24, 7 }
  0x5e   :  { %957 = vmatprep.subr.mxu1 %v839_v27  ;;  %892 = vmatprep.subr.mxu0 %v813_v38  ;;  %v6152_v27 = vld [vmem:[%s6418_s2] sm:$0xff] }
  0x5f   :  { %958 = vmatpush2.msra.mxu1 %v838_v29  ;;  %893 = vmatpush2.msra.mxu0 %v812_v40  ;;  %v63_v26 = vsub.s32 0, %v6146_v25  ;;  %v67_v28 = vsub.s32 1, %v6146_v25  ;;  %v79_v32 = vsub.s32 4, %v6146_v25  ;;  %v91_v24 = vsub.s32 7, %v6146_v25 }
  0x60   :  { %959 = vmatprep.subr.mxu1 %v831_v31  ;;  %894 = vmatprep.subr.mxu0 %v805_v42 }
  0x61   :  { %960 = vmatpush2.msra.mxu1 %v830_v33  ;;  %895 = vmatpush2.msra.mxu0 %v804_v44  ;;  %v64_v29 = vrot.slane %v6152_v27, %v63_v26  ;;  %v68_v30 = vrot.slane %v6152_v27, %v67_v28  ;;  %v6160_v38 = vrot.slane %v6152_v27, %v79_v32 }
  0x62   :  { %961 = vmatprep.subr.mxu1 %v823_v35  ;;  %896 = vmatprep.subr.mxu0 %v797_v46  ;;  %v83_v35 = vsub.s32 5, %v6146_v25 }
  0x63   :  { %962 = vmatpush2.msra.mxu1 %v822_v37  ;;  %897 = vmatpush2.msra.mxu0 %v796_v48 }
  0x64   :  { %963 = vmatprep.subr.mxu1 %v815_v39  ;;  %898 = vmatprep.subr.mxu0 %v789_v50 }
  0x65   :  { %964 = vmatpush2.msra.mxu1 %v814_v41  ;;  %899 = vmatpush2.msra.mxu0 %v788_v52  ;;  %v6163_v41 = vrot.slane %v6152_v27, %v83_v35 }
  0x66   :  { %965 = vmatprep.subr.mxu1 %v807_v43  ;;  %900 = vmatprep.subr.mxu0 %v781_v54 }
  0x67   :  { %966 = vmatpush2.msra.mxu1 %v806_v45  ;;  %901 = vmatpush2.msra.mxu0 %v780_v56  ;;  %v75_v56 = vsub.s32 3, %v6146_v25 }
  0x68   :  { %967 = vmatprep.subr.mxu1 %v799_v47  ;;  %902 = vmatprep.subr.mxu0 %v773_v58 }
  0x69   :  { %968 = vmatpush2.msra.mxu1 %v798_v49  ;;  %903 = vmatpush2.msra.mxu0 %v772_v60 }
  0x6a   :  { %969 = vmatprep.subr.mxu1 %v791_v51  ;;  %904 = vmatprep.subr.mxu0 %v765_v62  ;;  %v76_v62 = vrot.slane %v6152_v27, %v75_v56 }
  0x6b   :  { %970 = vmatpush2.msra.mxu1 %v790_v53  ;;  %905 = vmatpush2.msra.mxu0 %v764_v0  ;;  %v71_v53 = vsub.s32 2, %v6146_v25 }
  0x6c   :  { %971 = vmatprep.subr.mxu1 %v783_v55  ;;  %906 = vmatprep.subr.mxu0 %v757_v2 }
  0x6d   :  { %972 = vmatpush2.msra.mxu1 %v782_v57  ;;  %907 = vmatpush2.msra.mxu0 %v756_v4 }
  0x6e   :  { %973 = vmatprep.subr.mxu1 %v775_v59  ;;  %908 = vmatprep.subr.mxu0 %v749_v6  ;;  %v72_v59 = vrot.slane %v6152_v27, %v71_v53 }
  0x6f   :  { %974 = vmatpush2.msra.mxu1 %v774_v61  ;;  %909 = vmatpush2.msra.mxu0 %v748_v8 }
  0x70   :  { %975 = vmatprep.subr.mxu1 %v767_v63  ;;  %910 = vmatprep.subr.mxu0 %v741_v10 }
  0x71   :  { %976 = vmatpush2.msra.mxu1 %v766_v1  ;;  %911 = vmatpush2.msra.mxu0 %v740_v12 }
  0x72   :  { %977 = vmatprep.subr.mxu1 %v759_v3  ;;  %912 = vmatprep.subr.mxu0 %v733_v14 }
  0x73   :  { %978 = vmatpush2.msra.mxu1 %v758_v5  ;;  %913 = vmatpush2.msra.mxu0 %v732_v16 }
  0x74   :  { %979 = vmatprep.subr.mxu1 %v751_v7  ;;  %914 = vmatprep.subr.mxu0 %v725_v18 }
  0x75   :  { %980 = vmatpush2.msra.mxu1 %v750_v9  ;;  %915 = vmatpush2.msra.mxu0 %v724_v20 }
  0x76   :  { %981 = vmatprep.subr.mxu1 %v743_v11  ;;  %994 = vmatprep.subr.mxu0 %v721_v22 }
  0x77   :  { %982 = vmatpush2.msra.mxu1 %v742_v13 }
  0x78   :  { %983 = vmatprep.subr.mxu1 %v735_v15 }
  0x79   :  { %984 = vmatpush2.msra.mxu1 %v734_v17 }
  0x7a   :  { %985 = vmatprep.subr.mxu1 %v727_v19  ;;  %v87_v19 = vsub.s32 6, %v6146_v25  ;;  %v92_v25 = vrot.slane %v6152_v27, %v91_v24 }
  0x7b   :  { %986 = vmatpush2.msra.mxu1 %v726_v21 }
  0x7c   :  { %1065 = vmatprep.subr.mxu1 %v723_v23 }
  0xd4   :  { %v183_v31 = vpop.f32.mrf.mxu1 }
  0xd5   :  { %v184_v33 = vadd.f32 %v183_v31, %v64_v29  ;;  %v88_v31 = vrot.slane %v6152_v27, %v87_v19 }
  0xd6   :  { %v185_v34 = vpop.f32.mrf.mxu1 }
  0xd7   :  { %497 = vst [vmem:[#allocation2 + $0xb0] sm:$0xff] %v184_v33  ;;  %v186_v36 = vadd.f32 %v185_v34, %v68_v30 }
  0xd8   :  { %v189_v37 = vpop.f32.mrf.mxu1 }
  0xd9   :  { %498 = vst [vmem:[#allocation2 + $0xd0] sm:$0xff] %v186_v36  ;;  %v190_v39 = vadd.f32 %v189_v37, %v64_v29  ;;  %v373_v43 = vpop.f32.mrf.mxu0 }
  0xda   :  { %v191_v40 = vpop.f32.mrf.mxu1  ;;  %v374_v45 = vadd.f32 %v373_v43, %v6160_v38 }
  0xdb   :  { %505 = vst [vmem:[#allocation2 + $0x80] sm:$0xff] %v190_v39  ;;  %v192_v42 = vadd.f32 %v191_v40, %v68_v30  ;;  %v375_v47 = vpop.f32.mrf.mxu0 }
  0xdc   :  { %v195_v44 = vpop.f32.mrf.mxu1  ;;  %501 = vst [vmem:[#allocation2 + $0x120] sm:$0xff] %v374_v45  ;;  %v376_v49 = vadd.f32 %v375_v47, %v6163_v41 }
  0xdd   :  { %506 = vst [vmem:[#allocation2 + $0x108] sm:$0xff] %v192_v42  ;;  %v196_v46 = vadd.f32 %v195_v44, %v64_v29  ;;  %v379_v7 = vpop.f32.mrf.mxu0 }
  0xde   :  { %v197_v48 = vpop.f32.mrf.mxu1  ;;  %502 = vst [vmem:[#allocation2 + $0x38] sm:$0xff] %v376_v49  ;;  %v380_v9 = vadd.f32 %v379_v7, %v6160_v38  ;;  %v546_v33 = vld [vmem:[#allocation2 + $0xb0] sm:$0xf] }
  0xdf   :  { %513 = vst [vmem:[#allocation2 + $0x128] sm:$0xff] %v196_v46  ;;  %v198_v50 = vadd.f32 %v197_v48, %v68_v30  ;;  %v381_v11 = vpop.f32.mrf.mxu0  ;;  %5758 = vtanh.f32 %v546_v33 }
  0xe0   :  { %v201_v51 = vpop.f32.mrf.mxu1  ;;  %509 = vst [vmem:[#allocation2 + $0x18] sm:$0xff] %v380_v9  ;;  %v382_v13 = vadd.f32 %v381_v11, %v6163_v41  ;;  %v547_v47 = vld [vmem:[#allocation2 + $0xd0] sm:$0xf] }
  0xe1   :  { %514 = vst [vmem:[#allocation2 + $0x110] sm:$0xff] %v198_v50  ;;  %v202_v52 = vadd.f32 %v201_v51, %v64_v29  ;;  %v385_v15 = vpop.f32.mrf.mxu0 }
  0xe2   :  { %v203_v54 = vpop.f32.mrf.mxu1  ;;  %510 = vst [vmem:[#allocation2 + $0xc8] sm:$0xff] %v382_v13  ;;  %v386_v17 = vadd.f32 %v385_v15, %v6160_v38 }
  0xe3   :  { %521 = vst [vmem:[#allocation2 + $0xc0] sm:$0xff] %v202_v52  ;;  %v204_v55 = vadd.f32 %v203_v54, %v68_v30  ;;  %v387_v20 = vpop.f32.mrf.mxu0 }
  0xe4   :  { %v207_v57 = vpop.f32.mrf.mxu1  ;;  %517 = vst [vmem:[#allocation2 + $0xa8] sm:$0xff] %v386_v17  ;;  %v388_v22 = vadd.f32 %v387_v20, %v6163_v41 }
  0xe5   :  { %522 = vst [vmem:[#allocation2 + $0x118] sm:$0xff] %v204_v55  ;;  %v208_v58 = vadd.f32 %v207_v57, %v64_v29  ;;  %v391_v26 = vpop.f32.mrf.mxu0 }
  0xe6   :  { %v209_v60 = vpop.f32.mrf.mxu1  ;;  %518 = vst [vmem:[#allocation2 + $0x90] sm:$0xff] %v388_v22  ;;  %v392_v29 = vadd.f32 %v391_v26, %v6160_v38 }
  0xe7   :  { %529 = vst [vmem:[#allocation2 + $0x58] sm:$0xf] %v208_v58  ;;  %v210_v61 = vadd.f32 %v209_v60, %v68_v30  ;;  %v393_v32 = vpop.f32.mrf.mxu0 }
  0xe8   :  { %v278_v63 = vpop.f32.mrf.mxu1  ;;  %525 = vst [vmem:[#allocation2 + $0x68] sm:$0xff] %v392_v29  ;;  %v394_v35 = vadd.f32 %v393_v32, %v6163_v41 }
  0xe9   :  { %530 = vst [vmem:[#allocation2 + $0x78] sm:$0xf] %v210_v61  ;;  %v279_v0 = vadd.f32 %v278_v63, %v72_v59 }
  0xea   :  { %v280_v1 = vpop.f32.mrf.mxu1  ;;  %v397_v39 = vpop.f32.mrf.mxu0  ;;  %526 = vst [vmem:[#allocation2 + $0x130] sm:$0xff] %v394_v35 }
  0xeb   :  { %499 = vst [vmem:[#allocation2 + $0x10] sm:$0xff] %v279_v0  ;;  %v281_v2 = vadd.f32 %v280_v1, %v76_v62  ;;  %v398_v43 = vadd.f32 %v397_v39, %v6160_v38  ;;  %v715_v39 = vld [vmem:[#allocation4 + $0x3b8] sm:$0xff] }
  0xec   :  { %v284_v3 = vpop.f32.mrf.mxu1  ;;  %v399_v45 = vpop.f32.mrf.mxu0 }
  0xed   :  { %500 = vst [vmem:[#allocation2 + $0x48] sm:$0xff] %v281_v2  ;;  %v285_v4 = vadd.f32 %v284_v3, %v72_v59  ;;  %533 = vst [vmem:[#allocation2 + $0x28] sm:$0xf] %v398_v43  ;;  %v400_v48 = vadd.f32 %v399_v45, %v6163_v41  ;;  %v705_v43 = vld [vmem:[#allocation4 + $0x368] sm:$0xff]  ;;  %v704_v45 = vld [vmem:[#allocation4 + $0x360] sm:$0xff] }
  0xee   :  { %v286_v5 = vpop.f32.mrf.mxu1 }
  0xef   :  { %507 = vst [vmem:[#allocation2 + $0x138] sm:$0xff] %v285_v4  ;;  %v287_v6 = vadd.f32 %v286_v5, %v76_v62  ;;  %534 = vst [vmem:[#allocation2] sm:$0xf] %v400_v48  ;;  %v699_v48 = vld [vmem:[#allocation4 + $0x338] sm:$0xff] }
  0xf0   :  { %v290_v8 = vpop.f32.mrf.mxu1 }
  0xf1   :  { %508 = vst [vmem:[#allocation2 + $0xf0] sm:$0xff] %v287_v6  ;;  %v291_v10 = vadd.f32 %v290_v8, %v72_v59  ;;  %v551_v8 = vld [vmem:[#allocation2 + $0x38] sm:$0xf] }
  0xf2   :  { %v292_v12 = vpop.f32.mrf.mxu1  ;;  %v548_v36 = vld [vmem:[#allocation2 + $0x10] sm:$0xf] }
  0xf3   :  { %515 = vst [vmem:[#allocation2 + $0x8] sm:$0xff] %v291_v10  ;;  %v293_v14 = vadd.f32 %v292_v12, %v76_v62  ;;  %5760 = vtanh.f32 %v548_v36  ;;  %v550_v10 = vld [vmem:[#allocation2 + $0x120] sm:$0xf] }
  0xf4   :  { %v296_v16 = vpop.f32.mrf.mxu1  ;;  %v549_v42 = vld [vmem:[#allocation2 + $0x48] sm:$0xf]  ;;  %v720_v36 = vld [vmem:[#allocation4 + $0x3e0] sm:$0xff] }
  0xf5   :  { %516 = vst [vmem:[#allocation2 + $0x98] sm:$0xff] %v293_v14  ;;  %v297_v18 = vadd.f32 %v296_v16, %v72_v59  ;;  %5762 = vtanh.f32 %v549_v42  ;;  %v714_v42 = vld [vmem:[#allocation4 + $0x3b0] sm:$0xff] }
  0xf6   :  { %v298_v21 = vpop.f32.mrf.mxu1  ;;  %5764 = vtanh.f32 %v547_v47  ;;  %v697_v47 = vld [vmem:[#allocation4 + $0x328] sm:$0xff] }
  0xf7   :  { %523 = vst [vmem:[#allocation2 + $0xd8] sm:$0xff] %v297_v18  ;;  %v299_v23 = vadd.f32 %v298_v21, %v76_v62 }
  0xf8   :  { %v302_v28 = vpop.f32.mrf.mxu1 }
  0xf9   :  { %524 = vst [vmem:[#allocation2 + $0xa0] sm:$0xff] %v299_v23  ;;  %v303_v30 = vadd.f32 %v302_v28, %v72_v59  ;;  %v5759_v59 = vpop.eup %5758 }
  0xfa   :  { %v304_v34 = vpop.f32.mrf.mxu1  ;;  %v562_v6 = vmul.f32 0.5, %v5759_v59  ;;  %v674_v59 = vld [vmem:[#allocation4 + $0x270] sm:$0xff] }
  0xfb   :  { %531 = vst [vmem:[#allocation2 + $0x30] sm:$0xf] %v303_v30  ;;  %v305_v37 = vadd.f32 %v304_v34, %v76_v62 }
  0xfc   :  { %v468_v40 = vpop.f32.mrf.mxu1  ;;  %v568_v13 = vadd.f32 0.5, %v562_v6  ;;  %v648_v6 = vld [vmem:[#allocation4 + $0x1a0] sm:$0xff] }
  0xfd   :  { %532 = vst [vmem:[#allocation2 + $0x40] sm:$0xf] %v305_v37  ;;  %v469_v44 = vadd.f32 %v468_v40, %v88_v31  ;;  %v722_v37 = vld [vmem:[#allocation4 + $0x3f0] sm:$0xff]  ;;  %v712_v40 = vld [vmem:[#allocation4 + $0x3a0] sm:$0xff] }
  0xfe   :  { %v470_v46 = vpop.f32.mrf.mxu1 }
  0xff   :  { %503 = vst [vmem:[#allocation2 + $0xf8] sm:$0xff] %v469_v44  ;;  %v471_v49 = vadd.f32 %v470_v46, %v92_v25  ;;  %v707_v44 = vld [vmem:[#allocation4 + $0x378] sm:$0xff]  ;;  %v706_v46 = vld [vmem:[#allocation4 + $0x370] sm:$0xff] }
 0x100   :  { %v474_v27 = vpop.f32.mrf.mxu1  ;;  %v5761_v61 = vpop.eup %5760 }
 0x101   :  { %504 = vst [vmem:[#allocation2 + $0x100] sm:$0xff] %v471_v49  ;;  %v475_v50 = vadd.f32 %v474_v27, %v88_v31  ;;  %v564_v3 = vmul.f32 0.5, %v5761_v61  ;;  %v696_v49 = vld [vmem:[#allocation4 + $0x320] sm:$0xff]  ;;  %v698_v27 = vld [vmem:[#allocation4 + $0x330] sm:$0xff]  ;;  %v667_v61 = vld [vmem:[#allocation4 + $0x238] sm:$0xff] }
 0x102   :  { %v476_v51 = vpop.f32.mrf.mxu1  ;;  %v5763_v63 = vpop.eup %5762 }
 0x103   :  { %511 = vst [vmem:[#allocation2 + $0x70] sm:$0xff] %v475_v50  ;;  %v477_v38 = vadd.f32 %v476_v51, %v92_v25  ;;  %v5765_v2 = vpop.eup %5764  ;;  %v565_v5 = vmul.f32 0.5, %v5763_v63  ;;  %v570_v11 = vadd.f32 0.5, %v564_v3  ;;  %v689_v50 = vld [vmem:[#allocation4 + $0x2e8] sm:$0xff]  ;;  %v691_v51 = vld [vmem:[#allocation4 + $0x2f8] sm:$0xff]  ;;  %v666_v63 = vld [vmem:[#allocation4 + $0x230] sm:$0xff] }
 0x104   :  { %v480_v52 = vpop.f32.mrf.mxu1  ;;  %v563_v9 = vmul.f32 0.5, %v5765_v2  ;;  %v656_v2 = vld [vmem:[#allocation4 + $0x1e0] sm:$0xff]  ;;  %v658_v3 = vld [vmem:[#allocation4 + $0x1f0] sm:$0xff] }
 0x105   :  { %512 = vst [vmem:[#allocation2 + $0x20] sm:$0xff] %v477_v38  ;;  %v481_v53 = vadd.f32 %v480_v52, %v88_v31  ;;  %v571_v12 = vadd.f32 0.5, %v565_v5  ;;  %v574_v18 = vmul.f32 0.0, %v570_v11  ;;  %v688_v38 = vld [vmem:[#allocation4 + $0x2e0] sm:$0xff]  ;;  %v690_v52 = vld [vmem:[#allocation4 + $0x2f0] sm:$0xff]  ;;  %v651_v5 = vld [vmem:[#allocation4 + $0x1b8] sm:$0xff] }
 0x106   :  { %v552_v54 = vld [vmem:[#allocation2 + $0xf8] sm:$0xf]  ;;  %v482_v55 = vpop.f32.mrf.mxu1  ;;  %v569_v15 = vadd.f32 0.5, %v563_v9  ;;  %v642_v11 = vld [vmem:[#allocation4 + $0x170] sm:$0xff] }
 0x107   :  { %5766 = vtanh.f32 %v552_v54  ;;  %519 = vst [vmem:[#allocation2 + $0xe0] sm:$0xff] %v481_v53  ;;  %v483_v56 = vadd.f32 %v482_v55, %v92_v25  ;;  %v575_v19 = vmul.f32 0.0, %v571_v12  ;;  %v681_v53 = vld [vmem:[#allocation4 + $0x2a8] sm:$0xff]  ;;  %v683_v54 = vld [vmem:[#allocation4 + $0x2b8] sm:$0xff]  ;;  %v680_v55 = vld [vmem:[#allocation4 + $0x2a0] sm:$0xff] }
 0x108   :  { %v553_v41 = vld [vmem:[#allocation2 + $0x100] sm:$0xf]  ;;  %v486_v57 = vpop.f32.mrf.mxu1  ;;  %v643_v9 = vld [vmem:[#allocation4 + $0x178] sm:$0xff]  ;;  %v633_v12 = vld [vmem:[#allocation4 + $0x128] sm:$0xff] }
 0x109   :  { %5768 = vtanh.f32 %v553_v41  ;;  %520 = vst [vmem:[#allocation2 + $0x88] sm:$0xff] %v483_v56  ;;  %v487_v58 = vadd.f32 %v486_v57, %v88_v31  ;;  %v682_v56 = vld [vmem:[#allocation4 + $0x2b0] sm:$0xff]  ;;  %v673_v41 = vld [vmem:[#allocation4 + $0x268] sm:$0xff]  ;;  %v675_v57 = vld [vmem:[#allocation4 + $0x278] sm:$0xff] }
 0x10a   :  { %v488_v60 = vpop.f32.mrf.mxu1  ;;  %5770 = vtanh.f32 %v551_v8  ;;  %v641_v8 = vld [vmem:[#allocation4 + $0x168] sm:$0xff] }
 0x10b   :  { %527 = vst [vmem:[#allocation2 + $0x50] sm:$0xff] %v487_v58  ;;  %v489_v62 = vadd.f32 %v488_v60, %v92_v25  ;;  %5772 = vtanh.f32 %v550_v10  ;;  %v672_v58 = vld [vmem:[#allocation4 + $0x260] sm:$0xff]  ;;  %v665_v60 = vld [vmem:[#allocation4 + $0x228] sm:$0xff] }
 0x10c   :  { %v492_v0 = vpop.f32.mrf.mxu1  ;;  %v640_v10 = vld [vmem:[#allocation4 + $0x160] sm:$0xff] }
 0x10d   :  { %528 = vst [vmem:[#allocation2 + $0xe8] sm:$0xff] %v489_v62  ;;  %v493_v1 = vadd.f32 %v492_v0, %v88_v31  ;;  %v664_v62 = vld [vmem:[#allocation4 + $0x220] sm:$0xff]  ;;  %v657_v0 = vld [vmem:[#allocation4 + $0x1e8] sm:$0xff] }
 0x10e   :  { %v494_v4 = vpop.f32.mrf.mxu1 }
 0x10f   :  { %535 = vst [vmem:[#allocation2 + $0xb8] sm:$0xf] %v493_v1  ;;  %v495_v7 = vadd.f32 %v494_v4, %v92_v25  ;;  %v713_v25 = vld [vmem:[#allocation4 + $0x3a8] sm:$0xff]  ;;  %v659_v1 = vld [vmem:[#allocation4 + $0x1f8] sm:$0xff] }
 0x110   :  { %v649_v4 = vld [vmem:[#allocation4 + $0x1a8] sm:$0xff] }
 0x111   :  { %536 = vst [vmem:[#allocation2 + $0x60] sm:$0xf] %v495_v7  ;;  %v650_v7 = vld [vmem:[#allocation4 + $0x1b0] sm:$0xff] }
 0x114   :  { %v5767_v14 = vpop.eup %5766 }
 0x115   :  { %v576_v16 = vmul.f32 %v5767_v14, %v568_v13  ;;  %v635_v13 = vld [vmem:[#allocation4 + $0x138] sm:$0xff]  ;;  %v632_v14 = vld [vmem:[#allocation4 + $0x120] sm:$0xff] }
 0x116   :  { %v5769_v17 = vpop.eup %5768 }
 0x117   :  { %v577_v20 = vmul.f32 %v5769_v17, %v569_v15  ;;  %v6183_v21 = vadd.f32 %v576_v16, %v574_v18  ;;  %v5771_v23 = vpop.eup %5770  ;;  %v634_v15 = vld [vmem:[#allocation4 + $0x130] sm:$0xff]  ;;  %v625_v16 = vld [vmem:[#allocation4 + $0xe8] sm:$0xff]  ;;  %v627_v17 = vld [vmem:[#allocation4 + $0xf8] sm:$0xff] }
 0x118   :  { %v5773_v24 = vpop.eup %5772  ;;  %v567_v26 = vmul.f32 0.5, %v5771_v23  ;;  %v624_v18 = vld [vmem:[#allocation4 + $0xe0] sm:$0xff]  ;;  %v619_v23 = vld [vmem:[#allocation4 + $0xb8] sm:$0xff] }
 0x119   :  { %v6185_v22 = vadd.f32 %v577_v20, %v575_v19  ;;  %v566_v28 = vmul.f32 0.5, %v5773_v24  ;;  %v626_v19 = vld [vmem:[#allocation4 + $0xf0] sm:$0xff]  ;;  %v617_v20 = vld [vmem:[#allocation4 + $0xa8] sm:$0xff]  ;;  %v616_v24 = vld [vmem:[#allocation4 + $0xa0] sm:$0xff] }
 0x11a   :  { %v573_v29 = vadd.f32 0.5, %v567_v26  ;;  %v618_v26 = vld [vmem:[#allocation4 + $0xb0] sm:$0xff] }
 0x11b   :  { %5774 = vtanh.f32 %v6185_v22  ;;  %v572_v31 = vadd.f32 0.5, %v566_v28  ;;  %v609_v28 = vld [vmem:[#allocation4 + $0x68] sm:$0xff] }
 0x11c   :  { %5776 = vtanh.f32 %v6183_v21 }
 0x128   :  { %v5775_v30 = vpop.eup %5774 }
 0x129   :  { %v5777_v32 = vpop.eup %5776  ;;  %v583_v33 = vmul.f32 %v5775_v30, %v573_v29  ;;  %v611_v29 = vld [vmem:[#allocation4 + $0x78] sm:$0xff]  ;;  %v608_v30 = vld [vmem:[#allocation4 + $0x60] sm:$0xff] }
 0x12a   :  { %v6189_v35 = vmul.f32 %v5777_v32, %v572_v31  ;;  %v610_v31 = vld [vmem:[#allocation4 + $0x70] sm:$0xff]  ;;  %v601_v32 = vld [vmem:[#allocation4 + $0x28] sm:$0xff] }
 0x12b   :  { %v585_v34 = vmul.f32 0.0, %v583_v33  ;;  %v603_v33 = vld [vmem:[#allocation4 + $0x38] sm:$0xff] }
 0x12d   :  { %916 = vmatprep.mubr.f32.mxu0 %v585_v34  ;;  %987 = vmatprep.mubr.f32.mxu1 %v585_v34 }
 0x12e   :  { %917 = vmatmul.mubr.f32.vlgmr.msra.gmra.mxu0 %v6189_v35  ;;  %988 = vmatmul.mubr.f32.vlgmr.msra.gmra.mxu1 %v6189_v35 }
 0x12f   :  { %995 = vmatpush1.msra.mxu0 %v720_v36  ;;  %1066 = vmatpush1.msra.mxu1 %v722_v37  ;;  %v602_v36 = vld [vmem:[#allocation4 + $0x30] sm:$0xff]  ;;  %v849_v37 = vld [vmem:[#allocation4 + $0x7e8] sm:$0xff] }
 0x130   :  { %996 = vmatprep.subr.mxu0 %v713_v25  ;;  %1058 = vmatprep.mubr.f32.mxu0 %v585_v34  ;;  %v851_v25 = vld [vmem:[#allocation4 + $0x7f8] sm:$0xff] }
 0x131   :  { %1067 = vmatprep.subr.mxu1 %v715_v39  ;;  %1129 = vmatprep.mubr.f32.mxu1 %v585_v34  ;;  %v600_v34 = vld [vmem:[#allocation4 + $0x20] sm:$0xff] }
 0x132   :  { %997 = vmatpush1.msra.mxu0 %v712_v40  ;;  %1068 = vmatpush1.msra.mxu1 %v714_v42  ;;  %v848_v39 = vld [vmem:[#allocation4 + $0x7e0] sm:$0xff]  ;;  %v850_v40 = vld [vmem:[#allocation4 + $0x7f0] sm:$0xff]  ;;  %v841_v42 = vld [vmem:[#allocation4 + $0x7a8] sm:$0xff] }
 0x133   :  { %998 = vmatprep.subr.mxu0 %v705_v43  ;;  %1069 = vmatprep.subr.mxu1 %v707_v44  ;;  %v843_v43 = vld [vmem:[#allocation4 + $0x7b8] sm:$0xff]  ;;  %v840_v44 = vld [vmem:[#allocation4 + $0x7a0] sm:$0xff] }
 0x134   :  { %999 = vmatpush1.msra.mxu0 %v704_v45  ;;  %1070 = vmatpush1.msra.mxu1 %v706_v46  ;;  %v842_v45 = vld [vmem:[#allocation4 + $0x7b0] sm:$0xff]  ;;  %v833_v46 = vld [vmem:[#allocation4 + $0x768] sm:$0xff] }
 0x135   :  { %1000 = vmatprep.subr.mxu0 %v697_v47  ;;  %1071 = vmatprep.subr.mxu1 %v699_v48  ;;  %v835_v47 = vld [vmem:[#allocation4 + $0x778] sm:$0xff]  ;;  %v832_v48 = vld [vmem:[#allocation4 + $0x760] sm:$0xff] }
 0x136   :  { %1001 = vmatpush1.msra.mxu0 %v696_v49  ;;  %1072 = vmatpush1.msra.mxu1 %v698_v27  ;;  %v834_v49 = vld [vmem:[#allocation4 + $0x770] sm:$0xff]  ;;  %v825_v27 = vld [vmem:[#allocation4 + $0x728] sm:$0xff] }
 0x137   :  { %1002 = vmatprep.subr.mxu0 %v689_v50  ;;  %1073 = vmatprep.subr.mxu1 %v691_v51  ;;  %v827_v50 = vld [vmem:[#allocation4 + $0x738] sm:$0xff]  ;;  %v824_v51 = vld [vmem:[#allocation4 + $0x720] sm:$0xff] }
 0x138   :  { %1003 = vmatpush1.msra.mxu0 %v688_v38  ;;  %1074 = vmatpush1.msra.mxu1 %v690_v52  ;;  %v826_v38 = vld [vmem:[#allocation4 + $0x730] sm:$0xff]  ;;  %v817_v52 = vld [vmem:[#allocation4 + $0x6e8] sm:$0xff] }
 0x139   :  { %1004 = vmatprep.subr.mxu0 %v681_v53  ;;  %1075 = vmatprep.subr.mxu1 %v683_v54  ;;  %v819_v53 = vld [vmem:[#allocation4 + $0x6f8] sm:$0xff]  ;;  %v816_v54 = vld [vmem:[#allocation4 + $0x6e0] sm:$0xff] }
 0x13a   :  { %1005 = vmatpush1.msra.mxu0 %v680_v55  ;;  %1076 = vmatpush1.msra.mxu1 %v682_v56  ;;  %v818_v55 = vld [vmem:[#allocation4 + $0x6f0] sm:$0xff]  ;;  %v809_v56 = vld [vmem:[#allocation4 + $0x6a8] sm:$0xff] }
 0x13b   :  { %1006 = vmatprep.subr.mxu0 %v673_v41  ;;  %1077 = vmatprep.subr.mxu1 %v675_v57  ;;  %v811_v41 = vld [vmem:[#allocation4 + $0x6b8] sm:$0xff]  ;;  %v808_v57 = vld [vmem:[#allocation4 + $0x6a0] sm:$0xff] }
 0x13c   :  { %1007 = vmatpush1.msra.mxu0 %v672_v58  ;;  %1078 = vmatpush1.msra.mxu1 %v674_v59  ;;  %v810_v58 = vld [vmem:[#allocation4 + $0x6b0] sm:$0xff]  ;;  %v801_v59 = vld [vmem:[#allocation4 + $0x668] sm:$0xff] }
 0x13d   :  { %1008 = vmatprep.subr.mxu0 %v665_v60  ;;  %1079 = vmatprep.subr.mxu1 %v667_v61  ;;  %v803_v60 = vld [vmem:[#allocation4 + $0x678] sm:$0xff]  ;;  %v800_v61 = vld [vmem:[#allocation4 + $0x660] sm:$0xff] }
 0x13e   :  { %1009 = vmatpush1.msra.mxu0 %v664_v62  ;;  %1080 = vmatpush1.msra.mxu1 %v666_v63  ;;  %v802_v62 = vld [vmem:[#allocation4 + $0x670] sm:$0xff]  ;;  %v793_v63 = vld [vmem:[#allocation4 + $0x628] sm:$0xff] }
 0x13f   :  { %1010 = vmatprep.subr.mxu0 %v657_v0  ;;  %1081 = vmatprep.subr.mxu1 %v659_v1  ;;  %v795_v0 = vld [vmem:[#allocation4 + $0x638] sm:$0xff]  ;;  %v792_v1 = vld [vmem:[#allocation4 + $0x620] sm:$0xff] }
 0x140   :  { %1011 = vmatpush1.msra.mxu0 %v656_v2  ;;  %1082 = vmatpush1.msra.mxu1 %v658_v3  ;;  %v794_v2 = vld [vmem:[#allocation4 + $0x630] sm:$0xff]  ;;  %v785_v3 = vld [vmem:[#allocation4 + $0x5e8] sm:$0xff] }
 0x141   :  { %1012 = vmatprep.subr.mxu0 %v649_v4  ;;  %1083 = vmatprep.subr.mxu1 %v651_v5  ;;  %v787_v4 = vld [vmem:[#allocation4 + $0x5f8] sm:$0xff]  ;;  %v784_v5 = vld [vmem:[#allocation4 + $0x5e0] sm:$0xff] }
 0x142   :  { %1013 = vmatpush1.msra.mxu0 %v648_v6  ;;  %1084 = vmatpush1.msra.mxu1 %v650_v7  ;;  %v786_v6 = vld [vmem:[#allocation4 + $0x5f0] sm:$0xff]  ;;  %v777_v7 = vld [vmem:[#allocation4 + $0x5a8] sm:$0xff] }
 0x143   :  { %1014 = vmatprep.subr.mxu0 %v641_v8  ;;  %1085 = vmatprep.subr.mxu1 %v643_v9  ;;  %v779_v8 = vld [vmem:[#allocation4 + $0x5b8] sm:$0xff]  ;;  %v776_v9 = vld [vmem:[#allocation4 + $0x5a0] sm:$0xff] }
 0x144   :  { %1015 = vmatpush1.msra.mxu0 %v640_v10  ;;  %1086 = vmatpush1.msra.mxu1 %v642_v11  ;;  %v778_v10 = vld [vmem:[#allocation4 + $0x5b0] sm:$0xff]  ;;  %v769_v11 = vld [vmem:[#allocation4 + $0x568] sm:$0xff] }
 0x145   :  { %1016 = vmatprep.subr.mxu0 %v633_v12  ;;  %1087 = vmatprep.subr.mxu1 %v635_v13  ;;  %v771_v12 = vld [vmem:[#allocation4 + $0x578] sm:$0xff]  ;;  %v768_v13 = vld [vmem:[#allocation4 + $0x560] sm:$0xff] }
 0x146   :  { %1017 = vmatpush1.msra.mxu0 %v632_v14  ;;  %1088 = vmatpush1.msra.mxu1 %v634_v15  ;;  %v770_v14 = vld [vmem:[#allocation4 + $0x570] sm:$0xff]  ;;  %v761_v15 = vld [vmem:[#allocation4 + $0x528] sm:$0xff] }
 0x147   :  { %1018 = vmatprep.subr.mxu0 %v625_v16  ;;  %1089 = vmatprep.subr.mxu1 %v627_v17  ;;  %v763_v16 = vld [vmem:[#allocation4 + $0x538] sm:$0xff]  ;;  %v760_v17 = vld [vmem:[#allocation4 + $0x520] sm:$0xff] }
 0x148   :  { %1019 = vmatpush1.msra.mxu0 %v624_v18  ;;  %1090 = vmatpush1.msra.mxu1 %v626_v19  ;;  %v762_v18 = vld [vmem:[#allocation4 + $0x530] sm:$0xff]  ;;  %v753_v19 = vld [vmem:[#allocation4 + $0x4e8] sm:$0xff] }
 0x149   :  { %1020 = vmatprep.subr.mxu0 %v617_v20  ;;  %1091 = vmatprep.subr.mxu1 %v619_v23  ;;  %v755_v20 = vld [vmem:[#allocation4 + $0x4f8] sm:$0xff]  ;;  %v752_v23 = vld [vmem:[#allocation4 + $0x4e0] sm:$0xff] }
 0x14a   :  { %1021 = vmatpush1.msra.mxu0 %v616_v24  ;;  %1092 = vmatpush1.msra.mxu1 %v618_v26  ;;  %v754_v24 = vld [vmem:[#allocation4 + $0x4f0] sm:$0xff]  ;;  %v745_v26 = vld [vmem:[#allocation4 + $0x4a8] sm:$0xff] }
 0x14b   :  { %1022 = vmatprep.subr.mxu0 %v609_v28  ;;  %1093 = vmatprep.subr.mxu1 %v611_v29  ;;  %v747_v28 = vld [vmem:[#allocation4 + $0x4b8] sm:$0xff]  ;;  %v744_v29 = vld [vmem:[#allocation4 + $0x4a0] sm:$0xff] }
 0x14c   :  { %1023 = vmatpush1.msra.mxu0 %v608_v30  ;;  %1094 = vmatpush1.msra.mxu1 %v610_v31  ;;  %v746_v30 = vld [vmem:[#allocation4 + $0x4b0] sm:$0xff]  ;;  %v737_v31 = vld [vmem:[#allocation4 + $0x468] sm:$0xff] }
 0x14d   :  { %1024 = vmatprep.subr.mxu0 %v601_v32  ;;  %1095 = vmatprep.subr.mxu1 %v603_v33  ;;  %v739_v32 = vld [vmem:[#allocation4 + $0x478] sm:$0xff]  ;;  %v736_v33 = vld [vmem:[#allocation4 + $0x460] sm:$0xff] }
 0x14e   :  { %1025 = vmatpush1.msra.mxu0 %v600_v34  ;;  %1096 = vmatpush1.msra.mxu1 %v602_v36  ;;  %v738_v34 = vld [vmem:[#allocation4 + $0x470] sm:$0xff]  ;;  %v729_v36 = vld [vmem:[#allocation4 + $0x428] sm:$0xff] }
 0x14f   :  { %1026 = vmatprep.subr.mxu0 %v849_v37  ;;  %1097 = vmatprep.subr.mxu1 %v851_v25  ;;  %v731_v37 = vld [vmem:[#allocation4 + $0x438] sm:$0xff]  ;;  %v728_v25 = vld [vmem:[#allocation4 + $0x420] sm:$0xff] }
 0x150   :  { %1027 = vmatpush2.msra.mxu0 %v848_v39  ;;  %1098 = vmatpush2.msra.mxu1 %v850_v40  ;;  %v730_v39 = vld [vmem:[#allocation4 + $0x430] sm:$0xff]  ;;  %v1341_v40 = vld [vmem:[#allocation4 + $0x3c8] sm:$0xff] }
 0x151   :  { %1028 = vmatprep.subr.mxu0 %v841_v42  ;;  %1099 = vmatprep.subr.mxu1 %v843_v43  ;;  %v1343_v42 = vld [vmem:[#allocation4 + $0x3d8] sm:$0xff]  ;;  %v1340_v43 = vld [vmem:[#allocation4 + $0x3c0] sm:$0xff] }
 0x152   :  { %1029 = vmatpush2.msra.mxu0 %v840_v44  ;;  %1100 = vmatpush2.msra.mxu1 %v842_v45  ;;  %v1342_v44 = vld [vmem:[#allocation4 + $0x3d0] sm:$0xff]  ;;  %v1333_v45 = vld [vmem:[#allocation4 + $0x388] sm:$0xff] }
 0x153   :  { %1030 = vmatprep.subr.mxu0 %v833_v46  ;;  %1101 = vmatprep.subr.mxu1 %v835_v47  ;;  %v1335_v46 = vld [vmem:[#allocation4 + $0x398] sm:$0xff]  ;;  %v1332_v47 = vld [vmem:[#allocation4 + $0x380] sm:$0xff] }
 0x154   :  { %1031 = vmatpush2.msra.mxu0 %v832_v48  ;;  %1102 = vmatpush2.msra.mxu1 %v834_v49  ;;  %v1334_v48 = vld [vmem:[#allocation4 + $0x390] sm:$0xff]  ;;  %v1325_v49 = vld [vmem:[#allocation4 + $0x348] sm:$0xff] }
 0x155   :  { %1032 = vmatprep.subr.mxu0 %v825_v27  ;;  %1103 = vmatprep.subr.mxu1 %v827_v50  ;;  %v1327_v27 = vld [vmem:[#allocation4 + $0x358] sm:$0xff]  ;;  %v1324_v50 = vld [vmem:[#allocation4 + $0x340] sm:$0xff] }
 0x156   :  { %1033 = vmatpush2.msra.mxu0 %v824_v51  ;;  %1104 = vmatpush2.msra.mxu1 %v826_v38  ;;  %v1326_v51 = vld [vmem:[#allocation4 + $0x350] sm:$0xff]  ;;  %v1319_v38 = vld [vmem:[#allocation4 + $0x318] sm:$0xff] }
 0x157   :  { %1034 = vmatprep.subr.mxu0 %v817_v52  ;;  %1105 = vmatprep.subr.mxu1 %v819_v53  ;;  %v1316_v52 = vld [vmem:[#allocation4 + $0x300] sm:$0xff]  ;;  %v1318_v53 = vld [vmem:[#allocation4 + $0x310] sm:$0xff] }
 0x158   :  { %1035 = vmatpush2.msra.mxu0 %v816_v54  ;;  %1106 = vmatpush2.msra.mxu1 %v818_v55  ;;  %v1309_v54 = vld [vmem:[#allocation4 + $0x2c8] sm:$0xff]  ;;  %v1311_v55 = vld [vmem:[#allocation4 + $0x2d8] sm:$0xff] }
 0x159   :  { %1036 = vmatprep.subr.mxu0 %v809_v56  ;;  %1107 = vmatprep.subr.mxu1 %v811_v41  ;;  %v1308_v56 = vld [vmem:[#allocation4 + $0x2c0] sm:$0xff]  ;;  %v1310_v41 = vld [vmem:[#allocation4 + $0x2d0] sm:$0xff] }
 0x15a   :  { %1037 = vmatpush2.msra.mxu0 %v808_v57  ;;  %1108 = vmatpush2.msra.mxu1 %v810_v58  ;;  %v1301_v57 = vld [vmem:[#allocation4 + $0x288] sm:$0xff]  ;;  %v1303_v58 = vld [vmem:[#allocation4 + $0x298] sm:$0xff] }
 0x15b   :  { %1038 = vmatprep.subr.mxu0 %v801_v59  ;;  %1109 = vmatprep.subr.mxu1 %v803_v60  ;;  %v1300_v59 = vld [vmem:[#allocation4 + $0x280] sm:$0xff]  ;;  %v1302_v60 = vld [vmem:[#allocation4 + $0x290] sm:$0xff] }
 0x15c   :  { %1039 = vmatpush2.msra.mxu0 %v800_v61  ;;  %1110 = vmatpush2.msra.mxu1 %v802_v62  ;;  %v1293_v61 = vld [vmem:[#allocation4 + $0x248] sm:$0xff]  ;;  %v1295_v62 = vld [vmem:[#allocation4 + $0x258] sm:$0xff] }
 0x15d   :  { %1040 = vmatprep.subr.mxu0 %v793_v63  ;;  %1111 = vmatprep.subr.mxu1 %v795_v0  ;;  %v1292_v63 = vld [vmem:[#allocation4 + $0x240] sm:$0xff]  ;;  %v1294_v0 = vld [vmem:[#allocation4 + $0x250] sm:$0xff] }
 0x15e   :  { %1041 = vmatpush2.msra.mxu0 %v792_v1  ;;  %1112 = vmatpush2.msra.mxu1 %v794_v2  ;;  %v1285_v1 = vld [vmem:[#allocation4 + $0x208] sm:$0xff]  ;;  %v1287_v2 = vld [vmem:[#allocation4 + $0x218] sm:$0xff] }
 0x15f   :  { %1042 = vmatprep.subr.mxu0 %v785_v3  ;;  %1113 = vmatprep.subr.mxu1 %v787_v4  ;;  %v1284_v3 = vld [vmem:[#allocation4 + $0x200] sm:$0xff]  ;;  %v1286_v4 = vld [vmem:[#allocation4 + $0x210] sm:$0xff] }
 0x160   :  { %1043 = vmatpush2.msra.mxu0 %v784_v5  ;;  %1114 = vmatpush2.msra.mxu1 %v786_v6  ;;  %v1277_v5 = vld [vmem:[#allocation4 + $0x1c8] sm:$0xff]  ;;  %v1279_v6 = vld [vmem:[#allocation4 + $0x1d8] sm:$0xff] }
 0x161   :  { %1044 = vmatprep.subr.mxu0 %v777_v7  ;;  %1115 = vmatprep.subr.mxu1 %v779_v8  ;;  %v1276_v7 = vld [vmem:[#allocation4 + $0x1c0] sm:$0xff]  ;;  %v1278_v8 = vld [vmem:[#allocation4 + $0x1d0] sm:$0xff] }
 0x162   :  { %1045 = vmatpush2.msra.mxu0 %v776_v9  ;;  %1116 = vmatpush2.msra.mxu1 %v778_v10  ;;  %v1269_v9 = vld [vmem:[#allocation4 + $0x188] sm:$0xff]  ;;  %v1271_v10 = vld [vmem:[#allocation4 + $0x198] sm:$0xff] }
 0x163   :  { %1046 = vmatprep.subr.mxu0 %v769_v11  ;;  %1117 = vmatprep.subr.mxu1 %v771_v12  ;;  %v1268_v11 = vld [vmem:[#allocation4 + $0x180] sm:$0xff]  ;;  %v1270_v12 = vld [vmem:[#allocation4 + $0x190] sm:$0xff] }
 0x164   :  { %1047 = vmatpush2.msra.mxu0 %v768_v13  ;;  %1118 = vmatpush2.msra.mxu1 %v770_v14  ;;  %v1261_v13 = vld [vmem:[#allocation4 + $0x148] sm:$0xff]  ;;  %v1263_v14 = vld [vmem:[#allocation4 + $0x158] sm:$0xff] }
 0x165   :  { %1048 = vmatprep.subr.mxu0 %v761_v15  ;;  %1119 = vmatprep.subr.mxu1 %v763_v16  ;;  %v1260_v15 = vld [vmem:[#allocation4 + $0x140] sm:$0xff]  ;;  %v1262_v16 = vld [vmem:[#allocation4 + $0x150] sm:$0xff] }
 0x166   :  { %1049 = vmatpush2.msra.mxu0 %v760_v17  ;;  %1120 = vmatpush2.msra.mxu1 %v762_v18  ;;  %v1253_v17 = vld [vmem:[#allocation4 + $0x108] sm:$0xff]  ;;  %v1255_v18 = vld [vmem:[#allocation4 + $0x118] sm:$0xff] }
 0x167   :  { %1050 = vmatprep.subr.mxu0 %v753_v19  ;;  %1121 = vmatprep.subr.mxu1 %v755_v20  ;;  %v1252_v19 = vld [vmem:[#allocation4 + $0x100] sm:$0xff]  ;;  %v1254_v20 = vld [vmem:[#allocation4 + $0x110] sm:$0xff] }
 0x168   :  { %1051 = vmatpush2.msra.mxu0 %v752_v23  ;;  %1122 = vmatpush2.msra.mxu1 %v754_v24  ;;  %v1245_v23 = vld [vmem:[#allocation4 + $0xc8] sm:$0xff]  ;;  %v1247_v24 = vld [vmem:[#allocation4 + $0xd8] sm:$0xff] }
 0x169   :  { %1052 = vmatprep.subr.mxu0 %v745_v26  ;;  %1123 = vmatprep.subr.mxu1 %v747_v28  ;;  %v1244_v26 = vld [vmem:[#allocation4 + $0xc0] sm:$0xff]  ;;  %v1246_v28 = vld [vmem:[#allocation4 + $0xd0] sm:$0xff] }
 0x16a   :  { %1053 = vmatpush2.msra.mxu0 %v744_v29  ;;  %1124 = vmatpush2.msra.mxu1 %v746_v30  ;;  %v1237_v29 = vld [vmem:[#allocation4 + $0x88] sm:$0xff]  ;;  %v1239_v30 = vld [vmem:[#allocation4 + $0x98] sm:$0xff] }
 0x16b   :  { %1054 = vmatprep.subr.mxu0 %v737_v31  ;;  %1125 = vmatprep.subr.mxu1 %v739_v32  ;;  %v1236_v31 = vld [vmem:[#allocation4 + $0x80] sm:$0xff]  ;;  %v1238_v32 = vld [vmem:[#allocation4 + $0x90] sm:$0xff] }
 0x16c   :  { %1055 = vmatpush2.msra.mxu0 %v736_v33  ;;  %1126 = vmatpush2.msra.mxu1 %v738_v34  ;;  %v1229_v33 = vld [vmem:[#allocation4 + $0x48] sm:$0xff]  ;;  %v1231_v34 = vld [vmem:[#allocation4 + $0x58] sm:$0xff] }
 0x16d   :  { %1056 = vmatprep.subr.mxu0 %v729_v36  ;;  %1127 = vmatprep.subr.mxu1 %v731_v37  ;;  %v1228_v36 = vld [vmem:[#allocation4 + $0x40] sm:$0xff]  ;;  %v1230_v37 = vld [vmem:[#allocation4 + $0x50] sm:$0xff] }
 0x16e   :  { %1057 = vmatpush2.msra.mxu0 %v728_v25  ;;  %1128 = vmatpush2.msra.mxu1 %v730_v39  ;;  %v1221_v25 = vld [vmem:[#allocation4 + $0x8] sm:$0xff]  ;;  %v1223_v39 = vld [vmem:[#allocation4 + $0x18] sm:$0xff] }
 0x16f   :  { %1059 = vmatmul.mubr.f32.vlgmr.msra.gmra.mxu0 %v6189_v35  ;;  %1130 = vmatmul.mubr.f32.vlgmr.msra.gmra.mxu1 %v6189_v35  ;;  %v1317_v35 = vld [vmem:[#allocation4 + $0x308] sm:$0xff] }
 0x170   :  { %1476 = vmatprep.subr.mxu0 %v1341_v40  ;;  %1547 = vmatprep.subr.mxu1 %v1343_v42  ;;  %v1220_v40 = vld [vmem:[#allocation4] sm:$0xff]  ;;  %v1222_v42 = vld [vmem:[#allocation4 + $0x10] sm:$0xff] }
 0x171   :  { %1477 = vmatpush1.msra.mxu0 %v1340_v43  ;;  %1548 = vmatpush1.msra.mxu1 %v1342_v44  ;;  %v1469_v43 = vld [vmem:[#allocation4 + $0x7c8] sm:$0xff]  ;;  %v1471_v44 = vld [vmem:[#allocation4 + $0x7d8] sm:$0xff] }
 0x172   :  { %1478 = vmatprep.subr.mxu0 %v1333_v45  ;;  %1549 = vmatprep.subr.mxu1 %v1335_v46  ;;  %v1468_v45 = vld [vmem:[#allocation4 + $0x7c0] sm:$0xff]  ;;  %v1470_v46 = vld [vmem:[#allocation4 + $0x7d0] sm:$0xff] }
 0x173   :  { %1479 = vmatpush1.msra.mxu0 %v1332_v47  ;;  %1550 = vmatpush1.msra.mxu1 %v1334_v48  ;;  %v1461_v47 = vld [vmem:[#allocation4 + $0x788] sm:$0xff]  ;;  %v1463_v48 = vld [vmem:[#allocation4 + $0x798] sm:$0xff] }
 0x174   :  { %1480 = vmatprep.subr.mxu0 %v1325_v49  ;;  %1551 = vmatprep.subr.mxu1 %v1327_v27  ;;  %v1460_v49 = vld [vmem:[#allocation4 + $0x780] sm:$0xff]  ;;  %v1462_v27 = vld [vmem:[#allocation4 + $0x790] sm:$0xff] }
 0x175   :  { %1481 = vmatpush1.msra.mxu0 %v1324_v50  ;;  %1552 = vmatpush1.msra.mxu1 %v1326_v51  ;;  %v1453_v50 = vld [vmem:[#allocation4 + $0x748] sm:$0xff]  ;;  %v1455_v51 = vld [vmem:[#allocation4 + $0x758] sm:$0xff] }
 0x176   :  { %1482 = vmatprep.subr.mxu0 %v1317_v35  ;;  %1553 = vmatprep.subr.mxu1 %v1319_v38  ;;  %v1452_v35 = vld [vmem:[#allocation4 + $0x740] sm:$0xff]  ;;  %v1454_v38 = vld [vmem:[#allocation4 + $0x750] sm:$0xff] }
 0x177   :  { %1483 = vmatpush1.msra.mxu0 %v1316_v52  ;;  %1554 = vmatpush1.msra.mxu1 %v1318_v53  ;;  %v1445_v52 = vld [vmem:[#allocation4 + $0x708] sm:$0xff]  ;;  %v1447_v53 = vld [vmem:[#allocation4 + $0x718] sm:$0xff] }
 0x178   :  { %1484 = vmatprep.subr.mxu0 %v1309_v54  ;;  %1555 = vmatprep.subr.mxu1 %v1311_v55  ;;  %v1444_v54 = vld [vmem:[#allocation4 + $0x700] sm:$0xff]  ;;  %v1446_v55 = vld [vmem:[#allocation4 + $0x710] sm:$0xff] }
 0x179   :  { %1485 = vmatpush1.msra.mxu0 %v1308_v56  ;;  %1556 = vmatpush1.msra.mxu1 %v1310_v41  ;;  %v1437_v56 = vld [vmem:[#allocation4 + $0x6c8] sm:$0xff]  ;;  %v1439_v41 = vld [vmem:[#allocation4 + $0x6d8] sm:$0xff] }
 0x17a   :  { %1486 = vmatprep.subr.mxu0 %v1301_v57  ;;  %1557 = vmatprep.subr.mxu1 %v1303_v58  ;;  %v1436_v57 = vld [vmem:[#allocation4 + $0x6c0] sm:$0xff]  ;;  %v1438_v58 = vld [vmem:[#allocation4 + $0x6d0] sm:$0xff] }
 0x17b   :  { %1487 = vmatpush1.msra.mxu0 %v1300_v59  ;;  %1558 = vmatpush1.msra.mxu1 %v1302_v60  ;;  %v1429_v59 = vld [vmem:[#allocation4 + $0x688] sm:$0xff]  ;;  %v1431_v60 = vld [vmem:[#allocation4 + $0x698] sm:$0xff] }
 0x17c   :  { %1488 = vmatprep.subr.mxu0 %v1293_v61  ;;  %1559 = vmatprep.subr.mxu1 %v1295_v62  ;;  %v1428_v61 = vld [vmem:[#allocation4 + $0x680] sm:$0xff]  ;;  %v1430_v62 = vld [vmem:[#allocation4 + $0x690] sm:$0xff] }
 0x17d   :  { %1489 = vmatpush1.msra.mxu0 %v1292_v63  ;;  %1560 = vmatpush1.msra.mxu1 %v1294_v0  ;;  %v1421_v63 = vld [vmem:[#allocation4 + $0x648] sm:$0xff]  ;;  %v1423_v0 = vld [vmem:[#allocation4 + $0x658] sm:$0xff] }
 0x17e   :  { %1490 = vmatprep.subr.mxu0 %v1285_v1  ;;  %1561 = vmatprep.subr.mxu1 %v1287_v2  ;;  %v1420_v1 = vld [vmem:[#allocation4 + $0x640] sm:$0xff]  ;;  %v1422_v2 = vld [vmem:[#allocation4 + $0x650] sm:$0xff] }
 0x17f   :  { %1491 = vmatpush1.msra.mxu0 %v1284_v3  ;;  %1562 = vmatpush1.msra.mxu1 %v1286_v4  ;;  %v1413_v3 = vld [vmem:[#allocation4 + $0x608] sm:$0xff]  ;;  %v1415_v4 = vld [vmem:[#allocation4 + $0x618] sm:$0xff] }
 0x180   :  { %1492 = vmatprep.subr.mxu0 %v1277_v5  ;;  %1563 = vmatprep.subr.mxu1 %v1279_v6  ;;  %v1412_v5 = vld [vmem:[#allocation4 + $0x600] sm:$0xff]  ;;  %v1414_v6 = vld [vmem:[#allocation4 + $0x610] sm:$0xff] }
 0x181   :  { %1493 = vmatpush1.msra.mxu0 %v1276_v7  ;;  %1564 = vmatpush1.msra.mxu1 %v1278_v8  ;;  %v1405_v7 = vld [vmem:[#allocation4 + $0x5c8] sm:$0xff]  ;;  %v1407_v8 = vld [vmem:[#allocation4 + $0x5d8] sm:$0xff] }
 0x182   :  { %1494 = vmatprep.subr.mxu0 %v1269_v9  ;;  %1565 = vmatprep.subr.mxu1 %v1271_v10  ;;  %v1404_v9 = vld [vmem:[#allocation4 + $0x5c0] sm:$0xff]  ;;  %v1406_v10 = vld [vmem:[#allocation4 + $0x5d0] sm:$0xff] }
 0x183   :  { %1495 = vmatpush1.msra.mxu0 %v1268_v11  ;;  %1566 = vmatpush1.msra.mxu1 %v1270_v12  ;;  %v1397_v11 = vld [vmem:[#allocation4 + $0x588] sm:$0xff]  ;;  %v1399_v12 = vld [vmem:[#allocation4 + $0x598] sm:$0xff] }
 0x184   :  { %1496 = vmatprep.subr.mxu0 %v1261_v13  ;;  %1567 = vmatprep.subr.mxu1 %v1263_v14  ;;  %v1396_v13 = vld [vmem:[#allocation4 + $0x580] sm:$0xff]  ;;  %v1398_v14 = vld [vmem:[#allocation4 + $0x590] sm:$0xff] }
 0x185   :  { %1497 = vmatpush1.msra.mxu0 %v1260_v15  ;;  %1568 = vmatpush1.msra.mxu1 %v1262_v16  ;;  %v1389_v15 = vld [vmem:[#allocation4 + $0x548] sm:$0xff]  ;;  %v1391_v16 = vld [vmem:[#allocation4 + $0x558] sm:$0xff] }
 0x186   :  { %1498 = vmatprep.subr.mxu0 %v1253_v17  ;;  %1569 = vmatprep.subr.mxu1 %v1255_v18  ;;  %v1388_v17 = vld [vmem:[#allocation4 + $0x540] sm:$0xff]  ;;  %v1390_v18 = vld [vmem:[#allocation4 + $0x550] sm:$0xff] }
 0x187   :  { %1499 = vmatpush1.msra.mxu0 %v1252_v19  ;;  %1570 = vmatpush1.msra.mxu1 %v1254_v20  ;;  %v1381_v19 = vld [vmem:[#allocation4 + $0x508] sm:$0xff]  ;;  %v1383_v20 = vld [vmem:[#allocation4 + $0x518] sm:$0xff] }
 0x188   :  { %1500 = vmatprep.subr.mxu0 %v1245_v23  ;;  %1571 = vmatprep.subr.mxu1 %v1247_v24  ;;  %v1380_v23 = vld [vmem:[#allocation4 + $0x500] sm:$0xff]  ;;  %v1382_v24 = vld [vmem:[#allocation4 + $0x510] sm:$0xff] }
 0x189   :  { %1501 = vmatpush1.msra.mxu0 %v1244_v26  ;;  %1572 = vmatpush1.msra.mxu1 %v1246_v28  ;;  %v1373_v26 = vld [vmem:[#allocation4 + $0x4c8] sm:$0xff]  ;;  %v1375_v28 = vld [vmem:[#allocation4 + $0x4d8] sm:$0xff] }
 0x18a   :  { %1502 = vmatprep.subr.mxu0 %v1237_v29  ;;  %1573 = vmatprep.subr.mxu1 %v1239_v30  ;;  %v1372_v29 = vld [vmem:[#allocation4 + $0x4c0] sm:$0xff]  ;;  %v1374_v30 = vld [vmem:[#allocation4 + $0x4d0] sm:$0xff] }
 0x18b   :  { %1503 = vmatpush1.msra.mxu0 %v1236_v31  ;;  %1574 = vmatpush1.msra.mxu1 %v1238_v32  ;;  %v1365_v31 = vld [vmem:[#allocation4 + $0x488] sm:$0xff]  ;;  %v1367_v32 = vld [vmem:[#allocation4 + $0x498] sm:$0xff] }
 0x18c   :  { %1504 = vmatprep.subr.mxu0 %v1229_v33  ;;  %1575 = vmatprep.subr.mxu1 %v1231_v34  ;;  %v1364_v33 = vld [vmem:[#allocation4 + $0x480] sm:$0xff]  ;;  %v1366_v34 = vld [vmem:[#allocation4 + $0x490] sm:$0xff] }
 0x18d   :  { %1505 = vmatpush1.msra.mxu0 %v1228_v36  ;;  %1576 = vmatpush1.msra.mxu1 %v1230_v37  ;;  %v1357_v36 = vld [vmem:[#allocation4 + $0x448] sm:$0xff]  ;;  %v1359_v37 = vld [vmem:[#allocation4 + $0x458] sm:$0xff] }
 0x18e   :  { %1506 = vmatprep.subr.mxu0 %v1221_v25  ;;  %1577 = vmatprep.subr.mxu1 %v1223_v39  ;;  %v1356_v25 = vld [vmem:[#allocation4 + $0x440] sm:$0xff]  ;;  %v1358_v39 = vld [vmem:[#allocation4 + $0x450] sm:$0xff] }
 0x18f   :  { %1507 = vmatpush1.msra.mxu0 %v1220_v40  ;;  %1578 = vmatpush1.msra.mxu1 %v1222_v42  ;;  %v1349_v40 = vld [vmem:[#allocation4 + $0x408] sm:$0xff]  ;;  %v1351_v42 = vld [vmem:[#allocation4 + $0x418] sm:$0xff] }
 0x190   :  { %1508 = vmatprep.subr.mxu0 %v1469_v43  ;;  %1579 = vmatprep.subr.mxu1 %v1471_v44  ;;  %v1348_v43 = vld [vmem:[#allocation4 + $0x400] sm:$0xff]  ;;  %v1350_v44 = vld [vmem:[#allocation4 + $0x410] sm:$0xff] }
 0x191   :  { %1509 = vmatpush2.msra.mxu0 %v1468_v45  ;;  %1580 = vmatpush2.msra.mxu1 %v1470_v46  ;;  %v1345_v45 = vld [vmem:[#allocation4 + $0x3e8] sm:$0xff]  ;;  %v1347_v46 = vld [vmem:[#allocation4 + $0x3f8] sm:$0xff] }
 0x192   :  { %1510 = vmatprep.subr.mxu0 %v1461_v47  ;;  %1581 = vmatprep.subr.mxu1 %v1463_v48 }
 0x193   :  { %1511 = vmatpush2.msra.mxu0 %v1460_v49  ;;  %1582 = vmatpush2.msra.mxu1 %v1462_v27 }
 0x194   :  { %1512 = vmatprep.subr.mxu0 %v1453_v50  ;;  %1583 = vmatprep.subr.mxu1 %v1455_v51 }
 0x195   :  { %1513 = vmatpush2.msra.mxu0 %v1452_v35  ;;  %1584 = vmatpush2.msra.mxu1 %v1454_v38  ;;  %v590_v38 = vld [vmem:[#allocation2 + $0x10] sm:$0xf0] }
 0x196   :  { %1514 = vmatprep.subr.mxu0 %v1445_v52  ;;  %1585 = vmatprep.subr.mxu1 %v1447_v53  ;;  %v588_v52 = vld [vmem:[#allocation2 + $0xb0] sm:$0xf0] }
 0x197   :  { %1515 = vmatpush2.msra.mxu0 %v1444_v54  ;;  %1586 = vmatpush2.msra.mxu1 %v1446_v55 }
 0x198   :  { %1516 = vmatprep.subr.mxu0 %v1437_v56  ;;  %1587 = vmatprep.subr.mxu1 %v1439_v41  ;;  %v591_v56 = vld [vmem:[#allocation2 + $0x48] sm:$0xf0] }
 0x199   :  { %1517 = vmatpush2.msra.mxu0 %v1436_v57  ;;  %1588 = vmatpush2.msra.mxu1 %v1438_v58  ;;  %v589_v57 = vld [vmem:[#allocation2 + $0xd0] sm:$0xf0] }
 0x19a   :  { %1518 = vmatprep.subr.mxu0 %v1429_v59  ;;  %1589 = vmatprep.subr.mxu1 %v1431_v60 }
 0x19b   :  { %1519 = vmatpush2.msra.mxu0 %v1428_v61  ;;  %1590 = vmatpush2.msra.mxu1 %v1430_v62  ;;  %v594_v61 = vld [vmem:[#allocation2 + $0xf8] sm:$0xf0] }
 0x19c   :  { %1520 = vmatprep.subr.mxu0 %v1421_v63  ;;  %1591 = vmatprep.subr.mxu1 %v1423_v0 }
 0x19d   :  { %1521 = vmatpush2.msra.mxu0 %v1420_v1  ;;  %1592 = vmatpush2.msra.mxu1 %v1422_v2  ;;  %v595_v2 = vld [vmem:[#allocation2 + $0x100] sm:$0xf0] }
 0x19e   :  { %1522 = vmatprep.subr.mxu0 %v1413_v3  ;;  %1593 = vmatprep.subr.mxu1 %v1415_v4 }
 0x19f   :  { %1523 = vmatpush2.msra.mxu0 %v1412_v5  ;;  %1594 = vmatpush2.msra.mxu1 %v1414_v6 }
 0x1a0   :  { %1524 = vmatprep.subr.mxu0 %v1405_v7  ;;  %1595 = vmatprep.subr.mxu1 %v1407_v8 }
 0x1a1   :  { %1525 = vmatpush2.msra.mxu0 %v1404_v9  ;;  %1596 = vmatpush2.msra.mxu1 %v1406_v10  ;;  %v592_v10 = vld [vmem:[#allocation2 + $0x120] sm:$0xf0] }
 0x1a2   :  { %1526 = vmatprep.subr.mxu0 %v1397_v11  ;;  %1597 = vmatprep.subr.mxu1 %v1399_v12 }
 0x1a3   :  { %1527 = vmatpush2.msra.mxu0 %v1396_v13  ;;  %1598 = vmatpush2.msra.mxu1 %v1398_v14  ;;  %v593_v14 = vld [vmem:[#allocation2 + $0x38] sm:$0xf0] }
 0x1a4   :  { %1528 = vmatprep.subr.mxu0 %v1389_v15  ;;  %1599 = vmatprep.subr.mxu1 %v1391_v16 }
 0x1a5   :  { %1529 = vmatpush2.msra.mxu0 %v1388_v17  ;;  %1600 = vmatpush2.msra.mxu1 %v1390_v18 }
 0x1a6   :  { %1530 = vmatprep.subr.mxu0 %v1381_v19  ;;  %1601 = vmatprep.subr.mxu1 %v1383_v20  ;;  %v587_v20 = vmul.f32 0.0, %v6185_v22 }
 0x1a7   :  { %1531 = vmatpush2.msra.mxu0 %v1380_v23  ;;  %1602 = vmatpush2.msra.mxu1 %v1382_v24  ;;  %v1190_v24 = vrot.slane %v6183_v21, 4 }
 0x1a8   :  { %1532 = vmatprep.subr.mxu0 %v1373_v26  ;;  %1603 = vmatprep.subr.mxu1 %v1375_v28 }
 0x1a9   :  { %1533 = vmatpush2.msra.mxu0 %v1372_v29  ;;  %1604 = vmatpush2.msra.mxu1 %v1374_v30 }
 0x1aa   :  { %1534 = vmatprep.subr.mxu0 %v1365_v31  ;;  %1605 = vmatprep.subr.mxu1 %v1367_v32  ;;  %v1191_v31 = vrot.slane %v587_v20, 4  ;;  %v1265_v20 = vld [vmem:[#allocation4 + $0x168] sm:$0xff] }
 0x1ab   :  { %1535 = vmatpush2.msra.mxu0 %v1364_v33  ;;  %1606 = vmatpush2.msra.mxu1 %v1366_v34 }
 0x1ac   :  { %1536 = vmatprep.subr.mxu0 %v1357_v36  ;;  %1607 = vmatprep.subr.mxu1 %v1359_v37 }
 0x1ad   :  { %1537 = vmatpush2.msra.mxu0 %v1356_v25  ;;  %1608 = vmatpush2.msra.mxu1 %v1358_v39 }
 0x1ae   :  { %1538 = vmatprep.subr.mxu0 %v1349_v40  ;;  %1609 = vmatprep.subr.mxu1 %v1351_v42 }
 0x1af   :  { %1539 = vmatpush2.msra.mxu0 %v1348_v43  ;;  %1610 = vmatpush2.msra.mxu1 %v1350_v44 }
 0x1b0   :  { %1618 = vmatprep.subr.mxu0 %v1345_v45  ;;  %1689 = vmatprep.subr.mxu1 %v1347_v46 }
 0x1ee   :  { %v989_v47 = vpop.f32.mrf.mxu1  ;;  %v918_v48 = vpop.f32.mrf.mxu0 }
 0x1ef   :  { %v1146_v27 = vrot.slane %v989_v47, 4  ;;  %v1144_v50 = vrot.slane %v918_v48, 4 }
 0x1f0   :  { %v991_v49 = vpop.f32.mrf.mxu1  ;;  %v920_v51 = vpop.f32.mrf.mxu0 }
 0x1f1   :  { %v1147_v35 = vrot.slane %v991_v49, 4  ;;  %v1162_v53 = vadd.f32 %v1146_v27, %v590_v38  ;;  %v1145_v54 = vrot.slane %v920_v51, 4  ;;  %v1160_v55 = vadd.f32 %v1144_v50, %v588_v52  ;;  %v1344_v27 = vld [vmem:[#allocation4 + $0x3e0] sm:$0xff]  ;;  %v1346_v50 = vld [vmem:[#allocation4 + $0x3f0] sm:$0xff]  ;;  %v1337_v51 = vld [vmem:[#allocation4 + $0x3a8] sm:$0xff] }
 0x1f2   :  { %v1336_v38 = vld [vmem:[#allocation4 + $0x3a0] sm:$0xff]  ;;  %v1338_v52 = vld [vmem:[#allocation4 + $0x3b0] sm:$0xff] }
 0x1f3   :  { %v1163_v41 = vadd.f32 %v1147_v35, %v591_v56  ;;  %5778 = vtanh.f32 %v1162_v53  ;;  %v1161_v58 = vadd.f32 %v1145_v54, %v589_v57  ;;  %v1339_v35 = vld [vmem:[#allocation4 + $0x3b8] sm:$0xff]  ;;  %v1329_v53 = vld [vmem:[#allocation4 + $0x368] sm:$0xff]  ;;  %v1330_v56 = vld [vmem:[#allocation4 + $0x370] sm:$0xff] }
 0x1f4   :  { %5780 = vtanh.f32 %v1160_v55  ;;  %v1331_v54 = vld [vmem:[#allocation4 + $0x378] sm:$0xff]  ;;  %v1328_v55 = vld [vmem:[#allocation4 + $0x360] sm:$0xff] }
 0x1f5   :  { %5782 = vtanh.f32 %v1163_v41  ;;  %v1321_v41 = vld [vmem:[#allocation4 + $0x328] sm:$0xff]  ;;  %v1323_v57 = vld [vmem:[#allocation4 + $0x338] sm:$0xff] }
 0x1f6   :  { %5784 = vtanh.f32 %v1161_v58  ;;  %v1320_v58 = vld [vmem:[#allocation4 + $0x320] sm:$0xff] }
 0x200   :  { %v5779_v6 = vpop.eup %5778 }
 0x201   :  { %v5781_v7 = vpop.eup %5780  ;;  %v1178_v11 = vmul.f32 0.5, %v5779_v6  ;;  %v1296_v6 = vld [vmem:[#allocation4 + $0x260] sm:$0xff] }
 0x202   :  { %v5783_v9 = vpop.eup %5782  ;;  %v1176_v15 = vmul.f32 0.5, %v5781_v7  ;;  %v1298_v7 = vld [vmem:[#allocation4 + $0x270] sm:$0xff] }
 0x203   :  { %v5785_v13 = vpop.eup %5784  ;;  %v1179_v16 = vmul.f32 0.5, %v5783_v9  ;;  %v1184_v18 = vadd.f32 0.5, %v1178_v11  ;;  %v1291_v9 = vld [vmem:[#allocation4 + $0x238] sm:$0xff]  ;;  %v1290_v11 = vld [vmem:[#allocation4 + $0x230] sm:$0xff] }
 0x204   :  { %v1177_v19 = vmul.f32 0.5, %v5785_v13  ;;  %v1182_v23 = vadd.f32 0.5, %v1176_v15  ;;  %v1283_v13 = vld [vmem:[#allocation4 + $0x1f8] sm:$0xff]  ;;  %v1282_v15 = vld [vmem:[#allocation4 + $0x1f0] sm:$0xff] }
 0x205   :  { %v1185_v26 = vadd.f32 0.5, %v1179_v16  ;;  %v1194_v29 = vmul.f32 %v1190_v24, %v1184_v18  ;;  %v1273_v16 = vld [vmem:[#allocation4 + $0x1a8] sm:$0xff]  ;;  %v1272_v18 = vld [vmem:[#allocation4 + $0x1a0] sm:$0xff] }
 0x206   :  { %v1183_v30 = vadd.f32 0.5, %v1177_v19  ;;  %v1274_v19 = vld [vmem:[#allocation4 + $0x1b0] sm:$0xff]  ;;  %v1264_v24 = vld [vmem:[#allocation4 + $0x160] sm:$0xff] }
 0x207   :  { %v1195_v34 = vmul.f32 %v1191_v31, %v1185_v26  ;;  %v1266_v26 = vld [vmem:[#allocation4 + $0x170] sm:$0xff] }
 0x208   :  { %v1258_v31 = vld [vmem:[#allocation4 + $0x130] sm:$0xff] }
 0x22f   :  { %v1131_v59 = vpop.f32.mrf.mxu1  ;;  %v1060_v63 = vpop.f32.mrf.mxu0 }
 0x230   :  { %v1150_v60 = vrot.slane %v1131_v59, 4  ;;  %v1148_v5 = vrot.slane %v1060_v63, 4  ;;  %v1322_v59 = vld [vmem:[#allocation4 + $0x330] sm:$0xff] }
 0x231   :  { %v1133_v62 = vpop.f32.mrf.mxu1  ;;  %v1062_v4 = vpop.f32.mrf.mxu0  ;;  %v1314_v63 = vld [vmem:[#allocation4 + $0x2f0] sm:$0xff] }
 0x232   :  { %v1166_v0 = vadd.f32 %v1150_v60, %v594_v61  ;;  %v1151_v1 = vrot.slane %v1133_v62, 4  ;;  %v1149_v8 = vrot.slane %v1062_v4, 4  ;;  %v1164_v12 = vadd.f32 %v1148_v5, %v592_v10  ;;  %v1313_v60 = vld [vmem:[#allocation4 + $0x2e8] sm:$0xff]  ;;  %v1315_v61 = vld [vmem:[#allocation4 + $0x2f8] sm:$0xff]  ;;  %v1312_v62 = vld [vmem:[#allocation4 + $0x2e0] sm:$0xff] }
 0x233   :  { %v1297_v4 = vld [vmem:[#allocation4 + $0x268] sm:$0xff]  ;;  %v1299_v5 = vld [vmem:[#allocation4 + $0x278] sm:$0xff]  ;;  %v1288_v10 = vld [vmem:[#allocation4 + $0x220] sm:$0xff] }
 0x234   :  { %v1167_v3 = vadd.f32 %v1151_v1, %v595_v2  ;;  %5786 = vtanh.f32 %v1166_v0  ;;  %v1165_v17 = vadd.f32 %v1149_v8, %v593_v14  ;;  %v1305_v0 = vld [vmem:[#allocation4 + $0x2a8] sm:$0xff]  ;;  %v1307_v1 = vld [vmem:[#allocation4 + $0x2b8] sm:$0xff]  ;;  %v1304_v2 = vld [vmem:[#allocation4 + $0x2a0] sm:$0xff] }
 0x235   :  { %v1289_v8 = vld [vmem:[#allocation4 + $0x228] sm:$0xff]  ;;  %v1280_v14 = vld [vmem:[#allocation4 + $0x1e0] sm:$0xff] }
 0x236   :  { %5788 = vtanh.f32 %v1167_v3  ;;  %v1306_v3 = vld [vmem:[#allocation4 + $0x2b0] sm:$0xff] }
 0x237   :  { %5790 = vtanh.f32 %v1164_v12  ;;  %v1281_v12 = vld [vmem:[#allocation4 + $0x1e8] sm:$0xff] }
 0x238   :  { %5792 = vtanh.f32 %v1165_v17  ;;  %v1275_v17 = vld [vmem:[#allocation4 + $0x1b8] sm:$0xff] }
 0x241   :  { %v5787_v28 = vpop.eup %5786 }
 0x242   :  { %v1196_v32 = vmul.f32 %v5787_v28, %v1182_v23  ;;  %v1267_v23 = vld [vmem:[#allocation4 + $0x178] sm:$0xff]  ;;  %v1257_v28 = vld [vmem:[#allocation4 + $0x128] sm:$0xff] }
 0x243   :  { %v5789_v33 = vpop.eup %5788 }
 0x244   :  { %v6197_v36 = vadd.f32 %v1196_v32, %v1194_v29  ;;  %v1197_v37 = vmul.f32 %v5789_v33, %v1183_v30  ;;  %v5791_v22 = vpop.eup %5790  ;;  %v1259_v29 = vld [vmem:[#allocation4 + $0x138] sm:$0xff]  ;;  %v1256_v30 = vld [vmem:[#allocation4 + $0x120] sm:$0xff]  ;;  %v1249_v32 = vld [vmem:[#allocation4 + $0xe8] sm:$0xff] }
 0x245   :  { %v5793_v21 = vpop.eup %5792  ;;  %v1180_v39 = vmul.f32 0.5, %v5791_v22  ;;  %v1251_v33 = vld [vmem:[#allocation4 + $0xf8] sm:$0xff]  ;;  %v1241_v22 = vld [vmem:[#allocation4 + $0xa8] sm:$0xff] }
 0x246   :  { %5794 = vtanh.f32 %v6197_v36  ;;  %v6200_v25 = vadd.f32 %v1197_v37, %v1195_v34  ;;  %v1181_v40 = vmul.f32 0.5, %v5793_v21  ;;  %v1248_v34 = vld [vmem:[#allocation4 + $0xe0] sm:$0xff]  ;;  %v1250_v37 = vld [vmem:[#allocation4 + $0xf0] sm:$0xff]  ;;  %v1243_v21 = vld [vmem:[#allocation4 + $0xb8] sm:$0xff] }
 0x247   :  { %v1186_v42 = vadd.f32 0.5, %v1180_v39  ;;  %v1240_v39 = vld [vmem:[#allocation4 + $0xa0] sm:$0xff] }
 0x248   :  { %5796 = vtanh.f32 %v6200_v25  ;;  %v1187_v44 = vadd.f32 0.5, %v1181_v40  ;;  %v1242_v40 = vld [vmem:[#allocation4 + $0xb0] sm:$0xff] }
 0x253   :  { %v5795_v43 = vpop.eup %5794 }
 0x254   :  { %v1202_v45 = vmul.f32 %v5795_v43, %v1186_v42  ;;  %v1233_v42 = vld [vmem:[#allocation4 + $0x68] sm:$0xff]  ;;  %v1235_v43 = vld [vmem:[#allocation4 + $0x78] sm:$0xff] }
 0x255   :  { %v5797_v46 = vpop.eup %5796 }
 0x256   :  { %v1203_v47 = vmul.f32 %v5797_v46, %v1187_v44  ;;  %v6203_v48 = vrot.slane %v1202_v45, 4  ;;  %v1232_v44 = vld [vmem:[#allocation4 + $0x60] sm:$0xff]  ;;  %v1234_v45 = vld [vmem:[#allocation4 + $0x70] sm:$0xff]  ;;  %v1225_v46 = vld [vmem:[#allocation4 + $0x28] sm:$0xff] }
 0x258   :  { %v1207_v49 = vrot.slane %v1203_v47, 4  ;;  %1210 = vst [vmem:[#allocation3 + $0x18] sm:$0xf] %v6203_v48  ;;  %v1227_v47 = vld [vmem:[#allocation4 + $0x38] sm:$0xff] }
 0x25a   :  { %1211 = vst [vmem:[#allocation3 + $0x28] sm:$0xf] %v1207_v49  ;;  %1540 = vmatprep.mubr.f32.mxu0 %v1207_v49  ;;  %1611 = vmatprep.mubr.f32.mxu1 %v1207_v49 }
 0x25b   :  { %1541 = vmatmul.mubr.f32.vlgmr.msra.gmra.mxu0 %v6203_v48  ;;  %1612 = vmatmul.mubr.f32.vlgmr.msra.gmra.mxu1 %v6203_v48 }
 0x25c   :  { %1619 = vmatpush1.msra.mxu0 %v1344_v27  ;;  %1690 = vmatpush1.msra.mxu1 %v1346_v50  ;;  %v1226_v27 = vld [vmem:[#allocation4 + $0x30] sm:$0xff]  ;;  %v1473_v50 = vld [vmem:[#allocation4 + $0x7e8] sm:$0xff] }
 0x25d   :  { %1620 = vmatprep.subr.mxu0 %v1337_v51  ;;  %1682 = vmatprep.mubr.f32.mxu0 %v1207_v49  ;;  %v1475_v51 = vld [vmem:[#allocation4 + $0x7f8] sm:$0xff] }
 0x25e   :  { %1691 = vmatprep.subr.mxu1 %v1339_v35  ;;  %1753 = vmatprep.mubr.f32.mxu1 %v1207_v49  ;;  %v1224_v49 = vld [vmem:[#allocation4 + $0x20] sm:$0xff] }
 0x25f   :  { %1621 = vmatpush1.msra.mxu0 %v1336_v38  ;;  %1692 = vmatpush1.msra.mxu1 %v1338_v52  ;;  %v1472_v35 = vld [vmem:[#allocation4 + $0x7e0] sm:$0xff]  ;;  %v1474_v38 = vld [vmem:[#allocation4 + $0x7f0] sm:$0xff]  ;;  %v1465_v52 = vld [vmem:[#allocation4 + $0x7a8] sm:$0xff] }
 0x260   :  { %1622 = vmatprep.subr.mxu0 %v1329_v53  ;;  %1693 = vmatprep.subr.mxu1 %v1331_v54  ;;  %v1467_v53 = vld [vmem:[#allocation4 + $0x7b8] sm:$0xff]  ;;  %v1464_v54 = vld [vmem:[#allocation4 + $0x7a0] sm:$0xff] }
 0x261   :  { %1623 = vmatpush1.msra.mxu0 %v1328_v55  ;;  %1694 = vmatpush1.msra.mxu1 %v1330_v56  ;;  %v1466_v55 = vld [vmem:[#allocation4 + $0x7b0] sm:$0xff]  ;;  %v1457_v56 = vld [vmem:[#allocation4 + $0x768] sm:$0xff] }
 0x262   :  { %1624 = vmatprep.subr.mxu0 %v1321_v41  ;;  %1695 = vmatprep.subr.mxu1 %v1323_v57  ;;  %v1459_v41 = vld [vmem:[#allocation4 + $0x778] sm:$0xff]  ;;  %v1456_v57 = vld [vmem:[#allocation4 + $0x760] sm:$0xff] }
 0x263   :  { %1625 = vmatpush1.msra.mxu0 %v1320_v58  ;;  %1696 = vmatpush1.msra.mxu1 %v1322_v59  ;;  %v1458_v58 = vld [vmem:[#allocation4 + $0x770] sm:$0xff]  ;;  %v1449_v59 = vld [vmem:[#allocation4 + $0x728] sm:$0xff] }
 0x264   :  { %1626 = vmatprep.subr.mxu0 %v1313_v60  ;;  %1697 = vmatprep.subr.mxu1 %v1315_v61  ;;  %v1451_v60 = vld [vmem:[#allocation4 + $0x738] sm:$0xff]  ;;  %v1448_v61 = vld [vmem:[#allocation4 + $0x720] sm:$0xff] }
 0x265   :  { %1627 = vmatpush1.msra.mxu0 %v1312_v62  ;;  %1698 = vmatpush1.msra.mxu1 %v1314_v63  ;;  %v1450_v62 = vld [vmem:[#allocation4 + $0x730] sm:$0xff]  ;;  %v1441_v63 = vld [vmem:[#allocation4 + $0x6e8] sm:$0xff] }
 0x266   :  { %1628 = vmatprep.subr.mxu0 %v1305_v0  ;;  %1699 = vmatprep.subr.mxu1 %v1307_v1  ;;  %v1443_v0 = vld [vmem:[#allocation4 + $0x6f8] sm:$0xff]  ;;  %v1440_v1 = vld [vmem:[#allocation4 + $0x6e0] sm:$0xff] }
 0x267   :  { %1629 = vmatpush1.msra.mxu0 %v1304_v2  ;;  %1700 = vmatpush1.msra.mxu1 %v1306_v3  ;;  %v1442_v2 = vld [vmem:[#allocation4 + $0x6f0] sm:$0xff]  ;;  %v1433_v3 = vld [vmem:[#allocation4 + $0x6a8] sm:$0xff] }
 0x268   :  { %1630 = vmatprep.subr.mxu0 %v1297_v4  ;;  %1701 = vmatprep.subr.mxu1 %v1299_v5  ;;  %v1435_v4 = vld [vmem:[#allocation4 + $0x6b8] sm:$0xff]  ;;  %v1432_v5 = vld [vmem:[#allocation4 + $0x6a0] sm:$0xff] }
 0x269   :  { %1631 = vmatpush1.msra.mxu0 %v1296_v6  ;;  %1702 = vmatpush1.msra.mxu1 %v1298_v7  ;;  %v1434_v6 = vld [vmem:[#allocation4 + $0x6b0] sm:$0xff]  ;;  %v1425_v7 = vld [vmem:[#allocation4 + $0x668] sm:$0xff] }
 0x26a   :  { %1632 = vmatprep.subr.mxu0 %v1289_v8  ;;  %1703 = vmatprep.subr.mxu1 %v1291_v9  ;;  %v1427_v8 = vld [vmem:[#allocation4 + $0x678] sm:$0xff]  ;;  %v1424_v9 = vld [vmem:[#allocation4 + $0x660] sm:$0xff] }
 0x26b   :  { %1633 = vmatpush1.msra.mxu0 %v1288_v10  ;;  %1704 = vmatpush1.msra.mxu1 %v1290_v11  ;;  %v1426_v10 = vld [vmem:[#allocation4 + $0x670] sm:$0xff]  ;;  %v1417_v11 = vld [vmem:[#allocation4 + $0x628] sm:$0xff] }
 0x26c   :  { %1634 = vmatprep.subr.mxu0 %v1281_v12  ;;  %1705 = vmatprep.subr.mxu1 %v1283_v13  ;;  %v1419_v12 = vld [vmem:[#allocation4 + $0x638] sm:$0xff]  ;;  %v1416_v13 = vld [vmem:[#allocation4 + $0x620] sm:$0xff] }
 0x26d   :  { %1635 = vmatpush1.msra.mxu0 %v1280_v14  ;;  %1706 = vmatpush1.msra.mxu1 %v1282_v15  ;;  %v1418_v14 = vld [vmem:[#allocation4 + $0x630] sm:$0xff]  ;;  %v1409_v15 = vld [vmem:[#allocation4 + $0x5e8] sm:$0xff] }
 0x26e   :  { %1636 = vmatprep.subr.mxu0 %v1273_v16  ;;  %1707 = vmatprep.subr.mxu1 %v1275_v17  ;;  %v1411_v16 = vld [vmem:[#allocation4 + $0x5f8] sm:$0xff]  ;;  %v1408_v17 = vld [vmem:[#allocation4 + $0x5e0] sm:$0xff] }
 0x26f   :  { %1637 = vmatpush1.msra.mxu0 %v1272_v18  ;;  %1708 = vmatpush1.msra.mxu1 %v1274_v19  ;;  %v1410_v18 = vld [vmem:[#allocation4 + $0x5f0] sm:$0xff]  ;;  %v1401_v19 = vld [vmem:[#allocation4 + $0x5a8] sm:$0xff] }
 0x270   :  { %1638 = vmatprep.subr.mxu0 %v1265_v20  ;;  %1709 = vmatprep.subr.mxu1 %v1267_v23  ;;  %v1403_v20 = vld [vmem:[#allocation4 + $0x5b8] sm:$0xff]  ;;  %v1400_v23 = vld [vmem:[#allocation4 + $0x5a0] sm:$0xff] }
 0x271   :  { %1639 = vmatpush1.msra.mxu0 %v1264_v24  ;;  %1710 = vmatpush1.msra.mxu1 %v1266_v26  ;;  %v1402_v24 = vld [vmem:[#allocation4 + $0x5b0] sm:$0xff]  ;;  %v1393_v26 = vld [vmem:[#allocation4 + $0x568] sm:$0xff] }
 0x272   :  { %1640 = vmatprep.subr.mxu0 %v1257_v28  ;;  %1711 = vmatprep.subr.mxu1 %v1259_v29  ;;  %v1395_v28 = vld [vmem:[#allocation4 + $0x578] sm:$0xff]  ;;  %v1392_v29 = vld [vmem:[#allocation4 + $0x560] sm:$0xff] }
 0x273   :  { %1641 = vmatpush1.msra.mxu0 %v1256_v30  ;;  %1712 = vmatpush1.msra.mxu1 %v1258_v31  ;;  %v1394_v30 = vld [vmem:[#allocation4 + $0x570] sm:$0xff]  ;;  %v1385_v31 = vld [vmem:[#allocation4 + $0x528] sm:$0xff] }
 0x274   :  { %1642 = vmatprep.subr.mxu0 %v1249_v32  ;;  %1713 = vmatprep.subr.mxu1 %v1251_v33  ;;  %v1387_v32 = vld [vmem:[#allocation4 + $0x538] sm:$0xff]  ;;  %v1384_v33 = vld [vmem:[#allocation4 + $0x520] sm:$0xff] }
 0x275   :  { %1643 = vmatpush1.msra.mxu0 %v1248_v34  ;;  %1714 = vmatpush1.msra.mxu1 %v1250_v37  ;;  %v1386_v34 = vld [vmem:[#allocation4 + $0x530] sm:$0xff]  ;;  %v1377_v37 = vld [vmem:[#allocation4 + $0x4e8] sm:$0xff] }
 0x276   :  { %1644 = vmatprep.subr.mxu0 %v1241_v22  ;;  %1715 = vmatprep.subr.mxu1 %v1243_v21  ;;  %v1379_v22 = vld [vmem:[#allocation4 + $0x4f8] sm:$0xff]  ;;  %v1376_v21 = vld [vmem:[#allocation4 + $0x4e0] sm:$0xff] }
 0x277   :  { %1645 = vmatpush1.msra.mxu0 %v1240_v39  ;;  %1716 = vmatpush1.msra.mxu1 %v1242_v40  ;;  %v1378_v39 = vld [vmem:[#allocation4 + $0x4f0] sm:$0xff]  ;;  %v1369_v40 = vld [vmem:[#allocation4 + $0x4a8] sm:$0xff] }
 0x278   :  { %1646 = vmatprep.subr.mxu0 %v1233_v42  ;;  %1717 = vmatprep.subr.mxu1 %v1235_v43  ;;  %v1371_v42 = vld [vmem:[#allocation4 + $0x4b8] sm:$0xff]  ;;  %v1368_v43 = vld [vmem:[#allocation4 + $0x4a0] sm:$0xff] }
 0x279   :  { %1647 = vmatpush1.msra.mxu0 %v1232_v44  ;;  %1718 = vmatpush1.msra.mxu1 %v1234_v45  ;;  %v1370_v44 = vld [vmem:[#allocation4 + $0x4b0] sm:$0xff]  ;;  %v1361_v45 = vld [vmem:[#allocation4 + $0x468] sm:$0xff] }
 0x27a   :  { %1648 = vmatprep.subr.mxu0 %v1225_v46  ;;  %1719 = vmatprep.subr.mxu1 %v1227_v47  ;;  %v1363_v46 = vld [vmem:[#allocation4 + $0x478] sm:$0xff]  ;;  %v1360_v47 = vld [vmem:[#allocation4 + $0x460] sm:$0xff] }
 0x27b   :  { %1649 = vmatpush1.msra.mxu0 %v1224_v49  ;;  %1720 = vmatpush1.msra.mxu1 %v1226_v27  ;;  %v1362_v49 = vld [vmem:[#allocation4 + $0x470] sm:$0xff]  ;;  %v1353_v27 = vld [vmem:[#allocation4 + $0x428] sm:$0xff] }
 0x27c   :  { %1650 = vmatprep.subr.mxu0 %v1473_v50  ;;  %1721 = vmatprep.subr.mxu1 %v1475_v51  ;;  %v1355_v50 = vld [vmem:[#allocation4 + $0x438] sm:$0xff]  ;;  %v1352_v51 = vld [vmem:[#allocation4 + $0x420] sm:$0xff] }
 0x27d   :  { %1651 = vmatpush2.msra.mxu0 %v1472_v35  ;;  %1722 = vmatpush2.msra.mxu1 %v1474_v38  ;;  %v1354_v35 = vld [vmem:[#allocation4 + $0x430] sm:$0xff]  ;;  %v1941_v38 = vld [vmem:[#allocation4 + $0x3c8] sm:$0xff] }
 0x27e   :  { %1652 = vmatprep.subr.mxu0 %v1465_v52  ;;  %1723 = vmatprep.subr.mxu1 %v1467_v53  ;;  %v1943_v52 = vld [vmem:[#allocation4 + $0x3d8] sm:$0xff]  ;;  %v1940_v53 = vld [vmem:[#allocation4 + $0x3c0] sm:$0xff] }
 0x27f   :  { %1653 = vmatpush2.msra.mxu0 %v1464_v54  ;;  %1724 = vmatpush2.msra.mxu1 %v1466_v55  ;;  %v1942_v54 = vld [vmem:[#allocation4 + $0x3d0] sm:$0xff]  ;;  %v1933_v55 = vld [vmem:[#allocation4 + $0x388] sm:$0xff] }
 0x280   :  { %1654 = vmatprep.subr.mxu0 %v1457_v56  ;;  %1725 = vmatprep.subr.mxu1 %v1459_v41  ;;  %v1935_v56 = vld [vmem:[#allocation4 + $0x398] sm:$0xff]  ;;  %v1932_v41 = vld [vmem:[#allocation4 + $0x380] sm:$0xff] }
 0x281   :  { %1655 = vmatpush2.msra.mxu0 %v1456_v57  ;;  %1726 = vmatpush2.msra.mxu1 %v1458_v58  ;;  %v1934_v57 = vld [vmem:[#allocation4 + $0x390] sm:$0xff]  ;;  %v1925_v58 = vld [vmem:[#allocation4 + $0x348] sm:$0xff] }
 0x282   :  { %1656 = vmatprep.subr.mxu0 %v1449_v59  ;;  %1727 = vmatprep.subr.mxu1 %v1451_v60  ;;  %v1927_v59 = vld [vmem:[#allocation4 + $0x358] sm:$0xff]  ;;  %v1924_v60 = vld [vmem:[#allocation4 + $0x340] sm:$0xff] }
 0x283   :  { %1657 = vmatpush2.msra.mxu0 %v1448_v61  ;;  %1728 = vmatpush2.msra.mxu1 %v1450_v62  ;;  %v1926_v61 = vld [vmem:[#allocation4 + $0x350] sm:$0xff]  ;;  %v1919_v62 = vld [vmem:[#allocation4 + $0x318] sm:$0xff] }
 0x284   :  { %1658 = vmatprep.subr.mxu0 %v1441_v63  ;;  %1729 = vmatprep.subr.mxu1 %v1443_v0  ;;  %v1916_v63 = vld [vmem:[#allocation4 + $0x300] sm:$0xff]  ;;  %v1918_v0 = vld [vmem:[#allocation4 + $0x310] sm:$0xff] }
 0x285   :  { %1659 = vmatpush2.msra.mxu0 %v1440_v1  ;;  %1730 = vmatpush2.msra.mxu1 %v1442_v2  ;;  %v1909_v1 = vld [vmem:[#allocation4 + $0x2c8] sm:$0xff]  ;;  %v1911_v2 = vld [vmem:[#allocation4 + $0x2d8] sm:$0xff] }
 0x286   :  { %1660 = vmatprep.subr.mxu0 %v1433_v3  ;;  %1731 = vmatprep.subr.mxu1 %v1435_v4  ;;  %v1908_v3 = vld [vmem:[#allocation4 + $0x2c0] sm:$0xff]  ;;  %v1910_v4 = vld [vmem:[#allocation4 + $0x2d0] sm:$0xff] }
 0x287   :  { %1661 = vmatpush2.msra.mxu0 %v1432_v5  ;;  %1732 = vmatpush2.msra.mxu1 %v1434_v6  ;;  %v1901_v5 = vld [vmem:[#allocation4 + $0x288] sm:$0xff]  ;;  %v1903_v6 = vld [vmem:[#allocation4 + $0x298] sm:$0xff] }
 0x288   :  { %1662 = vmatprep.subr.mxu0 %v1425_v7  ;;  %1733 = vmatprep.subr.mxu1 %v1427_v8  ;;  %v1900_v7 = vld [vmem:[#allocation4 + $0x280] sm:$0xff]  ;;  %v1902_v8 = vld [vmem:[#allocation4 + $0x290] sm:$0xff] }
 0x289   :  { %1663 = vmatpush2.msra.mxu0 %v1424_v9  ;;  %1734 = vmatpush2.msra.mxu1 %v1426_v10  ;;  %v1893_v9 = vld [vmem:[#allocation4 + $0x248] sm:$0xff]  ;;  %v1895_v10 = vld [vmem:[#allocation4 + $0x258] sm:$0xff] }
 0x28a   :  { %1664 = vmatprep.subr.mxu0 %v1417_v11  ;;  %1735 = vmatprep.subr.mxu1 %v1419_v12  ;;  %v1892_v11 = vld [vmem:[#allocation4 + $0x240] sm:$0xff]  ;;  %v1894_v12 = vld [vmem:[#allocation4 + $0x250] sm:$0xff] }
 0x28b   :  { %1665 = vmatpush2.msra.mxu0 %v1416_v13  ;;  %1736 = vmatpush2.msra.mxu1 %v1418_v14  ;;  %v1885_v13 = vld [vmem:[#allocation4 + $0x208] sm:$0xff]  ;;  %v1887_v14 = vld [vmem:[#allocation4 + $0x218] sm:$0xff] }
 0x28c   :  { %1666 = vmatprep.subr.mxu0 %v1409_v15  ;;  %1737 = vmatprep.subr.mxu1 %v1411_v16  ;;  %v1884_v15 = vld [vmem:[#allocation4 + $0x200] sm:$0xff]  ;;  %v1886_v16 = vld [vmem:[#allocation4 + $0x210] sm:$0xff] }
 0x28d   :  { %1667 = vmatpush2.msra.mxu0 %v1408_v17  ;;  %1738 = vmatpush2.msra.mxu1 %v1410_v18  ;;  %v1877_v17 = vld [vmem:[#allocation4 + $0x1c8] sm:$0xff]  ;;  %v1879_v18 = vld [vmem:[#allocation4 + $0x1d8] sm:$0xff] }
 0x28e   :  { %1668 = vmatprep.subr.mxu0 %v1401_v19  ;;  %1739 = vmatprep.subr.mxu1 %v1403_v20  ;;  %v1876_v19 = vld [vmem:[#allocation4 + $0x1c0] sm:$0xff]  ;;  %v1878_v20 = vld [vmem:[#allocation4 + $0x1d0] sm:$0xff] }
 0x28f   :  { %1669 = vmatpush2.msra.mxu0 %v1400_v23  ;;  %1740 = vmatpush2.msra.mxu1 %v1402_v24  ;;  %v1869_v23 = vld [vmem:[#allocation4 + $0x188] sm:$0xff]  ;;  %v1871_v24 = vld [vmem:[#allocation4 + $0x198] sm:$0xff] }
 0x290   :  { %1670 = vmatprep.subr.mxu0 %v1393_v26  ;;  %1741 = vmatprep.subr.mxu1 %v1395_v28  ;;  %v1868_v26 = vld [vmem:[#allocation4 + $0x180] sm:$0xff]  ;;  %v1870_v28 = vld [vmem:[#allocation4 + $0x190] sm:$0xff] }
 0x291   :  { %1671 = vmatpush2.msra.mxu0 %v1392_v29  ;;  %1742 = vmatpush2.msra.mxu1 %v1394_v30  ;;  %v1861_v29 = vld [vmem:[#allocation4 + $0x148] sm:$0xff]  ;;  %v1863_v30 = vld [vmem:[#allocation4 + $0x158] sm:$0xff] }
 0x292   :  { %1672 = vmatprep.subr.mxu0 %v1385_v31  ;;  %1743 = vmatprep.subr.mxu1 %v1387_v32  ;;  %v1860_v31 = vld [vmem:[#allocation4 + $0x140] sm:$0xff]  ;;  %v1862_v32 = vld [vmem:[#allocation4 + $0x150] sm:$0xff] }
 0x293   :  { %1673 = vmatpush2.msra.mxu0 %v1384_v33  ;;  %1744 = vmatpush2.msra.mxu1 %v1386_v34  ;;  %v1853_v33 = vld [vmem:[#allocation4 + $0x108] sm:$0xff]  ;;  %v1855_v34 = vld [vmem:[#allocation4 + $0x118] sm:$0xff] }
 0x294   :  { %1674 = vmatprep.subr.mxu0 %v1377_v37  ;;  %1745 = vmatprep.subr.mxu1 %v1379_v22  ;;  %v1852_v37 = vld [vmem:[#allocation4 + $0x100] sm:$0xff]  ;;  %v1854_v22 = vld [vmem:[#allocation4 + $0x110] sm:$0xff] }
 0x295   :  { %1675 = vmatpush2.msra.mxu0 %v1376_v21  ;;  %1746 = vmatpush2.msra.mxu1 %v1378_v39  ;;  %v1845_v21 = vld [vmem:[#allocation4 + $0xc8] sm:$0xff]  ;;  %v1847_v39 = vld [vmem:[#allocation4 + $0xd8] sm:$0xff] }
 0x296   :  { %1676 = vmatprep.subr.mxu0 %v1369_v40  ;;  %1747 = vmatprep.subr.mxu1 %v1371_v42  ;;  %v1844_v40 = vld [vmem:[#allocation4 + $0xc0] sm:$0xff]  ;;  %v1846_v42 = vld [vmem:[#allocation4 + $0xd0] sm:$0xff] }
 0x297   :  { %1677 = vmatpush2.msra.mxu0 %v1368_v43  ;;  %1748 = vmatpush2.msra.mxu1 %v1370_v44  ;;  %v1837_v43 = vld [vmem:[#allocation4 + $0x88] sm:$0xff]  ;;  %v1839_v44 = vld [vmem:[#allocation4 + $0x98] sm:$0xff] }
 0x298   :  { %1678 = vmatprep.subr.mxu0 %v1361_v45  ;;  %1749 = vmatprep.subr.mxu1 %v1363_v46  ;;  %v1836_v45 = vld [vmem:[#allocation4 + $0x80] sm:$0xff]  ;;  %v1838_v46 = vld [vmem:[#allocation4 + $0x90] sm:$0xff] }
 0x299   :  { %1679 = vmatpush2.msra.mxu0 %v1360_v47  ;;  %1750 = vmatpush2.msra.mxu1 %v1362_v49  ;;  %v1829_v47 = vld [vmem:[#allocation4 + $0x48] sm:$0xff]  ;;  %v1831_v49 = vld [vmem:[#allocation4 + $0x58] sm:$0xff] }
 0x29a   :  { %1680 = vmatprep.subr.mxu0 %v1353_v27  ;;  %1751 = vmatprep.subr.mxu1 %v1355_v50  ;;  %v1828_v27 = vld [vmem:[#allocation4 + $0x40] sm:$0xff]  ;;  %v1830_v50 = vld [vmem:[#allocation4 + $0x50] sm:$0xff] }
 0x29b   :  { %1681 = vmatpush2.msra.mxu0 %v1352_v51  ;;  %1752 = vmatpush2.msra.mxu1 %v1354_v35  ;;  %v1821_v51 = vld [vmem:[#allocation4 + $0x8] sm:$0xff]  ;;  %v1823_v35 = vld [vmem:[#allocation4 + $0x18] sm:$0xff] }
 0x29c   :  { %1683 = vmatmul.mubr.f32.vlgmr.msra.gmra.mxu0 %v6203_v48  ;;  %1754 = vmatmul.mubr.f32.vlgmr.msra.gmra.mxu1 %v6203_v48  ;;  %v1917_v48 = vld [vmem:[#allocation4 + $0x308] sm:$0xff] }
 0x29d   :  { %2076 = vmatprep.subr.mxu0 %v1941_v38  ;;  %2147 = vmatprep.subr.mxu1 %v1943_v52  ;;  %v1820_v38 = vld [vmem:[#allocation4] sm:$0xff]  ;;  %v1822_v52 = vld [vmem:[#allocation4 + $0x10] sm:$0xff] }
 0x29e   :  { %2077 = vmatpush1.msra.mxu0 %v1940_v53  ;;  %2148 = vmatpush1.msra.mxu1 %v1942_v54  ;;  %v2069_v53 = vld [vmem:[#allocation4 + $0x7c8] sm:$0xff]  ;;  %v2071_v54 = vld [vmem:[#allocation4 + $0x7d8] sm:$0xff] }
 0x29f   :  { %2078 = vmatprep.subr.mxu0 %v1933_v55  ;;  %2149 = vmatprep.subr.mxu1 %v1935_v56  ;;  %v2068_v55 = vld [vmem:[#allocation4 + $0x7c0] sm:$0xff]  ;;  %v2070_v56 = vld [vmem:[#allocation4 + $0x7d0] sm:$0xff] }
 0x2a0   :  { %2079 = vmatpush1.msra.mxu0 %v1932_v41  ;;  %2150 = vmatpush1.msra.mxu1 %v1934_v57  ;;  %v2061_v41 = vld [vmem:[#allocation4 + $0x788] sm:$0xff]  ;;  %v2063_v57 = vld [vmem:[#allocation4 + $0x798] sm:$0xff] }
 0x2a1   :  { %2080 = vmatprep.subr.mxu0 %v1925_v58  ;;  %2151 = vmatprep.subr.mxu1 %v1927_v59  ;;  %v2060_v58 = vld [vmem:[#allocation4 + $0x780] sm:$0xff]  ;;  %v2062_v59 = vld [vmem:[#allocation4 + $0x790] sm:$0xff] }
 0x2a2   :  { %2081 = vmatpush1.msra.mxu0 %v1924_v60  ;;  %2152 = vmatpush1.msra.mxu1 %v1926_v61  ;;  %v2053_v60 = vld [vmem:[#allocation4 + $0x748] sm:$0xff]  ;;  %v2055_v61 = vld [vmem:[#allocation4 + $0x758] sm:$0xff] }
 0x2a3   :  { %2082 = vmatprep.subr.mxu0 %v1917_v48  ;;  %2153 = vmatprep.subr.mxu1 %v1919_v62  ;;  %v2052_v48 = vld [vmem:[#allocation4 + $0x740] sm:$0xff]  ;;  %v2054_v62 = vld [vmem:[#allocation4 + $0x750] sm:$0xff] }
 0x2a4   :  { %2083 = vmatpush1.msra.mxu0 %v1916_v63  ;;  %2154 = vmatpush1.msra.mxu1 %v1918_v0  ;;  %v2045_v63 = vld [vmem:[#allocation4 + $0x708] sm:$0xff]  ;;  %v2047_v0 = vld [vmem:[#allocation4 + $0x718] sm:$0xff] }
 0x2a5   :  { %2084 = vmatprep.subr.mxu0 %v1909_v1  ;;  %2155 = vmatprep.subr.mxu1 %v1911_v2  ;;  %v2044_v1 = vld [vmem:[#allocation4 + $0x700] sm:$0xff]  ;;  %v2046_v2 = vld [vmem:[#allocation4 + $0x710] sm:$0xff] }
 0x2a6   :  { %2085 = vmatpush1.msra.mxu0 %v1908_v3  ;;  %2156 = vmatpush1.msra.mxu1 %v1910_v4  ;;  %v2037_v3 = vld [vmem:[#allocation4 + $0x6c8] sm:$0xff]  ;;  %v2039_v4 = vld [vmem:[#allocation4 + $0x6d8] sm:$0xff] }
 0x2a7   :  { %2086 = vmatprep.subr.mxu0 %v1901_v5  ;;  %2157 = vmatprep.subr.mxu1 %v1903_v6  ;;  %v2036_v5 = vld [vmem:[#allocation4 + $0x6c0] sm:$0xff]  ;;  %v2038_v6 = vld [vmem:[#allocation4 + $0x6d0] sm:$0xff] }
 0x2a8   :  { %2087 = vmatpush1.msra.mxu0 %v1900_v7  ;;  %2158 = vmatpush1.msra.mxu1 %v1902_v8  ;;  %v2029_v7 = vld [vmem:[#allocation4 + $0x688] sm:$0xff]  ;;  %v2031_v8 = vld [vmem:[#allocation4 + $0x698] sm:$0xff] }
 0x2a9   :  { %2088 = vmatprep.subr.mxu0 %v1893_v9  ;;  %2159 = vmatprep.subr.mxu1 %v1895_v10  ;;  %v2028_v9 = vld [vmem:[#allocation4 + $0x680] sm:$0xff]  ;;  %v2030_v10 = vld [vmem:[#allocation4 + $0x690] sm:$0xff] }
 0x2aa   :  { %2089 = vmatpush1.msra.mxu0 %v1892_v11  ;;  %2160 = vmatpush1.msra.mxu1 %v1894_v12  ;;  %v2021_v11 = vld [vmem:[#allocation4 + $0x648] sm:$0xff]  ;;  %v2023_v12 = vld [vmem:[#allocation4 + $0x658] sm:$0xff] }
 0x2ab   :  { %2090 = vmatprep.subr.mxu0 %v1885_v13  ;;  %2161 = vmatprep.subr.mxu1 %v1887_v14  ;;  %v2020_v13 = vld [vmem:[#allocation4 + $0x640] sm:$0xff]  ;;  %v2022_v14 = vld [vmem:[#allocation4 + $0x650] sm:$0xff] }
 0x2ac   :  { %2091 = vmatpush1.msra.mxu0 %v1884_v15  ;;  %2162 = vmatpush1.msra.mxu1 %v1886_v16  ;;  %v2013_v15 = vld [vmem:[#allocation4 + $0x608] sm:$0xff]  ;;  %v2015_v16 = vld [vmem:[#allocation4 + $0x618] sm:$0xff] }
 0x2ad   :  { %2092 = vmatprep.subr.mxu0 %v1877_v17  ;;  %2163 = vmatprep.subr.mxu1 %v1879_v18  ;;  %v2012_v17 = vld [vmem:[#allocation4 + $0x600] sm:$0xff]  ;;  %v2014_v18 = vld [vmem:[#allocation4 + $0x610] sm:$0xff] }
 0x2ae   :  { %2093 = vmatpush1.msra.mxu0 %v1876_v19  ;;  %2164 = vmatpush1.msra.mxu1 %v1878_v20  ;;  %v2005_v19 = vld [vmem:[#allocation4 + $0x5c8] sm:$0xff]  ;;  %v2007_v20 = vld [vmem:[#allocation4 + $0x5d8] sm:$0xff] }
 0x2af   :  { %2094 = vmatprep.subr.mxu0 %v1869_v23  ;;  %2165 = vmatprep.subr.mxu1 %v1871_v24  ;;  %v2004_v23 = vld [vmem:[#allocation4 + $0x5c0] sm:$0xff]  ;;  %v2006_v24 = vld [vmem:[#allocation4 + $0x5d0] sm:$0xff] }
 0x2b0   :  { %2095 = vmatpush1.msra.mxu0 %v1868_v26  ;;  %2166 = vmatpush1.msra.mxu1 %v1870_v28  ;;  %v1997_v26 = vld [vmem:[#allocation4 + $0x588] sm:$0xff]  ;;  %v1999_v28 = vld [vmem:[#allocation4 + $0x598] sm:$0xff] }
 0x2b1   :  { %2096 = vmatprep.subr.mxu0 %v1861_v29  ;;  %2167 = vmatprep.subr.mxu1 %v1863_v30  ;;  %v1996_v29 = vld [vmem:[#allocation4 + $0x580] sm:$0xff]  ;;  %v1998_v30 = vld [vmem:[#allocation4 + $0x590] sm:$0xff] }
 0x2b2   :  { %2097 = vmatpush1.msra.mxu0 %v1860_v31  ;;  %2168 = vmatpush1.msra.mxu1 %v1862_v32  ;;  %v1989_v31 = vld [vmem:[#allocation4 + $0x548] sm:$0xff]  ;;  %v1991_v32 = vld [vmem:[#allocation4 + $0x558] sm:$0xff] }
 0x2b3   :  { %2098 = vmatprep.subr.mxu0 %v1853_v33  ;;  %2169 = vmatprep.subr.mxu1 %v1855_v34  ;;  %v1988_v33 = vld [vmem:[#allocation4 + $0x540] sm:$0xff]  ;;  %v1990_v34 = vld [vmem:[#allocation4 + $0x550] sm:$0xff] }
 0x2b4   :  { %2099 = vmatpush1.msra.mxu0 %v1852_v37  ;;  %2170 = vmatpush1.msra.mxu1 %v1854_v22  ;;  %v1981_v37 = vld [vmem:[#allocation4 + $0x508] sm:$0xff]  ;;  %v1983_v22 = vld [vmem:[#allocation4 + $0x518] sm:$0xff] }
 0x2b5   :  { %2100 = vmatprep.subr.mxu0 %v1845_v21  ;;  %2171 = vmatprep.subr.mxu1 %v1847_v39  ;;  %v1980_v21 = vld [vmem:[#allocation4 + $0x500] sm:$0xff]  ;;  %v1982_v39 = vld [vmem:[#allocation4 + $0x510] sm:$0xff] }
 0x2b6   :  { %2101 = vmatpush1.msra.mxu0 %v1844_v40  ;;  %2172 = vmatpush1.msra.mxu1 %v1846_v42  ;;  %v1973_v40 = vld [vmem:[#allocation4 + $0x4c8] sm:$0xff]  ;;  %v1975_v42 = vld [vmem:[#allocation4 + $0x4d8] sm:$0xff] }
 0x2b7   :  { %2102 = vmatprep.subr.mxu0 %v1837_v43  ;;  %2173 = vmatprep.subr.mxu1 %v1839_v44  ;;  %v1972_v43 = vld [vmem:[#allocation4 + $0x4c0] sm:$0xff]  ;;  %v1974_v44 = vld [vmem:[#allocation4 + $0x4d0] sm:$0xff] }
 0x2b8   :  { %2103 = vmatpush1.msra.mxu0 %v1836_v45  ;;  %2174 = vmatpush1.msra.mxu1 %v1838_v46  ;;  %v1965_v45 = vld [vmem:[#allocation4 + $0x488] sm:$0xff]  ;;  %v1967_v46 = vld [vmem:[#allocation4 + $0x498] sm:$0xff] }
 0x2b9   :  { %2104 = vmatprep.subr.mxu0 %v1829_v47  ;;  %2175 = vmatprep.subr.mxu1 %v1831_v49  ;;  %v1964_v47 = vld [vmem:[#allocation4 + $0x480] sm:$0xff]  ;;  %v1966_v49 = vld [vmem:[#allocation4 + $0x490] sm:$0xff] }
 0x2ba   :  { %2105 = vmatpush1.msra.mxu0 %v1828_v27  ;;  %2176 = vmatpush1.msra.mxu1 %v1830_v50  ;;  %v1957_v27 = vld [vmem:[#allocation4 + $0x448] sm:$0xff]  ;;  %v1959_v50 = vld [vmem:[#allocation4 + $0x458] sm:$0xff] }
 0x2bb   :  { %2106 = vmatprep.subr.mxu0 %v1821_v51  ;;  %2177 = vmatprep.subr.mxu1 %v1823_v35  ;;  %v1956_v51 = vld [vmem:[#allocation4 + $0x440] sm:$0xff]  ;;  %v1958_v35 = vld [vmem:[#allocation4 + $0x450] sm:$0xff] }
 0x2bc   :  { %2107 = vmatpush1.msra.mxu0 %v1820_v38  ;;  %2178 = vmatpush1.msra.mxu1 %v1822_v52  ;;  %v1949_v38 = vld [vmem:[#allocation4 + $0x408] sm:$0xff]  ;;  %v1951_v52 = vld [vmem:[#allocation4 + $0x418] sm:$0xff] }
 0x2bd   :  { %2108 = vmatprep.subr.mxu0 %v2069_v53  ;;  %2179 = vmatprep.subr.mxu1 %v2071_v54  ;;  %v1948_v53 = vld [vmem:[#allocation4 + $0x400] sm:$0xff]  ;;  %v1950_v54 = vld [vmem:[#allocation4 + $0x410] sm:$0xff] }
 0x2be   :  { %2109 = vmatpush2.msra.mxu0 %v2068_v55  ;;  %2180 = vmatpush2.msra.mxu1 %v2070_v56  ;;  %v1945_v55 = vld [vmem:[#allocation4 + $0x3e8] sm:$0xff]  ;;  %v1947_v56 = vld [vmem:[#allocation4 + $0x3f8] sm:$0xff] }
 0x2bf   :  { %2110 = vmatprep.subr.mxu0 %v2061_v41  ;;  %2181 = vmatprep.subr.mxu1 %v2063_v57 }
 0x2c0   :  { %2111 = vmatpush2.msra.mxu0 %v2060_v58  ;;  %2182 = vmatpush2.msra.mxu1 %v2062_v59  ;;  %v1214_v58 = vld [vmem:[#allocation2 + $0x138] sm:$0xf] }
 0x2c1   :  { %2112 = vmatprep.subr.mxu0 %v2053_v60  ;;  %2183 = vmatprep.subr.mxu1 %v2055_v61  ;;  %v1212_v60 = vld [vmem:[#allocation2 + $0x80] sm:$0xf] }
 0x2c2   :  { %2113 = vmatpush2.msra.mxu0 %v2052_v48  ;;  %2184 = vmatpush2.msra.mxu1 %v2054_v62 }
 0x2c3   :  { %2114 = vmatprep.subr.mxu0 %v2045_v63  ;;  %2185 = vmatprep.subr.mxu1 %v2047_v0  ;;  %v1215_v63 = vld [vmem:[#allocation2 + $0xf0] sm:$0xf] }
 0x2c4   :  { %2115 = vmatpush2.msra.mxu0 %v2044_v1  ;;  %2186 = vmatpush2.msra.mxu1 %v2046_v2  ;;  %v1213_v1 = vld [vmem:[#allocation2 + $0x108] sm:$0xf] }
 0x2c5   :  { %2116 = vmatprep.subr.mxu0 %v2037_v3  ;;  %2187 = vmatprep.subr.mxu1 %v2039_v4  ;;  %v1218_v3 = vld [vmem:[#allocation2 + $0x70] sm:$0xf] }
 0x2c6   :  { %2117 = vmatpush2.msra.mxu0 %v2036_v5  ;;  %2188 = vmatpush2.msra.mxu1 %v2038_v6  ;;  %v1219_v6 = vld [vmem:[#allocation2 + $0x20] sm:$0xf] }
 0x2c7   :  { %2118 = vmatprep.subr.mxu0 %v2029_v7  ;;  %2189 = vmatprep.subr.mxu1 %v2031_v8 }
 0x2c8   :  { %2119 = vmatpush2.msra.mxu0 %v2028_v9  ;;  %2190 = vmatpush2.msra.mxu1 %v2030_v10 }
 0x2c9   :  { %2120 = vmatprep.subr.mxu0 %v2021_v11  ;;  %2191 = vmatprep.subr.mxu1 %v2023_v12 }
 0x2ca   :  { %2121 = vmatpush2.msra.mxu0 %v2020_v13  ;;  %2192 = vmatpush2.msra.mxu1 %v2022_v14  ;;  %v1216_v13 = vld [vmem:[#allocation2 + $0x18] sm:$0xf] }
 0x2cb   :  { %2122 = vmatprep.subr.mxu0 %v2013_v15  ;;  %2193 = vmatprep.subr.mxu1 %v2015_v16 }
 0x2cc   :  { %2123 = vmatpush2.msra.mxu0 %v2012_v17  ;;  %2194 = vmatpush2.msra.mxu1 %v2014_v18  ;;  %v1217_v18 = vld [vmem:[#allocation2 + $0xc8] sm:$0xf] }
 0x2cd   :  { %2124 = vmatprep.subr.mxu0 %v2005_v19  ;;  %2195 = vmatprep.subr.mxu1 %v2007_v20 }
 0x2ce   :  { %2125 = vmatpush2.msra.mxu0 %v2004_v23  ;;  %2196 = vmatpush2.msra.mxu1 %v2006_v24 }
 0x2cf   :  { %2126 = vmatprep.subr.mxu0 %v1997_v26  ;;  %2197 = vmatprep.subr.mxu1 %v1999_v28 }
 0x2d0   :  { %2127 = vmatpush2.msra.mxu0 %v1996_v29  ;;  %2198 = vmatpush2.msra.mxu1 %v1998_v30  ;;  %v1790_v29 = vrot.slane %v6197_v36, 4 }
 0x2d1   :  { %2128 = vmatprep.subr.mxu0 %v1989_v31  ;;  %2199 = vmatprep.subr.mxu1 %v1991_v32 }
 0x2d2   :  { %2129 = vmatpush2.msra.mxu0 %v1988_v33  ;;  %2200 = vmatpush2.msra.mxu1 %v1990_v34  ;;  %v1791_v34 = vrot.slane %v6200_v25, 4 }
 0x2d3   :  { %2130 = vmatprep.subr.mxu0 %v1981_v37  ;;  %2201 = vmatprep.subr.mxu1 %v1983_v22 }
 0x2d4   :  { %2131 = vmatpush2.msra.mxu0 %v1980_v21  ;;  %2202 = vmatpush2.msra.mxu1 %v1982_v39 }
 0x2d5   :  { %2132 = vmatprep.subr.mxu0 %v1973_v40  ;;  %2203 = vmatprep.subr.mxu1 %v1975_v42 }
 0x2d6   :  { %2133 = vmatpush2.msra.mxu0 %v1972_v43  ;;  %2204 = vmatpush2.msra.mxu1 %v1974_v44 }
 0x2d7   :  { %2134 = vmatprep.subr.mxu0 %v1965_v45  ;;  %2205 = vmatprep.subr.mxu1 %v1967_v46 }
 0x2d8   :  { %2135 = vmatpush2.msra.mxu0 %v1964_v47  ;;  %2206 = vmatpush2.msra.mxu1 %v1966_v49 }
 0x2d9   :  { %2136 = vmatprep.subr.mxu0 %v1957_v27  ;;  %2207 = vmatprep.subr.mxu1 %v1959_v50 }
 0x2da   :  { %2137 = vmatpush2.msra.mxu0 %v1956_v51  ;;  %2208 = vmatpush2.msra.mxu1 %v1958_v35  ;;  %v1944_v35 = vld [vmem:[#allocation4 + $0x3e0] sm:$0xff] }
 0x2db   :  { %2138 = vmatprep.subr.mxu0 %v1949_v38  ;;  %2209 = vmatprep.subr.mxu1 %v1951_v52  ;;  %v1946_v38 = vld [vmem:[#allocation4 + $0x3f0] sm:$0xff] }
 0x2dc   :  { %2139 = vmatpush2.msra.mxu0 %v1948_v53  ;;  %2210 = vmatpush2.msra.mxu1 %v1950_v54  ;;  %v1937_v53 = vld [vmem:[#allocation4 + $0x3a8] sm:$0xff]  ;;  %v1939_v54 = vld [vmem:[#allocation4 + $0x3b8] sm:$0xff] }
 0x2dd   :  { %2218 = vmatprep.subr.mxu0 %v1945_v55  ;;  %2289 = vmatprep.subr.mxu1 %v1947_v56  ;;  %v1936_v55 = vld [vmem:[#allocation4 + $0x3a0] sm:$0xff]  ;;  %v1938_v56 = vld [vmem:[#allocation4 + $0x3b0] sm:$0xff] }
 0x31b   :  { %v1613_v41 = vpop.f32.mrf.mxu1  ;;  %v1542_v57 = vpop.f32.mrf.mxu0 }
 0x31c   :  { %v1762_v61 = vadd.f32 %v1613_v41, %v1214_v58  ;;  %v1760_v48 = vadd.f32 %v1542_v57, %v1212_v60  ;;  %v1929_v41 = vld [vmem:[#allocation4 + $0x368] sm:$0xff]  ;;  %v1931_v57 = vld [vmem:[#allocation4 + $0x378] sm:$0xff]  ;;  %v1928_v58 = vld [vmem:[#allocation4 + $0x360] sm:$0xff] }
 0x31d   :  { %v1615_v59 = vpop.f32.mrf.mxu1  ;;  %v1544_v62 = vpop.f32.mrf.mxu0  ;;  %v1921_v60 = vld [vmem:[#allocation4 + $0x328] sm:$0xff] }
 0x31e   :  { %v1763_v0 = vadd.f32 %v1615_v59, %v1215_v63  ;;  %5798 = vtanh.f32 %v1762_v61  ;;  %v1761_v2 = vadd.f32 %v1544_v62, %v1213_v1  ;;  %v1930_v59 = vld [vmem:[#allocation4 + $0x370] sm:$0xff]  ;;  %v1923_v61 = vld [vmem:[#allocation4 + $0x338] sm:$0xff]  ;;  %v1913_v63 = vld [vmem:[#allocation4 + $0x2e8] sm:$0xff] }
 0x31f   :  { %5800 = vtanh.f32 %v1760_v48  ;;  %v1920_v48 = vld [vmem:[#allocation4 + $0x320] sm:$0xff]  ;;  %v1922_v62 = vld [vmem:[#allocation4 + $0x330] sm:$0xff] }
 0x320   :  { %5802 = vtanh.f32 %v1763_v0  ;;  %v1915_v0 = vld [vmem:[#allocation4 + $0x2f8] sm:$0xff]  ;;  %v1912_v1 = vld [vmem:[#allocation4 + $0x2e0] sm:$0xff] }
 0x321   :  { %5804 = vtanh.f32 %v1761_v2  ;;  %v1914_v2 = vld [vmem:[#allocation4 + $0x2f0] sm:$0xff] }
 0x32b   :  { %v5799_v10 = vpop.eup %5798 }
 0x32c   :  { %v5801_v11 = vpop.eup %5800  ;;  %v1778_v15 = vmul.f32 0.5, %v5799_v10  ;;  %v1898_v10 = vld [vmem:[#allocation4 + $0x270] sm:$0xff] }
 0x32d   :  { %v5803_v12 = vpop.eup %5802  ;;  %v1776_v19 = vmul.f32 0.5, %v5801_v11  ;;  %v1889_v11 = vld [vmem:[#allocation4 + $0x228] sm:$0xff] }
 0x32e   :  { %v5805_v17 = vpop.eup %5804  ;;  %v1779_v20 = vmul.f32 0.5, %v5803_v12  ;;  %v1784_v24 = vadd.f32 0.5, %v1778_v15  ;;  %v1891_v12 = vld [vmem:[#allocation4 + $0x238] sm:$0xff]  ;;  %v1881_v15 = vld [vmem:[#allocation4 + $0x1e8] sm:$0xff] }
 0x32f   :  { %v1777_v26 = vmul.f32 0.5, %v5805_v17  ;;  %v1782_v28 = vadd.f32 0.5, %v1776_v19  ;;  %v1880_v17 = vld [vmem:[#allocation4 + $0x1e0] sm:$0xff]  ;;  %v1873_v19 = vld [vmem:[#allocation4 + $0x1a8] sm:$0xff] }
 0x330   :  { %v1785_v30 = vadd.f32 0.5, %v1779_v20  ;;  %v1794_v32 = vmul.f32 %v1790_v29, %v1784_v24  ;;  %v1875_v20 = vld [vmem:[#allocation4 + $0x1b8] sm:$0xff]  ;;  %v1874_v24 = vld [vmem:[#allocation4 + $0x1b0] sm:$0xff]  ;;  %v1864_v29 = vld [vmem:[#allocation4 + $0x160] sm:$0xff] }
 0x331   :  { %v1783_v33 = vadd.f32 0.5, %v1777_v26  ;;  %v1865_v26 = vld [vmem:[#allocation4 + $0x168] sm:$0xff] }
 0x332   :  { %v1795_v21 = vmul.f32 %v1791_v34, %v1785_v30  ;;  %v1866_v30 = vld [vmem:[#allocation4 + $0x170] sm:$0xff] }
 0x333   :  { %v1858_v34 = vld [vmem:[#allocation4 + $0x130] sm:$0xff] }
 0x35c   :  { %v1755_v4 = vpop.f32.mrf.mxu1  ;;  %v1684_v9 = vpop.f32.mrf.mxu0 }
 0x35d   :  { %v1766_v5 = vadd.f32 %v1755_v4, %v1218_v3  ;;  %v1764_v16 = vadd.f32 %v1684_v9, %v1216_v13  ;;  %v1905_v3 = vld [vmem:[#allocation4 + $0x2a8] sm:$0xff]  ;;  %v1907_v4 = vld [vmem:[#allocation4 + $0x2b8] sm:$0xff]  ;;  %v1896_v9 = vld [vmem:[#allocation4 + $0x260] sm:$0xff] }
 0x35e   :  { %v1757_v7 = vpop.f32.mrf.mxu1  ;;  %v1686_v14 = vpop.f32.mrf.mxu0  ;;  %v1888_v13 = vld [vmem:[#allocation4 + $0x220] sm:$0xff] }
 0x35f   :  { %v1767_v8 = vadd.f32 %v1757_v7, %v1219_v6  ;;  %5806 = vtanh.f32 %v1766_v5  ;;  %v1765_v23 = vadd.f32 %v1686_v14, %v1217_v18  ;;  %v1904_v5 = vld [vmem:[#allocation4 + $0x2a0] sm:$0xff]  ;;  %v1906_v6 = vld [vmem:[#allocation4 + $0x2b0] sm:$0xff]  ;;  %v1897_v7 = vld [vmem:[#allocation4 + $0x268] sm:$0xff] }
 0x360   :  { %v1890_v14 = vld [vmem:[#allocation4 + $0x230] sm:$0xff] }
 0x361   :  { %5808 = vtanh.f32 %v1767_v8  ;;  %v1899_v8 = vld [vmem:[#allocation4 + $0x278] sm:$0xff]  ;;  %v1882_v18 = vld [vmem:[#allocation4 + $0x1f0] sm:$0xff] }
 0x362   :  { %5810 = vtanh.f32 %v1764_v16  ;;  %v1883_v16 = vld [vmem:[#allocation4 + $0x1f8] sm:$0xff] }
 0x363   :  { %5812 = vtanh.f32 %v1765_v23  ;;  %v1872_v23 = vld [vmem:[#allocation4 + $0x1a0] sm:$0xff] }
 0x36c   :  { %v5807_v31 = vpop.eup %5806 }
 0x36d   :  { %v1796_v37 = vmul.f32 %v5807_v31, %v1782_v28  ;;  %v1867_v28 = vld [vmem:[#allocation4 + $0x178] sm:$0xff]  ;;  %v1857_v31 = vld [vmem:[#allocation4 + $0x128] sm:$0xff] }
 0x36e   :  { %v5809_v22 = vpop.eup %5808 }
 0x36f   :  { %v6212_v39 = vadd.f32 %v1796_v37, %v1794_v32  ;;  %v1797_v40 = vmul.f32 %v5809_v22, %v1783_v33  ;;  %v5811_v36 = vpop.eup %5810  ;;  %v1859_v32 = vld [vmem:[#allocation4 + $0x138] sm:$0xff]  ;;  %v1856_v33 = vld [vmem:[#allocation4 + $0x120] sm:$0xff]  ;;  %v1849_v37 = vld [vmem:[#allocation4 + $0xe8] sm:$0xff] }
 0x370   :  { %v5813_v43 = vpop.eup %5812  ;;  %v1780_v44 = vmul.f32 0.5, %v5811_v36  ;;  %v1851_v22 = vld [vmem:[#allocation4 + $0xf8] sm:$0xff]  ;;  %v1841_v36 = vld [vmem:[#allocation4 + $0xa8] sm:$0xff] }
 0x371   :  { %5814 = vtanh.f32 %v6212_v39  ;;  %v6215_v42 = vadd.f32 %v1797_v40, %v1795_v21  ;;  %v1781_v45 = vmul.f32 0.5, %v5813_v43  ;;  %v1848_v21 = vld [vmem:[#allocation4 + $0xe0] sm:$0xff]  ;;  %v1850_v40 = vld [vmem:[#allocation4 + $0xf0] sm:$0xff]  ;;  %v1843_v43 = vld [vmem:[#allocation4 + $0xb8] sm:$0xff] }
 0x372   :  { %v1786_v46 = vadd.f32 0.5, %v1780_v44  ;;  %v1840_v44 = vld [vmem:[#allocation4 + $0xa0] sm:$0xff] }
 0x373   :  { %5816 = vtanh.f32 %v6215_v42  ;;  %v1787_v49 = vadd.f32 0.5, %v1781_v45  ;;  %v1842_v45 = vld [vmem:[#allocation4 + $0xb0] sm:$0xff] }
 0x37e   :  { %v5815_v47 = vpop.eup %5814 }
 0x37f   :  { %v6218_v25 = vmul.f32 %v5815_v47, %v1786_v46  ;;  %v1833_v46 = vld [vmem:[#allocation4 + $0x68] sm:$0xff]  ;;  %v1835_v47 = vld [vmem:[#allocation4 + $0x78] sm:$0xff] }
 0x380   :  { %v5817_v27 = vpop.eup %5816 }
 0x381   :  { %v1803_v50 = vmul.f32 %v5817_v27, %v1787_v49  ;;  %v1806_v51 = vrot.slane %v6218_v25, 4  ;;  %v1832_v49 = vld [vmem:[#allocation4 + $0x60] sm:$0xff]  ;;  %v1834_v27 = vld [vmem:[#allocation4 + $0x70] sm:$0xff] }
 0x383   :  { %v1807_v52 = vrot.slane %v1803_v50, 4  ;;  %2140 = vmatprep.mubr.f32.mxu0 %v1803_v50  ;;  %2211 = vmatprep.mubr.f32.mxu1 %v1803_v50  ;;  %1810 = vst [vmem:[#allocation3 + $0x18] sm:$0xf0] %v1806_v51  ;;  %v1827_v51 = vld [vmem:[#allocation4 + $0x38] sm:$0xff] }
 0x384   :  { %2141 = vmatmul.mubr.f32.vlgmr.msra.gmra.mxu0 %v6218_v25  ;;  %2212 = vmatmul.mubr.f32.vlgmr.msra.gmra.mxu1 %v6218_v25 }
 0x385   :  { %1811 = vst [vmem:[#allocation3 + $0x28] sm:$0xf0] %v1807_v52  ;;  %2219 = vmatpush1.msra.mxu0 %v1944_v35  ;;  %2290 = vmatpush1.msra.mxu1 %v1946_v38  ;;  %v1824_v35 = vld [vmem:[#allocation4 + $0x20] sm:$0xff]  ;;  %v1826_v38 = vld [vmem:[#allocation4 + $0x30] sm:$0xff]  ;;  %v2073_v52 = vld [vmem:[#allocation4 + $0x7e8] sm:$0xff] }
 0x386   :  { %2220 = vmatprep.subr.mxu0 %v1937_v53  ;;  %2282 = vmatprep.mubr.f32.mxu0 %v1803_v50  ;;  %v2075_v53 = vld [vmem:[#allocation4 + $0x7f8] sm:$0xff] }
 0x387   :  { %2291 = vmatprep.subr.mxu1 %v1939_v54  ;;  %2353 = vmatprep.mubr.f32.mxu1 %v1803_v50  ;;  %v1825_v50 = vld [vmem:[#allocation4 + $0x28] sm:$0xff]  ;;  %v2072_v54 = vld [vmem:[#allocation4 + $0x7e0] sm:$0xff] }
 0x388   :  { %2221 = vmatpush1.msra.mxu0 %v1936_v55  ;;  %2292 = vmatpush1.msra.mxu1 %v1938_v56  ;;  %v2074_v55 = vld [vmem:[#allocation4 + $0x7f0] sm:$0xff]  ;;  %v2065_v56 = vld [vmem:[#allocation4 + $0x7a8] sm:$0xff] }
 0x389   :  { %2222 = vmatprep.subr.mxu0 %v1929_v41  ;;  %2293 = vmatprep.subr.mxu1 %v1931_v57  ;;  %v2067_v41 = vld [vmem:[#allocation4 + $0x7b8] sm:$0xff]  ;;  %v2064_v57 = vld [vmem:[#allocation4 + $0x7a0] sm:$0xff] }
 0x38a   :  { %2223 = vmatpush1.msra.mxu0 %v1928_v58  ;;  %2294 = vmatpush1.msra.mxu1 %v1930_v59  ;;  %v2066_v58 = vld [vmem:[#allocation4 + $0x7b0] sm:$0xff]  ;;  %v2057_v59 = vld [vmem:[#allocation4 + $0x768] sm:$0xff] }
 0x38b   :  { %2224 = vmatprep.subr.mxu0 %v1921_v60  ;;  %2295 = vmatprep.subr.mxu1 %v1923_v61  ;;  %v2059_v60 = vld [vmem:[#allocation4 + $0x778] sm:$0xff]  ;;  %v2056_v61 = vld [vmem:[#allocation4 + $0x760] sm:$0xff] }
 0x38c   :  { %2225 = vmatpush1.msra.mxu0 %v1920_v48  ;;  %2296 = vmatpush1.msra.mxu1 %v1922_v62  ;;  %v2058_v48 = vld [vmem:[#allocation4 + $0x770] sm:$0xff]  ;;  %v2049_v62 = vld [vmem:[#allocation4 + $0x728] sm:$0xff] }
 0x38d   :  { %2226 = vmatprep.subr.mxu0 %v1913_v63  ;;  %2297 = vmatprep.subr.mxu1 %v1915_v0  ;;  %v2051_v63 = vld [vmem:[#allocation4 + $0x738] sm:$0xff]  ;;  %v2048_v0 = vld [vmem:[#allocation4 + $0x720] sm:$0xff] }
 0x38e   :  { %2227 = vmatpush1.msra.mxu0 %v1912_v1  ;;  %2298 = vmatpush1.msra.mxu1 %v1914_v2  ;;  %v2050_v1 = vld [vmem:[#allocation4 + $0x730] sm:$0xff]  ;;  %v2041_v2 = vld [vmem:[#allocation4 + $0x6e8] sm:$0xff] }
 0x38f   :  { %2228 = vmatprep.subr.mxu0 %v1905_v3  ;;  %2299 = vmatprep.subr.mxu1 %v1907_v4  ;;  %v2043_v3 = vld [vmem:[#allocation4 + $0x6f8] sm:$0xff]  ;;  %v2040_v4 = vld [vmem:[#allocation4 + $0x6e0] sm:$0xff] }
 0x390   :  { %2229 = vmatpush1.msra.mxu0 %v1904_v5  ;;  %2300 = vmatpush1.msra.mxu1 %v1906_v6  ;;  %v2042_v5 = vld [vmem:[#allocation4 + $0x6f0] sm:$0xff]  ;;  %v2033_v6 = vld [vmem:[#allocation4 + $0x6a8] sm:$0xff] }
 0x391   :  { %2230 = vmatprep.subr.mxu0 %v1897_v7  ;;  %2301 = vmatprep.subr.mxu1 %v1899_v8  ;;  %v2035_v7 = vld [vmem:[#allocation4 + $0x6b8] sm:$0xff]  ;;  %v2032_v8 = vld [vmem:[#allocation4 + $0x6a0] sm:$0xff] }
 0x392   :  { %2231 = vmatpush1.msra.mxu0 %v1896_v9  ;;  %2302 = vmatpush1.msra.mxu1 %v1898_v10  ;;  %v2034_v9 = vld [vmem:[#allocation4 + $0x6b0] sm:$0xff]  ;;  %v2025_v10 = vld [vmem:[#allocation4 + $0x668] sm:$0xff] }
 0x393   :  { %2232 = vmatprep.subr.mxu0 %v1889_v11  ;;  %2303 = vmatprep.subr.mxu1 %v1891_v12  ;;  %v2027_v11 = vld [vmem:[#allocation4 + $0x678] sm:$0xff]  ;;  %v2024_v12 = vld [vmem:[#allocation4 + $0x660] sm:$0xff] }
 0x394   :  { %2233 = vmatpush1.msra.mxu0 %v1888_v13  ;;  %2304 = vmatpush1.msra.mxu1 %v1890_v14  ;;  %v2026_v13 = vld [vmem:[#allocation4 + $0x670] sm:$0xff]  ;;  %v2017_v14 = vld [vmem:[#allocation4 + $0x628] sm:$0xff] }
 0x395   :  { %2234 = vmatprep.subr.mxu0 %v1881_v15  ;;  %2305 = vmatprep.subr.mxu1 %v1883_v16  ;;  %v2019_v15 = vld [vmem:[#allocation4 + $0x638] sm:$0xff]  ;;  %v2016_v16 = vld [vmem:[#allocation4 + $0x620] sm:$0xff] }
 0x396   :  { %2235 = vmatpush1.msra.mxu0 %v1880_v17  ;;  %2306 = vmatpush1.msra.mxu1 %v1882_v18  ;;  %v2018_v17 = vld [vmem:[#allocation4 + $0x630] sm:$0xff]  ;;  %v2009_v18 = vld [vmem:[#allocation4 + $0x5e8] sm:$0xff] }
 0x397   :  { %2236 = vmatprep.subr.mxu0 %v1873_v19  ;;  %2307 = vmatprep.subr.mxu1 %v1875_v20  ;;  %v2011_v19 = vld [vmem:[#allocation4 + $0x5f8] sm:$0xff]  ;;  %v2008_v20 = vld [vmem:[#allocation4 + $0x5e0] sm:$0xff] }
 0x398   :  { %2237 = vmatpush1.msra.mxu0 %v1872_v23  ;;  %2308 = vmatpush1.msra.mxu1 %v1874_v24  ;;  %v2010_v23 = vld [vmem:[#allocation4 + $0x5f0] sm:$0xff]  ;;  %v2001_v24 = vld [vmem:[#allocation4 + $0x5a8] sm:$0xff] }
 0x399   :  { %2238 = vmatprep.subr.mxu0 %v1865_v26  ;;  %2309 = vmatprep.subr.mxu1 %v1867_v28  ;;  %v2003_v26 = vld [vmem:[#allocation4 + $0x5b8] sm:$0xff]  ;;  %v2000_v28 = vld [vmem:[#allocation4 + $0x5a0] sm:$0xff] }
 0x39a   :  { %2239 = vmatpush1.msra.mxu0 %v1864_v29  ;;  %2310 = vmatpush1.msra.mxu1 %v1866_v30  ;;  %v2002_v29 = vld [vmem:[#allocation4 + $0x5b0] sm:$0xff]  ;;  %v1993_v30 = vld [vmem:[#allocation4 + $0x568] sm:$0xff] }
 0x39b   :  { %2240 = vmatprep.subr.mxu0 %v1857_v31  ;;  %2311 = vmatprep.subr.mxu1 %v1859_v32  ;;  %v1995_v31 = vld [vmem:[#allocation4 + $0x578] sm:$0xff]  ;;  %v1992_v32 = vld [vmem:[#allocation4 + $0x560] sm:$0xff] }
 0x39c   :  { %2241 = vmatpush1.msra.mxu0 %v1856_v33  ;;  %2312 = vmatpush1.msra.mxu1 %v1858_v34  ;;  %v1994_v33 = vld [vmem:[#allocation4 + $0x570] sm:$0xff]  ;;  %v1985_v34 = vld [vmem:[#allocation4 + $0x528] sm:$0xff] }
 0x39d   :  { %2242 = vmatprep.subr.mxu0 %v1849_v37  ;;  %2313 = vmatprep.subr.mxu1 %v1851_v22  ;;  %v1987_v37 = vld [vmem:[#allocation4 + $0x538] sm:$0xff]  ;;  %v1984_v22 = vld [vmem:[#allocation4 + $0x520] sm:$0xff] }
 0x39e   :  { %2243 = vmatpush1.msra.mxu0 %v1848_v21  ;;  %2314 = vmatpush1.msra.mxu1 %v1850_v40  ;;  %v1986_v21 = vld [vmem:[#allocation4 + $0x530] sm:$0xff]  ;;  %v1977_v40 = vld [vmem:[#allocation4 + $0x4e8] sm:$0xff] }
 0x39f   :  { %2244 = vmatprep.subr.mxu0 %v1841_v36  ;;  %2315 = vmatprep.subr.mxu1 %v1843_v43  ;;  %v1979_v36 = vld [vmem:[#allocation4 + $0x4f8] sm:$0xff]  ;;  %v1976_v43 = vld [vmem:[#allocation4 + $0x4e0] sm:$0xff] }
 0x3a0   :  { %2245 = vmatpush1.msra.mxu0 %v1840_v44  ;;  %2316 = vmatpush1.msra.mxu1 %v1842_v45  ;;  %v1978_v44 = vld [vmem:[#allocation4 + $0x4f0] sm:$0xff]  ;;  %v1969_v45 = vld [vmem:[#allocation4 + $0x4a8] sm:$0xff] }
 0x3a1   :  { %2246 = vmatprep.subr.mxu0 %v1833_v46  ;;  %2317 = vmatprep.subr.mxu1 %v1835_v47  ;;  %v1971_v46 = vld [vmem:[#allocation4 + $0x4b8] sm:$0xff]  ;;  %v1968_v47 = vld [vmem:[#allocation4 + $0x4a0] sm:$0xff] }
 0x3a2   :  { %2247 = vmatpush1.msra.mxu0 %v1832_v49  ;;  %2318 = vmatpush1.msra.mxu1 %v1834_v27  ;;  %v1970_v49 = vld [vmem:[#allocation4 + $0x4b0] sm:$0xff]  ;;  %v1961_v27 = vld [vmem:[#allocation4 + $0x468] sm:$0xff] }
 0x3a3   :  { %2248 = vmatprep.subr.mxu0 %v1825_v50  ;;  %2319 = vmatprep.subr.mxu1 %v1827_v51  ;;  %v1963_v50 = vld [vmem:[#allocation4 + $0x478] sm:$0xff]  ;;  %v1960_v51 = vld [vmem:[#allocation4 + $0x460] sm:$0xff] }
 0x3a4   :  { %2249 = vmatpush1.msra.mxu0 %v1824_v35  ;;  %2320 = vmatpush1.msra.mxu1 %v1826_v38  ;;  %v1962_v35 = vld [vmem:[#allocation4 + $0x470] sm:$0xff]  ;;  %v1953_v38 = vld [vmem:[#allocation4 + $0x428] sm:$0xff] }
 0x3a5   :  { %2250 = vmatprep.subr.mxu0 %v2073_v52  ;;  %2321 = vmatprep.subr.mxu1 %v2075_v53  ;;  %v1955_v52 = vld [vmem:[#allocation4 + $0x438] sm:$0xff]  ;;  %v1952_v53 = vld [vmem:[#allocation4 + $0x420] sm:$0xff] }
 0x3a6   :  { %2251 = vmatpush2.msra.mxu0 %v2072_v54  ;;  %2322 = vmatpush2.msra.mxu1 %v2074_v55  ;;  %v1954_v54 = vld [vmem:[#allocation4 + $0x430] sm:$0xff]  ;;  %v2565_v55 = vld [vmem:[#allocation4 + $0x3c8] sm:$0xff] }
 0x3a7   :  { %2252 = vmatprep.subr.mxu0 %v2065_v56  ;;  %2323 = vmatprep.subr.mxu1 %v2067_v41  ;;  %v2567_v56 = vld [vmem:[#allocation4 + $0x3d8] sm:$0xff]  ;;  %v2564_v41 = vld [vmem:[#allocation4 + $0x3c0] sm:$0xff] }
 0x3a8   :  { %2253 = vmatpush2.msra.mxu0 %v2064_v57  ;;  %2324 = vmatpush2.msra.mxu1 %v2066_v58  ;;  %v2566_v57 = vld [vmem:[#allocation4 + $0x3d0] sm:$0xff]  ;;  %v2557_v58 = vld [vmem:[#allocation4 + $0x388] sm:$0xff] }
 0x3a9   :  { %2254 = vmatprep.subr.mxu0 %v2057_v59  ;;  %2325 = vmatprep.subr.mxu1 %v2059_v60  ;;  %v2559_v59 = vld [vmem:[#allocation4 + $0x398] sm:$0xff]  ;;  %v2556_v60 = vld [vmem:[#allocation4 + $0x380] sm:$0xff] }
 0x3aa   :  { %2255 = vmatpush2.msra.mxu0 %v2056_v61  ;;  %2326 = vmatpush2.msra.mxu1 %v2058_v48  ;;  %v2558_v61 = vld [vmem:[#allocation4 + $0x390] sm:$0xff]  ;;  %v2549_v48 = vld [vmem:[#allocation4 + $0x348] sm:$0xff] }
 0x3ab   :  { %2256 = vmatprep.subr.mxu0 %v2049_v62  ;;  %2327 = vmatprep.subr.mxu1 %v2051_v63  ;;  %v2551_v62 = vld [vmem:[#allocation4 + $0x358] sm:$0xff]  ;;  %v2548_v63 = vld [vmem:[#allocation4 + $0x340] sm:$0xff] }
 0x3ac   :  { %2257 = vmatpush2.msra.mxu0 %v2048_v0  ;;  %2328 = vmatpush2.msra.mxu1 %v2050_v1  ;;  %v2550_v0 = vld [vmem:[#allocation4 + $0x350] sm:$0xff]  ;;  %v2543_v1 = vld [vmem:[#allocation4 + $0x318] sm:$0xff] }
 0x3ad   :  { %2258 = vmatprep.subr.mxu0 %v2041_v2  ;;  %2329 = vmatprep.subr.mxu1 %v2043_v3  ;;  %v2540_v2 = vld [vmem:[#allocation4 + $0x300] sm:$0xff]  ;;  %v2542_v3 = vld [vmem:[#allocation4 + $0x310] sm:$0xff] }
 0x3ae   :  { %2259 = vmatpush2.msra.mxu0 %v2040_v4  ;;  %2330 = vmatpush2.msra.mxu1 %v2042_v5  ;;  %v2533_v4 = vld [vmem:[#allocation4 + $0x2c8] sm:$0xff]  ;;  %v2535_v5 = vld [vmem:[#allocation4 + $0x2d8] sm:$0xff] }
 0x3af   :  { %2260 = vmatprep.subr.mxu0 %v2033_v6  ;;  %2331 = vmatprep.subr.mxu1 %v2035_v7  ;;  %v2532_v6 = vld [vmem:[#allocation4 + $0x2c0] sm:$0xff]  ;;  %v2534_v7 = vld [vmem:[#allocation4 + $0x2d0] sm:$0xff] }
 0x3b0   :  { %2261 = vmatpush2.msra.mxu0 %v2032_v8  ;;  %2332 = vmatpush2.msra.mxu1 %v2034_v9  ;;  %v2525_v8 = vld [vmem:[#allocation4 + $0x288] sm:$0xff]  ;;  %v2527_v9 = vld [vmem:[#allocation4 + $0x298] sm:$0xff] }
 0x3b1   :  { %2262 = vmatprep.subr.mxu0 %v2025_v10  ;;  %2333 = vmatprep.subr.mxu1 %v2027_v11  ;;  %v2524_v10 = vld [vmem:[#allocation4 + $0x280] sm:$0xff]  ;;  %v2526_v11 = vld [vmem:[#allocation4 + $0x290] sm:$0xff] }
 0x3b2   :  { %2263 = vmatpush2.msra.mxu0 %v2024_v12  ;;  %2334 = vmatpush2.msra.mxu1 %v2026_v13  ;;  %v2517_v12 = vld [vmem:[#allocation4 + $0x248] sm:$0xff]  ;;  %v2519_v13 = vld [vmem:[#allocation4 + $0x258] sm:$0xff] }
 0x3b3   :  { %2264 = vmatprep.subr.mxu0 %v2017_v14  ;;  %2335 = vmatprep.subr.mxu1 %v2019_v15  ;;  %v2516_v14 = vld [vmem:[#allocation4 + $0x240] sm:$0xff]  ;;  %v2518_v15 = vld [vmem:[#allocation4 + $0x250] sm:$0xff] }
 0x3b4   :  { %2265 = vmatpush2.msra.mxu0 %v2016_v16  ;;  %2336 = vmatpush2.msra.mxu1 %v2018_v17  ;;  %v2509_v16 = vld [vmem:[#allocation4 + $0x208] sm:$0xff]  ;;  %v2511_v17 = vld [vmem:[#allocation4 + $0x218] sm:$0xff] }
 0x3b5   :  { %2266 = vmatprep.subr.mxu0 %v2009_v18  ;;  %2337 = vmatprep.subr.mxu1 %v2011_v19  ;;  %v2508_v18 = vld [vmem:[#allocation4 + $0x200] sm:$0xff]  ;;  %v2510_v19 = vld [vmem:[#allocation4 + $0x210] sm:$0xff] }
 0x3b6   :  { %2267 = vmatpush2.msra.mxu0 %v2008_v20  ;;  %2338 = vmatpush2.msra.mxu1 %v2010_v23  ;;  %v2501_v20 = vld [vmem:[#allocation4 + $0x1c8] sm:$0xff]  ;;  %v2503_v23 = vld [vmem:[#allocation4 + $0x1d8] sm:$0xff] }
 0x3b7   :  { %2268 = vmatprep.subr.mxu0 %v2001_v24  ;;  %2339 = vmatprep.subr.mxu1 %v2003_v26  ;;  %v2500_v24 = vld [vmem:[#allocation4 + $0x1c0] sm:$0xff]  ;;  %v2502_v26 = vld [vmem:[#allocation4 + $0x1d0] sm:$0xff] }
 0x3b8   :  { %2269 = vmatpush2.msra.mxu0 %v2000_v28  ;;  %2340 = vmatpush2.msra.mxu1 %v2002_v29  ;;  %v2493_v28 = vld [vmem:[#allocation4 + $0x188] sm:$0xff]  ;;  %v2495_v29 = vld [vmem:[#allocation4 + $0x198] sm:$0xff] }
 0x3b9   :  { %2270 = vmatprep.subr.mxu0 %v1993_v30  ;;  %2341 = vmatprep.subr.mxu1 %v1995_v31  ;;  %v2492_v30 = vld [vmem:[#allocation4 + $0x180] sm:$0xff]  ;;  %v2494_v31 = vld [vmem:[#allocation4 + $0x190] sm:$0xff] }
 0x3ba   :  { %2271 = vmatpush2.msra.mxu0 %v1992_v32  ;;  %2342 = vmatpush2.msra.mxu1 %v1994_v33  ;;  %v2485_v32 = vld [vmem:[#allocation4 + $0x148] sm:$0xff]  ;;  %v2487_v33 = vld [vmem:[#allocation4 + $0x158] sm:$0xff] }
 0x3bb   :  { %2272 = vmatprep.subr.mxu0 %v1985_v34  ;;  %2343 = vmatprep.subr.mxu1 %v1987_v37  ;;  %v2484_v34 = vld [vmem:[#allocation4 + $0x140] sm:$0xff]  ;;  %v2486_v37 = vld [vmem:[#allocation4 + $0x150] sm:$0xff] }
 0x3bc   :  { %2273 = vmatpush2.msra.mxu0 %v1984_v22  ;;  %2344 = vmatpush2.msra.mxu1 %v1986_v21  ;;  %v2477_v22 = vld [vmem:[#allocation4 + $0x108] sm:$0xff]  ;;  %v2479_v21 = vld [vmem:[#allocation4 + $0x118] sm:$0xff] }
 0x3bd   :  { %2274 = vmatprep.subr.mxu0 %v1977_v40  ;;  %2345 = vmatprep.subr.mxu1 %v1979_v36  ;;  %v2476_v40 = vld [vmem:[#allocation4 + $0x100] sm:$0xff]  ;;  %v2478_v36 = vld [vmem:[#allocation4 + $0x110] sm:$0xff] }
 0x3be   :  { %2275 = vmatpush2.msra.mxu0 %v1976_v43  ;;  %2346 = vmatpush2.msra.mxu1 %v1978_v44  ;;  %v2469_v43 = vld [vmem:[#allocation4 + $0xc8] sm:$0xff]  ;;  %v2471_v44 = vld [vmem:[#allocation4 + $0xd8] sm:$0xff] }
 0x3bf   :  { %2276 = vmatprep.subr.mxu0 %v1969_v45  ;;  %2347 = vmatprep.subr.mxu1 %v1971_v46  ;;  %v2468_v45 = vld [vmem:[#allocation4 + $0xc0] sm:$0xff]  ;;  %v2470_v46 = vld [vmem:[#allocation4 + $0xd0] sm:$0xff] }
 0x3c0   :  { %2277 = vmatpush2.msra.mxu0 %v1968_v47  ;;  %2348 = vmatpush2.msra.mxu1 %v1970_v49  ;;  %v2461_v47 = vld [vmem:[#allocation4 + $0x88] sm:$0xff]  ;;  %v2463_v49 = vld [vmem:[#allocation4 + $0x98] sm:$0xff] }
 0x3c1   :  { %2278 = vmatprep.subr.mxu0 %v1961_v27  ;;  %2349 = vmatprep.subr.mxu1 %v1963_v50  ;;  %v2460_v27 = vld [vmem:[#allocation4 + $0x80] sm:$0xff]  ;;  %v2462_v50 = vld [vmem:[#allocation4 + $0x90] sm:$0xff] }
 0x3c2   :  { %2279 = vmatpush2.msra.mxu0 %v1960_v51  ;;  %2350 = vmatpush2.msra.mxu1 %v1962_v35  ;;  %v2453_v51 = vld [vmem:[#allocation4 + $0x48] sm:$0xff]  ;;  %v2455_v35 = vld [vmem:[#allocation4 + $0x58] sm:$0xff] }
 0x3c3   :  { %2280 = vmatprep.subr.mxu0 %v1953_v38  ;;  %2351 = vmatprep.subr.mxu1 %v1955_v52  ;;  %v2452_v38 = vld [vmem:[#allocation4 + $0x40] sm:$0xff]  ;;  %v2454_v52 = vld [vmem:[#allocation4 + $0x50] sm:$0xff] }
 0x3c4   :  { %2281 = vmatpush2.msra.mxu0 %v1952_v53  ;;  %2352 = vmatpush2.msra.mxu1 %v1954_v54  ;;  %v2445_v53 = vld [vmem:[#allocation4 + $0x8] sm:$0xff]  ;;  %v2447_v54 = vld [vmem:[#allocation4 + $0x18] sm:$0xff] }
 0x3c5   :  { %2283 = vmatmul.mubr.f32.vlgmr.msra.gmra.mxu0 %v6218_v25  ;;  %2354 = vmatmul.mubr.f32.vlgmr.msra.gmra.mxu1 %v6218_v25  ;;  %v2541_v25 = vld [vmem:[#allocation4 + $0x308] sm:$0xff] }
 0x3c6   :  { %2700 = vmatprep.subr.mxu0 %v2565_v55  ;;  %2771 = vmatprep.subr.mxu1 %v2567_v56  ;;  %v2444_v55 = vld [vmem:[#allocation4] sm:$0xff]  ;;  %v2446_v56 = vld [vmem:[#allocation4 + $0x10] sm:$0xff] }
 0x3c7   :  { %2701 = vmatpush1.msra.mxu0 %v2564_v41  ;;  %2772 = vmatpush1.msra.mxu1 %v2566_v57  ;;  %v2693_v41 = vld [vmem:[#allocation4 + $0x7c8] sm:$0xff]  ;;  %v2695_v57 = vld [vmem:[#allocation4 + $0x7d8] sm:$0xff] }
 0x3c8   :  { %2702 = vmatprep.subr.mxu0 %v2557_v58  ;;  %2773 = vmatprep.subr.mxu1 %v2559_v59  ;;  %v2692_v58 = vld [vmem:[#allocation4 + $0x7c0] sm:$0xff]  ;;  %v2694_v59 = vld [vmem:[#allocation4 + $0x7d0] sm:$0xff] }
 0x3c9   :  { %2703 = vmatpush1.msra.mxu0 %v2556_v60  ;;  %2774 = vmatpush1.msra.mxu1 %v2558_v61  ;;  %v2685_v60 = vld [vmem:[#allocation4 + $0x788] sm:$0xff]  ;;  %v2687_v61 = vld [vmem:[#allocation4 + $0x798] sm:$0xff] }
 0x3ca   :  { %2704 = vmatprep.subr.mxu0 %v2549_v48  ;;  %2775 = vmatprep.subr.mxu1 %v2551_v62  ;;  %v2684_v48 = vld [vmem:[#allocation4 + $0x780] sm:$0xff]  ;;  %v2686_v62 = vld [vmem:[#allocation4 + $0x790] sm:$0xff] }
 0x3cb   :  { %2705 = vmatpush1.msra.mxu0 %v2548_v63  ;;  %2776 = vmatpush1.msra.mxu1 %v2550_v0  ;;  %v2677_v63 = vld [vmem:[#allocation4 + $0x748] sm:$0xff]  ;;  %v2679_v0 = vld [vmem:[#allocation4 + $0x758] sm:$0xff] }
 0x3cc   :  { %2706 = vmatprep.subr.mxu0 %v2541_v25  ;;  %2777 = vmatprep.subr.mxu1 %v2543_v1  ;;  %v2676_v25 = vld [vmem:[#allocation4 + $0x740] sm:$0xff]  ;;  %v2678_v1 = vld [vmem:[#allocation4 + $0x750] sm:$0xff] }
 0x3cd   :  { %2707 = vmatpush1.msra.mxu0 %v2540_v2  ;;  %2778 = vmatpush1.msra.mxu1 %v2542_v3  ;;  %v2669_v2 = vld [vmem:[#allocation4 + $0x708] sm:$0xff]  ;;  %v2671_v3 = vld [vmem:[#allocation4 + $0x718] sm:$0xff] }
 0x3ce   :  { %2708 = vmatprep.subr.mxu0 %v2533_v4  ;;  %2779 = vmatprep.subr.mxu1 %v2535_v5  ;;  %v2668_v4 = vld [vmem:[#allocation4 + $0x700] sm:$0xff]  ;;  %v2670_v5 = vld [vmem:[#allocation4 + $0x710] sm:$0xff] }
 0x3cf   :  { %2709 = vmatpush1.msra.mxu0 %v2532_v6  ;;  %2780 = vmatpush1.msra.mxu1 %v2534_v7  ;;  %v2661_v6 = vld [vmem:[#allocation4 + $0x6c8] sm:$0xff]  ;;  %v2663_v7 = vld [vmem:[#allocation4 + $0x6d8] sm:$0xff] }
 0x3d0   :  { %2710 = vmatprep.subr.mxu0 %v2525_v8  ;;  %2781 = vmatprep.subr.mxu1 %v2527_v9  ;;  %v2660_v8 = vld [vmem:[#allocation4 + $0x6c0] sm:$0xff]  ;;  %v2662_v9 = vld [vmem:[#allocation4 + $0x6d0] sm:$0xff] }
 0x3d1   :  { %2711 = vmatpush1.msra.mxu0 %v2524_v10  ;;  %2782 = vmatpush1.msra.mxu1 %v2526_v11  ;;  %v2653_v10 = vld [vmem:[#allocation4 + $0x688] sm:$0xff]  ;;  %v2655_v11 = vld [vmem:[#allocation4 + $0x698] sm:$0xff] }
 0x3d2   :  { %2712 = vmatprep.subr.mxu0 %v2517_v12  ;;  %2783 = vmatprep.subr.mxu1 %v2519_v13  ;;  %v2652_v12 = vld [vmem:[#allocation4 + $0x680] sm:$0xff]  ;;  %v2654_v13 = vld [vmem:[#allocation4 + $0x690] sm:$0xff] }
 0x3d3   :  { %2713 = vmatpush1.msra.mxu0 %v2516_v14  ;;  %2784 = vmatpush1.msra.mxu1 %v2518_v15  ;;  %v2645_v14 = vld [vmem:[#allocation4 + $0x648] sm:$0xff]  ;;  %v2647_v15 = vld [vmem:[#allocation4 + $0x658] sm:$0xff] }
 0x3d4   :  { %2714 = vmatprep.subr.mxu0 %v2509_v16  ;;  %2785 = vmatprep.subr.mxu1 %v2511_v17  ;;  %v2644_v16 = vld [vmem:[#allocation4 + $0x640] sm:$0xff]  ;;  %v2646_v17 = vld [vmem:[#allocation4 + $0x650] sm:$0xff] }
 0x3d5   :  { %2715 = vmatpush1.msra.mxu0 %v2508_v18  ;;  %2786 = vmatpush1.msra.mxu1 %v2510_v19  ;;  %v2637_v18 = vld [vmem:[#allocation4 + $0x608] sm:$0xff]  ;;  %v2639_v19 = vld [vmem:[#allocation4 + $0x618] sm:$0xff] }
 0x3d6   :  { %2716 = vmatprep.subr.mxu0 %v2501_v20  ;;  %2787 = vmatprep.subr.mxu1 %v2503_v23  ;;  %v2636_v20 = vld [vmem:[#allocation4 + $0x600] sm:$0xff]  ;;  %v2638_v23 = vld [vmem:[#allocation4 + $0x610] sm:$0xff] }
 0x3d7   :  { %2717 = vmatpush1.msra.mxu0 %v2500_v24  ;;  %2788 = vmatpush1.msra.mxu1 %v2502_v26  ;;  %v2629_v24 = vld [vmem:[#allocation4 + $0x5c8] sm:$0xff]  ;;  %v2631_v26 = vld [vmem:[#allocation4 + $0x5d8] sm:$0xff] }
 0x3d8   :  { %2718 = vmatprep.subr.mxu0 %v2493_v28  ;;  %2789 = vmatprep.subr.mxu1 %v2495_v29  ;;  %v2628_v28 = vld [vmem:[#allocation4 + $0x5c0] sm:$0xff]  ;;  %v2630_v29 = vld [vmem:[#allocation4 + $0x5d0] sm:$0xff] }
 0x3d9   :  { %2719 = vmatpush1.msra.mxu0 %v2492_v30  ;;  %2790 = vmatpush1.msra.mxu1 %v2494_v31  ;;  %v2621_v30 = vld [vmem:[#allocation4 + $0x588] sm:$0xff]  ;;  %v2623_v31 = vld [vmem:[#allocation4 + $0x598] sm:$0xff] }
 0x3da   :  { %2720 = vmatprep.subr.mxu0 %v2485_v32  ;;  %2791 = vmatprep.subr.mxu1 %v2487_v33  ;;  %v2620_v32 = vld [vmem:[#allocation4 + $0x580] sm:$0xff]  ;;  %v2622_v33 = vld [vmem:[#allocation4 + $0x590] sm:$0xff] }
 0x3db   :  { %2721 = vmatpush1.msra.mxu0 %v2484_v34  ;;  %2792 = vmatpush1.msra.mxu1 %v2486_v37  ;;  %v2613_v34 = vld [vmem:[#allocation4 + $0x548] sm:$0xff]  ;;  %v2615_v37 = vld [vmem:[#allocation4 + $0x558] sm:$0xff] }
 0x3dc   :  { %2722 = vmatprep.subr.mxu0 %v2477_v22  ;;  %2793 = vmatprep.subr.mxu1 %v2479_v21  ;;  %v2612_v22 = vld [vmem:[#allocation4 + $0x540] sm:$0xff]  ;;  %v2614_v21 = vld [vmem:[#allocation4 + $0x550] sm:$0xff] }
 0x3dd   :  { %2723 = vmatpush1.msra.mxu0 %v2476_v40  ;;  %2794 = vmatpush1.msra.mxu1 %v2478_v36  ;;  %v2605_v40 = vld [vmem:[#allocation4 + $0x508] sm:$0xff]  ;;  %v2607_v36 = vld [vmem:[#allocation4 + $0x518] sm:$0xff] }
 0x3de   :  { %2724 = vmatprep.subr.mxu0 %v2469_v43  ;;  %2795 = vmatprep.subr.mxu1 %v2471_v44  ;;  %v2604_v43 = vld [vmem:[#allocation4 + $0x500] sm:$0xff]  ;;  %v2606_v44 = vld [vmem:[#allocation4 + $0x510] sm:$0xff] }
 0x3df   :  { %2725 = vmatpush1.msra.mxu0 %v2468_v45  ;;  %2796 = vmatpush1.msra.mxu1 %v2470_v46  ;;  %v2597_v45 = vld [vmem:[#allocation4 + $0x4c8] sm:$0xff]  ;;  %v2599_v46 = vld [vmem:[#allocation4 + $0x4d8] sm:$0xff] }
 0x3e0   :  { %2726 = vmatprep.subr.mxu0 %v2461_v47  ;;  %2797 = vmatprep.subr.mxu1 %v2463_v49  ;;  %v2596_v47 = vld [vmem:[#allocation4 + $0x4c0] sm:$0xff]  ;;  %v2598_v49 = vld [vmem:[#allocation4 + $0x4d0] sm:$0xff] }
 0x3e1   :  { %2727 = vmatpush1.msra.mxu0 %v2460_v27  ;;  %2798 = vmatpush1.msra.mxu1 %v2462_v50  ;;  %v2589_v27 = vld [vmem:[#allocation4 + $0x488] sm:$0xff]  ;;  %v2591_v50 = vld [vmem:[#allocation4 + $0x498] sm:$0xff] }
 0x3e2   :  { %2728 = vmatprep.subr.mxu0 %v2453_v51  ;;  %2799 = vmatprep.subr.mxu1 %v2455_v35  ;;  %v2588_v51 = vld [vmem:[#allocation4 + $0x480] sm:$0xff]  ;;  %v2590_v35 = vld [vmem:[#allocation4 + $0x490] sm:$0xff] }
 0x3e3   :  { %2729 = vmatpush1.msra.mxu0 %v2452_v38  ;;  %2800 = vmatpush1.msra.mxu1 %v2454_v52  ;;  %v2581_v38 = vld [vmem:[#allocation4 + $0x448] sm:$0xff]  ;;  %v2583_v52 = vld [vmem:[#allocation4 + $0x458] sm:$0xff] }
 0x3e4   :  { %2730 = vmatprep.subr.mxu0 %v2445_v53  ;;  %2801 = vmatprep.subr.mxu1 %v2447_v54  ;;  %v2580_v53 = vld [vmem:[#allocation4 + $0x440] sm:$0xff]  ;;  %v2582_v54 = vld [vmem:[#allocation4 + $0x450] sm:$0xff] }
 0x3e5   :  { %2731 = vmatpush1.msra.mxu0 %v2444_v55  ;;  %2802 = vmatpush1.msra.mxu1 %v2446_v56  ;;  %v2573_v55 = vld [vmem:[#allocation4 + $0x408] sm:$0xff]  ;;  %v2575_v56 = vld [vmem:[#allocation4 + $0x418] sm:$0xff] }
 0x3e6   :  { %2732 = vmatprep.subr.mxu0 %v2693_v41  ;;  %2803 = vmatprep.subr.mxu1 %v2695_v57  ;;  %v2572_v41 = vld [vmem:[#allocation4 + $0x400] sm:$0xff]  ;;  %v2574_v57 = vld [vmem:[#allocation4 + $0x410] sm:$0xff] }
 0x3e7   :  { %2733 = vmatpush2.msra.mxu0 %v2692_v58  ;;  %2804 = vmatpush2.msra.mxu1 %v2694_v59  ;;  %v2569_v58 = vld [vmem:[#allocation4 + $0x3e8] sm:$0xff]  ;;  %v2571_v59 = vld [vmem:[#allocation4 + $0x3f8] sm:$0xff] }
 0x3e8   :  { %2734 = vmatprep.subr.mxu0 %v2685_v60  ;;  %2805 = vmatprep.subr.mxu1 %v2687_v61 }
 0x3e9   :  { %2735 = vmatpush2.msra.mxu0 %v2684_v48  ;;  %2806 = vmatpush2.msra.mxu1 %v2686_v62 }
 0x3ea   :  { %2736 = vmatprep.subr.mxu0 %v2677_v63  ;;  %2807 = vmatprep.subr.mxu1 %v2679_v0 }
 0x3eb   :  { %2737 = vmatpush2.msra.mxu0 %v2676_v25  ;;  %2808 = vmatpush2.msra.mxu1 %v2678_v1  ;;  %v1814_v1 = vld [vmem:[#allocation2 + $0x138] sm:$0xf0] }
 0x3ec   :  { %2738 = vmatprep.subr.mxu0 %v2669_v2  ;;  %2809 = vmatprep.subr.mxu1 %v2671_v3  ;;  %v1812_v2 = vld [vmem:[#allocation2 + $0x80] sm:$0xf0] }
 0x3ed   :  { %2739 = vmatpush2.msra.mxu0 %v2668_v4  ;;  %2810 = vmatpush2.msra.mxu1 %v2670_v5 }
 0x3ee   :  { %2740 = vmatprep.subr.mxu0 %v2661_v6  ;;  %2811 = vmatprep.subr.mxu1 %v2663_v7  ;;  %v1815_v6 = vld [vmem:[#allocation2 + $0xf0] sm:$0xf0] }
 0x3ef   :  { %2741 = vmatpush2.msra.mxu0 %v2660_v8  ;;  %2812 = vmatpush2.msra.mxu1 %v2662_v9  ;;  %v1813_v8 = vld [vmem:[#allocation2 + $0x108] sm:$0xf0] }
 0x3f0   :  { %2742 = vmatprep.subr.mxu0 %v2653_v10  ;;  %2813 = vmatprep.subr.mxu1 %v2655_v11 }
 0x3f1   :  { %2743 = vmatpush2.msra.mxu0 %v2652_v12  ;;  %2814 = vmatpush2.msra.mxu1 %v2654_v13  ;;  %v1818_v12 = vld [vmem:[#allocation2 + $0x70] sm:$0xf0] }
 0x3f2   :  { %2744 = vmatprep.subr.mxu0 %v2645_v14  ;;  %2815 = vmatprep.subr.mxu1 %v2647_v15 }
 0x3f3   :  { %2745 = vmatpush2.msra.mxu0 %v2644_v16  ;;  %2816 = vmatpush2.msra.mxu1 %v2646_v17  ;;  %v1819_v17 = vld [vmem:[#allocation2 + $0x20] sm:$0xf0] }
 0x3f4   :  { %2746 = vmatprep.subr.mxu0 %v2637_v18  ;;  %2817 = vmatprep.subr.mxu1 %v2639_v19 }
 0x3f5   :  { %2747 = vmatpush2.msra.mxu0 %v2636_v20  ;;  %2818 = vmatpush2.msra.mxu1 %v2638_v23 }
 0x3f6   :  { %2748 = vmatprep.subr.mxu0 %v2629_v24  ;;  %2819 = vmatprep.subr.mxu1 %v2631_v26 }
 0x3f7   :  { %2749 = vmatpush2.msra.mxu0 %v2628_v28  ;;  %2820 = vmatpush2.msra.mxu1 %v2630_v29  ;;  %v1816_v29 = vld [vmem:[#allocation2 + $0x18] sm:$0xf0] }
 0x3f8   :  { %2750 = vmatprep.subr.mxu0 %v2621_v30  ;;  %2821 = vmatprep.subr.mxu1 %v2623_v31 }
 0x3f9   :  { %2751 = vmatpush2.msra.mxu0 %v2620_v32  ;;  %2822 = vmatpush2.msra.mxu1 %v2622_v33  ;;  %v1817_v33 = vld [vmem:[#allocation2 + $0xc8] sm:$0xf0] }
 0x3fa   :  { %2752 = vmatprep.subr.mxu0 %v2613_v34  ;;  %2823 = vmatprep.subr.mxu1 %v2615_v37 }
 0x3fb   :  { %2753 = vmatpush2.msra.mxu0 %v2612_v22  ;;  %2824 = vmatpush2.msra.mxu1 %v2614_v21 }
 0x3fc   :  { %2754 = vmatprep.subr.mxu0 %v2605_v40  ;;  %2825 = vmatprep.subr.mxu1 %v2607_v36 }
 0x3fd   :  { %2755 = vmatpush2.msra.mxu0 %v2604_v43  ;;  %2826 = vmatpush2.msra.mxu1 %v2606_v44  ;;  %v2414_v43 = vrot.slane %v6212_v39, 4 }
 0x3fe   :  { %2756 = vmatprep.subr.mxu0 %v2597_v45  ;;  %2827 = vmatprep.subr.mxu1 %v2599_v46 }
 0x3ff   :  { %2757 = vmatpush2.msra.mxu0 %v2596_v47  ;;  %2828 = vmatpush2.msra.mxu1 %v2598_v49  ;;  %v2415_v49 = vrot.slane %v6215_v42, 4 }
 0x400   :  { %2758 = vmatprep.subr.mxu0 %v2589_v27  ;;  %2829 = vmatprep.subr.mxu1 %v2591_v50 }
 0x401   :  { %2759 = vmatpush2.msra.mxu0 %v2588_v51  ;;  %2830 = vmatpush2.msra.mxu1 %v2590_v35 }
 0x402   :  { %2760 = vmatprep.subr.mxu0 %v2581_v38  ;;  %2831 = vmatprep.subr.mxu1 %v2583_v52 }
 0x403   :  { %2761 = vmatpush2.msra.mxu0 %v2580_v53  ;;  %2832 = vmatpush2.msra.mxu1 %v2582_v54 }
 0x404   :  { %2762 = vmatprep.subr.mxu0 %v2573_v55  ;;  %2833 = vmatprep.subr.mxu1 %v2575_v56 }
 0x405   :  { %2763 = vmatpush2.msra.mxu0 %v2572_v41  ;;  %2834 = vmatpush2.msra.mxu1 %v2574_v57 }
 0x406   :  { %2842 = vmatprep.subr.mxu0 %v2569_v58  ;;  %2913 = vmatprep.subr.mxu1 %v2571_v59 }
 0x444   :  { %v2213_v60 = vpop.f32.mrf.mxu1  ;;  %v2142_v61 = vpop.f32.mrf.mxu0 }
 0x445   :  { %v2370_v62 = vrot.slane %v2213_v60, 4  ;;  %v2368_v63 = vrot.slane %v2142_v61, 4 }
 0x446   :  { %v2215_v48 = vpop.f32.mrf.mxu1  ;;  %v2144_v0 = vpop.f32.mrf.mxu0 }
 0x447   :  { %v2371_v25 = vrot.slane %v2215_v48, 4  ;;  %v2386_v3 = vadd.f32 %v2370_v62, %v1814_v1  ;;  %v2369_v4 = vrot.slane %v2144_v0, 4  ;;  %v2384_v5 = vadd.f32 %v2368_v63, %v1812_v2  ;;  %v2568_v48 = vld [vmem:[#allocation4 + $0x3e0] sm:$0xff]  ;;  %v2570_v62 = vld [vmem:[#allocation4 + $0x3f0] sm:$0xff]  ;;  %v2561_v63 = vld [vmem:[#allocation4 + $0x3a8] sm:$0xff] }
 0x448   :  { %v2563_v0 = vld [vmem:[#allocation4 + $0x3b8] sm:$0xff]  ;;  %v2562_v1 = vld [vmem:[#allocation4 + $0x3b0] sm:$0xff]  ;;  %v2553_v2 = vld [vmem:[#allocation4 + $0x368] sm:$0xff] }
 0x449   :  { %v2387_v7 = vadd.f32 %v2371_v25, %v1815_v6  ;;  %5818 = vtanh.f32 %v2386_v3  ;;  %v2385_v9 = vadd.f32 %v2369_v4, %v1813_v8  ;;  %v2560_v25 = vld [vmem:[#allocation4 + $0x3a0] sm:$0xff]  ;;  %v2555_v3 = vld [vmem:[#allocation4 + $0x378] sm:$0xff]  ;;  %v2545_v6 = vld [vmem:[#allocation4 + $0x328] sm:$0xff] }
 0x44a   :  { %5820 = vtanh.f32 %v2384_v5  ;;  %v2552_v4 = vld [vmem:[#allocation4 + $0x360] sm:$0xff]  ;;  %v2554_v5 = vld [vmem:[#allocation4 + $0x370] sm:$0xff] }
 0x44b   :  { %5822 = vtanh.f32 %v2387_v7  ;;  %v2547_v7 = vld [vmem:[#allocation4 + $0x338] sm:$0xff]  ;;  %v2544_v8 = vld [vmem:[#allocation4 + $0x320] sm:$0xff] }
 0x44c   :  { %5824 = vtanh.f32 %v2385_v9  ;;  %v2546_v9 = vld [vmem:[#allocation4 + $0x330] sm:$0xff] }
 0x456   :  { %v5819_v23 = vpop.eup %5818 }
 0x457   :  { %v5821_v24 = vpop.eup %5820  ;;  %v2402_v30 = vmul.f32 0.5, %v5819_v23  ;;  %v2522_v23 = vld [vmem:[#allocation4 + $0x270] sm:$0xff] }
 0x458   :  { %v5823_v28 = vpop.eup %5822  ;;  %v2400_v34 = vmul.f32 0.5, %v5821_v24  ;;  %v2513_v24 = vld [vmem:[#allocation4 + $0x228] sm:$0xff] }
 0x459   :  { %v5825_v32 = vpop.eup %5824  ;;  %v2403_v37 = vmul.f32 0.5, %v5823_v28  ;;  %v2408_v21 = vadd.f32 0.5, %v2402_v30  ;;  %v2512_v28 = vld [vmem:[#allocation4 + $0x220] sm:$0xff]  ;;  %v2505_v30 = vld [vmem:[#allocation4 + $0x1e8] sm:$0xff] }
 0x45a   :  { %v2401_v40 = vmul.f32 0.5, %v5825_v32  ;;  %v2406_v36 = vadd.f32 0.5, %v2400_v34  ;;  %v2504_v32 = vld [vmem:[#allocation4 + $0x1e0] sm:$0xff]  ;;  %v2497_v34 = vld [vmem:[#allocation4 + $0x1a8] sm:$0xff] }
 0x45b   :  { %v2409_v44 = vadd.f32 0.5, %v2403_v37  ;;  %v2418_v46 = vmul.f32 %v2414_v43, %v2408_v21  ;;  %v2499_v37 = vld [vmem:[#allocation4 + $0x1b8] sm:$0xff]  ;;  %v2498_v21 = vld [vmem:[#allocation4 + $0x1b0] sm:$0xff]  ;;  %v2488_v43 = vld [vmem:[#allocation4 + $0x160] sm:$0xff] }
 0x45c   :  { %v2407_v47 = vadd.f32 0.5, %v2401_v40  ;;  %v2489_v40 = vld [vmem:[#allocation4 + $0x168] sm:$0xff] }
 0x45d   :  { %v2419_v51 = vmul.f32 %v2415_v49, %v2409_v44  ;;  %v2490_v44 = vld [vmem:[#allocation4 + $0x170] sm:$0xff] }
 0x45e   :  { %v2482_v49 = vld [vmem:[#allocation4 + $0x130] sm:$0xff] }
 0x485   :  { %v2355_v10 = vpop.f32.mrf.mxu1  ;;  %v2284_v14 = vpop.f32.mrf.mxu0 }
 0x486   :  { %v2374_v11 = vrot.slane %v2355_v10, 4  ;;  %v2372_v20 = vrot.slane %v2284_v14, 4  ;;  %v2537_v10 = vld [vmem:[#allocation4 + $0x2e8] sm:$0xff] }
 0x487   :  { %v2357_v13 = vpop.f32.mrf.mxu1  ;;  %v2286_v19 = vpop.f32.mrf.mxu0  ;;  %v2529_v14 = vld [vmem:[#allocation4 + $0x2a8] sm:$0xff] }
 0x488   :  { %v2390_v15 = vadd.f32 %v2374_v11, %v1818_v12  ;;  %v2375_v16 = vrot.slane %v2357_v13, 4  ;;  %v2373_v26 = vrot.slane %v2286_v19, 4  ;;  %v2388_v31 = vadd.f32 %v2372_v20, %v1816_v29  ;;  %v2539_v11 = vld [vmem:[#allocation4 + $0x2f8] sm:$0xff]  ;;  %v2536_v12 = vld [vmem:[#allocation4 + $0x2e0] sm:$0xff]  ;;  %v2538_v13 = vld [vmem:[#allocation4 + $0x2f0] sm:$0xff] }
 0x489   :  { %v2523_v19 = vld [vmem:[#allocation4 + $0x278] sm:$0xff]  ;;  %v2520_v20 = vld [vmem:[#allocation4 + $0x260] sm:$0xff]  ;;  %v2514_v29 = vld [vmem:[#allocation4 + $0x230] sm:$0xff] }
 0x48a   :  { %v2391_v18 = vadd.f32 %v2375_v16, %v1819_v17  ;;  %5826 = vtanh.f32 %v2390_v15  ;;  %v2389_v22 = vadd.f32 %v2373_v26, %v1817_v33  ;;  %v2531_v15 = vld [vmem:[#allocation4 + $0x2b8] sm:$0xff]  ;;  %v2528_v16 = vld [vmem:[#allocation4 + $0x2a0] sm:$0xff]  ;;  %v2530_v17 = vld [vmem:[#allocation4 + $0x2b0] sm:$0xff] }
 0x48b   :  { %v2515_v26 = vld [vmem:[#allocation4 + $0x238] sm:$0xff]  ;;  %v2506_v33 = vld [vmem:[#allocation4 + $0x1f0] sm:$0xff] }
 0x48c   :  { %5828 = vtanh.f32 %v2391_v18  ;;  %v2521_v18 = vld [vmem:[#allocation4 + $0x268] sm:$0xff] }
 0x48d   :  { %5830 = vtanh.f32 %v2388_v31  ;;  %v2507_v31 = vld [vmem:[#allocation4 + $0x1f8] sm:$0xff] }
 0x48e   :  { %5832 = vtanh.f32 %v2389_v22  ;;  %v2496_v22 = vld [vmem:[#allocation4 + $0x1a0] sm:$0xff] }
 0x497   :  { %v5827_v45 = vpop.eup %5826 }
 0x498   :  { %v2420_v27 = vmul.f32 %v5827_v45, %v2406_v36  ;;  %v2491_v36 = vld [vmem:[#allocation4 + $0x178] sm:$0xff]  ;;  %v2481_v45 = vld [vmem:[#allocation4 + $0x128] sm:$0xff] }
 0x499   :  { %v5829_v50 = vpop.eup %5828 }
 0x49a   :  { %v6227_v35 = vadd.f32 %v2420_v27, %v2418_v46  ;;  %v2421_v38 = vmul.f32 %v5829_v50, %v2407_v47  ;;  %v5831_v39 = vpop.eup %5830  ;;  %v2483_v46 = vld [vmem:[#allocation4 + $0x138] sm:$0xff]  ;;  %v2480_v47 = vld [vmem:[#allocation4 + $0x120] sm:$0xff]  ;;  %v2473_v27 = vld [vmem:[#allocation4 + $0xe8] sm:$0xff] }
 0x49b   :  { %v5833_v53 = vpop.eup %5832  ;;  %v2404_v54 = vmul.f32 0.5, %v5831_v39  ;;  %v2475_v50 = vld [vmem:[#allocation4 + $0xf8] sm:$0xff]  ;;  %v2465_v39 = vld [vmem:[#allocation4 + $0xa8] sm:$0xff] }
 0x49c   :  { %5834 = vtanh.f32 %v6227_v35  ;;  %v6230_v52 = vadd.f32 %v2421_v38, %v2419_v51  ;;  %v2405_v55 = vmul.f32 0.5, %v5833_v53  ;;  %v2472_v51 = vld [vmem:[#allocation4 + $0xe0] sm:$0xff]  ;;  %v2474_v38 = vld [vmem:[#allocation4 + $0xf0] sm:$0xff]  ;;  %v2467_v53 = vld [vmem:[#allocation4 + $0xb8] sm:$0xff] }
 0x49d   :  { %v2410_v56 = vadd.f32 0.5, %v2404_v54  ;;  %v2464_v54 = vld [vmem:[#allocation4 + $0xa0] sm:$0xff] }
 0x49e   :  { %5836 = vtanh.f32 %v6230_v52  ;;  %v2411_v57 = vadd.f32 0.5, %v2405_v55  ;;  %v2466_v55 = vld [vmem:[#allocation4 + $0xb0] sm:$0xff] }
 0x4a9   :  { %v5835_v41 = vpop.eup %5834 }
 0x4aa   :  { %v2426_v42 = vmul.f32 %v5835_v41, %v2410_v56  ;;  %v2457_v56 = vld [vmem:[#allocation4 + $0x68] sm:$0xff]  ;;  %v2459_v41 = vld [vmem:[#allocation4 + $0x78] sm:$0xff] }
 0x4ab   :  { %v5837_v58 = vpop.eup %5836 }
 0x4ac   :  { %v2427_v59 = vmul.f32 %v5837_v58, %v2411_v57  ;;  %v6233_v60 = vrot.slane %v2426_v42, 4  ;;  %v2456_v57 = vld [vmem:[#allocation4 + $0x60] sm:$0xff]  ;;  %v2458_v42 = vld [vmem:[#allocation4 + $0x70] sm:$0xff]  ;;  %v2449_v58 = vld [vmem:[#allocation4 + $0x28] sm:$0xff] }
 0x4ae   :  { %v2431_v61 = vrot.slane %v2427_v59, 4  ;;  %2434 = vst [vmem:[#allocation3 + $0x38] sm:$0xf] %v6233_v60  ;;  %v2451_v59 = vld [vmem:[#allocation4 + $0x38] sm:$0xff] }
 0x4b0   :  { %2435 = vst [vmem:[#allocation3 + $0x8] sm:$0xf] %v2431_v61  ;;  %2764 = vmatprep.mubr.f32.mxu0 %v2431_v61  ;;  %2835 = vmatprep.mubr.f32.mxu1 %v2431_v61 }
 0x4b1   :  { %2765 = vmatmul.mubr.f32.vlgmr.msra.gmra.mxu0 %v6233_v60  ;;  %2836 = vmatmul.mubr.f32.vlgmr.msra.gmra.mxu1 %v6233_v60 }
 0x4b2   :  { %2843 = vmatpush1.msra.mxu0 %v2568_v48  ;;  %2914 = vmatpush1.msra.mxu1 %v2570_v62  ;;  %v2450_v48 = vld [vmem:[#allocation4 + $0x30] sm:$0xff]  ;;  %v2697_v62 = vld [vmem:[#allocation4 + $0x7e8] sm:$0xff] }
 0x4b3   :  { %2844 = vmatprep.subr.mxu0 %v2561_v63  ;;  %2906 = vmatprep.mubr.f32.mxu0 %v2431_v61  ;;  %v2699_v63 = vld [vmem:[#allocation4 + $0x7f8] sm:$0xff] }
 0x4b4   :  { %2915 = vmatprep.subr.mxu1 %v2563_v0  ;;  %2977 = vmatprep.mubr.f32.mxu1 %v2431_v61  ;;  %v2448_v61 = vld [vmem:[#allocation4 + $0x20] sm:$0xff] }
 0x4b5   :  { %2845 = vmatpush1.msra.mxu0 %v2560_v25  ;;  %2916 = vmatpush1.msra.mxu1 %v2562_v1  ;;  %v2696_v0 = vld [vmem:[#allocation4 + $0x7e0] sm:$0xff]  ;;  %v2698_v25 = vld [vmem:[#allocation4 + $0x7f0] sm:$0xff]  ;;  %v2689_v1 = vld [vmem:[#allocation4 + $0x7a8] sm:$0xff] }
 0x4b6   :  { %2846 = vmatprep.subr.mxu0 %v2553_v2  ;;  %2917 = vmatprep.subr.mxu1 %v2555_v3  ;;  %v2691_v2 = vld [vmem:[#allocation4 + $0x7b8] sm:$0xff]  ;;  %v2688_v3 = vld [vmem:[#allocation4 + $0x7a0] sm:$0xff] }
 0x4b7   :  { %2847 = vmatpush1.msra.mxu0 %v2552_v4  ;;  %2918 = vmatpush1.msra.mxu1 %v2554_v5  ;;  %v2690_v4 = vld [vmem:[#allocation4 + $0x7b0] sm:$0xff]  ;;  %v2681_v5 = vld [vmem:[#allocation4 + $0x768] sm:$0xff] }
 0x4b8   :  { %2848 = vmatprep.subr.mxu0 %v2545_v6  ;;  %2919 = vmatprep.subr.mxu1 %v2547_v7  ;;  %v2683_v6 = vld [vmem:[#allocation4 + $0x778] sm:$0xff]  ;;  %v2680_v7 = vld [vmem:[#allocation4 + $0x760] sm:$0xff] }
 0x4b9   :  { %2849 = vmatpush1.msra.mxu0 %v2544_v8  ;;  %2920 = vmatpush1.msra.mxu1 %v2546_v9  ;;  %v2682_v8 = vld [vmem:[#allocation4 + $0x770] sm:$0xff]  ;;  %v2673_v9 = vld [vmem:[#allocation4 + $0x728] sm:$0xff] }
 0x4ba   :  { %2850 = vmatprep.subr.mxu0 %v2537_v10  ;;  %2921 = vmatprep.subr.mxu1 %v2539_v11  ;;  %v2675_v10 = vld [vmem:[#allocation4 + $0x738] sm:$0xff]  ;;  %v2672_v11 = vld [vmem:[#allocation4 + $0x720] sm:$0xff] }
 0x4bb   :  { %2851 = vmatpush1.msra.mxu0 %v2536_v12  ;;  %2922 = vmatpush1.msra.mxu1 %v2538_v13  ;;  %v2674_v12 = vld [vmem:[#allocation4 + $0x730] sm:$0xff]  ;;  %v2665_v13 = vld [vmem:[#allocation4 + $0x6e8] sm:$0xff] }
 0x4bc   :  { %2852 = vmatprep.subr.mxu0 %v2529_v14  ;;  %2923 = vmatprep.subr.mxu1 %v2531_v15  ;;  %v2667_v14 = vld [vmem:[#allocation4 + $0x6f8] sm:$0xff]  ;;  %v2664_v15 = vld [vmem:[#allocation4 + $0x6e0] sm:$0xff] }
 0x4bd   :  { %2853 = vmatpush1.msra.mxu0 %v2528_v16  ;;  %2924 = vmatpush1.msra.mxu1 %v2530_v17  ;;  %v2666_v16 = vld [vmem:[#allocation4 + $0x6f0] sm:$0xff]  ;;  %v2657_v17 = vld [vmem:[#allocation4 + $0x6a8] sm:$0xff] }
 0x4be   :  { %2854 = vmatprep.subr.mxu0 %v2521_v18  ;;  %2925 = vmatprep.subr.mxu1 %v2523_v19  ;;  %v2659_v18 = vld [vmem:[#allocation4 + $0x6b8] sm:$0xff]  ;;  %v2656_v19 = vld [vmem:[#allocation4 + $0x6a0] sm:$0xff] }
 0x4bf   :  { %2855 = vmatpush1.msra.mxu0 %v2520_v20  ;;  %2926 = vmatpush1.msra.mxu1 %v2522_v23  ;;  %v2658_v20 = vld [vmem:[#allocation4 + $0x6b0] sm:$0xff]  ;;  %v2649_v23 = vld [vmem:[#allocation4 + $0x668] sm:$0xff] }
 0x4c0   :  { %2856 = vmatprep.subr.mxu0 %v2513_v24  ;;  %2927 = vmatprep.subr.mxu1 %v2515_v26  ;;  %v2651_v24 = vld [vmem:[#allocation4 + $0x678] sm:$0xff]  ;;  %v2648_v26 = vld [vmem:[#allocation4 + $0x660] sm:$0xff] }
 0x4c1   :  { %2857 = vmatpush1.msra.mxu0 %v2512_v28  ;;  %2928 = vmatpush1.msra.mxu1 %v2514_v29  ;;  %v2650_v28 = vld [vmem:[#allocation4 + $0x670] sm:$0xff]  ;;  %v2641_v29 = vld [vmem:[#allocation4 + $0x628] sm:$0xff] }
 0x4c2   :  { %2858 = vmatprep.subr.mxu0 %v2505_v30  ;;  %2929 = vmatprep.subr.mxu1 %v2507_v31  ;;  %v2643_v30 = vld [vmem:[#allocation4 + $0x638] sm:$0xff]  ;;  %v2640_v31 = vld [vmem:[#allocation4 + $0x620] sm:$0xff] }
 0x4c3   :  { %2859 = vmatpush1.msra.mxu0 %v2504_v32  ;;  %2930 = vmatpush1.msra.mxu1 %v2506_v33  ;;  %v2642_v32 = vld [vmem:[#allocation4 + $0x630] sm:$0xff]  ;;  %v2633_v33 = vld [vmem:[#allocation4 + $0x5e8] sm:$0xff] }
 0x4c4   :  { %2860 = vmatprep.subr.mxu0 %v2497_v34  ;;  %2931 = vmatprep.subr.mxu1 %v2499_v37  ;;  %v2635_v34 = vld [vmem:[#allocation4 + $0x5f8] sm:$0xff]  ;;  %v2632_v37 = vld [vmem:[#allocation4 + $0x5e0] sm:$0xff] }
 0x4c5   :  { %2861 = vmatpush1.msra.mxu0 %v2496_v22  ;;  %2932 = vmatpush1.msra.mxu1 %v2498_v21  ;;  %v2634_v22 = vld [vmem:[#allocation4 + $0x5f0] sm:$0xff]  ;;  %v2625_v21 = vld [vmem:[#allocation4 + $0x5a8] sm:$0xff] }
 0x4c6   :  { %2862 = vmatprep.subr.mxu0 %v2489_v40  ;;  %2933 = vmatprep.subr.mxu1 %v2491_v36  ;;  %v2627_v40 = vld [vmem:[#allocation4 + $0x5b8] sm:$0xff]  ;;  %v2624_v36 = vld [vmem:[#allocation4 + $0x5a0] sm:$0xff] }
 0x4c7   :  { %2863 = vmatpush1.msra.mxu0 %v2488_v43  ;;  %2934 = vmatpush1.msra.mxu1 %v2490_v44  ;;  %v2626_v43 = vld [vmem:[#allocation4 + $0x5b0] sm:$0xff]  ;;  %v2617_v44 = vld [vmem:[#allocation4 + $0x568] sm:$0xff] }
 0x4c8   :  { %2864 = vmatprep.subr.mxu0 %v2481_v45  ;;  %2935 = vmatprep.subr.mxu1 %v2483_v46  ;;  %v2619_v45 = vld [vmem:[#allocation4 + $0x578] sm:$0xff]  ;;  %v2616_v46 = vld [vmem:[#allocation4 + $0x560] sm:$0xff] }
 0x4c9   :  { %2865 = vmatpush1.msra.mxu0 %v2480_v47  ;;  %2936 = vmatpush1.msra.mxu1 %v2482_v49  ;;  %v2618_v47 = vld [vmem:[#allocation4 + $0x570] sm:$0xff]  ;;  %v2609_v49 = vld [vmem:[#allocation4 + $0x528] sm:$0xff] }
 0x4ca   :  { %2866 = vmatprep.subr.mxu0 %v2473_v27  ;;  %2937 = vmatprep.subr.mxu1 %v2475_v50  ;;  %v2611_v27 = vld [vmem:[#allocation4 + $0x538] sm:$0xff]  ;;  %v2608_v50 = vld [vmem:[#allocation4 + $0x520] sm:$0xff] }
 0x4cb   :  { %2867 = vmatpush1.msra.mxu0 %v2472_v51  ;;  %2938 = vmatpush1.msra.mxu1 %v2474_v38  ;;  %v2610_v51 = vld [vmem:[#allocation4 + $0x530] sm:$0xff]  ;;  %v2601_v38 = vld [vmem:[#allocation4 + $0x4e8] sm:$0xff] }
 0x4cc   :  { %2868 = vmatprep.subr.mxu0 %v2465_v39  ;;  %2939 = vmatprep.subr.mxu1 %v2467_v53  ;;  %v2603_v39 = vld [vmem:[#allocation4 + $0x4f8] sm:$0xff]  ;;  %v2600_v53 = vld [vmem:[#allocation4 + $0x4e0] sm:$0xff] }
 0x4cd   :  { %2869 = vmatpush1.msra.mxu0 %v2464_v54  ;;  %2940 = vmatpush1.msra.mxu1 %v2466_v55  ;;  %v2602_v54 = vld [vmem:[#allocation4 + $0x4f0] sm:$0xff]  ;;  %v2593_v55 = vld [vmem:[#allocation4 + $0x4a8] sm:$0xff] }
 0x4ce   :  { %2870 = vmatprep.subr.mxu0 %v2457_v56  ;;  %2941 = vmatprep.subr.mxu1 %v2459_v41  ;;  %v2595_v56 = vld [vmem:[#allocation4 + $0x4b8] sm:$0xff]  ;;  %v2592_v41 = vld [vmem:[#allocation4 + $0x4a0] sm:$0xff] }
 0x4cf   :  { %2871 = vmatpush1.msra.mxu0 %v2456_v57  ;;  %2942 = vmatpush1.msra.mxu1 %v2458_v42  ;;  %v2594_v57 = vld [vmem:[#allocation4 + $0x4b0] sm:$0xff]  ;;  %v2585_v42 = vld [vmem:[#allocation4 + $0x468] sm:$0xff] }
 0x4d0   :  { %2872 = vmatprep.subr.mxu0 %v2449_v58  ;;  %2943 = vmatprep.subr.mxu1 %v2451_v59  ;;  %v2587_v58 = vld [vmem:[#allocation4 + $0x478] sm:$0xff]  ;;  %v2584_v59 = vld [vmem:[#allocation4 + $0x460] sm:$0xff] }
 0x4d1   :  { %2873 = vmatpush1.msra.mxu0 %v2448_v61  ;;  %2944 = vmatpush1.msra.mxu1 %v2450_v48  ;;  %v2586_v61 = vld [vmem:[#allocation4 + $0x470] sm:$0xff]  ;;  %v2577_v48 = vld [vmem:[#allocation4 + $0x428] sm:$0xff] }
 0x4d2   :  { %2874 = vmatprep.subr.mxu0 %v2697_v62  ;;  %2945 = vmatprep.subr.mxu1 %v2699_v63  ;;  %v2579_v62 = vld [vmem:[#allocation4 + $0x438] sm:$0xff]  ;;  %v2576_v63 = vld [vmem:[#allocation4 + $0x420] sm:$0xff] }
 0x4d3   :  { %2875 = vmatpush2.msra.mxu0 %v2696_v0  ;;  %2946 = vmatpush2.msra.mxu1 %v2698_v25  ;;  %v2578_v0 = vld [vmem:[#allocation4 + $0x430] sm:$0xff]  ;;  %v3165_v25 = vld [vmem:[#allocation4 + $0x3c8] sm:$0xff] }
 0x4d4   :  { %2876 = vmatprep.subr.mxu0 %v2689_v1  ;;  %2947 = vmatprep.subr.mxu1 %v2691_v2  ;;  %v3167_v1 = vld [vmem:[#allocation4 + $0x3d8] sm:$0xff]  ;;  %v3164_v2 = vld [vmem:[#allocation4 + $0x3c0] sm:$0xff] }
 0x4d5   :  { %2877 = vmatpush2.msra.mxu0 %v2688_v3  ;;  %2948 = vmatpush2.msra.mxu1 %v2690_v4  ;;  %v3166_v3 = vld [vmem:[#allocation4 + $0x3d0] sm:$0xff]  ;;  %v3157_v4 = vld [vmem:[#allocation4 + $0x388] sm:$0xff] }
 0x4d6   :  { %2878 = vmatprep.subr.mxu0 %v2681_v5  ;;  %2949 = vmatprep.subr.mxu1 %v2683_v6  ;;  %v3159_v5 = vld [vmem:[#allocation4 + $0x398] sm:$0xff]  ;;  %v3156_v6 = vld [vmem:[#allocation4 + $0x380] sm:$0xff] }
 0x4d7   :  { %2879 = vmatpush2.msra.mxu0 %v2680_v7  ;;  %2950 = vmatpush2.msra.mxu1 %v2682_v8  ;;  %v3158_v7 = vld [vmem:[#allocation4 + $0x390] sm:$0xff]  ;;  %v3149_v8 = vld [vmem:[#allocation4 + $0x348] sm:$0xff] }
 0x4d8   :  { %2880 = vmatprep.subr.mxu0 %v2673_v9  ;;  %2951 = vmatprep.subr.mxu1 %v2675_v10  ;;  %v3151_v9 = vld [vmem:[#allocation4 + $0x358] sm:$0xff]  ;;  %v3148_v10 = vld [vmem:[#allocation4 + $0x340] sm:$0xff] }
 0x4d9   :  { %2881 = vmatpush2.msra.mxu0 %v2672_v11  ;;  %2952 = vmatpush2.msra.mxu1 %v2674_v12  ;;  %v3150_v11 = vld [vmem:[#allocation4 + $0x350] sm:$0xff]  ;;  %v3143_v12 = vld [vmem:[#allocation4 + $0x318] sm:$0xff] }
 0x4da   :  { %2882 = vmatprep.subr.mxu0 %v2665_v13  ;;  %2953 = vmatprep.subr.mxu1 %v2667_v14  ;;  %v3140_v13 = vld [vmem:[#allocation4 + $0x300] sm:$0xff]  ;;  %v3142_v14 = vld [vmem:[#allocation4 + $0x310] sm:$0xff] }
 0x4db   :  { %2883 = vmatpush2.msra.mxu0 %v2664_v15  ;;  %2954 = vmatpush2.msra.mxu1 %v2666_v16  ;;  %v3133_v15 = vld [vmem:[#allocation4 + $0x2c8] sm:$0xff]  ;;  %v3135_v16 = vld [vmem:[#allocation4 + $0x2d8] sm:$0xff] }
 0x4dc   :  { %2884 = vmatprep.subr.mxu0 %v2657_v17  ;;  %2955 = vmatprep.subr.mxu1 %v2659_v18  ;;  %v3132_v17 = vld [vmem:[#allocation4 + $0x2c0] sm:$0xff]  ;;  %v3134_v18 = vld [vmem:[#allocation4 + $0x2d0] sm:$0xff] }
 0x4dd   :  { %2885 = vmatpush2.msra.mxu0 %v2656_v19  ;;  %2956 = vmatpush2.msra.mxu1 %v2658_v20  ;;  %v3125_v19 = vld [vmem:[#allocation4 + $0x288] sm:$0xff]  ;;  %v3127_v20 = vld [vmem:[#allocation4 + $0x298] sm:$0xff] }
 0x4de   :  { %2886 = vmatprep.subr.mxu0 %v2649_v23  ;;  %2957 = vmatprep.subr.mxu1 %v2651_v24  ;;  %v3124_v23 = vld [vmem:[#allocation4 + $0x280] sm:$0xff]  ;;  %v3126_v24 = vld [vmem:[#allocation4 + $0x290] sm:$0xff] }
 0x4df   :  { %2887 = vmatpush2.msra.mxu0 %v2648_v26  ;;  %2958 = vmatpush2.msra.mxu1 %v2650_v28  ;;  %v3117_v26 = vld [vmem:[#allocation4 + $0x248] sm:$0xff]  ;;  %v3119_v28 = vld [vmem:[#allocation4 + $0x258] sm:$0xff] }
 0x4e0   :  { %2888 = vmatprep.subr.mxu0 %v2641_v29  ;;  %2959 = vmatprep.subr.mxu1 %v2643_v30  ;;  %v3116_v29 = vld [vmem:[#allocation4 + $0x240] sm:$0xff]  ;;  %v3118_v30 = vld [vmem:[#allocation4 + $0x250] sm:$0xff] }
 0x4e1   :  { %2889 = vmatpush2.msra.mxu0 %v2640_v31  ;;  %2960 = vmatpush2.msra.mxu1 %v2642_v32  ;;  %v3109_v31 = vld [vmem:[#allocation4 + $0x208] sm:$0xff]  ;;  %v3111_v32 = vld [vmem:[#allocation4 + $0x218] sm:$0xff] }
 0x4e2   :  { %2890 = vmatprep.subr.mxu0 %v2633_v33  ;;  %2961 = vmatprep.subr.mxu1 %v2635_v34  ;;  %v3108_v33 = vld [vmem:[#allocation4 + $0x200] sm:$0xff]  ;;  %v3110_v34 = vld [vmem:[#allocation4 + $0x210] sm:$0xff] }
 0x4e3   :  { %2891 = vmatpush2.msra.mxu0 %v2632_v37  ;;  %2962 = vmatpush2.msra.mxu1 %v2634_v22  ;;  %v3101_v37 = vld [vmem:[#allocation4 + $0x1c8] sm:$0xff]  ;;  %v3103_v22 = vld [vmem:[#allocation4 + $0x1d8] sm:$0xff] }
 0x4e4   :  { %2892 = vmatprep.subr.mxu0 %v2625_v21  ;;  %2963 = vmatprep.subr.mxu1 %v2627_v40  ;;  %v3100_v21 = vld [vmem:[#allocation4 + $0x1c0] sm:$0xff]  ;;  %v3102_v40 = vld [vmem:[#allocation4 + $0x1d0] sm:$0xff] }
 0x4e5   :  { %2893 = vmatpush2.msra.mxu0 %v2624_v36  ;;  %2964 = vmatpush2.msra.mxu1 %v2626_v43  ;;  %v3093_v36 = vld [vmem:[#allocation4 + $0x188] sm:$0xff]  ;;  %v3095_v43 = vld [vmem:[#allocation4 + $0x198] sm:$0xff] }
 0x4e6   :  { %2894 = vmatprep.subr.mxu0 %v2617_v44  ;;  %2965 = vmatprep.subr.mxu1 %v2619_v45  ;;  %v3092_v44 = vld [vmem:[#allocation4 + $0x180] sm:$0xff]  ;;  %v3094_v45 = vld [vmem:[#allocation4 + $0x190] sm:$0xff] }
 0x4e7   :  { %2895 = vmatpush2.msra.mxu0 %v2616_v46  ;;  %2966 = vmatpush2.msra.mxu1 %v2618_v47  ;;  %v3085_v46 = vld [vmem:[#allocation4 + $0x148] sm:$0xff]  ;;  %v3087_v47 = vld [vmem:[#allocation4 + $0x158] sm:$0xff] }
 0x4e8   :  { %2896 = vmatprep.subr.mxu0 %v2609_v49  ;;  %2967 = vmatprep.subr.mxu1 %v2611_v27  ;;  %v3084_v49 = vld [vmem:[#allocation4 + $0x140] sm:$0xff]  ;;  %v3086_v27 = vld [vmem:[#allocation4 + $0x150] sm:$0xff] }
 0x4e9   :  { %2897 = vmatpush2.msra.mxu0 %v2608_v50  ;;  %2968 = vmatpush2.msra.mxu1 %v2610_v51  ;;  %v3077_v50 = vld [vmem:[#allocation4 + $0x108] sm:$0xff]  ;;  %v3079_v51 = vld [vmem:[#allocation4 + $0x118] sm:$0xff] }
 0x4ea   :  { %2898 = vmatprep.subr.mxu0 %v2601_v38  ;;  %2969 = vmatprep.subr.mxu1 %v2603_v39  ;;  %v3076_v38 = vld [vmem:[#allocation4 + $0x100] sm:$0xff]  ;;  %v3078_v39 = vld [vmem:[#allocation4 + $0x110] sm:$0xff] }
 0x4eb   :  { %2899 = vmatpush2.msra.mxu0 %v2600_v53  ;;  %2970 = vmatpush2.msra.mxu1 %v2602_v54  ;;  %v3069_v53 = vld [vmem:[#allocation4 + $0xc8] sm:$0xff]  ;;  %v3071_v54 = vld [vmem:[#allocation4 + $0xd8] sm:$0xff] }
 0x4ec   :  { %2900 = vmatprep.subr.mxu0 %v2593_v55  ;;  %2971 = vmatprep.subr.mxu1 %v2595_v56  ;;  %v3068_v55 = vld [vmem:[#allocation4 + $0xc0] sm:$0xff]  ;;  %v3070_v56 = vld [vmem:[#allocation4 + $0xd0] sm:$0xff] }
 0x4ed   :  { %2901 = vmatpush2.msra.mxu0 %v2592_v41  ;;  %2972 = vmatpush2.msra.mxu1 %v2594_v57  ;;  %v3061_v41 = vld [vmem:[#allocation4 + $0x88] sm:$0xff]  ;;  %v3063_v57 = vld [vmem:[#allocation4 + $0x98] sm:$0xff] }
 0x4ee   :  { %2902 = vmatprep.subr.mxu0 %v2585_v42  ;;  %2973 = vmatprep.subr.mxu1 %v2587_v58  ;;  %v3060_v42 = vld [vmem:[#allocation4 + $0x80] sm:$0xff]  ;;  %v3062_v58 = vld [vmem:[#allocation4 + $0x90] sm:$0xff] }
 0x4ef   :  { %2903 = vmatpush2.msra.mxu0 %v2584_v59  ;;  %2974 = vmatpush2.msra.mxu1 %v2586_v61  ;;  %v3053_v59 = vld [vmem:[#allocation4 + $0x48] sm:$0xff]  ;;  %v3055_v61 = vld [vmem:[#allocation4 + $0x58] sm:$0xff] }
 0x4f0   :  { %2904 = vmatprep.subr.mxu0 %v2577_v48  ;;  %2975 = vmatprep.subr.mxu1 %v2579_v62  ;;  %v3052_v48 = vld [vmem:[#allocation4 + $0x40] sm:$0xff]  ;;  %v3054_v62 = vld [vmem:[#allocation4 + $0x50] sm:$0xff] }
 0x4f1   :  { %2905 = vmatpush2.msra.mxu0 %v2576_v63  ;;  %2976 = vmatpush2.msra.mxu1 %v2578_v0  ;;  %v3045_v63 = vld [vmem:[#allocation4 + $0x8] sm:$0xff]  ;;  %v3047_v0 = vld [vmem:[#allocation4 + $0x18] sm:$0xff] }
 0x4f2   :  { %2907 = vmatmul.mubr.f32.vlgmr.msra.gmra.mxu0 %v6233_v60  ;;  %2978 = vmatmul.mubr.f32.vlgmr.msra.gmra.mxu1 %v6233_v60  ;;  %v3141_v60 = vld [vmem:[#allocation4 + $0x308] sm:$0xff] }
 0x4f3   :  { %3300 = vmatprep.subr.mxu0 %v3165_v25  ;;  %3371 = vmatprep.subr.mxu1 %v3167_v1  ;;  %v3044_v25 = vld [vmem:[#allocation4] sm:$0xff]  ;;  %v3046_v1 = vld [vmem:[#allocation4 + $0x10] sm:$0xff] }
 0x4f4   :  { %3301 = vmatpush1.msra.mxu0 %v3164_v2  ;;  %3372 = vmatpush1.msra.mxu1 %v3166_v3  ;;  %v3293_v2 = vld [vmem:[#allocation4 + $0x7c8] sm:$0xff]  ;;  %v3295_v3 = vld [vmem:[#allocation4 + $0x7d8] sm:$0xff] }
 0x4f5   :  { %3302 = vmatprep.subr.mxu0 %v3157_v4  ;;  %3373 = vmatprep.subr.mxu1 %v3159_v5  ;;  %v3292_v4 = vld [vmem:[#allocation4 + $0x7c0] sm:$0xff]  ;;  %v3294_v5 = vld [vmem:[#allocation4 + $0x7d0] sm:$0xff] }
 0x4f6   :  { %3303 = vmatpush1.msra.mxu0 %v3156_v6  ;;  %3374 = vmatpush1.msra.mxu1 %v3158_v7  ;;  %v3285_v6 = vld [vmem:[#allocation4 + $0x788] sm:$0xff]  ;;  %v3287_v7 = vld [vmem:[#allocation4 + $0x798] sm:$0xff] }
 0x4f7   :  { %3304 = vmatprep.subr.mxu0 %v3149_v8  ;;  %3375 = vmatprep.subr.mxu1 %v3151_v9  ;;  %v3284_v8 = vld [vmem:[#allocation4 + $0x780] sm:$0xff]  ;;  %v3286_v9 = vld [vmem:[#allocation4 + $0x790] sm:$0xff] }
 0x4f8   :  { %3305 = vmatpush1.msra.mxu0 %v3148_v10  ;;  %3376 = vmatpush1.msra.mxu1 %v3150_v11  ;;  %v3277_v10 = vld [vmem:[#allocation4 + $0x748] sm:$0xff]  ;;  %v3279_v11 = vld [vmem:[#allocation4 + $0x758] sm:$0xff] }
 0x4f9   :  { %3306 = vmatprep.subr.mxu0 %v3141_v60  ;;  %3377 = vmatprep.subr.mxu1 %v3143_v12  ;;  %v3276_v60 = vld [vmem:[#allocation4 + $0x740] sm:$0xff]  ;;  %v3278_v12 = vld [vmem:[#allocation4 + $0x750] sm:$0xff] }
 0x4fa   :  { %3307 = vmatpush1.msra.mxu0 %v3140_v13  ;;  %3378 = vmatpush1.msra.mxu1 %v3142_v14  ;;  %v3269_v13 = vld [vmem:[#allocation4 + $0x708] sm:$0xff]  ;;  %v3271_v14 = vld [vmem:[#allocation4 + $0x718] sm:$0xff] }
 0x4fb   :  { %3308 = vmatprep.subr.mxu0 %v3133_v15  ;;  %3379 = vmatprep.subr.mxu1 %v3135_v16  ;;  %v3268_v15 = vld [vmem:[#allocation4 + $0x700] sm:$0xff]  ;;  %v3270_v16 = vld [vmem:[#allocation4 + $0x710] sm:$0xff] }
 0x4fc   :  { %3309 = vmatpush1.msra.mxu0 %v3132_v17  ;;  %3380 = vmatpush1.msra.mxu1 %v3134_v18  ;;  %v3261_v17 = vld [vmem:[#allocation4 + $0x6c8] sm:$0xff]  ;;  %v3263_v18 = vld [vmem:[#allocation4 + $0x6d8] sm:$0xff] }
 0x4fd   :  { %3310 = vmatprep.subr.mxu0 %v3125_v19  ;;  %3381 = vmatprep.subr.mxu1 %v3127_v20  ;;  %v3260_v19 = vld [vmem:[#allocation4 + $0x6c0] sm:$0xff]  ;;  %v3262_v20 = vld [vmem:[#allocation4 + $0x6d0] sm:$0xff] }
 0x4fe   :  { %3311 = vmatpush1.msra.mxu0 %v3124_v23  ;;  %3382 = vmatpush1.msra.mxu1 %v3126_v24  ;;  %v3253_v23 = vld [vmem:[#allocation4 + $0x688] sm:$0xff]  ;;  %v3255_v24 = vld [vmem:[#allocation4 + $0x698] sm:$0xff] }
 0x4ff   :  { %3312 = vmatprep.subr.mxu0 %v3117_v26  ;;  %3383 = vmatprep.subr.mxu1 %v3119_v28  ;;  %v3252_v26 = vld [vmem:[#allocation4 + $0x680] sm:$0xff]  ;;  %v3254_v28 = vld [vmem:[#allocation4 + $0x690] sm:$0xff] }
 0x500   :  { %3313 = vmatpush1.msra.mxu0 %v3116_v29  ;;  %3384 = vmatpush1.msra.mxu1 %v3118_v30  ;;  %v3245_v29 = vld [vmem:[#allocation4 + $0x648] sm:$0xff]  ;;  %v3247_v30 = vld [vmem:[#allocation4 + $0x658] sm:$0xff] }
 0x501   :  { %3314 = vmatprep.subr.mxu0 %v3109_v31  ;;  %3385 = vmatprep.subr.mxu1 %v3111_v32  ;;  %v3244_v31 = vld [vmem:[#allocation4 + $0x640] sm:$0xff]  ;;  %v3246_v32 = vld [vmem:[#allocation4 + $0x650] sm:$0xff] }
 0x502   :  { %3315 = vmatpush1.msra.mxu0 %v3108_v33  ;;  %3386 = vmatpush1.msra.mxu1 %v3110_v34  ;;  %v3237_v33 = vld [vmem:[#allocation4 + $0x608] sm:$0xff]  ;;  %v3239_v34 = vld [vmem:[#allocation4 + $0x618] sm:$0xff] }
 0x503   :  { %3316 = vmatprep.subr.mxu0 %v3101_v37  ;;  %3387 = vmatprep.subr.mxu1 %v3103_v22  ;;  %v3236_v37 = vld [vmem:[#allocation4 + $0x600] sm:$0xff]  ;;  %v3238_v22 = vld [vmem:[#allocation4 + $0x610] sm:$0xff] }
 0x504   :  { %3317 = vmatpush1.msra.mxu0 %v3100_v21  ;;  %3388 = vmatpush1.msra.mxu1 %v3102_v40  ;;  %v3229_v21 = vld [vmem:[#allocation4 + $0x5c8] sm:$0xff]  ;;  %v3231_v40 = vld [vmem:[#allocation4 + $0x5d8] sm:$0xff] }
 0x505   :  { %3318 = vmatprep.subr.mxu0 %v3093_v36  ;;  %3389 = vmatprep.subr.mxu1 %v3095_v43  ;;  %v3228_v36 = vld [vmem:[#allocation4 + $0x5c0] sm:$0xff]  ;;  %v3230_v43 = vld [vmem:[#allocation4 + $0x5d0] sm:$0xff] }
 0x506   :  { %3319 = vmatpush1.msra.mxu0 %v3092_v44  ;;  %3390 = vmatpush1.msra.mxu1 %v3094_v45  ;;  %v3221_v44 = vld [vmem:[#allocation4 + $0x588] sm:$0xff]  ;;  %v3223_v45 = vld [vmem:[#allocation4 + $0x598] sm:$0xff] }
 0x507   :  { %3320 = vmatprep.subr.mxu0 %v3085_v46  ;;  %3391 = vmatprep.subr.mxu1 %v3087_v47  ;;  %v3220_v46 = vld [vmem:[#allocation4 + $0x580] sm:$0xff]  ;;  %v3222_v47 = vld [vmem:[#allocation4 + $0x590] sm:$0xff] }
 0x508   :  { %3321 = vmatpush1.msra.mxu0 %v3084_v49  ;;  %3392 = vmatpush1.msra.mxu1 %v3086_v27  ;;  %v3213_v49 = vld [vmem:[#allocation4 + $0x548] sm:$0xff]  ;;  %v3215_v27 = vld [vmem:[#allocation4 + $0x558] sm:$0xff] }
 0x509   :  { %3322 = vmatprep.subr.mxu0 %v3077_v50  ;;  %3393 = vmatprep.subr.mxu1 %v3079_v51  ;;  %v3212_v50 = vld [vmem:[#allocation4 + $0x540] sm:$0xff]  ;;  %v3214_v51 = vld [vmem:[#allocation4 + $0x550] sm:$0xff] }
 0x50a   :  { %3323 = vmatpush1.msra.mxu0 %v3076_v38  ;;  %3394 = vmatpush1.msra.mxu1 %v3078_v39  ;;  %v3205_v38 = vld [vmem:[#allocation4 + $0x508] sm:$0xff]  ;;  %v3207_v39 = vld [vmem:[#allocation4 + $0x518] sm:$0xff] }
 0x50b   :  { %3324 = vmatprep.subr.mxu0 %v3069_v53  ;;  %3395 = vmatprep.subr.mxu1 %v3071_v54  ;;  %v3204_v53 = vld [vmem:[#allocation4 + $0x500] sm:$0xff]  ;;  %v3206_v54 = vld [vmem:[#allocation4 + $0x510] sm:$0xff] }
 0x50c   :  { %3325 = vmatpush1.msra.mxu0 %v3068_v55  ;;  %3396 = vmatpush1.msra.mxu1 %v3070_v56  ;;  %v3197_v55 = vld [vmem:[#allocation4 + $0x4c8] sm:$0xff]  ;;  %v3199_v56 = vld [vmem:[#allocation4 + $0x4d8] sm:$0xff] }
 0x50d   :  { %3326 = vmatprep.subr.mxu0 %v3061_v41  ;;  %3397 = vmatprep.subr.mxu1 %v3063_v57  ;;  %v3196_v41 = vld [vmem:[#allocation4 + $0x4c0] sm:$0xff]  ;;  %v3198_v57 = vld [vmem:[#allocation4 + $0x4d0] sm:$0xff] }
 0x50e   :  { %3327 = vmatpush1.msra.mxu0 %v3060_v42  ;;  %3398 = vmatpush1.msra.mxu1 %v3062_v58  ;;  %v3189_v42 = vld [vmem:[#allocation4 + $0x488] sm:$0xff]  ;;  %v3191_v58 = vld [vmem:[#allocation4 + $0x498] sm:$0xff] }
 0x50f   :  { %3328 = vmatprep.subr.mxu0 %v3053_v59  ;;  %3399 = vmatprep.subr.mxu1 %v3055_v61  ;;  %v3188_v59 = vld [vmem:[#allocation4 + $0x480] sm:$0xff]  ;;  %v3190_v61 = vld [vmem:[#allocation4 + $0x490] sm:$0xff] }
 0x510   :  { %3329 = vmatpush1.msra.mxu0 %v3052_v48  ;;  %3400 = vmatpush1.msra.mxu1 %v3054_v62  ;;  %v3181_v48 = vld [vmem:[#allocation4 + $0x448] sm:$0xff]  ;;  %v3183_v62 = vld [vmem:[#allocation4 + $0x458] sm:$0xff] }
 0x511   :  { %3330 = vmatprep.subr.mxu0 %v3045_v63  ;;  %3401 = vmatprep.subr.mxu1 %v3047_v0  ;;  %v3180_v63 = vld [vmem:[#allocation4 + $0x440] sm:$0xff]  ;;  %v3182_v0 = vld [vmem:[#allocation4 + $0x450] sm:$0xff] }
 0x512   :  { %3331 = vmatpush1.msra.mxu0 %v3044_v25  ;;  %3402 = vmatpush1.msra.mxu1 %v3046_v1  ;;  %v3173_v25 = vld [vmem:[#allocation4 + $0x408] sm:$0xff]  ;;  %v3175_v1 = vld [vmem:[#allocation4 + $0x418] sm:$0xff] }
 0x513   :  { %3332 = vmatprep.subr.mxu0 %v3293_v2  ;;  %3403 = vmatprep.subr.mxu1 %v3295_v3  ;;  %v3172_v2 = vld [vmem:[#allocation4 + $0x400] sm:$0xff]  ;;  %v3174_v3 = vld [vmem:[#allocation4 + $0x410] sm:$0xff] }
 0x514   :  { %3333 = vmatpush2.msra.mxu0 %v3292_v4  ;;  %3404 = vmatpush2.msra.mxu1 %v3294_v5  ;;  %v3169_v4 = vld [vmem:[#allocation4 + $0x3e8] sm:$0xff]  ;;  %v3171_v5 = vld [vmem:[#allocation4 + $0x3f8] sm:$0xff] }
 0x515   :  { %3334 = vmatprep.subr.mxu0 %v3285_v6  ;;  %3405 = vmatprep.subr.mxu1 %v3287_v7 }
 0x516   :  { %3335 = vmatpush2.msra.mxu0 %v3284_v8  ;;  %3406 = vmatpush2.msra.mxu1 %v3286_v9  ;;  %v2438_v8 = vld [vmem:[#allocation2 + $0x8] sm:$0xf] }
 0x517   :  { %3336 = vmatprep.subr.mxu0 %v3277_v10  ;;  %3407 = vmatprep.subr.mxu1 %v3279_v11  ;;  %v2436_v10 = vld [vmem:[#allocation2 + $0x128] sm:$0xf] }
 0x518   :  { %3337 = vmatpush2.msra.mxu0 %v3276_v60  ;;  %3408 = vmatpush2.msra.mxu1 %v3278_v12 }
 0x519   :  { %3338 = vmatprep.subr.mxu0 %v3269_v13  ;;  %3409 = vmatprep.subr.mxu1 %v3271_v14  ;;  %v2439_v13 = vld [vmem:[#allocation2 + $0x98] sm:$0xf] }
 0x51a   :  { %3339 = vmatpush2.msra.mxu0 %v3268_v15  ;;  %3410 = vmatpush2.msra.mxu1 %v3270_v16  ;;  %v2437_v15 = vld [vmem:[#allocation2 + $0x110] sm:$0xf] }
 0x51b   :  { %3340 = vmatprep.subr.mxu0 %v3261_v17  ;;  %3411 = vmatprep.subr.mxu1 %v3263_v18  ;;  %v2442_v17 = vld [vmem:[#allocation2 + $0xe0] sm:$0xf] }
 0x51c   :  { %3341 = vmatpush2.msra.mxu0 %v3260_v19  ;;  %3412 = vmatpush2.msra.mxu1 %v3262_v20  ;;  %v2443_v20 = vld [vmem:[#allocation2 + $0x88] sm:$0xf] }
 0x51d   :  { %3342 = vmatprep.subr.mxu0 %v3253_v23  ;;  %3413 = vmatprep.subr.mxu1 %v3255_v24 }
 0x51e   :  { %3343 = vmatpush2.msra.mxu0 %v3252_v26  ;;  %3414 = vmatpush2.msra.mxu1 %v3254_v28 }
 0x51f   :  { %3344 = vmatprep.subr.mxu0 %v3245_v29  ;;  %3415 = vmatprep.subr.mxu1 %v3247_v30 }
 0x520   :  { %3345 = vmatpush2.msra.mxu0 %v3244_v31  ;;  %3416 = vmatpush2.msra.mxu1 %v3246_v32  ;;  %v2440_v31 = vld [vmem:[#allocation2 + $0xa8] sm:$0xf] }
 0x521   :  { %3346 = vmatprep.subr.mxu0 %v3237_v33  ;;  %3417 = vmatprep.subr.mxu1 %v3239_v34 }
 0x522   :  { %3347 = vmatpush2.msra.mxu0 %v3236_v37  ;;  %3418 = vmatpush2.msra.mxu1 %v3238_v22  ;;  %v2441_v22 = vld [vmem:[#allocation2 + $0x90] sm:$0xf] }
 0x523   :  { %3348 = vmatprep.subr.mxu0 %v3229_v21  ;;  %3419 = vmatprep.subr.mxu1 %v3231_v40 }
 0x524   :  { %3349 = vmatpush2.msra.mxu0 %v3228_v36  ;;  %3420 = vmatpush2.msra.mxu1 %v3230_v43 }
 0x525   :  { %3350 = vmatprep.subr.mxu0 %v3221_v44  ;;  %3421 = vmatprep.subr.mxu1 %v3223_v45 }
 0x526   :  { %3351 = vmatpush2.msra.mxu0 %v3220_v46  ;;  %3422 = vmatpush2.msra.mxu1 %v3222_v47  ;;  %v3014_v46 = vrot.slane %v6227_v35, 4 }
 0x527   :  { %3352 = vmatprep.subr.mxu0 %v3213_v49  ;;  %3423 = vmatprep.subr.mxu1 %v3215_v27 }
 0x528   :  { %3353 = vmatpush2.msra.mxu0 %v3212_v50  ;;  %3424 = vmatpush2.msra.mxu1 %v3214_v51  ;;  %v3015_v51 = vrot.slane %v6230_v52, 4 }
 0x529   :  { %3354 = vmatprep.subr.mxu0 %v3205_v38  ;;  %3425 = vmatprep.subr.mxu1 %v3207_v39 }
 0x52a   :  { %3355 = vmatpush2.msra.mxu0 %v3204_v53  ;;  %3426 = vmatpush2.msra.mxu1 %v3206_v54 }
 0x52b   :  { %3356 = vmatprep.subr.mxu0 %v3197_v55  ;;  %3427 = vmatprep.subr.mxu1 %v3199_v56 }
 0x52c   :  { %3357 = vmatpush2.msra.mxu0 %v3196_v41  ;;  %3428 = vmatpush2.msra.mxu1 %v3198_v57 }
 0x52d   :  { %3358 = vmatprep.subr.mxu0 %v3189_v42  ;;  %3429 = vmatprep.subr.mxu1 %v3191_v58 }
 0x52e   :  { %3359 = vmatpush2.msra.mxu0 %v3188_v59  ;;  %3430 = vmatpush2.msra.mxu1 %v3190_v61 }
 0x52f   :  { %3360 = vmatprep.subr.mxu0 %v3181_v48  ;;  %3431 = vmatprep.subr.mxu1 %v3183_v62 }
 0x530   :  { %3361 = vmatpush2.msra.mxu0 %v3180_v63  ;;  %3432 = vmatpush2.msra.mxu1 %v3182_v0  ;;  %v3168_v0 = vld [vmem:[#allocation4 + $0x3e0] sm:$0xff] }
 0x531   :  { %3362 = vmatprep.subr.mxu0 %v3173_v25  ;;  %3433 = vmatprep.subr.mxu1 %v3175_v1  ;;  %v3170_v25 = vld [vmem:[#allocation4 + $0x3f0] sm:$0xff] }
 0x532   :  { %3363 = vmatpush2.msra.mxu0 %v3172_v2  ;;  %3434 = vmatpush2.msra.mxu1 %v3174_v3  ;;  %v3161_v2 = vld [vmem:[#allocation4 + $0x3a8] sm:$0xff]  ;;  %v3163_v3 = vld [vmem:[#allocation4 + $0x3b8] sm:$0xff] }
 0x533   :  { %3442 = vmatprep.subr.mxu0 %v3169_v4  ;;  %3513 = vmatprep.subr.mxu1 %v3171_v5  ;;  %v3160_v4 = vld [vmem:[#allocation4 + $0x3a0] sm:$0xff]  ;;  %v3162_v5 = vld [vmem:[#allocation4 + $0x3b0] sm:$0xff] }
 0x571   :  { %v2837_v6 = vpop.f32.mrf.mxu1  ;;  %v2766_v7 = vpop.f32.mrf.mxu0 }
 0x572   :  { %v2986_v11 = vadd.f32 %v2837_v6, %v2438_v8  ;;  %v2984_v60 = vadd.f32 %v2766_v7, %v2436_v10  ;;  %v3153_v6 = vld [vmem:[#allocation4 + $0x368] sm:$0xff]  ;;  %v3155_v7 = vld [vmem:[#allocation4 + $0x378] sm:$0xff]  ;;  %v3152_v8 = vld [vmem:[#allocation4 + $0x360] sm:$0xff] }
 0x573   :  { %v2839_v9 = vpop.f32.mrf.mxu1  ;;  %v2768_v12 = vpop.f32.mrf.mxu0  ;;  %v3145_v10 = vld [vmem:[#allocation4 + $0x328] sm:$0xff] }
 0x574   :  { %v2987_v14 = vadd.f32 %v2839_v9, %v2439_v13  ;;  %5838 = vtanh.f32 %v2986_v11  ;;  %v2985_v16 = vadd.f32 %v2768_v12, %v2437_v15  ;;  %v3154_v9 = vld [vmem:[#allocation4 + $0x370] sm:$0xff]  ;;  %v3147_v11 = vld [vmem:[#allocation4 + $0x338] sm:$0xff]  ;;  %v3137_v13 = vld [vmem:[#allocation4 + $0x2e8] sm:$0xff] }
 0x575   :  { %5840 = vtanh.f32 %v2984_v60  ;;  %v3144_v60 = vld [vmem:[#allocation4 + $0x320] sm:$0xff]  ;;  %v3146_v12 = vld [vmem:[#allocation4 + $0x330] sm:$0xff] }
 0x576   :  { %5842 = vtanh.f32 %v2987_v14  ;;  %v3139_v14 = vld [vmem:[#allocation4 + $0x2f8] sm:$0xff]  ;;  %v3136_v15 = vld [vmem:[#allocation4 + $0x2e0] sm:$0xff] }
 0x577   :  { %5844 = vtanh.f32 %v2985_v16  ;;  %v3138_v16 = vld [vmem:[#allocation4 + $0x2f0] sm:$0xff] }
 0x581   :  { %v5839_v28 = vpop.eup %5838 }
 0x582   :  { %v5841_v29 = vpop.eup %5840  ;;  %v3002_v33 = vmul.f32 0.5, %v5839_v28  ;;  %v3122_v28 = vld [vmem:[#allocation4 + $0x270] sm:$0xff] }
 0x583   :  { %v5843_v30 = vpop.eup %5842  ;;  %v3000_v21 = vmul.f32 0.5, %v5841_v29  ;;  %v3113_v29 = vld [vmem:[#allocation4 + $0x228] sm:$0xff] }
 0x584   :  { %v5845_v37 = vpop.eup %5844  ;;  %v3003_v40 = vmul.f32 0.5, %v5843_v30  ;;  %v3008_v43 = vadd.f32 0.5, %v3002_v33  ;;  %v3115_v30 = vld [vmem:[#allocation4 + $0x238] sm:$0xff]  ;;  %v3105_v33 = vld [vmem:[#allocation4 + $0x1e8] sm:$0xff] }
 0x585   :  { %v3001_v44 = vmul.f32 0.5, %v5845_v37  ;;  %v3006_v45 = vadd.f32 0.5, %v3000_v21  ;;  %v3104_v37 = vld [vmem:[#allocation4 + $0x1e0] sm:$0xff]  ;;  %v3097_v21 = vld [vmem:[#allocation4 + $0x1a8] sm:$0xff] }
 0x586   :  { %v3009_v47 = vadd.f32 0.5, %v3003_v40  ;;  %v3018_v27 = vmul.f32 %v3014_v46, %v3008_v43  ;;  %v3099_v40 = vld [vmem:[#allocation4 + $0x1b8] sm:$0xff]  ;;  %v3098_v43 = vld [vmem:[#allocation4 + $0x1b0] sm:$0xff]  ;;  %v3088_v46 = vld [vmem:[#allocation4 + $0x160] sm:$0xff] }
 0x587   :  { %v3007_v50 = vadd.f32 0.5, %v3001_v44  ;;  %v3089_v44 = vld [vmem:[#allocation4 + $0x168] sm:$0xff] }
 0x588   :  { %v3019_v53 = vmul.f32 %v3015_v51, %v3009_v47  ;;  %v3090_v47 = vld [vmem:[#allocation4 + $0x170] sm:$0xff] }
 0x589   :  { %v3082_v51 = vld [vmem:[#allocation4 + $0x130] sm:$0xff] }
 0x5b2   :  { %v2979_v18 = vpop.f32.mrf.mxu1  ;;  %v2908_v26 = vpop.f32.mrf.mxu0 }
 0x5b3   :  { %v2990_v19 = vadd.f32 %v2979_v18, %v2442_v17  ;;  %v2988_v34 = vadd.f32 %v2908_v26, %v2440_v31  ;;  %v3129_v17 = vld [vmem:[#allocation4 + $0x2a8] sm:$0xff]  ;;  %v3131_v18 = vld [vmem:[#allocation4 + $0x2b8] sm:$0xff]  ;;  %v3120_v26 = vld [vmem:[#allocation4 + $0x260] sm:$0xff] }
 0x5b4   :  { %v2981_v23 = vpop.f32.mrf.mxu1  ;;  %v2910_v32 = vpop.f32.mrf.mxu0  ;;  %v3112_v31 = vld [vmem:[#allocation4 + $0x220] sm:$0xff] }
 0x5b5   :  { %v2991_v24 = vadd.f32 %v2981_v23, %v2443_v20  ;;  %5846 = vtanh.f32 %v2990_v19  ;;  %v2989_v36 = vadd.f32 %v2910_v32, %v2441_v22  ;;  %v3128_v19 = vld [vmem:[#allocation4 + $0x2a0] sm:$0xff]  ;;  %v3130_v20 = vld [vmem:[#allocation4 + $0x2b0] sm:$0xff]  ;;  %v3121_v23 = vld [vmem:[#allocation4 + $0x268] sm:$0xff] }
 0x5b6   :  { %v3114_v32 = vld [vmem:[#allocation4 + $0x230] sm:$0xff] }
 0x5b7   :  { %5848 = vtanh.f32 %v2991_v24  ;;  %v3123_v24 = vld [vmem:[#allocation4 + $0x278] sm:$0xff]  ;;  %v3106_v22 = vld [vmem:[#allocation4 + $0x1f0] sm:$0xff] }
 0x5b8   :  { %5850 = vtanh.f32 %v2988_v34  ;;  %v3107_v34 = vld [vmem:[#allocation4 + $0x1f8] sm:$0xff] }
 0x5b9   :  { %5852 = vtanh.f32 %v2989_v36  ;;  %v3096_v36 = vld [vmem:[#allocation4 + $0x1a0] sm:$0xff] }
 0x5c2   :  { %v5847_v49 = vpop.eup %5846 }
 0x5c3   :  { %v3020_v38 = vmul.f32 %v5847_v49, %v3006_v45  ;;  %v3091_v45 = vld [vmem:[#allocation4 + $0x178] sm:$0xff]  ;;  %v3081_v49 = vld [vmem:[#allocation4 + $0x128] sm:$0xff] }
 0x5c4   :  { %v5849_v39 = vpop.eup %5848 }
 0x5c5   :  { %v6242_v54 = vadd.f32 %v3020_v38, %v3018_v27  ;;  %v3021_v55 = vmul.f32 %v5849_v39, %v3007_v50  ;;  %v5851_v35 = vpop.eup %5850  ;;  %v3083_v27 = vld [vmem:[#allocation4 + $0x138] sm:$0xff]  ;;  %v3080_v50 = vld [vmem:[#allocation4 + $0x120] sm:$0xff]  ;;  %v3073_v38 = vld [vmem:[#allocation4 + $0xe8] sm:$0xff] }
 0x5c6   :  { %v5853_v41 = vpop.eup %5852  ;;  %v3004_v57 = vmul.f32 0.5, %v5851_v35  ;;  %v3075_v39 = vld [vmem:[#allocation4 + $0xf8] sm:$0xff]  ;;  %v3065_v35 = vld [vmem:[#allocation4 + $0xa8] sm:$0xff] }
 0x5c7   :  { %5854 = vtanh.f32 %v6242_v54  ;;  %v6245_v56 = vadd.f32 %v3021_v55, %v3019_v53  ;;  %v3005_v42 = vmul.f32 0.5, %v5853_v41  ;;  %v3072_v53 = vld [vmem:[#allocation4 + $0xe0] sm:$0xff]  ;;  %v3074_v55 = vld [vmem:[#allocation4 + $0xf0] sm:$0xff]  ;;  %v3067_v41 = vld [vmem:[#allocation4 + $0xb8] sm:$0xff] }
 0x5c8   :  { %v3010_v58 = vadd.f32 0.5, %v3004_v57  ;;  %v3064_v57 = vld [vmem:[#allocation4 + $0xa0] sm:$0xff] }
 0x5c9   :  { %5856 = vtanh.f32 %v6245_v56  ;;  %v3011_v61 = vadd.f32 0.5, %v3005_v42  ;;  %v3066_v42 = vld [vmem:[#allocation4 + $0xb0] sm:$0xff] }
 0x5d4   :  { %v5855_v59 = vpop.eup %5854 }
 0x5d5   :  { %v6248_v52 = vmul.f32 %v5855_v59, %v3010_v58  ;;  %v3057_v58 = vld [vmem:[#allocation4 + $0x68] sm:$0xff]  ;;  %v3059_v59 = vld [vmem:[#allocation4 + $0x78] sm:$0xff] }
 0x5d6   :  { %v5857_v48 = vpop.eup %5856 }
 0x5d7   :  { %v3027_v62 = vmul.f32 %v5857_v48, %v3011_v61  ;;  %v3030_v63 = vrot.slane %v6248_v52, 4  ;;  %v3056_v61 = vld [vmem:[#allocation4 + $0x60] sm:$0xff]  ;;  %v3058_v48 = vld [vmem:[#allocation4 + $0x70] sm:$0xff] }
 0x5d9   :  { %v3031_v1 = vrot.slane %v3027_v62, 4  ;;  %3364 = vmatprep.mubr.f32.mxu0 %v3027_v62  ;;  %3435 = vmatprep.mubr.f32.mxu1 %v3027_v62  ;;  %3034 = vst [vmem:[#allocation3 + $0x38] sm:$0xf0] %v3030_v63  ;;  %v3051_v63 = vld [vmem:[#allocation4 + $0x38] sm:$0xff] }
 0x5da   :  { %3365 = vmatmul.mubr.f32.vlgmr.msra.gmra.mxu0 %v6248_v52  ;;  %3436 = vmatmul.mubr.f32.vlgmr.msra.gmra.mxu1 %v6248_v52 }
 0x5db   :  { %3035 = vst [vmem:[#allocation3 + $0x8] sm:$0xf0] %v3031_v1  ;;  %3443 = vmatpush1.msra.mxu0 %v3168_v0  ;;  %3514 = vmatpush1.msra.mxu1 %v3170_v25  ;;  %v3048_v0 = vld [vmem:[#allocation4 + $0x20] sm:$0xff]  ;;  %v3050_v25 = vld [vmem:[#allocation4 + $0x30] sm:$0xff]  ;;  %v3297_v1 = vld [vmem:[#allocation4 + $0x7e8] sm:$0xff] }
 0x5dc   :  { %3444 = vmatprep.subr.mxu0 %v3161_v2  ;;  %3506 = vmatprep.mubr.f32.mxu0 %v3027_v62  ;;  %v3299_v2 = vld [vmem:[#allocation4 + $0x7f8] sm:$0xff] }
 0x5dd   :  { %3515 = vmatprep.subr.mxu1 %v3163_v3  ;;  %3577 = vmatprep.mubr.f32.mxu1 %v3027_v62  ;;  %v3049_v62 = vld [vmem:[#allocation4 + $0x28] sm:$0xff]  ;;  %v3296_v3 = vld [vmem:[#allocation4 + $0x7e0] sm:$0xff] }
 0x5de   :  { %3445 = vmatpush1.msra.mxu0 %v3160_v4  ;;  %3516 = vmatpush1.msra.mxu1 %v3162_v5  ;;  %v3298_v4 = vld [vmem:[#allocation4 + $0x7f0] sm:$0xff]  ;;  %v3289_v5 = vld [vmem:[#allocation4 + $0x7a8] sm:$0xff] }
 0x5df   :  { %3446 = vmatprep.subr.mxu0 %v3153_v6  ;;  %3517 = vmatprep.subr.mxu1 %v3155_v7  ;;  %v3291_v6 = vld [vmem:[#allocation4 + $0x7b8] sm:$0xff]  ;;  %v3288_v7 = vld [vmem:[#allocation4 + $0x7a0] sm:$0xff] }
 0x5e0   :  { %3447 = vmatpush1.msra.mxu0 %v3152_v8  ;;  %3518 = vmatpush1.msra.mxu1 %v3154_v9  ;;  %v3290_v8 = vld [vmem:[#allocation4 + $0x7b0] sm:$0xff]  ;;  %v3281_v9 = vld [vmem:[#allocation4 + $0x768] sm:$0xff] }
 0x5e1   :  { %3448 = vmatprep.subr.mxu0 %v3145_v10  ;;  %3519 = vmatprep.subr.mxu1 %v3147_v11  ;;  %v3283_v10 = vld [vmem:[#allocation4 + $0x778] sm:$0xff]  ;;  %v3280_v11 = vld [vmem:[#allocation4 + $0x760] sm:$0xff] }
 0x5e2   :  { %3449 = vmatpush1.msra.mxu0 %v3144_v60  ;;  %3520 = vmatpush1.msra.mxu1 %v3146_v12  ;;  %v3282_v60 = vld [vmem:[#allocation4 + $0x770] sm:$0xff]  ;;  %v3273_v12 = vld [vmem:[#allocation4 + $0x728] sm:$0xff] }
 0x5e3   :  { %3450 = vmatprep.subr.mxu0 %v3137_v13  ;;  %3521 = vmatprep.subr.mxu1 %v3139_v14  ;;  %v3275_v13 = vld [vmem:[#allocation4 + $0x738] sm:$0xff]  ;;  %v3272_v14 = vld [vmem:[#allocation4 + $0x720] sm:$0xff] }
 0x5e4   :  { %3451 = vmatpush1.msra.mxu0 %v3136_v15  ;;  %3522 = vmatpush1.msra.mxu1 %v3138_v16  ;;  %v3274_v15 = vld [vmem:[#allocation4 + $0x730] sm:$0xff]  ;;  %v3265_v16 = vld [vmem:[#allocation4 + $0x6e8] sm:$0xff] }
 0x5e5   :  { %3452 = vmatprep.subr.mxu0 %v3129_v17  ;;  %3523 = vmatprep.subr.mxu1 %v3131_v18  ;;  %v3267_v17 = vld [vmem:[#allocation4 + $0x6f8] sm:$0xff]  ;;  %v3264_v18 = vld [vmem:[#allocation4 + $0x6e0] sm:$0xff] }
 0x5e6   :  { %3453 = vmatpush1.msra.mxu0 %v3128_v19  ;;  %3524 = vmatpush1.msra.mxu1 %v3130_v20  ;;  %v3266_v19 = vld [vmem:[#allocation4 + $0x6f0] sm:$0xff]  ;;  %v3257_v20 = vld [vmem:[#allocation4 + $0x6a8] sm:$0xff] }
 0x5e7   :  { %3454 = vmatprep.subr.mxu0 %v3121_v23  ;;  %3525 = vmatprep.subr.mxu1 %v3123_v24  ;;  %v3259_v23 = vld [vmem:[#allocation4 + $0x6b8] sm:$0xff]  ;;  %v3256_v24 = vld [vmem:[#allocation4 + $0x6a0] sm:$0xff] }
 0x5e8   :  { %3455 = vmatpush1.msra.mxu0 %v3120_v26  ;;  %3526 = vmatpush1.msra.mxu1 %v3122_v28  ;;  %v3258_v26 = vld [vmem:[#allocation4 + $0x6b0] sm:$0xff]  ;;  %v3249_v28 = vld [vmem:[#allocation4 + $0x668] sm:$0xff] }
 0x5e9   :  { %3456 = vmatprep.subr.mxu0 %v3113_v29  ;;  %3527 = vmatprep.subr.mxu1 %v3115_v30  ;;  %v3251_v29 = vld [vmem:[#allocation4 + $0x678] sm:$0xff]  ;;  %v3248_v30 = vld [vmem:[#allocation4 + $0x660] sm:$0xff] }
 0x5ea   :  { %3457 = vmatpush1.msra.mxu0 %v3112_v31  ;;  %3528 = vmatpush1.msra.mxu1 %v3114_v32  ;;  %v3250_v31 = vld [vmem:[#allocation4 + $0x670] sm:$0xff]  ;;  %v3241_v32 = vld [vmem:[#allocation4 + $0x628] sm:$0xff] }
 0x5eb   :  { %3458 = vmatprep.subr.mxu0 %v3105_v33  ;;  %3529 = vmatprep.subr.mxu1 %v3107_v34  ;;  %v3243_v33 = vld [vmem:[#allocation4 + $0x638] sm:$0xff]  ;;  %v3240_v34 = vld [vmem:[#allocation4 + $0x620] sm:$0xff] }
 0x5ec   :  { %3459 = vmatpush1.msra.mxu0 %v3104_v37  ;;  %3530 = vmatpush1.msra.mxu1 %v3106_v22  ;;  %v3242_v37 = vld [vmem:[#allocation4 + $0x630] sm:$0xff]  ;;  %v3233_v22 = vld [vmem:[#allocation4 + $0x5e8] sm:$0xff] }
 0x5ed   :  { %3460 = vmatprep.subr.mxu0 %v3097_v21  ;;  %3531 = vmatprep.subr.mxu1 %v3099_v40  ;;  %v3235_v21 = vld [vmem:[#allocation4 + $0x5f8] sm:$0xff]  ;;  %v3232_v40 = vld [vmem:[#allocation4 + $0x5e0] sm:$0xff] }
 0x5ee   :  { %3461 = vmatpush1.msra.mxu0 %v3096_v36  ;;  %3532 = vmatpush1.msra.mxu1 %v3098_v43  ;;  %v3234_v36 = vld [vmem:[#allocation4 + $0x5f0] sm:$0xff]  ;;  %v3225_v43 = vld [vmem:[#allocation4 + $0x5a8] sm:$0xff] }
 0x5ef   :  { %3462 = vmatprep.subr.mxu0 %v3089_v44  ;;  %3533 = vmatprep.subr.mxu1 %v3091_v45  ;;  %v3227_v44 = vld [vmem:[#allocation4 + $0x5b8] sm:$0xff]  ;;  %v3224_v45 = vld [vmem:[#allocation4 + $0x5a0] sm:$0xff] }
 0x5f0   :  { %3463 = vmatpush1.msra.mxu0 %v3088_v46  ;;  %3534 = vmatpush1.msra.mxu1 %v3090_v47  ;;  %v3226_v46 = vld [vmem:[#allocation4 + $0x5b0] sm:$0xff]  ;;  %v3217_v47 = vld [vmem:[#allocation4 + $0x568] sm:$0xff] }
 0x5f1   :  { %3464 = vmatprep.subr.mxu0 %v3081_v49  ;;  %3535 = vmatprep.subr.mxu1 %v3083_v27  ;;  %v3219_v49 = vld [vmem:[#allocation4 + $0x578] sm:$0xff]  ;;  %v3216_v27 = vld [vmem:[#allocation4 + $0x560] sm:$0xff] }
 0x5f2   :  { %3465 = vmatpush1.msra.mxu0 %v3080_v50  ;;  %3536 = vmatpush1.msra.mxu1 %v3082_v51  ;;  %v3218_v50 = vld [vmem:[#allocation4 + $0x570] sm:$0xff]  ;;  %v3209_v51 = vld [vmem:[#allocation4 + $0x528] sm:$0xff] }
 0x5f3   :  { %3466 = vmatprep.subr.mxu0 %v3073_v38  ;;  %3537 = vmatprep.subr.mxu1 %v3075_v39  ;;  %v3211_v38 = vld [vmem:[#allocation4 + $0x538] sm:$0xff]  ;;  %v3208_v39 = vld [vmem:[#allocation4 + $0x520] sm:$0xff] }
 0x5f4   :  { %3467 = vmatpush1.msra.mxu0 %v3072_v53  ;;  %3538 = vmatpush1.msra.mxu1 %v3074_v55  ;;  %v3210_v53 = vld [vmem:[#allocation4 + $0x530] sm:$0xff]  ;;  %v3201_v55 = vld [vmem:[#allocation4 + $0x4e8] sm:$0xff] }
 0x5f5   :  { %3468 = vmatprep.subr.mxu0 %v3065_v35  ;;  %3539 = vmatprep.subr.mxu1 %v3067_v41  ;;  %v3203_v35 = vld [vmem:[#allocation4 + $0x4f8] sm:$0xff]  ;;  %v3200_v41 = vld [vmem:[#allocation4 + $0x4e0] sm:$0xff] }
 0x5f6   :  { %3469 = vmatpush1.msra.mxu0 %v3064_v57  ;;  %3540 = vmatpush1.msra.mxu1 %v3066_v42  ;;  %v3202_v57 = vld [vmem:[#allocation4 + $0x4f0] sm:$0xff]  ;;  %v3193_v42 = vld [vmem:[#allocation4 + $0x4a8] sm:$0xff] }
 0x5f7   :  { %3470 = vmatprep.subr.mxu0 %v3057_v58  ;;  %3541 = vmatprep.subr.mxu1 %v3059_v59  ;;  %v3195_v58 = vld [vmem:[#allocation4 + $0x4b8] sm:$0xff]  ;;  %v3192_v59 = vld [vmem:[#allocation4 + $0x4a0] sm:$0xff] }
 0x5f8   :  { %3471 = vmatpush1.msra.mxu0 %v3056_v61  ;;  %3542 = vmatpush1.msra.mxu1 %v3058_v48  ;;  %v3194_v61 = vld [vmem:[#allocation4 + $0x4b0] sm:$0xff]  ;;  %v3185_v48 = vld [vmem:[#allocation4 + $0x468] sm:$0xff] }
 0x5f9   :  { %3472 = vmatprep.subr.mxu0 %v3049_v62  ;;  %3543 = vmatprep.subr.mxu1 %v3051_v63  ;;  %v3187_v62 = vld [vmem:[#allocation4 + $0x478] sm:$0xff]  ;;  %v3184_v63 = vld [vmem:[#allocation4 + $0x460] sm:$0xff] }
 0x5fa   :  { %3473 = vmatpush1.msra.mxu0 %v3048_v0  ;;  %3544 = vmatpush1.msra.mxu1 %v3050_v25  ;;  %v3186_v0 = vld [vmem:[#allocation4 + $0x470] sm:$0xff]  ;;  %v3177_v25 = vld [vmem:[#allocation4 + $0x428] sm:$0xff] }
 0x5fb   :  { %3474 = vmatprep.subr.mxu0 %v3297_v1  ;;  %3545 = vmatprep.subr.mxu1 %v3299_v2  ;;  %v3179_v1 = vld [vmem:[#allocation4 + $0x438] sm:$0xff]  ;;  %v3176_v2 = vld [vmem:[#allocation4 + $0x420] sm:$0xff] }
 0x5fc   :  { %3475 = vmatpush2.msra.mxu0 %v3296_v3  ;;  %3546 = vmatpush2.msra.mxu1 %v3298_v4  ;;  %v3178_v3 = vld [vmem:[#allocation4 + $0x430] sm:$0xff]  ;;  %v3789_v4 = vld [vmem:[#allocation4 + $0x3c8] sm:$0xff] }
 0x5fd   :  { %3476 = vmatprep.subr.mxu0 %v3289_v5  ;;  %3547 = vmatprep.subr.mxu1 %v3291_v6  ;;  %v3791_v5 = vld [vmem:[#allocation4 + $0x3d8] sm:$0xff]  ;;  %v3788_v6 = vld [vmem:[#allocation4 + $0x3c0] sm:$0xff] }
 0x5fe   :  { %3477 = vmatpush2.msra.mxu0 %v3288_v7  ;;  %3548 = vmatpush2.msra.mxu1 %v3290_v8  ;;  %v3790_v7 = vld [vmem:[#allocation4 + $0x3d0] sm:$0xff]  ;;  %v3781_v8 = vld [vmem:[#allocation4 + $0x388] sm:$0xff] }
 0x5ff   :  { %3478 = vmatprep.subr.mxu0 %v3281_v9  ;;  %3549 = vmatprep.subr.mxu1 %v3283_v10  ;;  %v3783_v9 = vld [vmem:[#allocation4 + $0x398] sm:$0xff]  ;;  %v3780_v10 = vld [vmem:[#allocation4 + $0x380] sm:$0xff] }
 0x600   :  { %3479 = vmatpush2.msra.mxu0 %v3280_v11  ;;  %3550 = vmatpush2.msra.mxu1 %v3282_v60  ;;  %v3782_v11 = vld [vmem:[#allocation4 + $0x390] sm:$0xff]  ;;  %v3773_v60 = vld [vmem:[#allocation4 + $0x348] sm:$0xff] }
 0x601   :  { %3480 = vmatprep.subr.mxu0 %v3273_v12  ;;  %3551 = vmatprep.subr.mxu1 %v3275_v13  ;;  %v3775_v12 = vld [vmem:[#allocation4 + $0x358] sm:$0xff]  ;;  %v3772_v13 = vld [vmem:[#allocation4 + $0x340] sm:$0xff] }
 0x602   :  { %3481 = vmatpush2.msra.mxu0 %v3272_v14  ;;  %3552 = vmatpush2.msra.mxu1 %v3274_v15  ;;  %v3774_v14 = vld [vmem:[#allocation4 + $0x350] sm:$0xff]  ;;  %v3767_v15 = vld [vmem:[#allocation4 + $0x318] sm:$0xff] }
 0x603   :  { %3482 = vmatprep.subr.mxu0 %v3265_v16  ;;  %3553 = vmatprep.subr.mxu1 %v3267_v17  ;;  %v3764_v16 = vld [vmem:[#allocation4 + $0x300] sm:$0xff]  ;;  %v3766_v17 = vld [vmem:[#allocation4 + $0x310] sm:$0xff] }
 0x604   :  { %3483 = vmatpush2.msra.mxu0 %v3264_v18  ;;  %3554 = vmatpush2.msra.mxu1 %v3266_v19  ;;  %v3757_v18 = vld [vmem:[#allocation4 + $0x2c8] sm:$0xff]  ;;  %v3759_v19 = vld [vmem:[#allocation4 + $0x2d8] sm:$0xff] }
 0x605   :  { %3484 = vmatprep.subr.mxu0 %v3257_v20  ;;  %3555 = vmatprep.subr.mxu1 %v3259_v23  ;;  %v3756_v20 = vld [vmem:[#allocation4 + $0x2c0] sm:$0xff]  ;;  %v3758_v23 = vld [vmem:[#allocation4 + $0x2d0] sm:$0xff] }
 0x606   :  { %3485 = vmatpush2.msra.mxu0 %v3256_v24  ;;  %3556 = vmatpush2.msra.mxu1 %v3258_v26  ;;  %v3749_v24 = vld [vmem:[#allocation4 + $0x288] sm:$0xff]  ;;  %v3751_v26 = vld [vmem:[#allocation4 + $0x298] sm:$0xff] }
 0x607   :  { %3486 = vmatprep.subr.mxu0 %v3249_v28  ;;  %3557 = vmatprep.subr.mxu1 %v3251_v29  ;;  %v3748_v28 = vld [vmem:[#allocation4 + $0x280] sm:$0xff]  ;;  %v3750_v29 = vld [vmem:[#allocation4 + $0x290] sm:$0xff] }
 0x608   :  { %3487 = vmatpush2.msra.mxu0 %v3248_v30  ;;  %3558 = vmatpush2.msra.mxu1 %v3250_v31  ;;  %v3741_v30 = vld [vmem:[#allocation4 + $0x248] sm:$0xff]  ;;  %v3743_v31 = vld [vmem:[#allocation4 + $0x258] sm:$0xff] }
 0x609   :  { %3488 = vmatprep.subr.mxu0 %v3241_v32  ;;  %3559 = vmatprep.subr.mxu1 %v3243_v33  ;;  %v3740_v32 = vld [vmem:[#allocation4 + $0x240] sm:$0xff]  ;;  %v3742_v33 = vld [vmem:[#allocation4 + $0x250] sm:$0xff] }
 0x60a   :  { %3489 = vmatpush2.msra.mxu0 %v3240_v34  ;;  %3560 = vmatpush2.msra.mxu1 %v3242_v37  ;;  %v3733_v34 = vld [vmem:[#allocation4 + $0x208] sm:$0xff]  ;;  %v3735_v37 = vld [vmem:[#allocation4 + $0x218] sm:$0xff] }
 0x60b   :  { %3490 = vmatprep.subr.mxu0 %v3233_v22  ;;  %3561 = vmatprep.subr.mxu1 %v3235_v21  ;;  %v3732_v22 = vld [vmem:[#allocation4 + $0x200] sm:$0xff]  ;;  %v3734_v21 = vld [vmem:[#allocation4 + $0x210] sm:$0xff] }
 0x60c   :  { %3491 = vmatpush2.msra.mxu0 %v3232_v40  ;;  %3562 = vmatpush2.msra.mxu1 %v3234_v36  ;;  %v3725_v40 = vld [vmem:[#allocation4 + $0x1c8] sm:$0xff]  ;;  %v3727_v36 = vld [vmem:[#allocation4 + $0x1d8] sm:$0xff] }
 0x60d   :  { %3492 = vmatprep.subr.mxu0 %v3225_v43  ;;  %3563 = vmatprep.subr.mxu1 %v3227_v44  ;;  %v3724_v43 = vld [vmem:[#allocation4 + $0x1c0] sm:$0xff]  ;;  %v3726_v44 = vld [vmem:[#allocation4 + $0x1d0] sm:$0xff] }
 0x60e   :  { %3493 = vmatpush2.msra.mxu0 %v3224_v45  ;;  %3564 = vmatpush2.msra.mxu1 %v3226_v46  ;;  %v3717_v45 = vld [vmem:[#allocation4 + $0x188] sm:$0xff]  ;;  %v3719_v46 = vld [vmem:[#allocation4 + $0x198] sm:$0xff] }
 0x60f   :  { %3494 = vmatprep.subr.mxu0 %v3217_v47  ;;  %3565 = vmatprep.subr.mxu1 %v3219_v49  ;;  %v3716_v47 = vld [vmem:[#allocation4 + $0x180] sm:$0xff]  ;;  %v3718_v49 = vld [vmem:[#allocation4 + $0x190] sm:$0xff] }
 0x610   :  { %3495 = vmatpush2.msra.mxu0 %v3216_v27  ;;  %3566 = vmatpush2.msra.mxu1 %v3218_v50  ;;  %v3709_v27 = vld [vmem:[#allocation4 + $0x148] sm:$0xff]  ;;  %v3711_v50 = vld [vmem:[#allocation4 + $0x158] sm:$0xff] }
 0x611   :  { %3496 = vmatprep.subr.mxu0 %v3209_v51  ;;  %3567 = vmatprep.subr.mxu1 %v3211_v38  ;;  %v3708_v51 = vld [vmem:[#allocation4 + $0x140] sm:$0xff]  ;;  %v3710_v38 = vld [vmem:[#allocation4 + $0x150] sm:$0xff] }
 0x612   :  { %3497 = vmatpush2.msra.mxu0 %v3208_v39  ;;  %3568 = vmatpush2.msra.mxu1 %v3210_v53  ;;  %v3701_v39 = vld [vmem:[#allocation4 + $0x108] sm:$0xff]  ;;  %v3703_v53 = vld [vmem:[#allocation4 + $0x118] sm:$0xff] }
 0x613   :  { %3498 = vmatprep.subr.mxu0 %v3201_v55  ;;  %3569 = vmatprep.subr.mxu1 %v3203_v35  ;;  %v3700_v55 = vld [vmem:[#allocation4 + $0x100] sm:$0xff]  ;;  %v3702_v35 = vld [vmem:[#allocation4 + $0x110] sm:$0xff] }
 0x614   :  { %3499 = vmatpush2.msra.mxu0 %v3200_v41  ;;  %3570 = vmatpush2.msra.mxu1 %v3202_v57  ;;  %v3693_v41 = vld [vmem:[#allocation4 + $0xc8] sm:$0xff]  ;;  %v3695_v57 = vld [vmem:[#allocation4 + $0xd8] sm:$0xff] }
 0x615   :  { %3500 = vmatprep.subr.mxu0 %v3193_v42  ;;  %3571 = vmatprep.subr.mxu1 %v3195_v58  ;;  %v3692_v42 = vld [vmem:[#allocation4 + $0xc0] sm:$0xff]  ;;  %v3694_v58 = vld [vmem:[#allocation4 + $0xd0] sm:$0xff] }
 0x616   :  { %3501 = vmatpush2.msra.mxu0 %v3192_v59  ;;  %3572 = vmatpush2.msra.mxu1 %v3194_v61  ;;  %v3685_v59 = vld [vmem:[#allocation4 + $0x88] sm:$0xff]  ;;  %v3687_v61 = vld [vmem:[#allocation4 + $0x98] sm:$0xff] }
 0x617   :  { %3502 = vmatprep.subr.mxu0 %v3185_v48  ;;  %3573 = vmatprep.subr.mxu1 %v3187_v62  ;;  %v3684_v48 = vld [vmem:[#allocation4 + $0x80] sm:$0xff]  ;;  %v3686_v62 = vld [vmem:[#allocation4 + $0x90] sm:$0xff] }
 0x618   :  { %3503 = vmatpush2.msra.mxu0 %v3184_v63  ;;  %3574 = vmatpush2.msra.mxu1 %v3186_v0  ;;  %v3677_v63 = vld [vmem:[#allocation4 + $0x48] sm:$0xff]  ;;  %v3679_v0 = vld [vmem:[#allocation4 + $0x58] sm:$0xff] }
 0x619   :  { %3504 = vmatprep.subr.mxu0 %v3177_v25  ;;  %3575 = vmatprep.subr.mxu1 %v3179_v1  ;;  %v3676_v25 = vld [vmem:[#allocation4 + $0x40] sm:$0xff]  ;;  %v3678_v1 = vld [vmem:[#allocation4 + $0x50] sm:$0xff] }
 0x61a   :  { %3505 = vmatpush2.msra.mxu0 %v3176_v2  ;;  %3576 = vmatpush2.msra.mxu1 %v3178_v3  ;;  %v3669_v2 = vld [vmem:[#allocation4 + $0x8] sm:$0xff]  ;;  %v3671_v3 = vld [vmem:[#allocation4 + $0x18] sm:$0xff] }
 0x61b   :  { %3507 = vmatmul.mubr.f32.vlgmr.msra.gmra.mxu0 %v6248_v52  ;;  %3578 = vmatmul.mubr.f32.vlgmr.msra.gmra.mxu1 %v6248_v52  ;;  %v3765_v52 = vld [vmem:[#allocation4 + $0x308] sm:$0xff] }
 0x61c   :  { %3924 = vmatprep.subr.mxu0 %v3789_v4  ;;  %3995 = vmatprep.subr.mxu1 %v3791_v5  ;;  %v3668_v4 = vld [vmem:[#allocation4] sm:$0xff]  ;;  %v3670_v5 = vld [vmem:[#allocation4 + $0x10] sm:$0xff] }
 0x61d   :  { %3925 = vmatpush1.msra.mxu0 %v3788_v6  ;;  %3996 = vmatpush1.msra.mxu1 %v3790_v7  ;;  %v3917_v6 = vld [vmem:[#allocation4 + $0x7c8] sm:$0xff]  ;;  %v3919_v7 = vld [vmem:[#allocation4 + $0x7d8] sm:$0xff] }
 0x61e   :  { %3926 = vmatprep.subr.mxu0 %v3781_v8  ;;  %3997 = vmatprep.subr.mxu1 %v3783_v9  ;;  %v3916_v8 = vld [vmem:[#allocation4 + $0x7c0] sm:$0xff]  ;;  %v3918_v9 = vld [vmem:[#allocation4 + $0x7d0] sm:$0xff] }
 0x61f   :  { %3927 = vmatpush1.msra.mxu0 %v3780_v10  ;;  %3998 = vmatpush1.msra.mxu1 %v3782_v11  ;;  %v3909_v10 = vld [vmem:[#allocation4 + $0x788] sm:$0xff]  ;;  %v3911_v11 = vld [vmem:[#allocation4 + $0x798] sm:$0xff] }
 0x620   :  { %3928 = vmatprep.subr.mxu0 %v3773_v60  ;;  %3999 = vmatprep.subr.mxu1 %v3775_v12  ;;  %v3908_v60 = vld [vmem:[#allocation4 + $0x780] sm:$0xff]  ;;  %v3910_v12 = vld [vmem:[#allocation4 + $0x790] sm:$0xff] }
 0x621   :  { %3929 = vmatpush1.msra.mxu0 %v3772_v13  ;;  %4000 = vmatpush1.msra.mxu1 %v3774_v14  ;;  %v3901_v13 = vld [vmem:[#allocation4 + $0x748] sm:$0xff]  ;;  %v3903_v14 = vld [vmem:[#allocation4 + $0x758] sm:$0xff] }
 0x622   :  { %3930 = vmatprep.subr.mxu0 %v3765_v52  ;;  %4001 = vmatprep.subr.mxu1 %v3767_v15  ;;  %v3900_v52 = vld [vmem:[#allocation4 + $0x740] sm:$0xff]  ;;  %v3902_v15 = vld [vmem:[#allocation4 + $0x750] sm:$0xff] }
 0x623   :  { %3931 = vmatpush1.msra.mxu0 %v3764_v16  ;;  %4002 = vmatpush1.msra.mxu1 %v3766_v17  ;;  %v3893_v16 = vld [vmem:[#allocation4 + $0x708] sm:$0xff]  ;;  %v3895_v17 = vld [vmem:[#allocation4 + $0x718] sm:$0xff] }
 0x624   :  { %3932 = vmatprep.subr.mxu0 %v3757_v18  ;;  %4003 = vmatprep.subr.mxu1 %v3759_v19  ;;  %v3892_v18 = vld [vmem:[#allocation4 + $0x700] sm:$0xff]  ;;  %v3894_v19 = vld [vmem:[#allocation4 + $0x710] sm:$0xff] }
 0x625   :  { %3933 = vmatpush1.msra.mxu0 %v3756_v20  ;;  %4004 = vmatpush1.msra.mxu1 %v3758_v23  ;;  %v3885_v20 = vld [vmem:[#allocation4 + $0x6c8] sm:$0xff]  ;;  %v3887_v23 = vld [vmem:[#allocation4 + $0x6d8] sm:$0xff] }
 0x626   :  { %3934 = vmatprep.subr.mxu0 %v3749_v24  ;;  %4005 = vmatprep.subr.mxu1 %v3751_v26  ;;  %v3884_v24 = vld [vmem:[#allocation4 + $0x6c0] sm:$0xff]  ;;  %v3886_v26 = vld [vmem:[#allocation4 + $0x6d0] sm:$0xff] }
 0x627   :  { %3935 = vmatpush1.msra.mxu0 %v3748_v28  ;;  %4006 = vmatpush1.msra.mxu1 %v3750_v29  ;;  %v3877_v28 = vld [vmem:[#allocation4 + $0x688] sm:$0xff]  ;;  %v3879_v29 = vld [vmem:[#allocation4 + $0x698] sm:$0xff] }
 0x628   :  { %3936 = vmatprep.subr.mxu0 %v3741_v30  ;;  %4007 = vmatprep.subr.mxu1 %v3743_v31  ;;  %v3876_v30 = vld [vmem:[#allocation4 + $0x680] sm:$0xff]  ;;  %v3878_v31 = vld [vmem:[#allocation4 + $0x690] sm:$0xff] }
 0x629   :  { %3937 = vmatpush1.msra.mxu0 %v3740_v32  ;;  %4008 = vmatpush1.msra.mxu1 %v3742_v33  ;;  %v3869_v32 = vld [vmem:[#allocation4 + $0x648] sm:$0xff]  ;;  %v3871_v33 = vld [vmem:[#allocation4 + $0x658] sm:$0xff] }
 0x62a   :  { %3938 = vmatprep.subr.mxu0 %v3733_v34  ;;  %4009 = vmatprep.subr.mxu1 %v3735_v37  ;;  %v3868_v34 = vld [vmem:[#allocation4 + $0x640] sm:$0xff]  ;;  %v3870_v37 = vld [vmem:[#allocation4 + $0x650] sm:$0xff] }
 0x62b   :  { %3939 = vmatpush1.msra.mxu0 %v3732_v22  ;;  %4010 = vmatpush1.msra.mxu1 %v3734_v21  ;;  %v3861_v22 = vld [vmem:[#allocation4 + $0x608] sm:$0xff]  ;;  %v3863_v21 = vld [vmem:[#allocation4 + $0x618] sm:$0xff] }
 0x62c   :  { %3940 = vmatprep.subr.mxu0 %v3725_v40  ;;  %4011 = vmatprep.subr.mxu1 %v3727_v36  ;;  %v3860_v40 = vld [vmem:[#allocation4 + $0x600] sm:$0xff]  ;;  %v3862_v36 = vld [vmem:[#allocation4 + $0x610] sm:$0xff] }
 0x62d   :  { %3941 = vmatpush1.msra.mxu0 %v3724_v43  ;;  %4012 = vmatpush1.msra.mxu1 %v3726_v44  ;;  %v3853_v43 = vld [vmem:[#allocation4 + $0x5c8] sm:$0xff]  ;;  %v3855_v44 = vld [vmem:[#allocation4 + $0x5d8] sm:$0xff] }
 0x62e   :  { %3942 = vmatprep.subr.mxu0 %v3717_v45  ;;  %4013 = vmatprep.subr.mxu1 %v3719_v46  ;;  %v3852_v45 = vld [vmem:[#allocation4 + $0x5c0] sm:$0xff]  ;;  %v3854_v46 = vld [vmem:[#allocation4 + $0x5d0] sm:$0xff] }
 0x62f   :  { %3943 = vmatpush1.msra.mxu0 %v3716_v47  ;;  %4014 = vmatpush1.msra.mxu1 %v3718_v49  ;;  %v3845_v47 = vld [vmem:[#allocation4 + $0x588] sm:$0xff]  ;;  %v3847_v49 = vld [vmem:[#allocation4 + $0x598] sm:$0xff] }
 0x630   :  { %3944 = vmatprep.subr.mxu0 %v3709_v27  ;;  %4015 = vmatprep.subr.mxu1 %v3711_v50  ;;  %v3844_v27 = vld [vmem:[#allocation4 + $0x580] sm:$0xff]  ;;  %v3846_v50 = vld [vmem:[#allocation4 + $0x590] sm:$0xff] }
 0x631   :  { %3945 = vmatpush1.msra.mxu0 %v3708_v51  ;;  %4016 = vmatpush1.msra.mxu1 %v3710_v38  ;;  %v3837_v51 = vld [vmem:[#allocation4 + $0x548] sm:$0xff]  ;;  %v3839_v38 = vld [vmem:[#allocation4 + $0x558] sm:$0xff] }
 0x632   :  { %3946 = vmatprep.subr.mxu0 %v3701_v39  ;;  %4017 = vmatprep.subr.mxu1 %v3703_v53  ;;  %v3836_v39 = vld [vmem:[#allocation4 + $0x540] sm:$0xff]  ;;  %v3838_v53 = vld [vmem:[#allocation4 + $0x550] sm:$0xff] }
 0x633   :  { %3947 = vmatpush1.msra.mxu0 %v3700_v55  ;;  %4018 = vmatpush1.msra.mxu1 %v3702_v35  ;;  %v3829_v55 = vld [vmem:[#allocation4 + $0x508] sm:$0xff]  ;;  %v3831_v35 = vld [vmem:[#allocation4 + $0x518] sm:$0xff] }
 0x634   :  { %3948 = vmatprep.subr.mxu0 %v3693_v41  ;;  %4019 = vmatprep.subr.mxu1 %v3695_v57  ;;  %v3828_v41 = vld [vmem:[#allocation4 + $0x500] sm:$0xff]  ;;  %v3830_v57 = vld [vmem:[#allocation4 + $0x510] sm:$0xff] }
 0x635   :  { %3949 = vmatpush1.msra.mxu0 %v3692_v42  ;;  %4020 = vmatpush1.msra.mxu1 %v3694_v58  ;;  %v3821_v42 = vld [vmem:[#allocation4 + $0x4c8] sm:$0xff]  ;;  %v3823_v58 = vld [vmem:[#allocation4 + $0x4d8] sm:$0xff] }
 0x636   :  { %3950 = vmatprep.subr.mxu0 %v3685_v59  ;;  %4021 = vmatprep.subr.mxu1 %v3687_v61  ;;  %v3820_v59 = vld [vmem:[#allocation4 + $0x4c0] sm:$0xff]  ;;  %v3822_v61 = vld [vmem:[#allocation4 + $0x4d0] sm:$0xff] }
 0x637   :  { %3951 = vmatpush1.msra.mxu0 %v3684_v48  ;;  %4022 = vmatpush1.msra.mxu1 %v3686_v62  ;;  %v3813_v48 = vld [vmem:[#allocation4 + $0x488] sm:$0xff]  ;;  %v3815_v62 = vld [vmem:[#allocation4 + $0x498] sm:$0xff] }
 0x638   :  { %3952 = vmatprep.subr.mxu0 %v3677_v63  ;;  %4023 = vmatprep.subr.mxu1 %v3679_v0  ;;  %v3812_v63 = vld [vmem:[#allocation4 + $0x480] sm:$0xff]  ;;  %v3814_v0 = vld [vmem:[#allocation4 + $0x490] sm:$0xff] }
 0x639   :  { %3953 = vmatpush1.msra.mxu0 %v3676_v25  ;;  %4024 = vmatpush1.msra.mxu1 %v3678_v1  ;;  %v3805_v25 = vld [vmem:[#allocation4 + $0x448] sm:$0xff]  ;;  %v3807_v1 = vld [vmem:[#allocation4 + $0x458] sm:$0xff] }
 0x63a   :  { %3954 = vmatprep.subr.mxu0 %v3669_v2  ;;  %4025 = vmatprep.subr.mxu1 %v3671_v3  ;;  %v3804_v2 = vld [vmem:[#allocation4 + $0x440] sm:$0xff]  ;;  %v3806_v3 = vld [vmem:[#allocation4 + $0x450] sm:$0xff] }
 0x63b   :  { %3955 = vmatpush1.msra.mxu0 %v3668_v4  ;;  %4026 = vmatpush1.msra.mxu1 %v3670_v5  ;;  %v3797_v4 = vld [vmem:[#allocation4 + $0x408] sm:$0xff]  ;;  %v3799_v5 = vld [vmem:[#allocation4 + $0x418] sm:$0xff] }
 0x63c   :  { %3956 = vmatprep.subr.mxu0 %v3917_v6  ;;  %4027 = vmatprep.subr.mxu1 %v3919_v7  ;;  %v3796_v6 = vld [vmem:[#allocation4 + $0x400] sm:$0xff]  ;;  %v3798_v7 = vld [vmem:[#allocation4 + $0x410] sm:$0xff] }
 0x63d   :  { %3957 = vmatpush2.msra.mxu0 %v3916_v8  ;;  %4028 = vmatpush2.msra.mxu1 %v3918_v9  ;;  %v3793_v8 = vld [vmem:[#allocation4 + $0x3e8] sm:$0xff]  ;;  %v3795_v9 = vld [vmem:[#allocation4 + $0x3f8] sm:$0xff] }
 0x63e   :  { %3958 = vmatprep.subr.mxu0 %v3909_v10  ;;  %4029 = vmatprep.subr.mxu1 %v3911_v11 }
 0x63f   :  { %3959 = vmatpush2.msra.mxu0 %v3908_v60  ;;  %4030 = vmatpush2.msra.mxu1 %v3910_v12 }
 0x640   :  { %3960 = vmatprep.subr.mxu0 %v3901_v13  ;;  %4031 = vmatprep.subr.mxu1 %v3903_v14 }
 0x641   :  { %3961 = vmatpush2.msra.mxu0 %v3900_v52  ;;  %4032 = vmatpush2.msra.mxu1 %v3902_v15  ;;  %v3038_v15 = vld [vmem:[#allocation2 + $0x8] sm:$0xf0] }
 0x642   :  { %3962 = vmatprep.subr.mxu0 %v3893_v16  ;;  %4033 = vmatprep.subr.mxu1 %v3895_v17  ;;  %v3036_v16 = vld [vmem:[#allocation2 + $0x128] sm:$0xf0] }
 0x643   :  { %3963 = vmatpush2.msra.mxu0 %v3892_v18  ;;  %4034 = vmatpush2.msra.mxu1 %v3894_v19 }
 0x644   :  { %3964 = vmatprep.subr.mxu0 %v3885_v20  ;;  %4035 = vmatprep.subr.mxu1 %v3887_v23  ;;  %v3039_v20 = vld [vmem:[#allocation2 + $0x98] sm:$0xf0] }
 0x645   :  { %3965 = vmatpush2.msra.mxu0 %v3884_v24  ;;  %4036 = vmatpush2.msra.mxu1 %v3886_v26  ;;  %v3037_v24 = vld [vmem:[#allocation2 + $0x110] sm:$0xf0] }
 0x646   :  { %3966 = vmatprep.subr.mxu0 %v3877_v28  ;;  %4037 = vmatprep.subr.mxu1 %v3879_v29 }
 0x647   :  { %3967 = vmatpush2.msra.mxu0 %v3876_v30  ;;  %4038 = vmatpush2.msra.mxu1 %v3878_v31  ;;  %v3042_v30 = vld [vmem:[#allocation2 + $0xe0] sm:$0xf0] }
 0x648   :  { %3968 = vmatprep.subr.mxu0 %v3869_v32  ;;  %4039 = vmatprep.subr.mxu1 %v3871_v33 }
 0x649   :  { %3969 = vmatpush2.msra.mxu0 %v3868_v34  ;;  %4040 = vmatpush2.msra.mxu1 %v3870_v37  ;;  %v3043_v37 = vld [vmem:[#allocation2 + $0x88] sm:$0xf0] }
 0x64a   :  { %3970 = vmatprep.subr.mxu0 %v3861_v22  ;;  %4041 = vmatprep.subr.mxu1 %v3863_v21 }
 0x64b   :  { %3971 = vmatpush2.msra.mxu0 %v3860_v40  ;;  %4042 = vmatpush2.msra.mxu1 %v3862_v36 }
 0x64c   :  { %3972 = vmatprep.subr.mxu0 %v3853_v43  ;;  %4043 = vmatprep.subr.mxu1 %v3855_v44 }
 0x64d   :  { %3973 = vmatpush2.msra.mxu0 %v3852_v45  ;;  %4044 = vmatpush2.msra.mxu1 %v3854_v46  ;;  %v3040_v46 = vld [vmem:[#allocation2 + $0xa8] sm:$0xf0] }
 0x64e   :  { %3974 = vmatprep.subr.mxu0 %v3845_v47  ;;  %4045 = vmatprep.subr.mxu1 %v3847_v49 }
 0x64f   :  { %3975 = vmatpush2.msra.mxu0 %v3844_v27  ;;  %4046 = vmatpush2.msra.mxu1 %v3846_v50  ;;  %v3041_v50 = vld [vmem:[#allocation2 + $0x90] sm:$0xf0] }
 0x650   :  { %3976 = vmatprep.subr.mxu0 %v3837_v51  ;;  %4047 = vmatprep.subr.mxu1 %v3839_v38 }
 0x651   :  { %3977 = vmatpush2.msra.mxu0 %v3836_v39  ;;  %4048 = vmatpush2.msra.mxu1 %v3838_v53 }
 0x652   :  { %3978 = vmatprep.subr.mxu0 %v3829_v55  ;;  %4049 = vmatprep.subr.mxu1 %v3831_v35 }
 0x653   :  { %3979 = vmatpush2.msra.mxu0 %v3828_v41  ;;  %4050 = vmatpush2.msra.mxu1 %v3830_v57  ;;  %v3638_v41 = vrot.slane %v6242_v54, 4 }
 0x654   :  { %3980 = vmatprep.subr.mxu0 %v3821_v42  ;;  %4051 = vmatprep.subr.mxu1 %v3823_v58 }
 0x655   :  { %3981 = vmatpush2.msra.mxu0 %v3820_v59  ;;  %4052 = vmatpush2.msra.mxu1 %v3822_v61  ;;  %v3639_v61 = vrot.slane %v6245_v56, 4 }
 0x656   :  { %3982 = vmatprep.subr.mxu0 %v3813_v48  ;;  %4053 = vmatprep.subr.mxu1 %v3815_v62 }
 0x657   :  { %3983 = vmatpush2.msra.mxu0 %v3812_v63  ;;  %4054 = vmatpush2.msra.mxu1 %v3814_v0 }
 0x658   :  { %3984 = vmatprep.subr.mxu0 %v3805_v25  ;;  %4055 = vmatprep.subr.mxu1 %v3807_v1 }
 0x659   :  { %3985 = vmatpush2.msra.mxu0 %v3804_v2  ;;  %4056 = vmatpush2.msra.mxu1 %v3806_v3 }
 0x65a   :  { %3986 = vmatprep.subr.mxu0 %v3797_v4  ;;  %4057 = vmatprep.subr.mxu1 %v3799_v5 }
 0x65b   :  { %3987 = vmatpush2.msra.mxu0 %v3796_v6  ;;  %4058 = vmatpush2.msra.mxu1 %v3798_v7 }
 0x65c   :  { %4066 = vmatprep.subr.mxu0 %v3793_v8  ;;  %4137 = vmatprep.subr.mxu1 %v3795_v9 }
 0x69a   :  { %v3437_v10 = vpop.f32.mrf.mxu1  ;;  %v3366_v11 = vpop.f32.mrf.mxu0 }
 0x69b   :  { %v3594_v12 = vrot.slane %v3437_v10, 4  ;;  %v3592_v13 = vrot.slane %v3366_v11, 4 }
 0x69c   :  { %v3439_v60 = vpop.f32.mrf.mxu1  ;;  %v3368_v14 = vpop.f32.mrf.mxu0 }
 0x69d   :  { %v3595_v52 = vrot.slane %v3439_v60, 4  ;;  %v3610_v17 = vadd.f32 %v3594_v12, %v3038_v15  ;;  %v3593_v18 = vrot.slane %v3368_v14, 4  ;;  %v3608_v19 = vadd.f32 %v3592_v13, %v3036_v16  ;;  %v3792_v60 = vld [vmem:[#allocation4 + $0x3e0] sm:$0xff]  ;;  %v3794_v12 = vld [vmem:[#allocation4 + $0x3f0] sm:$0xff]  ;;  %v3785_v13 = vld [vmem:[#allocation4 + $0x3a8] sm:$0xff] }
 0x69e   :  { %v3787_v14 = vld [vmem:[#allocation4 + $0x3b8] sm:$0xff]  ;;  %v3786_v15 = vld [vmem:[#allocation4 + $0x3b0] sm:$0xff]  ;;  %v3777_v16 = vld [vmem:[#allocation4 + $0x368] sm:$0xff] }
 0x69f   :  { %v3611_v23 = vadd.f32 %v3595_v52, %v3039_v20  ;;  %5858 = vtanh.f32 %v3610_v17  ;;  %v3609_v26 = vadd.f32 %v3593_v18, %v3037_v24  ;;  %v3784_v52 = vld [vmem:[#allocation4 + $0x3a0] sm:$0xff]  ;;  %v3779_v17 = vld [vmem:[#allocation4 + $0x378] sm:$0xff]  ;;  %v3769_v20 = vld [vmem:[#allocation4 + $0x328] sm:$0xff] }
 0x6a0   :  { %5860 = vtanh.f32 %v3608_v19  ;;  %v3776_v18 = vld [vmem:[#allocation4 + $0x360] sm:$0xff]  ;;  %v3778_v19 = vld [vmem:[#allocation4 + $0x370] sm:$0xff] }
 0x6a1   :  { %5862 = vtanh.f32 %v3611_v23  ;;  %v3771_v23 = vld [vmem:[#allocation4 + $0x338] sm:$0xff]  ;;  %v3768_v24 = vld [vmem:[#allocation4 + $0x320] sm:$0xff] }
 0x6a2   :  { %5864 = vtanh.f32 %v3609_v26  ;;  %v3770_v26 = vld [vmem:[#allocation4 + $0x330] sm:$0xff] }
 0x6ac   :  { %v5859_v36 = vpop.eup %5858 }
 0x6ad   :  { %v5861_v43 = vpop.eup %5860  ;;  %v3626_v47 = vmul.f32 0.5, %v5859_v36  ;;  %v3746_v36 = vld [vmem:[#allocation4 + $0x270] sm:$0xff] }
 0x6ae   :  { %v5863_v45 = vpop.eup %5862  ;;  %v3624_v51 = vmul.f32 0.5, %v5861_v43  ;;  %v3737_v43 = vld [vmem:[#allocation4 + $0x228] sm:$0xff] }
 0x6af   :  { %v5865_v27 = vpop.eup %5864  ;;  %v3627_v38 = vmul.f32 0.5, %v5863_v45  ;;  %v3632_v53 = vadd.f32 0.5, %v3626_v47  ;;  %v3736_v45 = vld [vmem:[#allocation4 + $0x220] sm:$0xff]  ;;  %v3729_v47 = vld [vmem:[#allocation4 + $0x1e8] sm:$0xff] }
 0x6b0   :  { %v3625_v55 = vmul.f32 0.5, %v5865_v27  ;;  %v3630_v35 = vadd.f32 0.5, %v3624_v51  ;;  %v3728_v27 = vld [vmem:[#allocation4 + $0x1e0] sm:$0xff]  ;;  %v3721_v51 = vld [vmem:[#allocation4 + $0x1a8] sm:$0xff] }
 0x6b1   :  { %v3633_v57 = vadd.f32 0.5, %v3627_v38  ;;  %v3642_v58 = vmul.f32 %v3638_v41, %v3632_v53  ;;  %v3723_v38 = vld [vmem:[#allocation4 + $0x1b8] sm:$0xff]  ;;  %v3722_v53 = vld [vmem:[#allocation4 + $0x1b0] sm:$0xff]  ;;  %v3712_v41 = vld [vmem:[#allocation4 + $0x160] sm:$0xff] }
 0x6b2   :  { %v3631_v59 = vadd.f32 0.5, %v3625_v55  ;;  %v3713_v55 = vld [vmem:[#allocation4 + $0x168] sm:$0xff] }
 0x6b3   :  { %v3643_v63 = vmul.f32 %v3639_v61, %v3633_v57  ;;  %v3714_v57 = vld [vmem:[#allocation4 + $0x170] sm:$0xff] }
 0x6b4   :  { %v3706_v61 = vld [vmem:[#allocation4 + $0x130] sm:$0xff] }
 0x6db   :  { %v3579_v28 = vpop.f32.mrf.mxu1  ;;  %v3508_v32 = vpop.f32.mrf.mxu0 }
 0x6dc   :  { %v3598_v29 = vrot.slane %v3579_v28, 4  ;;  %v3596_v40 = vrot.slane %v3508_v32, 4  ;;  %v3761_v28 = vld [vmem:[#allocation4 + $0x2e8] sm:$0xff] }
 0x6dd   :  { %v3581_v31 = vpop.f32.mrf.mxu1  ;;  %v3510_v21 = vpop.f32.mrf.mxu0  ;;  %v3753_v32 = vld [vmem:[#allocation4 + $0x2a8] sm:$0xff] }
 0x6de   :  { %v3614_v33 = vadd.f32 %v3598_v29, %v3042_v30  ;;  %v3599_v34 = vrot.slane %v3581_v31, 4  ;;  %v3597_v44 = vrot.slane %v3510_v21, 4  ;;  %v3612_v49 = vadd.f32 %v3596_v40, %v3040_v46  ;;  %v3763_v29 = vld [vmem:[#allocation4 + $0x2f8] sm:$0xff]  ;;  %v3760_v30 = vld [vmem:[#allocation4 + $0x2e0] sm:$0xff]  ;;  %v3762_v31 = vld [vmem:[#allocation4 + $0x2f0] sm:$0xff] }
 0x6df   :  { %v3747_v21 = vld [vmem:[#allocation4 + $0x278] sm:$0xff]  ;;  %v3744_v40 = vld [vmem:[#allocation4 + $0x260] sm:$0xff]  ;;  %v3738_v46 = vld [vmem:[#allocation4 + $0x230] sm:$0xff] }
 0x6e0   :  { %v3615_v22 = vadd.f32 %v3599_v34, %v3043_v37  ;;  %5866 = vtanh.f32 %v3614_v33  ;;  %v3613_v39 = vadd.f32 %v3597_v44, %v3041_v50  ;;  %v3755_v33 = vld [vmem:[#allocation4 + $0x2b8] sm:$0xff]  ;;  %v3752_v34 = vld [vmem:[#allocation4 + $0x2a0] sm:$0xff]  ;;  %v3754_v37 = vld [vmem:[#allocation4 + $0x2b0] sm:$0xff] }
 0x6e1   :  { %v3739_v44 = vld [vmem:[#allocation4 + $0x238] sm:$0xff]  ;;  %v3730_v50 = vld [vmem:[#allocation4 + $0x1f0] sm:$0xff] }
 0x6e2   :  { %5868 = vtanh.f32 %v3615_v22  ;;  %v3745_v22 = vld [vmem:[#allocation4 + $0x268] sm:$0xff] }
 0x6e3   :  { %5870 = vtanh.f32 %v3612_v49  ;;  %v3731_v49 = vld [vmem:[#allocation4 + $0x1f8] sm:$0xff] }
 0x6e4   :  { %5872 = vtanh.f32 %v3613_v39  ;;  %v3720_v39 = vld [vmem:[#allocation4 + $0x1a0] sm:$0xff] }
 0x6ed   :  { %v5867_v42 = vpop.eup %5866 }
 0x6ee   :  { %v3644_v48 = vmul.f32 %v5867_v42, %v3630_v35  ;;  %v3715_v35 = vld [vmem:[#allocation4 + $0x178] sm:$0xff]  ;;  %v3705_v42 = vld [vmem:[#allocation4 + $0x128] sm:$0xff] }
 0x6ef   :  { %v5869_v62 = vpop.eup %5868 }
 0x6f0   :  { %v6257_v0 = vadd.f32 %v3644_v48, %v3642_v58  ;;  %v3645_v25 = vmul.f32 %v5869_v62, %v3631_v59  ;;  %v5871_v54 = vpop.eup %5870  ;;  %v3707_v58 = vld [vmem:[#allocation4 + $0x138] sm:$0xff]  ;;  %v3704_v59 = vld [vmem:[#allocation4 + $0x120] sm:$0xff]  ;;  %v3697_v48 = vld [vmem:[#allocation4 + $0xe8] sm:$0xff] }
 0x6f1   :  { %v5873_v2 = vpop.eup %5872  ;;  %v3628_v3 = vmul.f32 0.5, %v5871_v54  ;;  %v3699_v62 = vld [vmem:[#allocation4 + $0xf8] sm:$0xff]  ;;  %v3689_v54 = vld [vmem:[#allocation4 + $0xa8] sm:$0xff] }
 0x6f2   :  { %5874 = vtanh.f32 %v6257_v0  ;;  %v6260_v1 = vadd.f32 %v3645_v25, %v3643_v63  ;;  %v3629_v4 = vmul.f32 0.5, %v5873_v2  ;;  %v3696_v63 = vld [vmem:[#allocation4 + $0xe0] sm:$0xff]  ;;  %v3698_v25 = vld [vmem:[#allocation4 + $0xf0] sm:$0xff]  ;;  %v3691_v2 = vld [vmem:[#allocation4 + $0xb8] sm:$0xff] }
 0x6f3   :  { %v3634_v5 = vadd.f32 0.5, %v3628_v3  ;;  %v3688_v3 = vld [vmem:[#allocation4 + $0xa0] sm:$0xff] }
 0x6f4   :  { %5876 = vtanh.f32 %v6260_v1  ;;  %v3635_v7 = vadd.f32 0.5, %v3629_v4  ;;  %v3690_v4 = vld [vmem:[#allocation4 + $0xb0] sm:$0xff] }
 0x6ff   :  { %v5875_v6 = vpop.eup %5874 }
 0x700   :  { %v3650_v56 = vmul.f32 %v5875_v6, %v3634_v5  ;;  %v3681_v5 = vld [vmem:[#allocation4 + $0x68] sm:$0xff]  ;;  %v3683_v6 = vld [vmem:[#allocation4 + $0x78] sm:$0xff] }
 0x701   :  { %v5877_v8 = vpop.eup %5876 }
 0x702   :  { %v3651_v9 = vmul.f32 %v5877_v8, %v3635_v7  ;;  %v6263_v10 = vrot.slane %v3650_v56, 4  ;;  %v3680_v7 = vld [vmem:[#allocation4 + $0x60] sm:$0xff]  ;;  %v3682_v56 = vld [vmem:[#allocation4 + $0x70] sm:$0xff]  ;;  %v3673_v8 = vld [vmem:[#allocation4 + $0x28] sm:$0xff] }
 0x704   :  { %v3655_v11 = vrot.slane %v3651_v9, 4  ;;  %3658 = vst [vmem:[#allocation3] sm:$0xf] %v6263_v10  ;;  %v3675_v9 = vld [vmem:[#allocation4 + $0x38] sm:$0xff] }
 0x706   :  { %3659 = vst [vmem:[#allocation3 + $0x20] sm:$0xf] %v3655_v11  ;;  %3988 = vmatprep.mubr.f32.mxu0 %v3655_v11  ;;  %4059 = vmatprep.mubr.f32.mxu1 %v3655_v11 }
 0x707   :  { %3989 = vmatmul.mubr.f32.vlgmr.msra.gmra.mxu0 %v6263_v10  ;;  %4060 = vmatmul.mubr.f32.vlgmr.msra.gmra.mxu1 %v6263_v10 }
 0x708   :  { %4067 = vmatpush1.msra.mxu0 %v3792_v60  ;;  %4138 = vmatpush1.msra.mxu1 %v3794_v12  ;;  %v3674_v60 = vld [vmem:[#allocation4 + $0x30] sm:$0xff]  ;;  %v3921_v12 = vld [vmem:[#allocation4 + $0x7e8] sm:$0xff] }
 0x709   :  { %4068 = vmatprep.subr.mxu0 %v3785_v13  ;;  %4130 = vmatprep.mubr.f32.mxu0 %v3655_v11  ;;  %v3923_v13 = vld [vmem:[#allocation4 + $0x7f8] sm:$0xff] }
 0x70a   :  { %4139 = vmatprep.subr.mxu1 %v3787_v14  ;;  %4201 = vmatprep.mubr.f32.mxu1 %v3655_v11  ;;  %v3672_v11 = vld [vmem:[#allocation4 + $0x20] sm:$0xff] }
 0x70b   :  { %4069 = vmatpush1.msra.mxu0 %v3784_v52  ;;  %4140 = vmatpush1.msra.mxu1 %v3786_v15  ;;  %v3920_v14 = vld [vmem:[#allocation4 + $0x7e0] sm:$0xff]  ;;  %v3922_v52 = vld [vmem:[#allocation4 + $0x7f0] sm:$0xff]  ;;  %v3913_v15 = vld [vmem:[#allocation4 + $0x7a8] sm:$0xff] }
 0x70c   :  { %4070 = vmatprep.subr.mxu0 %v3777_v16  ;;  %4141 = vmatprep.subr.mxu1 %v3779_v17  ;;  %v3915_v16 = vld [vmem:[#allocation4 + $0x7b8] sm:$0xff]  ;;  %v3912_v17 = vld [vmem:[#allocation4 + $0x7a0] sm:$0xff] }
 0x70d   :  { %4071 = vmatpush1.msra.mxu0 %v3776_v18  ;;  %4142 = vmatpush1.msra.mxu1 %v3778_v19  ;;  %v3914_v18 = vld [vmem:[#allocation4 + $0x7b0] sm:$0xff]  ;;  %v3905_v19 = vld [vmem:[#allocation4 + $0x768] sm:$0xff] }
 0x70e   :  { %4072 = vmatprep.subr.mxu0 %v3769_v20  ;;  %4143 = vmatprep.subr.mxu1 %v3771_v23  ;;  %v3907_v20 = vld [vmem:[#allocation4 + $0x778] sm:$0xff]  ;;  %v3904_v23 = vld [vmem:[#allocation4 + $0x760] sm:$0xff] }
 0x70f   :  { %4073 = vmatpush1.msra.mxu0 %v3768_v24  ;;  %4144 = vmatpush1.msra.mxu1 %v3770_v26  ;;  %v3906_v24 = vld [vmem:[#allocation4 + $0x770] sm:$0xff]  ;;  %v3897_v26 = vld [vmem:[#allocation4 + $0x728] sm:$0xff] }
 0x710   :  { %4074 = vmatprep.subr.mxu0 %v3761_v28  ;;  %4145 = vmatprep.subr.mxu1 %v3763_v29  ;;  %v3899_v28 = vld [vmem:[#allocation4 + $0x738] sm:$0xff]  ;;  %v3896_v29 = vld [vmem:[#allocation4 + $0x720] sm:$0xff] }
 0x711   :  { %4075 = vmatpush1.msra.mxu0 %v3760_v30  ;;  %4146 = vmatpush1.msra.mxu1 %v3762_v31  ;;  %v3898_v30 = vld [vmem:[#allocation4 + $0x730] sm:$0xff]  ;;  %v3889_v31 = vld [vmem:[#allocation4 + $0x6e8] sm:$0xff] }
 0x712   :  { %4076 = vmatprep.subr.mxu0 %v3753_v32  ;;  %4147 = vmatprep.subr.mxu1 %v3755_v33  ;;  %v3891_v32 = vld [vmem:[#allocation4 + $0x6f8] sm:$0xff]  ;;  %v3888_v33 = vld [vmem:[#allocation4 + $0x6e0] sm:$0xff] }
 0x713   :  { %4077 = vmatpush1.msra.mxu0 %v3752_v34  ;;  %4148 = vmatpush1.msra.mxu1 %v3754_v37  ;;  %v3890_v34 = vld [vmem:[#allocation4 + $0x6f0] sm:$0xff]  ;;  %v3881_v37 = vld [vmem:[#allocation4 + $0x6a8] sm:$0xff] }
 0x714   :  { %4078 = vmatprep.subr.mxu0 %v3745_v22  ;;  %4149 = vmatprep.subr.mxu1 %v3747_v21  ;;  %v3883_v22 = vld [vmem:[#allocation4 + $0x6b8] sm:$0xff]  ;;  %v3880_v21 = vld [vmem:[#allocation4 + $0x6a0] sm:$0xff] }
 0x715   :  { %4079 = vmatpush1.msra.mxu0 %v3744_v40  ;;  %4150 = vmatpush1.msra.mxu1 %v3746_v36  ;;  %v3882_v40 = vld [vmem:[#allocation4 + $0x6b0] sm:$0xff]  ;;  %v3873_v36 = vld [vmem:[#allocation4 + $0x668] sm:$0xff] }
 0x716   :  { %4080 = vmatprep.subr.mxu0 %v3737_v43  ;;  %4151 = vmatprep.subr.mxu1 %v3739_v44  ;;  %v3875_v43 = vld [vmem:[#allocation4 + $0x678] sm:$0xff]  ;;  %v3872_v44 = vld [vmem:[#allocation4 + $0x660] sm:$0xff] }
 0x717   :  { %4081 = vmatpush1.msra.mxu0 %v3736_v45  ;;  %4152 = vmatpush1.msra.mxu1 %v3738_v46  ;;  %v3874_v45 = vld [vmem:[#allocation4 + $0x670] sm:$0xff]  ;;  %v3865_v46 = vld [vmem:[#allocation4 + $0x628] sm:$0xff] }
 0x718   :  { %4082 = vmatprep.subr.mxu0 %v3729_v47  ;;  %4153 = vmatprep.subr.mxu1 %v3731_v49  ;;  %v3867_v47 = vld [vmem:[#allocation4 + $0x638] sm:$0xff]  ;;  %v3864_v49 = vld [vmem:[#allocation4 + $0x620] sm:$0xff] }
 0x719   :  { %4083 = vmatpush1.msra.mxu0 %v3728_v27  ;;  %4154 = vmatpush1.msra.mxu1 %v3730_v50  ;;  %v3866_v27 = vld [vmem:[#allocation4 + $0x630] sm:$0xff]  ;;  %v3857_v50 = vld [vmem:[#allocation4 + $0x5e8] sm:$0xff] }
 0x71a   :  { %4084 = vmatprep.subr.mxu0 %v3721_v51  ;;  %4155 = vmatprep.subr.mxu1 %v3723_v38  ;;  %v3859_v51 = vld [vmem:[#allocation4 + $0x5f8] sm:$0xff]  ;;  %v3856_v38 = vld [vmem:[#allocation4 + $0x5e0] sm:$0xff] }
 0x71b   :  { %4085 = vmatpush1.msra.mxu0 %v3720_v39  ;;  %4156 = vmatpush1.msra.mxu1 %v3722_v53  ;;  %v3858_v39 = vld [vmem:[#allocation4 + $0x5f0] sm:$0xff]  ;;  %v3849_v53 = vld [vmem:[#allocation4 + $0x5a8] sm:$0xff] }
 0x71c   :  { %4086 = vmatprep.subr.mxu0 %v3713_v55  ;;  %4157 = vmatprep.subr.mxu1 %v3715_v35  ;;  %v3851_v55 = vld [vmem:[#allocation4 + $0x5b8] sm:$0xff]  ;;  %v3848_v35 = vld [vmem:[#allocation4 + $0x5a0] sm:$0xff] }
 0x71d   :  { %4087 = vmatpush1.msra.mxu0 %v3712_v41  ;;  %4158 = vmatpush1.msra.mxu1 %v3714_v57  ;;  %v3850_v41 = vld [vmem:[#allocation4 + $0x5b0] sm:$0xff]  ;;  %v3841_v57 = vld [vmem:[#allocation4 + $0x568] sm:$0xff] }
 0x71e   :  { %4088 = vmatprep.subr.mxu0 %v3705_v42  ;;  %4159 = vmatprep.subr.mxu1 %v3707_v58  ;;  %v3843_v42 = vld [vmem:[#allocation4 + $0x578] sm:$0xff]  ;;  %v3840_v58 = vld [vmem:[#allocation4 + $0x560] sm:$0xff] }
 0x71f   :  { %4089 = vmatpush1.msra.mxu0 %v3704_v59  ;;  %4160 = vmatpush1.msra.mxu1 %v3706_v61  ;;  %v3842_v59 = vld [vmem:[#allocation4 + $0x570] sm:$0xff]  ;;  %v3833_v61 = vld [vmem:[#allocation4 + $0x528] sm:$0xff] }
 0x720   :  { %4090 = vmatprep.subr.mxu0 %v3697_v48  ;;  %4161 = vmatprep.subr.mxu1 %v3699_v62  ;;  %v3835_v48 = vld [vmem:[#allocation4 + $0x538] sm:$0xff]  ;;  %v3832_v62 = vld [vmem:[#allocation4 + $0x520] sm:$0xff] }
 0x721   :  { %4091 = vmatpush1.msra.mxu0 %v3696_v63  ;;  %4162 = vmatpush1.msra.mxu1 %v3698_v25  ;;  %v3834_v63 = vld [vmem:[#allocation4 + $0x530] sm:$0xff]  ;;  %v3825_v25 = vld [vmem:[#allocation4 + $0x4e8] sm:$0xff] }
 0x722   :  { %4092 = vmatprep.subr.mxu0 %v3689_v54  ;;  %4163 = vmatprep.subr.mxu1 %v3691_v2  ;;  %v3827_v54 = vld [vmem:[#allocation4 + $0x4f8] sm:$0xff]  ;;  %v3824_v2 = vld [vmem:[#allocation4 + $0x4e0] sm:$0xff] }
 0x723   :  { %4093 = vmatpush1.msra.mxu0 %v3688_v3  ;;  %4164 = vmatpush1.msra.mxu1 %v3690_v4  ;;  %v3826_v3 = vld [vmem:[#allocation4 + $0x4f0] sm:$0xff]  ;;  %v3817_v4 = vld [vmem:[#allocation4 + $0x4a8] sm:$0xff] }
 0x724   :  { %4094 = vmatprep.subr.mxu0 %v3681_v5  ;;  %4165 = vmatprep.subr.mxu1 %v3683_v6  ;;  %v3819_v5 = vld [vmem:[#allocation4 + $0x4b8] sm:$0xff]  ;;  %v3816_v6 = vld [vmem:[#allocation4 + $0x4a0] sm:$0xff] }
 0x725   :  { %4095 = vmatpush1.msra.mxu0 %v3680_v7  ;;  %4166 = vmatpush1.msra.mxu1 %v3682_v56  ;;  %v3818_v7 = vld [vmem:[#allocation4 + $0x4b0] sm:$0xff]  ;;  %v3809_v56 = vld [vmem:[#allocation4 + $0x468] sm:$0xff] }
 0x726   :  { %4096 = vmatprep.subr.mxu0 %v3673_v8  ;;  %4167 = vmatprep.subr.mxu1 %v3675_v9  ;;  %v3811_v8 = vld [vmem:[#allocation4 + $0x478] sm:$0xff]  ;;  %v3808_v9 = vld [vmem:[#allocation4 + $0x460] sm:$0xff] }
 0x727   :  { %4097 = vmatpush1.msra.mxu0 %v3672_v11  ;;  %4168 = vmatpush1.msra.mxu1 %v3674_v60  ;;  %v3810_v11 = vld [vmem:[#allocation4 + $0x470] sm:$0xff]  ;;  %v3801_v60 = vld [vmem:[#allocation4 + $0x428] sm:$0xff] }
 0x728   :  { %4098 = vmatprep.subr.mxu0 %v3921_v12  ;;  %4169 = vmatprep.subr.mxu1 %v3923_v13  ;;  %v3803_v12 = vld [vmem:[#allocation4 + $0x438] sm:$0xff]  ;;  %v3800_v13 = vld [vmem:[#allocation4 + $0x420] sm:$0xff] }
 0x729   :  { %4099 = vmatpush2.msra.mxu0 %v3920_v14  ;;  %4170 = vmatpush2.msra.mxu1 %v3922_v52  ;;  %v3802_v14 = vld [vmem:[#allocation4 + $0x430] sm:$0xff]  ;;  %v4389_v52 = vld [vmem:[#allocation4 + $0x3c8] sm:$0xff] }
 0x72a   :  { %4100 = vmatprep.subr.mxu0 %v3913_v15  ;;  %4171 = vmatprep.subr.mxu1 %v3915_v16  ;;  %v4391_v15 = vld [vmem:[#allocation4 + $0x3d8] sm:$0xff]  ;;  %v4388_v16 = vld [vmem:[#allocation4 + $0x3c0] sm:$0xff] }
 0x72b   :  { %4101 = vmatpush2.msra.mxu0 %v3912_v17  ;;  %4172 = vmatpush2.msra.mxu1 %v3914_v18  ;;  %v4390_v17 = vld [vmem:[#allocation4 + $0x3d0] sm:$0xff]  ;;  %v4381_v18 = vld [vmem:[#allocation4 + $0x388] sm:$0xff] }
 0x72c   :  { %4102 = vmatprep.subr.mxu0 %v3905_v19  ;;  %4173 = vmatprep.subr.mxu1 %v3907_v20  ;;  %v4383_v19 = vld [vmem:[#allocation4 + $0x398] sm:$0xff]  ;;  %v4380_v20 = vld [vmem:[#allocation4 + $0x380] sm:$0xff] }
 0x72d   :  { %4103 = vmatpush2.msra.mxu0 %v3904_v23  ;;  %4174 = vmatpush2.msra.mxu1 %v3906_v24  ;;  %v4382_v23 = vld [vmem:[#allocation4 + $0x390] sm:$0xff]  ;;  %v4373_v24 = vld [vmem:[#allocation4 + $0x348] sm:$0xff] }
 0x72e   :  { %4104 = vmatprep.subr.mxu0 %v3897_v26  ;;  %4175 = vmatprep.subr.mxu1 %v3899_v28  ;;  %v4375_v26 = vld [vmem:[#allocation4 + $0x358] sm:$0xff]  ;;  %v4372_v28 = vld [vmem:[#allocation4 + $0x340] sm:$0xff] }
 0x72f   :  { %4105 = vmatpush2.msra.mxu0 %v3896_v29  ;;  %4176 = vmatpush2.msra.mxu1 %v3898_v30  ;;  %v4374_v29 = vld [vmem:[#allocation4 + $0x350] sm:$0xff]  ;;  %v4367_v30 = vld [vmem:[#allocation4 + $0x318] sm:$0xff] }
 0x730   :  { %4106 = vmatprep.subr.mxu0 %v3889_v31  ;;  %4177 = vmatprep.subr.mxu1 %v3891_v32  ;;  %v4364_v31 = vld [vmem:[#allocation4 + $0x300] sm:$0xff]  ;;  %v4366_v32 = vld [vmem:[#allocation4 + $0x310] sm:$0xff] }
 0x731   :  { %4107 = vmatpush2.msra.mxu0 %v3888_v33  ;;  %4178 = vmatpush2.msra.mxu1 %v3890_v34  ;;  %v4357_v33 = vld [vmem:[#allocation4 + $0x2c8] sm:$0xff]  ;;  %v4359_v34 = vld [vmem:[#allocation4 + $0x2d8] sm:$0xff] }
 0x732   :  { %4108 = vmatprep.subr.mxu0 %v3881_v37  ;;  %4179 = vmatprep.subr.mxu1 %v3883_v22  ;;  %v4356_v37 = vld [vmem:[#allocation4 + $0x2c0] sm:$0xff]  ;;  %v4358_v22 = vld [vmem:[#allocation4 + $0x2d0] sm:$0xff] }
 0x733   :  { %4109 = vmatpush2.msra.mxu0 %v3880_v21  ;;  %4180 = vmatpush2.msra.mxu1 %v3882_v40  ;;  %v4349_v21 = vld [vmem:[#allocation4 + $0x288] sm:$0xff]  ;;  %v4351_v40 = vld [vmem:[#allocation4 + $0x298] sm:$0xff] }
 0x734   :  { %4110 = vmatprep.subr.mxu0 %v3873_v36  ;;  %4181 = vmatprep.subr.mxu1 %v3875_v43  ;;  %v4348_v36 = vld [vmem:[#allocation4 + $0x280] sm:$0xff]  ;;  %v4350_v43 = vld [vmem:[#allocation4 + $0x290] sm:$0xff] }
 0x735   :  { %4111 = vmatpush2.msra.mxu0 %v3872_v44  ;;  %4182 = vmatpush2.msra.mxu1 %v3874_v45  ;;  %v4341_v44 = vld [vmem:[#allocation4 + $0x248] sm:$0xff]  ;;  %v4343_v45 = vld [vmem:[#allocation4 + $0x258] sm:$0xff] }
 0x736   :  { %4112 = vmatprep.subr.mxu0 %v3865_v46  ;;  %4183 = vmatprep.subr.mxu1 %v3867_v47  ;;  %v4340_v46 = vld [vmem:[#allocation4 + $0x240] sm:$0xff]  ;;  %v4342_v47 = vld [vmem:[#allocation4 + $0x250] sm:$0xff] }
 0x737   :  { %4113 = vmatpush2.msra.mxu0 %v3864_v49  ;;  %4184 = vmatpush2.msra.mxu1 %v3866_v27  ;;  %v4333_v49 = vld [vmem:[#allocation4 + $0x208] sm:$0xff]  ;;  %v4335_v27 = vld [vmem:[#allocation4 + $0x218] sm:$0xff] }
 0x738   :  { %4114 = vmatprep.subr.mxu0 %v3857_v50  ;;  %4185 = vmatprep.subr.mxu1 %v3859_v51  ;;  %v4332_v50 = vld [vmem:[#allocation4 + $0x200] sm:$0xff]  ;;  %v4334_v51 = vld [vmem:[#allocation4 + $0x210] sm:$0xff] }
 0x739   :  { %4115 = vmatpush2.msra.mxu0 %v3856_v38  ;;  %4186 = vmatpush2.msra.mxu1 %v3858_v39  ;;  %v4325_v38 = vld [vmem:[#allocation4 + $0x1c8] sm:$0xff]  ;;  %v4327_v39 = vld [vmem:[#allocation4 + $0x1d8] sm:$0xff] }
 0x73a   :  { %4116 = vmatprep.subr.mxu0 %v3849_v53  ;;  %4187 = vmatprep.subr.mxu1 %v3851_v55  ;;  %v4324_v53 = vld [vmem:[#allocation4 + $0x1c0] sm:$0xff]  ;;  %v4326_v55 = vld [vmem:[#allocation4 + $0x1d0] sm:$0xff] }
 0x73b   :  { %4117 = vmatpush2.msra.mxu0 %v3848_v35  ;;  %4188 = vmatpush2.msra.mxu1 %v3850_v41  ;;  %v4317_v35 = vld [vmem:[#allocation4 + $0x188] sm:$0xff]  ;;  %v4319_v41 = vld [vmem:[#allocation4 + $0x198] sm:$0xff] }
 0x73c   :  { %4118 = vmatprep.subr.mxu0 %v3841_v57  ;;  %4189 = vmatprep.subr.mxu1 %v3843_v42  ;;  %v4316_v57 = vld [vmem:[#allocation4 + $0x180] sm:$0xff]  ;;  %v4318_v42 = vld [vmem:[#allocation4 + $0x190] sm:$0xff] }
 0x73d   :  { %4119 = vmatpush2.msra.mxu0 %v3840_v58  ;;  %4190 = vmatpush2.msra.mxu1 %v3842_v59  ;;  %v4309_v58 = vld [vmem:[#allocation4 + $0x148] sm:$0xff]  ;;  %v4311_v59 = vld [vmem:[#allocation4 + $0x158] sm:$0xff] }
 0x73e   :  { %4120 = vmatprep.subr.mxu0 %v3833_v61  ;;  %4191 = vmatprep.subr.mxu1 %v3835_v48  ;;  %v4308_v61 = vld [vmem:[#allocation4 + $0x140] sm:$0xff]  ;;  %v4310_v48 = vld [vmem:[#allocation4 + $0x150] sm:$0xff] }
 0x73f   :  { %4121 = vmatpush2.msra.mxu0 %v3832_v62  ;;  %4192 = vmatpush2.msra.mxu1 %v3834_v63  ;;  %v4301_v62 = vld [vmem:[#allocation4 + $0x108] sm:$0xff]  ;;  %v4303_v63 = vld [vmem:[#allocation4 + $0x118] sm:$0xff] }
 0x740   :  { %4122 = vmatprep.subr.mxu0 %v3825_v25  ;;  %4193 = vmatprep.subr.mxu1 %v3827_v54  ;;  %v4300_v25 = vld [vmem:[#allocation4 + $0x100] sm:$0xff]  ;;  %v4302_v54 = vld [vmem:[#allocation4 + $0x110] sm:$0xff] }
 0x741   :  { %4123 = vmatpush2.msra.mxu0 %v3824_v2  ;;  %4194 = vmatpush2.msra.mxu1 %v3826_v3  ;;  %v4293_v2 = vld [vmem:[#allocation4 + $0xc8] sm:$0xff]  ;;  %v4295_v3 = vld [vmem:[#allocation4 + $0xd8] sm:$0xff] }
 0x742   :  { %4124 = vmatprep.subr.mxu0 %v3817_v4  ;;  %4195 = vmatprep.subr.mxu1 %v3819_v5  ;;  %v4292_v4 = vld [vmem:[#allocation4 + $0xc0] sm:$0xff]  ;;  %v4294_v5 = vld [vmem:[#allocation4 + $0xd0] sm:$0xff] }
 0x743   :  { %4125 = vmatpush2.msra.mxu0 %v3816_v6  ;;  %4196 = vmatpush2.msra.mxu1 %v3818_v7  ;;  %v4285_v6 = vld [vmem:[#allocation4 + $0x88] sm:$0xff]  ;;  %v4287_v7 = vld [vmem:[#allocation4 + $0x98] sm:$0xff] }
 0x744   :  { %4126 = vmatprep.subr.mxu0 %v3809_v56  ;;  %4197 = vmatprep.subr.mxu1 %v3811_v8  ;;  %v4284_v56 = vld [vmem:[#allocation4 + $0x80] sm:$0xff]  ;;  %v4286_v8 = vld [vmem:[#allocation4 + $0x90] sm:$0xff] }
 0x745   :  { %4127 = vmatpush2.msra.mxu0 %v3808_v9  ;;  %4198 = vmatpush2.msra.mxu1 %v3810_v11  ;;  %v4277_v9 = vld [vmem:[#allocation4 + $0x48] sm:$0xff]  ;;  %v4279_v11 = vld [vmem:[#allocation4 + $0x58] sm:$0xff] }
 0x746   :  { %4128 = vmatprep.subr.mxu0 %v3801_v60  ;;  %4199 = vmatprep.subr.mxu1 %v3803_v12  ;;  %v4276_v60 = vld [vmem:[#allocation4 + $0x40] sm:$0xff]  ;;  %v4278_v12 = vld [vmem:[#allocation4 + $0x50] sm:$0xff] }
 0x747   :  { %4129 = vmatpush2.msra.mxu0 %v3800_v13  ;;  %4200 = vmatpush2.msra.mxu1 %v3802_v14  ;;  %v4269_v13 = vld [vmem:[#allocation4 + $0x8] sm:$0xff]  ;;  %v4271_v14 = vld [vmem:[#allocation4 + $0x18] sm:$0xff] }
 0x748   :  { %4131 = vmatmul.mubr.f32.vlgmr.msra.gmra.mxu0 %v6263_v10  ;;  %4202 = vmatmul.mubr.f32.vlgmr.msra.gmra.mxu1 %v6263_v10  ;;  %v4365_v10 = vld [vmem:[#allocation4 + $0x308] sm:$0xff] }
 0x749   :  { %4524 = vmatprep.subr.mxu0 %v4389_v52  ;;  %4595 = vmatprep.subr.mxu1 %v4391_v15  ;;  %v4268_v52 = vld [vmem:[#allocation4] sm:$0xff]  ;;  %v4270_v15 = vld [vmem:[#allocation4 + $0x10] sm:$0xff] }
 0x74a   :  { %4525 = vmatpush1.msra.mxu0 %v4388_v16  ;;  %4596 = vmatpush1.msra.mxu1 %v4390_v17  ;;  %v4517_v16 = vld [vmem:[#allocation4 + $0x7c8] sm:$0xff]  ;;  %v4519_v17 = vld [vmem:[#allocation4 + $0x7d8] sm:$0xff] }
 0x74b   :  { %4526 = vmatprep.subr.mxu0 %v4381_v18  ;;  %4597 = vmatprep.subr.mxu1 %v4383_v19  ;;  %v4516_v18 = vld [vmem:[#allocation4 + $0x7c0] sm:$0xff]  ;;  %v4518_v19 = vld [vmem:[#allocation4 + $0x7d0] sm:$0xff] }
 0x74c   :  { %4527 = vmatpush1.msra.mxu0 %v4380_v20  ;;  %4598 = vmatpush1.msra.mxu1 %v4382_v23  ;;  %v4509_v20 = vld [vmem:[#allocation4 + $0x788] sm:$0xff]  ;;  %v4511_v23 = vld [vmem:[#allocation4 + $0x798] sm:$0xff] }
 0x74d   :  { %4528 = vmatprep.subr.mxu0 %v4373_v24  ;;  %4599 = vmatprep.subr.mxu1 %v4375_v26  ;;  %v4508_v24 = vld [vmem:[#allocation4 + $0x780] sm:$0xff]  ;;  %v4510_v26 = vld [vmem:[#allocation4 + $0x790] sm:$0xff] }
 0x74e   :  { %4529 = vmatpush1.msra.mxu0 %v4372_v28  ;;  %4600 = vmatpush1.msra.mxu1 %v4374_v29  ;;  %v4501_v28 = vld [vmem:[#allocation4 + $0x748] sm:$0xff]  ;;  %v4503_v29 = vld [vmem:[#allocation4 + $0x758] sm:$0xff] }
 0x74f   :  { %4530 = vmatprep.subr.mxu0 %v4365_v10  ;;  %4601 = vmatprep.subr.mxu1 %v4367_v30  ;;  %v4500_v10 = vld [vmem:[#allocation4 + $0x740] sm:$0xff]  ;;  %v4502_v30 = vld [vmem:[#allocation4 + $0x750] sm:$0xff] }
 0x750   :  { %4531 = vmatpush1.msra.mxu0 %v4364_v31  ;;  %4602 = vmatpush1.msra.mxu1 %v4366_v32  ;;  %v4493_v31 = vld [vmem:[#allocation4 + $0x708] sm:$0xff]  ;;  %v4495_v32 = vld [vmem:[#allocation4 + $0x718] sm:$0xff] }
 0x751   :  { %4532 = vmatprep.subr.mxu0 %v4357_v33  ;;  %4603 = vmatprep.subr.mxu1 %v4359_v34  ;;  %v4492_v33 = vld [vmem:[#allocation4 + $0x700] sm:$0xff]  ;;  %v4494_v34 = vld [vmem:[#allocation4 + $0x710] sm:$0xff] }
 0x752   :  { %4533 = vmatpush1.msra.mxu0 %v4356_v37  ;;  %4604 = vmatpush1.msra.mxu1 %v4358_v22  ;;  %v4485_v37 = vld [vmem:[#allocation4 + $0x6c8] sm:$0xff]  ;;  %v4487_v22 = vld [vmem:[#allocation4 + $0x6d8] sm:$0xff] }
 0x753   :  { %4534 = vmatprep.subr.mxu0 %v4349_v21  ;;  %4605 = vmatprep.subr.mxu1 %v4351_v40  ;;  %v4484_v21 = vld [vmem:[#allocation4 + $0x6c0] sm:$0xff]  ;;  %v4486_v40 = vld [vmem:[#allocation4 + $0x6d0] sm:$0xff] }
 0x754   :  { %4535 = vmatpush1.msra.mxu0 %v4348_v36  ;;  %4606 = vmatpush1.msra.mxu1 %v4350_v43  ;;  %v4477_v36 = vld [vmem:[#allocation4 + $0x688] sm:$0xff]  ;;  %v4479_v43 = vld [vmem:[#allocation4 + $0x698] sm:$0xff] }
 0x755   :  { %4536 = vmatprep.subr.mxu0 %v4341_v44  ;;  %4607 = vmatprep.subr.mxu1 %v4343_v45  ;;  %v4476_v44 = vld [vmem:[#allocation4 + $0x680] sm:$0xff]  ;;  %v4478_v45 = vld [vmem:[#allocation4 + $0x690] sm:$0xff] }
 0x756   :  { %4537 = vmatpush1.msra.mxu0 %v4340_v46  ;;  %4608 = vmatpush1.msra.mxu1 %v4342_v47  ;;  %v4469_v46 = vld [vmem:[#allocation4 + $0x648] sm:$0xff]  ;;  %v4471_v47 = vld [vmem:[#allocation4 + $0x658] sm:$0xff] }
 0x757   :  { %4538 = vmatprep.subr.mxu0 %v4333_v49  ;;  %4609 = vmatprep.subr.mxu1 %v4335_v27  ;;  %v4468_v49 = vld [vmem:[#allocation4 + $0x640] sm:$0xff]  ;;  %v4470_v27 = vld [vmem:[#allocation4 + $0x650] sm:$0xff] }
 0x758   :  { %4539 = vmatpush1.msra.mxu0 %v4332_v50  ;;  %4610 = vmatpush1.msra.mxu1 %v4334_v51  ;;  %v4461_v50 = vld [vmem:[#allocation4 + $0x608] sm:$0xff]  ;;  %v4463_v51 = vld [vmem:[#allocation4 + $0x618] sm:$0xff] }
 0x759   :  { %4540 = vmatprep.subr.mxu0 %v4325_v38  ;;  %4611 = vmatprep.subr.mxu1 %v4327_v39  ;;  %v4460_v38 = vld [vmem:[#allocation4 + $0x600] sm:$0xff]  ;;  %v4462_v39 = vld [vmem:[#allocation4 + $0x610] sm:$0xff] }
 0x75a   :  { %4541 = vmatpush1.msra.mxu0 %v4324_v53  ;;  %4612 = vmatpush1.msra.mxu1 %v4326_v55  ;;  %v4453_v53 = vld [vmem:[#allocation4 + $0x5c8] sm:$0xff]  ;;  %v4455_v55 = vld [vmem:[#allocation4 + $0x5d8] sm:$0xff] }
 0x75b   :  { %4542 = vmatprep.subr.mxu0 %v4317_v35  ;;  %4613 = vmatprep.subr.mxu1 %v4319_v41  ;;  %v4452_v35 = vld [vmem:[#allocation4 + $0x5c0] sm:$0xff]  ;;  %v4454_v41 = vld [vmem:[#allocation4 + $0x5d0] sm:$0xff] }
 0x75c   :  { %4543 = vmatpush1.msra.mxu0 %v4316_v57  ;;  %4614 = vmatpush1.msra.mxu1 %v4318_v42  ;;  %v4445_v57 = vld [vmem:[#allocation4 + $0x588] sm:$0xff]  ;;  %v4447_v42 = vld [vmem:[#allocation4 + $0x598] sm:$0xff] }
 0x75d   :  { %4544 = vmatprep.subr.mxu0 %v4309_v58  ;;  %4615 = vmatprep.subr.mxu1 %v4311_v59  ;;  %v4444_v58 = vld [vmem:[#allocation4 + $0x580] sm:$0xff]  ;;  %v4446_v59 = vld [vmem:[#allocation4 + $0x590] sm:$0xff] }
 0x75e   :  { %4545 = vmatpush1.msra.mxu0 %v4308_v61  ;;  %4616 = vmatpush1.msra.mxu1 %v4310_v48  ;;  %v4437_v61 = vld [vmem:[#allocation4 + $0x548] sm:$0xff]  ;;  %v4439_v48 = vld [vmem:[#allocation4 + $0x558] sm:$0xff] }
 0x75f   :  { %4546 = vmatprep.subr.mxu0 %v4301_v62  ;;  %4617 = vmatprep.subr.mxu1 %v4303_v63  ;;  %v4436_v62 = vld [vmem:[#allocation4 + $0x540] sm:$0xff]  ;;  %v4438_v63 = vld [vmem:[#allocation4 + $0x550] sm:$0xff] }
 0x760   :  { %4547 = vmatpush1.msra.mxu0 %v4300_v25  ;;  %4618 = vmatpush1.msra.mxu1 %v4302_v54  ;;  %v4429_v25 = vld [vmem:[#allocation4 + $0x508] sm:$0xff]  ;;  %v4431_v54 = vld [vmem:[#allocation4 + $0x518] sm:$0xff] }
 0x761   :  { %4548 = vmatprep.subr.mxu0 %v4293_v2  ;;  %4619 = vmatprep.subr.mxu1 %v4295_v3  ;;  %v4428_v2 = vld [vmem:[#allocation4 + $0x500] sm:$0xff]  ;;  %v4430_v3 = vld [vmem:[#allocation4 + $0x510] sm:$0xff] }
 0x762   :  { %4549 = vmatpush1.msra.mxu0 %v4292_v4  ;;  %4620 = vmatpush1.msra.mxu1 %v4294_v5  ;;  %v4421_v4 = vld [vmem:[#allocation4 + $0x4c8] sm:$0xff]  ;;  %v4423_v5 = vld [vmem:[#allocation4 + $0x4d8] sm:$0xff] }
 0x763   :  { %4550 = vmatprep.subr.mxu0 %v4285_v6  ;;  %4621 = vmatprep.subr.mxu1 %v4287_v7  ;;  %v4420_v6 = vld [vmem:[#allocation4 + $0x4c0] sm:$0xff]  ;;  %v4422_v7 = vld [vmem:[#allocation4 + $0x4d0] sm:$0xff] }
 0x764   :  { %4551 = vmatpush1.msra.mxu0 %v4284_v56  ;;  %4622 = vmatpush1.msra.mxu1 %v4286_v8  ;;  %v4413_v56 = vld [vmem:[#allocation4 + $0x488] sm:$0xff]  ;;  %v4415_v8 = vld [vmem:[#allocation4 + $0x498] sm:$0xff] }
 0x765   :  { %4552 = vmatprep.subr.mxu0 %v4277_v9  ;;  %4623 = vmatprep.subr.mxu1 %v4279_v11  ;;  %v4412_v9 = vld [vmem:[#allocation4 + $0x480] sm:$0xff]  ;;  %v4414_v11 = vld [vmem:[#allocation4 + $0x490] sm:$0xff] }
 0x766   :  { %4553 = vmatpush1.msra.mxu0 %v4276_v60  ;;  %4624 = vmatpush1.msra.mxu1 %v4278_v12  ;;  %v4405_v60 = vld [vmem:[#allocation4 + $0x448] sm:$0xff]  ;;  %v4407_v12 = vld [vmem:[#allocation4 + $0x458] sm:$0xff] }
 0x767   :  { %4554 = vmatprep.subr.mxu0 %v4269_v13  ;;  %4625 = vmatprep.subr.mxu1 %v4271_v14  ;;  %v4404_v13 = vld [vmem:[#allocation4 + $0x440] sm:$0xff]  ;;  %v4406_v14 = vld [vmem:[#allocation4 + $0x450] sm:$0xff] }
 0x768   :  { %4555 = vmatpush1.msra.mxu0 %v4268_v52  ;;  %4626 = vmatpush1.msra.mxu1 %v4270_v15  ;;  %v4397_v52 = vld [vmem:[#allocation4 + $0x408] sm:$0xff]  ;;  %v4399_v15 = vld [vmem:[#allocation4 + $0x418] sm:$0xff] }
 0x769   :  { %4556 = vmatprep.subr.mxu0 %v4517_v16  ;;  %4627 = vmatprep.subr.mxu1 %v4519_v17  ;;  %v4396_v16 = vld [vmem:[#allocation4 + $0x400] sm:$0xff]  ;;  %v4398_v17 = vld [vmem:[#allocation4 + $0x410] sm:$0xff] }
 0x76a   :  { %4557 = vmatpush2.msra.mxu0 %v4516_v18  ;;  %4628 = vmatpush2.msra.mxu1 %v4518_v19  ;;  %v4393_v18 = vld [vmem:[#allocation4 + $0x3e8] sm:$0xff]  ;;  %v4395_v19 = vld [vmem:[#allocation4 + $0x3f8] sm:$0xff] }
 0x76b   :  { %4558 = vmatprep.subr.mxu0 %v4509_v20  ;;  %4629 = vmatprep.subr.mxu1 %v4511_v23 }
 0x76c   :  { %4559 = vmatpush2.msra.mxu0 %v4508_v24  ;;  %4630 = vmatpush2.msra.mxu1 %v4510_v26  ;;  %v3662_v24 = vld [vmem:[#allocation2 + $0xd8] sm:$0xf] }
 0x76d   :  { %4560 = vmatprep.subr.mxu0 %v4501_v28  ;;  %4631 = vmatprep.subr.mxu1 %v4503_v29  ;;  %v3660_v28 = vld [vmem:[#allocation2 + $0xc0] sm:$0xf] }
 0x76e   :  { %4561 = vmatpush2.msra.mxu0 %v4500_v10  ;;  %4632 = vmatpush2.msra.mxu1 %v4502_v30 }
 0x76f   :  { %4562 = vmatprep.subr.mxu0 %v4493_v31  ;;  %4633 = vmatprep.subr.mxu1 %v4495_v32  ;;  %v3663_v31 = vld [vmem:[#allocation2 + $0xa0] sm:$0xf] }
 0x770   :  { %4563 = vmatpush2.msra.mxu0 %v4492_v33  ;;  %4634 = vmatpush2.msra.mxu1 %v4494_v34  ;;  %v3661_v33 = vld [vmem:[#allocation2 + $0x118] sm:$0xf] }
 0x771   :  { %4564 = vmatprep.subr.mxu0 %v4485_v37  ;;  %4635 = vmatprep.subr.mxu1 %v4487_v22  ;;  %v3666_v37 = vld [vmem:[#allocation2 + $0x50] sm:$0xf] }
 0x772   :  { %4565 = vmatpush2.msra.mxu0 %v4484_v21  ;;  %4636 = vmatpush2.msra.mxu1 %v4486_v40  ;;  %v3667_v40 = vld [vmem:[#allocation2 + $0xe8] sm:$0xf] }
 0x773   :  { %4566 = vmatprep.subr.mxu0 %v4477_v36  ;;  %4637 = vmatprep.subr.mxu1 %v4479_v43 }
 0x774   :  { %4567 = vmatpush2.msra.mxu0 %v4476_v44  ;;  %4638 = vmatpush2.msra.mxu1 %v4478_v45 }
 0x775   :  { %4568 = vmatprep.subr.mxu0 %v4469_v46  ;;  %4639 = vmatprep.subr.mxu1 %v4471_v47 }
 0x776   :  { %4569 = vmatpush2.msra.mxu0 %v4468_v49  ;;  %4640 = vmatpush2.msra.mxu1 %v4470_v27  ;;  %v3664_v49 = vld [vmem:[#allocation2 + $0x68] sm:$0xf] }
 0x777   :  { %4570 = vmatprep.subr.mxu0 %v4461_v50  ;;  %4641 = vmatprep.subr.mxu1 %v4463_v51 }
 0x778   :  { %4571 = vmatpush2.msra.mxu0 %v4460_v38  ;;  %4642 = vmatpush2.msra.mxu1 %v4462_v39  ;;  %v3665_v39 = vld [vmem:[#allocation2 + $0x130] sm:$0xf] }
 0x779   :  { %4572 = vmatprep.subr.mxu0 %v4453_v53  ;;  %4643 = vmatprep.subr.mxu1 %v4455_v55 }
 0x77a   :  { %4573 = vmatpush2.msra.mxu0 %v4452_v35  ;;  %4644 = vmatpush2.msra.mxu1 %v4454_v41 }
 0x77b   :  { %4574 = vmatprep.subr.mxu0 %v4445_v57  ;;  %4645 = vmatprep.subr.mxu1 %v4447_v42 }
 0x77c   :  { %4575 = vmatpush2.msra.mxu0 %v4444_v58  ;;  %4646 = vmatpush2.msra.mxu1 %v4446_v59  ;;  %v4238_v58 = vrot.slane %v6257_v0, 4 }
 0x77d   :  { %4576 = vmatprep.subr.mxu0 %v4437_v61  ;;  %4647 = vmatprep.subr.mxu1 %v4439_v48 }
 0x77e   :  { %4577 = vmatpush2.msra.mxu0 %v4436_v62  ;;  %4648 = vmatpush2.msra.mxu1 %v4438_v63  ;;  %v4239_v63 = vrot.slane %v6260_v1, 4 }
 0x77f   :  { %4578 = vmatprep.subr.mxu0 %v4429_v25  ;;  %4649 = vmatprep.subr.mxu1 %v4431_v54 }
 0x780   :  { %4579 = vmatpush2.msra.mxu0 %v4428_v2  ;;  %4650 = vmatpush2.msra.mxu1 %v4430_v3 }
 0x781   :  { %4580 = vmatprep.subr.mxu0 %v4421_v4  ;;  %4651 = vmatprep.subr.mxu1 %v4423_v5 }
 0x782   :  { %4581 = vmatpush2.msra.mxu0 %v4420_v6  ;;  %4652 = vmatpush2.msra.mxu1 %v4422_v7 }
 0x783   :  { %4582 = vmatprep.subr.mxu0 %v4413_v56  ;;  %4653 = vmatprep.subr.mxu1 %v4415_v8 }
 0x784   :  { %4583 = vmatpush2.msra.mxu0 %v4412_v9  ;;  %4654 = vmatpush2.msra.mxu1 %v4414_v11 }
 0x785   :  { %4584 = vmatprep.subr.mxu0 %v4405_v60  ;;  %4655 = vmatprep.subr.mxu1 %v4407_v12 }
 0x786   :  { %4585 = vmatpush2.msra.mxu0 %v4404_v13  ;;  %4656 = vmatpush2.msra.mxu1 %v4406_v14  ;;  %v4392_v14 = vld [vmem:[#allocation4 + $0x3e0] sm:$0xff] }
 0x787   :  { %4586 = vmatprep.subr.mxu0 %v4397_v52  ;;  %4657 = vmatprep.subr.mxu1 %v4399_v15  ;;  %v4394_v52 = vld [vmem:[#allocation4 + $0x3f0] sm:$0xff] }
 0x788   :  { %4587 = vmatpush2.msra.mxu0 %v4396_v16  ;;  %4658 = vmatpush2.msra.mxu1 %v4398_v17  ;;  %v4385_v16 = vld [vmem:[#allocation4 + $0x3a8] sm:$0xff]  ;;  %v4387_v17 = vld [vmem:[#allocation4 + $0x3b8] sm:$0xff] }
 0x789   :  { %4666 = vmatprep.subr.mxu0 %v4393_v18  ;;  %4737 = vmatprep.subr.mxu1 %v4395_v19  ;;  %v4384_v18 = vld [vmem:[#allocation4 + $0x3a0] sm:$0xff]  ;;  %v4386_v19 = vld [vmem:[#allocation4 + $0x3b0] sm:$0xff] }
 0x7c7   :  { %v4061_v20 = vpop.f32.mrf.mxu1  ;;  %v3990_v23 = vpop.f32.mrf.mxu0 }
 0x7c8   :  { %v4210_v29 = vadd.f32 %v4061_v20, %v3662_v24  ;;  %v4208_v10 = vadd.f32 %v3990_v23, %v3660_v28  ;;  %v4377_v20 = vld [vmem:[#allocation4 + $0x368] sm:$0xff]  ;;  %v4379_v23 = vld [vmem:[#allocation4 + $0x378] sm:$0xff]  ;;  %v4376_v24 = vld [vmem:[#allocation4 + $0x360] sm:$0xff] }
 0x7c9   :  { %v4063_v26 = vpop.f32.mrf.mxu1  ;;  %v3992_v30 = vpop.f32.mrf.mxu0  ;;  %v4369_v28 = vld [vmem:[#allocation4 + $0x328] sm:$0xff] }
 0x7ca   :  { %v4211_v32 = vadd.f32 %v4063_v26, %v3663_v31  ;;  %5878 = vtanh.f32 %v4210_v29  ;;  %v4209_v34 = vadd.f32 %v3992_v30, %v3661_v33  ;;  %v4378_v26 = vld [vmem:[#allocation4 + $0x370] sm:$0xff]  ;;  %v4371_v29 = vld [vmem:[#allocation4 + $0x338] sm:$0xff]  ;;  %v4361_v31 = vld [vmem:[#allocation4 + $0x2e8] sm:$0xff] }
 0x7cb   :  { %5880 = vtanh.f32 %v4208_v10  ;;  %v4368_v10 = vld [vmem:[#allocation4 + $0x320] sm:$0xff]  ;;  %v4370_v30 = vld [vmem:[#allocation4 + $0x330] sm:$0xff] }
 0x7cc   :  { %5882 = vtanh.f32 %v4211_v32  ;;  %v4363_v32 = vld [vmem:[#allocation4 + $0x2f8] sm:$0xff]  ;;  %v4360_v33 = vld [vmem:[#allocation4 + $0x2e0] sm:$0xff] }
 0x7cd   :  { %5884 = vtanh.f32 %v4209_v34  ;;  %v4362_v34 = vld [vmem:[#allocation4 + $0x2f0] sm:$0xff] }
 0x7d7   :  { %v5879_v45 = vpop.eup %5878 }
 0x7d8   :  { %v5881_v46 = vpop.eup %5880  ;;  %v4226_v50 = vmul.f32 0.5, %v5879_v45  ;;  %v4346_v45 = vld [vmem:[#allocation4 + $0x270] sm:$0xff] }
 0x7d9   :  { %v5883_v47 = vpop.eup %5882  ;;  %v4224_v53 = vmul.f32 0.5, %v5881_v46  ;;  %v4337_v46 = vld [vmem:[#allocation4 + $0x228] sm:$0xff] }
 0x7da   :  { %v5885_v38 = vpop.eup %5884  ;;  %v4227_v55 = vmul.f32 0.5, %v5883_v47  ;;  %v4232_v41 = vadd.f32 0.5, %v4226_v50  ;;  %v4339_v47 = vld [vmem:[#allocation4 + $0x238] sm:$0xff]  ;;  %v4329_v50 = vld [vmem:[#allocation4 + $0x1e8] sm:$0xff] }
 0x7db   :  { %v4225_v57 = vmul.f32 0.5, %v5885_v38  ;;  %v4230_v42 = vadd.f32 0.5, %v4224_v53  ;;  %v4328_v38 = vld [vmem:[#allocation4 + $0x1e0] sm:$0xff]  ;;  %v4321_v53 = vld [vmem:[#allocation4 + $0x1a8] sm:$0xff] }
 0x7dc   :  { %v4233_v59 = vadd.f32 0.5, %v4227_v55  ;;  %v4242_v48 = vmul.f32 %v4238_v58, %v4232_v41  ;;  %v4323_v55 = vld [vmem:[#allocation4 + $0x1b8] sm:$0xff]  ;;  %v4322_v41 = vld [vmem:[#allocation4 + $0x1b0] sm:$0xff]  ;;  %v4312_v58 = vld [vmem:[#allocation4 + $0x160] sm:$0xff] }
 0x7dd   :  { %v4231_v62 = vadd.f32 0.5, %v4225_v57  ;;  %v4313_v57 = vld [vmem:[#allocation4 + $0x168] sm:$0xff] }
 0x7de   :  { %v4243_v2 = vmul.f32 %v4239_v63, %v4233_v59  ;;  %v4314_v59 = vld [vmem:[#allocation4 + $0x170] sm:$0xff] }
 0x7df   :  { %v4306_v63 = vld [vmem:[#allocation4 + $0x130] sm:$0xff] }
 0x808   :  { %v4203_v22 = vpop.f32.mrf.mxu1  ;;  %v4132_v44 = vpop.f32.mrf.mxu0 }
 0x809   :  { %v4214_v21 = vadd.f32 %v4203_v22, %v3666_v37  ;;  %v4212_v51 = vadd.f32 %v4132_v44, %v3664_v49  ;;  %v4353_v37 = vld [vmem:[#allocation4 + $0x2a8] sm:$0xff]  ;;  %v4355_v22 = vld [vmem:[#allocation4 + $0x2b8] sm:$0xff]  ;;  %v4344_v44 = vld [vmem:[#allocation4 + $0x260] sm:$0xff] }
 0x80a   :  { %v4205_v36 = vpop.f32.mrf.mxu1  ;;  %v4134_v27 = vpop.f32.mrf.mxu0  ;;  %v4336_v49 = vld [vmem:[#allocation4 + $0x220] sm:$0xff] }
 0x80b   :  { %v4215_v43 = vadd.f32 %v4205_v36, %v3667_v40  ;;  %5886 = vtanh.f32 %v4214_v21  ;;  %v4213_v35 = vadd.f32 %v4134_v27, %v3665_v39  ;;  %v4352_v21 = vld [vmem:[#allocation4 + $0x2a0] sm:$0xff]  ;;  %v4354_v40 = vld [vmem:[#allocation4 + $0x2b0] sm:$0xff]  ;;  %v4345_v36 = vld [vmem:[#allocation4 + $0x268] sm:$0xff] }
 0x80c   :  { %v4338_v27 = vld [vmem:[#allocation4 + $0x230] sm:$0xff] }
 0x80d   :  { %5888 = vtanh.f32 %v4215_v43  ;;  %v4347_v43 = vld [vmem:[#allocation4 + $0x278] sm:$0xff]  ;;  %v4330_v39 = vld [vmem:[#allocation4 + $0x1f0] sm:$0xff] }
 0x80e   :  { %5890 = vtanh.f32 %v4212_v51  ;;  %v4331_v51 = vld [vmem:[#allocation4 + $0x1f8] sm:$0xff] }
 0x80f   :  { %5892 = vtanh.f32 %v4213_v35  ;;  %v4320_v35 = vld [vmem:[#allocation4 + $0x1a0] sm:$0xff] }
 0x818   :  { %v5887_v61 = vpop.eup %5886 }
 0x819   :  { %v4244_v25 = vmul.f32 %v5887_v61, %v4230_v42  ;;  %v4315_v42 = vld [vmem:[#allocation4 + $0x178] sm:$0xff]  ;;  %v4305_v61 = vld [vmem:[#allocation4 + $0x128] sm:$0xff] }
 0x81a   :  { %v5889_v54 = vpop.eup %5888 }
 0x81b   :  { %v6272_v3 = vadd.f32 %v4244_v25, %v4242_v48  ;;  %v4245_v4 = vmul.f32 %v5889_v54, %v4231_v62  ;;  %v5891_v0 = vpop.eup %5890  ;;  %v4307_v48 = vld [vmem:[#allocation4 + $0x138] sm:$0xff]  ;;  %v4304_v62 = vld [vmem:[#allocation4 + $0x120] sm:$0xff]  ;;  %v4297_v25 = vld [vmem:[#allocation4 + $0xe8] sm:$0xff] }
 0x81c   :  { %v5893_v6 = vpop.eup %5892  ;;  %v4228_v7 = vmul.f32 0.5, %v5891_v0  ;;  %v4299_v54 = vld [vmem:[#allocation4 + $0xf8] sm:$0xff]  ;;  %v4289_v0 = vld [vmem:[#allocation4 + $0xa8] sm:$0xff] }
 0x81d   :  { %5894 = vtanh.f32 %v6272_v3  ;;  %v6275_v5 = vadd.f32 %v4245_v4, %v4243_v2  ;;  %v4229_v56 = vmul.f32 0.5, %v5893_v6  ;;  %v4296_v2 = vld [vmem:[#allocation4 + $0xe0] sm:$0xff]  ;;  %v4298_v4 = vld [vmem:[#allocation4 + $0xf0] sm:$0xff]  ;;  %v4291_v6 = vld [vmem:[#allocation4 + $0xb8] sm:$0xff] }
 0x81e   :  { %v4234_v8 = vadd.f32 0.5, %v4228_v7  ;;  %v4288_v7 = vld [vmem:[#allocation4 + $0xa0] sm:$0xff] }
 0x81f   :  { %5896 = vtanh.f32 %v6275_v5  ;;  %v4235_v11 = vadd.f32 0.5, %v4229_v56  ;;  %v4290_v56 = vld [vmem:[#allocation4 + $0xb0] sm:$0xff] }
 0x82a   :  { %v5895_v9 = vpop.eup %5894 }
 0x82b   :  { %v6278_v1 = vmul.f32 %v5895_v9, %v4234_v8  ;;  %v4281_v8 = vld [vmem:[#allocation4 + $0x68] sm:$0xff]  ;;  %v4283_v9 = vld [vmem:[#allocation4 + $0x78] sm:$0xff] }
 0x82c   :  { %v5897_v60 = vpop.eup %5896 }
 0x82d   :  { %v4251_v12 = vmul.f32 %v5897_v60, %v4235_v11  ;;  %v4254_v13 = vrot.slane %v6278_v1, 4  ;;  %v4280_v11 = vld [vmem:[#allocation4 + $0x60] sm:$0xff]  ;;  %v4282_v60 = vld [vmem:[#allocation4 + $0x70] sm:$0xff] }
 0x82f   :  { %v4255_v15 = vrot.slane %v4251_v12, 4  ;;  %4588 = vmatprep.mubr.f32.mxu0 %v4251_v12  ;;  %4659 = vmatprep.mubr.f32.mxu1 %v4251_v12  ;;  %4258 = vst [vmem:[#allocation3] sm:$0xf0] %v4254_v13  ;;  %v4275_v13 = vld [vmem:[#allocation4 + $0x38] sm:$0xff] }
 0x830   :  { %4589 = vmatmul.mubr.f32.vlgmr.msra.gmra.mxu0 %v6278_v1  ;;  %4660 = vmatmul.mubr.f32.vlgmr.msra.gmra.mxu1 %v6278_v1 }
 0x831   :  { %4259 = vst [vmem:[#allocation3 + $0x20] sm:$0xf0] %v4255_v15  ;;  %4667 = vmatpush1.msra.mxu0 %v4392_v14  ;;  %4738 = vmatpush1.msra.mxu1 %v4394_v52  ;;  %v4272_v14 = vld [vmem:[#allocation4 + $0x20] sm:$0xff]  ;;  %v4274_v52 = vld [vmem:[#allocation4 + $0x30] sm:$0xff]  ;;  %v4521_v15 = vld [vmem:[#allocation4 + $0x7e8] sm:$0xff] }
 0x832   :  { %4668 = vmatprep.subr.mxu0 %v4385_v16  ;;  %4730 = vmatprep.mubr.f32.mxu0 %v4251_v12  ;;  %v4523_v16 = vld [vmem:[#allocation4 + $0x7f8] sm:$0xff] }
 0x833   :  { %4739 = vmatprep.subr.mxu1 %v4387_v17  ;;  %4801 = vmatprep.mubr.f32.mxu1 %v4251_v12  ;;  %v4273_v12 = vld [vmem:[#allocation4 + $0x28] sm:$0xff]  ;;  %v4520_v17 = vld [vmem:[#allocation4 + $0x7e0] sm:$0xff] }
 0x834   :  { %4669 = vmatpush1.msra.mxu0 %v4384_v18  ;;  %4740 = vmatpush1.msra.mxu1 %v4386_v19  ;;  %v4522_v18 = vld [vmem:[#allocation4 + $0x7f0] sm:$0xff]  ;;  %v4513_v19 = vld [vmem:[#allocation4 + $0x7a8] sm:$0xff] }
 0x835   :  { %4670 = vmatprep.subr.mxu0 %v4377_v20  ;;  %4741 = vmatprep.subr.mxu1 %v4379_v23  ;;  %v4515_v20 = vld [vmem:[#allocation4 + $0x7b8] sm:$0xff]  ;;  %v4512_v23 = vld [vmem:[#allocation4 + $0x7a0] sm:$0xff] }
 0x836   :  { %4671 = vmatpush1.msra.mxu0 %v4376_v24  ;;  %4742 = vmatpush1.msra.mxu1 %v4378_v26  ;;  %v4514_v24 = vld [vmem:[#allocation4 + $0x7b0] sm:$0xff]  ;;  %v4505_v26 = vld [vmem:[#allocation4 + $0x768] sm:$0xff] }
 0x837   :  { %4672 = vmatprep.subr.mxu0 %v4369_v28  ;;  %4743 = vmatprep.subr.mxu1 %v4371_v29  ;;  %v4507_v28 = vld [vmem:[#allocation4 + $0x778] sm:$0xff]  ;;  %v4504_v29 = vld [vmem:[#allocation4 + $0x760] sm:$0xff] }
 0x838   :  { %4673 = vmatpush1.msra.mxu0 %v4368_v10  ;;  %4744 = vmatpush1.msra.mxu1 %v4370_v30  ;;  %v4506_v10 = vld [vmem:[#allocation4 + $0x770] sm:$0xff]  ;;  %v4497_v30 = vld [vmem:[#allocation4 + $0x728] sm:$0xff] }
 0x839   :  { %4674 = vmatprep.subr.mxu0 %v4361_v31  ;;  %4745 = vmatprep.subr.mxu1 %v4363_v32  ;;  %v4499_v31 = vld [vmem:[#allocation4 + $0x738] sm:$0xff]  ;;  %v4496_v32 = vld [vmem:[#allocation4 + $0x720] sm:$0xff] }
 0x83a   :  { %4675 = vmatpush1.msra.mxu0 %v4360_v33  ;;  %4746 = vmatpush1.msra.mxu1 %v4362_v34  ;;  %v4498_v33 = vld [vmem:[#allocation4 + $0x730] sm:$0xff]  ;;  %v4489_v34 = vld [vmem:[#allocation4 + $0x6e8] sm:$0xff] }
 0x83b   :  { %4676 = vmatprep.subr.mxu0 %v4353_v37  ;;  %4747 = vmatprep.subr.mxu1 %v4355_v22  ;;  %v4491_v37 = vld [vmem:[#allocation4 + $0x6f8] sm:$0xff]  ;;  %v4488_v22 = vld [vmem:[#allocation4 + $0x6e0] sm:$0xff] }
 0x83c   :  { %4677 = vmatpush1.msra.mxu0 %v4352_v21  ;;  %4748 = vmatpush1.msra.mxu1 %v4354_v40  ;;  %v4490_v21 = vld [vmem:[#allocation4 + $0x6f0] sm:$0xff]  ;;  %v4481_v40 = vld [vmem:[#allocation4 + $0x6a8] sm:$0xff] }
 0x83d   :  { %4678 = vmatprep.subr.mxu0 %v4345_v36  ;;  %4749 = vmatprep.subr.mxu1 %v4347_v43  ;;  %v4483_v36 = vld [vmem:[#allocation4 + $0x6b8] sm:$0xff]  ;;  %v4480_v43 = vld [vmem:[#allocation4 + $0x6a0] sm:$0xff] }
 0x83e   :  { %4679 = vmatpush1.msra.mxu0 %v4344_v44  ;;  %4750 = vmatpush1.msra.mxu1 %v4346_v45  ;;  %v4482_v44 = vld [vmem:[#allocation4 + $0x6b0] sm:$0xff]  ;;  %v4473_v45 = vld [vmem:[#allocation4 + $0x668] sm:$0xff] }
 0x83f   :  { %4680 = vmatprep.subr.mxu0 %v4337_v46  ;;  %4751 = vmatprep.subr.mxu1 %v4339_v47  ;;  %v4475_v46 = vld [vmem:[#allocation4 + $0x678] sm:$0xff]  ;;  %v4472_v47 = vld [vmem:[#allocation4 + $0x660] sm:$0xff] }
 0x840   :  { %4681 = vmatpush1.msra.mxu0 %v4336_v49  ;;  %4752 = vmatpush1.msra.mxu1 %v4338_v27  ;;  %v4474_v49 = vld [vmem:[#allocation4 + $0x670] sm:$0xff]  ;;  %v4465_v27 = vld [vmem:[#allocation4 + $0x628] sm:$0xff] }
 0x841   :  { %4682 = vmatprep.subr.mxu0 %v4329_v50  ;;  %4753 = vmatprep.subr.mxu1 %v4331_v51  ;;  %v4467_v50 = vld [vmem:[#allocation4 + $0x638] sm:$0xff]  ;;  %v4464_v51 = vld [vmem:[#allocation4 + $0x620] sm:$0xff] }
 0x842   :  { %4683 = vmatpush1.msra.mxu0 %v4328_v38  ;;  %4754 = vmatpush1.msra.mxu1 %v4330_v39  ;;  %v4466_v38 = vld [vmem:[#allocation4 + $0x630] sm:$0xff]  ;;  %v4457_v39 = vld [vmem:[#allocation4 + $0x5e8] sm:$0xff] }
 0x843   :  { %4684 = vmatprep.subr.mxu0 %v4321_v53  ;;  %4755 = vmatprep.subr.mxu1 %v4323_v55  ;;  %v4459_v53 = vld [vmem:[#allocation4 + $0x5f8] sm:$0xff]  ;;  %v4456_v55 = vld [vmem:[#allocation4 + $0x5e0] sm:$0xff] }
 0x844   :  { %4685 = vmatpush1.msra.mxu0 %v4320_v35  ;;  %4756 = vmatpush1.msra.mxu1 %v4322_v41  ;;  %v4458_v35 = vld [vmem:[#allocation4 + $0x5f0] sm:$0xff]  ;;  %v4449_v41 = vld [vmem:[#allocation4 + $0x5a8] sm:$0xff] }
 0x845   :  { %4686 = vmatprep.subr.mxu0 %v4313_v57  ;;  %4757 = vmatprep.subr.mxu1 %v4315_v42  ;;  %v4451_v57 = vld [vmem:[#allocation4 + $0x5b8] sm:$0xff]  ;;  %v4448_v42 = vld [vmem:[#allocation4 + $0x5a0] sm:$0xff] }
 0x846   :  { %4687 = vmatpush1.msra.mxu0 %v4312_v58  ;;  %4758 = vmatpush1.msra.mxu1 %v4314_v59  ;;  %v4450_v58 = vld [vmem:[#allocation4 + $0x5b0] sm:$0xff]  ;;  %v4441_v59 = vld [vmem:[#allocation4 + $0x568] sm:$0xff] }
 0x847   :  { %4688 = vmatprep.subr.mxu0 %v4305_v61  ;;  %4759 = vmatprep.subr.mxu1 %v4307_v48  ;;  %v4443_v61 = vld [vmem:[#allocation4 + $0x578] sm:$0xff]  ;;  %v4440_v48 = vld [vmem:[#allocation4 + $0x560] sm:$0xff] }
 0x848   :  { %4689 = vmatpush1.msra.mxu0 %v4304_v62  ;;  %4760 = vmatpush1.msra.mxu1 %v4306_v63  ;;  %v4442_v62 = vld [vmem:[#allocation4 + $0x570] sm:$0xff]  ;;  %v4433_v63 = vld [vmem:[#allocation4 + $0x528] sm:$0xff] }
 0x849   :  { %4690 = vmatprep.subr.mxu0 %v4297_v25  ;;  %4761 = vmatprep.subr.mxu1 %v4299_v54  ;;  %v4435_v25 = vld [vmem:[#allocation4 + $0x538] sm:$0xff]  ;;  %v4432_v54 = vld [vmem:[#allocation4 + $0x520] sm:$0xff] }
 0x84a   :  { %4691 = vmatpush1.msra.mxu0 %v4296_v2  ;;  %4762 = vmatpush1.msra.mxu1 %v4298_v4  ;;  %v4434_v2 = vld [vmem:[#allocation4 + $0x530] sm:$0xff]  ;;  %v4425_v4 = vld [vmem:[#allocation4 + $0x4e8] sm:$0xff] }
 0x84b   :  { %4692 = vmatprep.subr.mxu0 %v4289_v0  ;;  %4763 = vmatprep.subr.mxu1 %v4291_v6  ;;  %v4427_v0 = vld [vmem:[#allocation4 + $0x4f8] sm:$0xff]  ;;  %v4424_v6 = vld [vmem:[#allocation4 + $0x4e0] sm:$0xff] }
 0x84c   :  { %4693 = vmatpush1.msra.mxu0 %v4288_v7  ;;  %4764 = vmatpush1.msra.mxu1 %v4290_v56  ;;  %v4426_v7 = vld [vmem:[#allocation4 + $0x4f0] sm:$0xff]  ;;  %v4417_v56 = vld [vmem:[#allocation4 + $0x4a8] sm:$0xff] }
 0x84d   :  { %4694 = vmatprep.subr.mxu0 %v4281_v8  ;;  %4765 = vmatprep.subr.mxu1 %v4283_v9  ;;  %v4419_v8 = vld [vmem:[#allocation4 + $0x4b8] sm:$0xff]  ;;  %v4416_v9 = vld [vmem:[#allocation4 + $0x4a0] sm:$0xff] }
 0x84e   :  { %4695 = vmatpush1.msra.mxu0 %v4280_v11  ;;  %4766 = vmatpush1.msra.mxu1 %v4282_v60  ;;  %v4418_v11 = vld [vmem:[#allocation4 + $0x4b0] sm:$0xff]  ;;  %v4409_v60 = vld [vmem:[#allocation4 + $0x468] sm:$0xff] }
 0x84f   :  { %4696 = vmatprep.subr.mxu0 %v4273_v12  ;;  %4767 = vmatprep.subr.mxu1 %v4275_v13  ;;  %v4411_v12 = vld [vmem:[#allocation4 + $0x478] sm:$0xff]  ;;  %v4408_v13 = vld [vmem:[#allocation4 + $0x460] sm:$0xff] }
 0x850   :  { %4697 = vmatpush1.msra.mxu0 %v4272_v14  ;;  %4768 = vmatpush1.msra.mxu1 %v4274_v52  ;;  %v4410_v14 = vld [vmem:[#allocation4 + $0x470] sm:$0xff]  ;;  %v4401_v52 = vld [vmem:[#allocation4 + $0x428] sm:$0xff] }
 0x851   :  { %4698 = vmatprep.subr.mxu0 %v4521_v15  ;;  %4769 = vmatprep.subr.mxu1 %v4523_v16  ;;  %v4403_v15 = vld [vmem:[#allocation4 + $0x438] sm:$0xff]  ;;  %v4400_v16 = vld [vmem:[#allocation4 + $0x420] sm:$0xff] }
 0x852   :  { %4699 = vmatpush2.msra.mxu0 %v4520_v17  ;;  %4770 = vmatpush2.msra.mxu1 %v4522_v18  ;;  %v4402_v17 = vld [vmem:[#allocation4 + $0x430] sm:$0xff]  ;;  %v5013_v18 = vld [vmem:[#allocation4 + $0x3c8] sm:$0xff] }
 0x853   :  { %4700 = vmatprep.subr.mxu0 %v4513_v19  ;;  %4771 = vmatprep.subr.mxu1 %v4515_v20  ;;  %v5015_v19 = vld [vmem:[#allocation4 + $0x3d8] sm:$0xff]  ;;  %v5012_v20 = vld [vmem:[#allocation4 + $0x3c0] sm:$0xff] }
 0x854   :  { %4701 = vmatpush2.msra.mxu0 %v4512_v23  ;;  %4772 = vmatpush2.msra.mxu1 %v4514_v24  ;;  %v5014_v23 = vld [vmem:[#allocation4 + $0x3d0] sm:$0xff]  ;;  %v5005_v24 = vld [vmem:[#allocation4 + $0x388] sm:$0xff] }
 0x855   :  { %4702 = vmatprep.subr.mxu0 %v4505_v26  ;;  %4773 = vmatprep.subr.mxu1 %v4507_v28  ;;  %v5007_v26 = vld [vmem:[#allocation4 + $0x398] sm:$0xff]  ;;  %v5004_v28 = vld [vmem:[#allocation4 + $0x380] sm:$0xff] }
 0x856   :  { %4703 = vmatpush2.msra.mxu0 %v4504_v29  ;;  %4774 = vmatpush2.msra.mxu1 %v4506_v10  ;;  %v5006_v29 = vld [vmem:[#allocation4 + $0x390] sm:$0xff]  ;;  %v4997_v10 = vld [vmem:[#allocation4 + $0x348] sm:$0xff] }
 0x857   :  { %4704 = vmatprep.subr.mxu0 %v4497_v30  ;;  %4775 = vmatprep.subr.mxu1 %v4499_v31  ;;  %v4999_v30 = vld [vmem:[#allocation4 + $0x358] sm:$0xff]  ;;  %v4996_v31 = vld [vmem:[#allocation4 + $0x340] sm:$0xff] }
 0x858   :  { %4705 = vmatpush2.msra.mxu0 %v4496_v32  ;;  %4776 = vmatpush2.msra.mxu1 %v4498_v33  ;;  %v4998_v32 = vld [vmem:[#allocation4 + $0x350] sm:$0xff]  ;;  %v4991_v33 = vld [vmem:[#allocation4 + $0x318] sm:$0xff] }
 0x859   :  { %4706 = vmatprep.subr.mxu0 %v4489_v34  ;;  %4777 = vmatprep.subr.mxu1 %v4491_v37  ;;  %v4988_v34 = vld [vmem:[#allocation4 + $0x300] sm:$0xff]  ;;  %v4990_v37 = vld [vmem:[#allocation4 + $0x310] sm:$0xff] }
 0x85a   :  { %4707 = vmatpush2.msra.mxu0 %v4488_v22  ;;  %4778 = vmatpush2.msra.mxu1 %v4490_v21  ;;  %v4981_v22 = vld [vmem:[#allocation4 + $0x2c8] sm:$0xff]  ;;  %v4983_v21 = vld [vmem:[#allocation4 + $0x2d8] sm:$0xff] }
 0x85b   :  { %4708 = vmatprep.subr.mxu0 %v4481_v40  ;;  %4779 = vmatprep.subr.mxu1 %v4483_v36  ;;  %v4980_v40 = vld [vmem:[#allocation4 + $0x2c0] sm:$0xff]  ;;  %v4982_v36 = vld [vmem:[#allocation4 + $0x2d0] sm:$0xff] }
 0x85c   :  { %4709 = vmatpush2.msra.mxu0 %v4480_v43  ;;  %4780 = vmatpush2.msra.mxu1 %v4482_v44  ;;  %v4973_v43 = vld [vmem:[#allocation4 + $0x288] sm:$0xff]  ;;  %v4975_v44 = vld [vmem:[#allocation4 + $0x298] sm:$0xff] }
 0x85d   :  { %4710 = vmatprep.subr.mxu0 %v4473_v45  ;;  %4781 = vmatprep.subr.mxu1 %v4475_v46  ;;  %v4972_v45 = vld [vmem:[#allocation4 + $0x280] sm:$0xff]  ;;  %v4974_v46 = vld [vmem:[#allocation4 + $0x290] sm:$0xff] }
 0x85e   :  { %4711 = vmatpush2.msra.mxu0 %v4472_v47  ;;  %4782 = vmatpush2.msra.mxu1 %v4474_v49  ;;  %v4965_v47 = vld [vmem:[#allocation4 + $0x248] sm:$0xff]  ;;  %v4967_v49 = vld [vmem:[#allocation4 + $0x258] sm:$0xff] }
 0x85f   :  { %4712 = vmatprep.subr.mxu0 %v4465_v27  ;;  %4783 = vmatprep.subr.mxu1 %v4467_v50  ;;  %v4964_v27 = vld [vmem:[#allocation4 + $0x240] sm:$0xff]  ;;  %v4966_v50 = vld [vmem:[#allocation4 + $0x250] sm:$0xff] }
 0x860   :  { %4713 = vmatpush2.msra.mxu0 %v4464_v51  ;;  %4784 = vmatpush2.msra.mxu1 %v4466_v38  ;;  %v4957_v51 = vld [vmem:[#allocation4 + $0x208] sm:$0xff]  ;;  %v4959_v38 = vld [vmem:[#allocation4 + $0x218] sm:$0xff] }
 0x861   :  { %4714 = vmatprep.subr.mxu0 %v4457_v39  ;;  %4785 = vmatprep.subr.mxu1 %v4459_v53  ;;  %v4956_v39 = vld [vmem:[#allocation4 + $0x200] sm:$0xff]  ;;  %v4958_v53 = vld [vmem:[#allocation4 + $0x210] sm:$0xff] }
 0x862   :  { %4715 = vmatpush2.msra.mxu0 %v4456_v55  ;;  %4786 = vmatpush2.msra.mxu1 %v4458_v35  ;;  %v4949_v55 = vld [vmem:[#allocation4 + $0x1c8] sm:$0xff]  ;;  %v4951_v35 = vld [vmem:[#allocation4 + $0x1d8] sm:$0xff] }
 0x863   :  { %4716 = vmatprep.subr.mxu0 %v4449_v41  ;;  %4787 = vmatprep.subr.mxu1 %v4451_v57  ;;  %v4948_v41 = vld [vmem:[#allocation4 + $0x1c0] sm:$0xff]  ;;  %v4950_v57 = vld [vmem:[#allocation4 + $0x1d0] sm:$0xff] }
 0x864   :  { %4717 = vmatpush2.msra.mxu0 %v4448_v42  ;;  %4788 = vmatpush2.msra.mxu1 %v4450_v58  ;;  %v4941_v42 = vld [vmem:[#allocation4 + $0x188] sm:$0xff]  ;;  %v4943_v58 = vld [vmem:[#allocation4 + $0x198] sm:$0xff] }
 0x865   :  { %4718 = vmatprep.subr.mxu0 %v4441_v59  ;;  %4789 = vmatprep.subr.mxu1 %v4443_v61  ;;  %v4940_v59 = vld [vmem:[#allocation4 + $0x180] sm:$0xff]  ;;  %v4942_v61 = vld [vmem:[#allocation4 + $0x190] sm:$0xff] }
 0x866   :  { %4719 = vmatpush2.msra.mxu0 %v4440_v48  ;;  %4790 = vmatpush2.msra.mxu1 %v4442_v62  ;;  %v4933_v48 = vld [vmem:[#allocation4 + $0x148] sm:$0xff]  ;;  %v4935_v62 = vld [vmem:[#allocation4 + $0x158] sm:$0xff] }
 0x867   :  { %4720 = vmatprep.subr.mxu0 %v4433_v63  ;;  %4791 = vmatprep.subr.mxu1 %v4435_v25  ;;  %v4932_v63 = vld [vmem:[#allocation4 + $0x140] sm:$0xff]  ;;  %v4934_v25 = vld [vmem:[#allocation4 + $0x150] sm:$0xff] }
 0x868   :  { %4721 = vmatpush2.msra.mxu0 %v4432_v54  ;;  %4792 = vmatpush2.msra.mxu1 %v4434_v2  ;;  %v4925_v54 = vld [vmem:[#allocation4 + $0x108] sm:$0xff]  ;;  %v4927_v2 = vld [vmem:[#allocation4 + $0x118] sm:$0xff] }
 0x869   :  { %4722 = vmatprep.subr.mxu0 %v4425_v4  ;;  %4793 = vmatprep.subr.mxu1 %v4427_v0  ;;  %v4924_v4 = vld [vmem:[#allocation4 + $0x100] sm:$0xff]  ;;  %v4926_v0 = vld [vmem:[#allocation4 + $0x110] sm:$0xff] }
 0x86a   :  { %4723 = vmatpush2.msra.mxu0 %v4424_v6  ;;  %4794 = vmatpush2.msra.mxu1 %v4426_v7  ;;  %v4917_v6 = vld [vmem:[#allocation4 + $0xc8] sm:$0xff]  ;;  %v4919_v7 = vld [vmem:[#allocation4 + $0xd8] sm:$0xff] }
 0x86b   :  { %4724 = vmatprep.subr.mxu0 %v4417_v56  ;;  %4795 = vmatprep.subr.mxu1 %v4419_v8  ;;  %v4916_v56 = vld [vmem:[#allocation4 + $0xc0] sm:$0xff]  ;;  %v4918_v8 = vld [vmem:[#allocation4 + $0xd0] sm:$0xff] }
 0x86c   :  { %4725 = vmatpush2.msra.mxu0 %v4416_v9  ;;  %4796 = vmatpush2.msra.mxu1 %v4418_v11  ;;  %v4909_v9 = vld [vmem:[#allocation4 + $0x88] sm:$0xff]  ;;  %v4911_v11 = vld [vmem:[#allocation4 + $0x98] sm:$0xff] }
 0x86d   :  { %4726 = vmatprep.subr.mxu0 %v4409_v60  ;;  %4797 = vmatprep.subr.mxu1 %v4411_v12  ;;  %v4908_v60 = vld [vmem:[#allocation4 + $0x80] sm:$0xff]  ;;  %v4910_v12 = vld [vmem:[#allocation4 + $0x90] sm:$0xff] }
 0x86e   :  { %4727 = vmatpush2.msra.mxu0 %v4408_v13  ;;  %4798 = vmatpush2.msra.mxu1 %v4410_v14  ;;  %v4901_v13 = vld [vmem:[#allocation4 + $0x48] sm:$0xff]  ;;  %v4903_v14 = vld [vmem:[#allocation4 + $0x58] sm:$0xff] }
 0x86f   :  { %4728 = vmatprep.subr.mxu0 %v4401_v52  ;;  %4799 = vmatprep.subr.mxu1 %v4403_v15  ;;  %v4900_v52 = vld [vmem:[#allocation4 + $0x40] sm:$0xff]  ;;  %v4902_v15 = vld [vmem:[#allocation4 + $0x50] sm:$0xff] }
 0x870   :  { %4729 = vmatpush2.msra.mxu0 %v4400_v16  ;;  %4800 = vmatpush2.msra.mxu1 %v4402_v17  ;;  %v4893_v16 = vld [vmem:[#allocation4 + $0x8] sm:$0xff]  ;;  %v4895_v17 = vld [vmem:[#allocation4 + $0x18] sm:$0xff] }
 0x871   :  { %4731 = vmatmul.mubr.f32.vlgmr.msra.gmra.mxu0 %v6278_v1  ;;  %4802 = vmatmul.mubr.f32.vlgmr.msra.gmra.mxu1 %v6278_v1  ;;  %v4989_v1 = vld [vmem:[#allocation4 + $0x308] sm:$0xff] }
 0x872   :  { %5148 = vmatprep.subr.mxu0 %v5013_v18  ;;  %5219 = vmatprep.subr.mxu1 %v5015_v19  ;;  %v4892_v18 = vld [vmem:[#allocation4] sm:$0xff]  ;;  %v4894_v19 = vld [vmem:[#allocation4 + $0x10] sm:$0xff] }
 0x873   :  { %5149 = vmatpush1.msra.mxu0 %v5012_v20  ;;  %5220 = vmatpush1.msra.mxu1 %v5014_v23  ;;  %v5141_v20 = vld [vmem:[#allocation4 + $0x7c8] sm:$0xff]  ;;  %v5143_v23 = vld [vmem:[#allocation4 + $0x7d8] sm:$0xff] }
 0x874   :  { %5150 = vmatprep.subr.mxu0 %v5005_v24  ;;  %5221 = vmatprep.subr.mxu1 %v5007_v26  ;;  %v5140_v24 = vld [vmem:[#allocation4 + $0x7c0] sm:$0xff]  ;;  %v5142_v26 = vld [vmem:[#allocation4 + $0x7d0] sm:$0xff] }
 0x875   :  { %5151 = vmatpush1.msra.mxu0 %v5004_v28  ;;  %5222 = vmatpush1.msra.mxu1 %v5006_v29  ;;  %v5133_v28 = vld [vmem:[#allocation4 + $0x788] sm:$0xff]  ;;  %v5135_v29 = vld [vmem:[#allocation4 + $0x798] sm:$0xff] }
 0x876   :  { %5152 = vmatprep.subr.mxu0 %v4997_v10  ;;  %5223 = vmatprep.subr.mxu1 %v4999_v30  ;;  %v5132_v10 = vld [vmem:[#allocation4 + $0x780] sm:$0xff]  ;;  %v5134_v30 = vld [vmem:[#allocation4 + $0x790] sm:$0xff] }
 0x877   :  { %5153 = vmatpush1.msra.mxu0 %v4996_v31  ;;  %5224 = vmatpush1.msra.mxu1 %v4998_v32  ;;  %v5125_v31 = vld [vmem:[#allocation4 + $0x748] sm:$0xff]  ;;  %v5127_v32 = vld [vmem:[#allocation4 + $0x758] sm:$0xff] }
 0x878   :  { %5154 = vmatprep.subr.mxu0 %v4989_v1  ;;  %5225 = vmatprep.subr.mxu1 %v4991_v33  ;;  %v5124_v1 = vld [vmem:[#allocation4 + $0x740] sm:$0xff]  ;;  %v5126_v33 = vld [vmem:[#allocation4 + $0x750] sm:$0xff] }
 0x879   :  { %5155 = vmatpush1.msra.mxu0 %v4988_v34  ;;  %5226 = vmatpush1.msra.mxu1 %v4990_v37  ;;  %v5117_v34 = vld [vmem:[#allocation4 + $0x708] sm:$0xff]  ;;  %v5119_v37 = vld [vmem:[#allocation4 + $0x718] sm:$0xff] }
 0x87a   :  { %5156 = vmatprep.subr.mxu0 %v4981_v22  ;;  %5227 = vmatprep.subr.mxu1 %v4983_v21  ;;  %v5116_v22 = vld [vmem:[#allocation4 + $0x700] sm:$0xff]  ;;  %v5118_v21 = vld [vmem:[#allocation4 + $0x710] sm:$0xff] }
 0x87b   :  { %5157 = vmatpush1.msra.mxu0 %v4980_v40  ;;  %5228 = vmatpush1.msra.mxu1 %v4982_v36  ;;  %v5109_v40 = vld [vmem:[#allocation4 + $0x6c8] sm:$0xff]  ;;  %v5111_v36 = vld [vmem:[#allocation4 + $0x6d8] sm:$0xff] }
 0x87c   :  { %5158 = vmatprep.subr.mxu0 %v4973_v43  ;;  %5229 = vmatprep.subr.mxu1 %v4975_v44  ;;  %v5108_v43 = vld [vmem:[#allocation4 + $0x6c0] sm:$0xff]  ;;  %v5110_v44 = vld [vmem:[#allocation4 + $0x6d0] sm:$0xff] }
 0x87d   :  { %5159 = vmatpush1.msra.mxu0 %v4972_v45  ;;  %5230 = vmatpush1.msra.mxu1 %v4974_v46  ;;  %v5101_v45 = vld [vmem:[#allocation4 + $0x688] sm:$0xff]  ;;  %v5103_v46 = vld [vmem:[#allocation4 + $0x698] sm:$0xff] }
 0x87e   :  { %5160 = vmatprep.subr.mxu0 %v4965_v47  ;;  %5231 = vmatprep.subr.mxu1 %v4967_v49  ;;  %v5100_v47 = vld [vmem:[#allocation4 + $0x680] sm:$0xff]  ;;  %v5102_v49 = vld [vmem:[#allocation4 + $0x690] sm:$0xff] }
 0x87f   :  { %5161 = vmatpush1.msra.mxu0 %v4964_v27  ;;  %5232 = vmatpush1.msra.mxu1 %v4966_v50  ;;  %v5093_v27 = vld [vmem:[#allocation4 + $0x648] sm:$0xff]  ;;  %v5095_v50 = vld [vmem:[#allocation4 + $0x658] sm:$0xff] }
 0x880   :  { %5162 = vmatprep.subr.mxu0 %v4957_v51  ;;  %5233 = vmatprep.subr.mxu1 %v4959_v38  ;;  %v5092_v51 = vld [vmem:[#allocation4 + $0x640] sm:$0xff]  ;;  %v5094_v38 = vld [vmem:[#allocation4 + $0x650] sm:$0xff] }
 0x881   :  { %5163 = vmatpush1.msra.mxu0 %v4956_v39  ;;  %5234 = vmatpush1.msra.mxu1 %v4958_v53  ;;  %v5085_v39 = vld [vmem:[#allocation4 + $0x608] sm:$0xff]  ;;  %v5087_v53 = vld [vmem:[#allocation4 + $0x618] sm:$0xff] }
 0x882   :  { %5164 = vmatprep.subr.mxu0 %v4949_v55  ;;  %5235 = vmatprep.subr.mxu1 %v4951_v35  ;;  %v5084_v55 = vld [vmem:[#allocation4 + $0x600] sm:$0xff]  ;;  %v5086_v35 = vld [vmem:[#allocation4 + $0x610] sm:$0xff] }
 0x883   :  { %5165 = vmatpush1.msra.mxu0 %v4948_v41  ;;  %5236 = vmatpush1.msra.mxu1 %v4950_v57  ;;  %v5077_v41 = vld [vmem:[#allocation4 + $0x5c8] sm:$0xff]  ;;  %v5079_v57 = vld [vmem:[#allocation4 + $0x5d8] sm:$0xff] }
 0x884   :  { %5166 = vmatprep.subr.mxu0 %v4941_v42  ;;  %5237 = vmatprep.subr.mxu1 %v4943_v58  ;;  %v5076_v42 = vld [vmem:[#allocation4 + $0x5c0] sm:$0xff]  ;;  %v5078_v58 = vld [vmem:[#allocation4 + $0x5d0] sm:$0xff] }
 0x885   :  { %5167 = vmatpush1.msra.mxu0 %v4940_v59  ;;  %5238 = vmatpush1.msra.mxu1 %v4942_v61  ;;  %v5069_v59 = vld [vmem:[#allocation4 + $0x588] sm:$0xff]  ;;  %v5071_v61 = vld [vmem:[#allocation4 + $0x598] sm:$0xff] }
 0x886   :  { %5168 = vmatprep.subr.mxu0 %v4933_v48  ;;  %5239 = vmatprep.subr.mxu1 %v4935_v62  ;;  %v5068_v48 = vld [vmem:[#allocation4 + $0x580] sm:$0xff]  ;;  %v5070_v62 = vld [vmem:[#allocation4 + $0x590] sm:$0xff] }
 0x887   :  { %5169 = vmatpush1.msra.mxu0 %v4932_v63  ;;  %5240 = vmatpush1.msra.mxu1 %v4934_v25  ;;  %v5061_v63 = vld [vmem:[#allocation4 + $0x548] sm:$0xff]  ;;  %v5063_v25 = vld [vmem:[#allocation4 + $0x558] sm:$0xff] }
 0x888   :  { %5170 = vmatprep.subr.mxu0 %v4925_v54  ;;  %5241 = vmatprep.subr.mxu1 %v4927_v2  ;;  %v5060_v54 = vld [vmem:[#allocation4 + $0x540] sm:$0xff]  ;;  %v5062_v2 = vld [vmem:[#allocation4 + $0x550] sm:$0xff] }
 0x889   :  { %5171 = vmatpush1.msra.mxu0 %v4924_v4  ;;  %5242 = vmatpush1.msra.mxu1 %v4926_v0  ;;  %v5053_v4 = vld [vmem:[#allocation4 + $0x508] sm:$0xff]  ;;  %v5055_v0 = vld [vmem:[#allocation4 + $0x518] sm:$0xff] }
 0x88a   :  { %5172 = vmatprep.subr.mxu0 %v4917_v6  ;;  %5243 = vmatprep.subr.mxu1 %v4919_v7  ;;  %v5052_v6 = vld [vmem:[#allocation4 + $0x500] sm:$0xff]  ;;  %v5054_v7 = vld [vmem:[#allocation4 + $0x510] sm:$0xff] }
 0x88b   :  { %5173 = vmatpush1.msra.mxu0 %v4916_v56  ;;  %5244 = vmatpush1.msra.mxu1 %v4918_v8  ;;  %v5045_v56 = vld [vmem:[#allocation4 + $0x4c8] sm:$0xff]  ;;  %v5047_v8 = vld [vmem:[#allocation4 + $0x4d8] sm:$0xff] }
 0x88c   :  { %5174 = vmatprep.subr.mxu0 %v4909_v9  ;;  %5245 = vmatprep.subr.mxu1 %v4911_v11  ;;  %v5044_v9 = vld [vmem:[#allocation4 + $0x4c0] sm:$0xff]  ;;  %v5046_v11 = vld [vmem:[#allocation4 + $0x4d0] sm:$0xff] }
 0x88d   :  { %5175 = vmatpush1.msra.mxu0 %v4908_v60  ;;  %5246 = vmatpush1.msra.mxu1 %v4910_v12  ;;  %v5037_v60 = vld [vmem:[#allocation4 + $0x488] sm:$0xff]  ;;  %v5039_v12 = vld [vmem:[#allocation4 + $0x498] sm:$0xff] }
 0x88e   :  { %5176 = vmatprep.subr.mxu0 %v4901_v13  ;;  %5247 = vmatprep.subr.mxu1 %v4903_v14  ;;  %v5036_v13 = vld [vmem:[#allocation4 + $0x480] sm:$0xff]  ;;  %v5038_v14 = vld [vmem:[#allocation4 + $0x490] sm:$0xff] }
 0x88f   :  { %5177 = vmatpush1.msra.mxu0 %v4900_v52  ;;  %5248 = vmatpush1.msra.mxu1 %v4902_v15  ;;  %v5029_v52 = vld [vmem:[#allocation4 + $0x448] sm:$0xff]  ;;  %v5031_v15 = vld [vmem:[#allocation4 + $0x458] sm:$0xff] }
 0x890   :  { %5178 = vmatprep.subr.mxu0 %v4893_v16  ;;  %5249 = vmatprep.subr.mxu1 %v4895_v17  ;;  %v5028_v16 = vld [vmem:[#allocation4 + $0x440] sm:$0xff]  ;;  %v5030_v17 = vld [vmem:[#allocation4 + $0x450] sm:$0xff] }
 0x891   :  { %5179 = vmatpush1.msra.mxu0 %v4892_v18  ;;  %5250 = vmatpush1.msra.mxu1 %v4894_v19  ;;  %v5021_v18 = vld [vmem:[#allocation4 + $0x408] sm:$0xff]  ;;  %v5023_v19 = vld [vmem:[#allocation4 + $0x418] sm:$0xff] }
 0x892   :  { %5180 = vmatprep.subr.mxu0 %v5141_v20  ;;  %5251 = vmatprep.subr.mxu1 %v5143_v23  ;;  %v5020_v20 = vld [vmem:[#allocation4 + $0x400] sm:$0xff]  ;;  %v5022_v23 = vld [vmem:[#allocation4 + $0x410] sm:$0xff] }
 0x893   :  { %5181 = vmatpush2.msra.mxu0 %v5140_v24  ;;  %5252 = vmatpush2.msra.mxu1 %v5142_v26  ;;  %v5017_v24 = vld [vmem:[#allocation4 + $0x3e8] sm:$0xff]  ;;  %v5019_v26 = vld [vmem:[#allocation4 + $0x3f8] sm:$0xff] }
 0x894   :  { %5182 = vmatprep.subr.mxu0 %v5133_v28  ;;  %5253 = vmatprep.subr.mxu1 %v5135_v29 }
 0x895   :  { %5183 = vmatpush2.msra.mxu0 %v5132_v10  ;;  %5254 = vmatpush2.msra.mxu1 %v5134_v30 }
 0x896   :  { %5184 = vmatprep.subr.mxu0 %v5125_v31  ;;  %5255 = vmatprep.subr.mxu1 %v5127_v32 }
 0x897   :  { %5185 = vmatpush2.msra.mxu0 %v5124_v1  ;;  %5256 = vmatpush2.msra.mxu1 %v5126_v33  ;;  %v4262_v33 = vld [vmem:[#allocation2 + $0xd8] sm:$0xf0] }
 0x898   :  { %5186 = vmatprep.subr.mxu0 %v5117_v34  ;;  %5257 = vmatprep.subr.mxu1 %v5119_v37  ;;  %v4260_v34 = vld [vmem:[#allocation2 + $0xc0] sm:$0xf0] }
 0x899   :  { %5187 = vmatpush2.msra.mxu0 %v5116_v22  ;;  %5258 = vmatpush2.msra.mxu1 %v5118_v21 }
 0x89a   :  { %5188 = vmatprep.subr.mxu0 %v5109_v40  ;;  %5259 = vmatprep.subr.mxu1 %v5111_v36  ;;  %v4263_v40 = vld [vmem:[#allocation2 + $0xa0] sm:$0xf0] }
 0x89b   :  { %5189 = vmatpush2.msra.mxu0 %v5108_v43  ;;  %5260 = vmatpush2.msra.mxu1 %v5110_v44  ;;  %v4261_v43 = vld [vmem:[#allocation2 + $0x118] sm:$0xf0] }
 0x89c   :  { %5190 = vmatprep.subr.mxu0 %v5101_v45  ;;  %5261 = vmatprep.subr.mxu1 %v5103_v46 }
 0x89d   :  { %5191 = vmatpush2.msra.mxu0 %v5100_v47  ;;  %5262 = vmatpush2.msra.mxu1 %v5102_v49  ;;  %v4266_v47 = vld [vmem:[#allocation2 + $0x50] sm:$0xf0] }
 0x89e   :  { %5192 = vmatprep.subr.mxu0 %v5093_v27  ;;  %5263 = vmatprep.subr.mxu1 %v5095_v50 }
 0x89f   :  { %5193 = vmatpush2.msra.mxu0 %v5092_v51  ;;  %5264 = vmatpush2.msra.mxu1 %v5094_v38  ;;  %v4267_v38 = vld [vmem:[#allocation2 + $0xe8] sm:$0xf0] }
 0x8a0   :  { %5194 = vmatprep.subr.mxu0 %v5085_v39  ;;  %5265 = vmatprep.subr.mxu1 %v5087_v53 }
 0x8a1   :  { %5195 = vmatpush2.msra.mxu0 %v5084_v55  ;;  %5266 = vmatpush2.msra.mxu1 %v5086_v35 }
 0x8a2   :  { %5196 = vmatprep.subr.mxu0 %v5077_v41  ;;  %5267 = vmatprep.subr.mxu1 %v5079_v57 }
 0x8a3   :  { %5197 = vmatpush2.msra.mxu0 %v5076_v42  ;;  %5268 = vmatpush2.msra.mxu1 %v5078_v58  ;;  %v4264_v58 = vld [vmem:[#allocation2 + $0x68] sm:$0xf0] }
 0x8a4   :  { %5198 = vmatprep.subr.mxu0 %v5069_v59  ;;  %5269 = vmatprep.subr.mxu1 %v5071_v61 }
 0x8a5   :  { %5199 = vmatpush2.msra.mxu0 %v5068_v48  ;;  %5270 = vmatpush2.msra.mxu1 %v5070_v62  ;;  %v4265_v62 = vld [vmem:[#allocation2 + $0x130] sm:$0xf0] }
 0x8a6   :  { %5200 = vmatprep.subr.mxu0 %v5061_v63  ;;  %5271 = vmatprep.subr.mxu1 %v5063_v25 }
 0x8a7   :  { %5201 = vmatpush2.msra.mxu0 %v5060_v54  ;;  %5272 = vmatpush2.msra.mxu1 %v5062_v2 }
 0x8a8   :  { %5202 = vmatprep.subr.mxu0 %v5053_v4  ;;  %5273 = vmatprep.subr.mxu1 %v5055_v0 }
 0x8a9   :  { %5203 = vmatpush2.msra.mxu0 %v5052_v6  ;;  %5274 = vmatpush2.msra.mxu1 %v5054_v7  ;;  %v4862_v6 = vrot.slane %v6272_v3, 4 }
 0x8aa   :  { %5204 = vmatprep.subr.mxu0 %v5045_v56  ;;  %5275 = vmatprep.subr.mxu1 %v5047_v8 }
 0x8ab   :  { %5205 = vmatpush2.msra.mxu0 %v5044_v9  ;;  %5276 = vmatpush2.msra.mxu1 %v5046_v11  ;;  %v4863_v11 = vrot.slane %v6275_v5, 4 }
 0x8ac   :  { %5206 = vmatprep.subr.mxu0 %v5037_v60  ;;  %5277 = vmatprep.subr.mxu1 %v5039_v12 }
 0x8ad   :  { %5207 = vmatpush2.msra.mxu0 %v5036_v13  ;;  %5278 = vmatpush2.msra.mxu1 %v5038_v14 }
 0x8ae   :  { %5208 = vmatprep.subr.mxu0 %v5029_v52  ;;  %5279 = vmatprep.subr.mxu1 %v5031_v15 }
 0x8af   :  { %5209 = vmatpush2.msra.mxu0 %v5028_v16  ;;  %5280 = vmatpush2.msra.mxu1 %v5030_v17 }
 0x8b0   :  { %5210 = vmatprep.subr.mxu0 %v5021_v18  ;;  %5281 = vmatprep.subr.mxu1 %v5023_v19 }
 0x8b1   :  { %5211 = vmatpush2.msra.mxu0 %v5020_v20  ;;  %5282 = vmatpush2.msra.mxu1 %v5022_v23 }
 0x8b2   :  { %5290 = vmatprep.subr.mxu0 %v5017_v24  ;;  %5361 = vmatprep.subr.mxu1 %v5019_v26 }
 0x8f0   :  { %v4661_v28 = vpop.f32.mrf.mxu1  ;;  %v4590_v29 = vpop.f32.mrf.mxu0 }
 0x8f1   :  { %v4818_v30 = vrot.slane %v4661_v28, 4  ;;  %v4816_v31 = vrot.slane %v4590_v29, 4 }
 0x8f2   :  { %v4663_v10 = vpop.f32.mrf.mxu1  ;;  %v4592_v32 = vpop.f32.mrf.mxu0 }
 0x8f3   :  { %v4819_v1 = vrot.slane %v4663_v10, 4  ;;  %v4834_v37 = vadd.f32 %v4818_v30, %v4262_v33  ;;  %v4817_v22 = vrot.slane %v4592_v32, 4  ;;  %v4832_v21 = vadd.f32 %v4816_v31, %v4260_v34  ;;  %v5016_v10 = vld [vmem:[#allocation4 + $0x3e0] sm:$0xff]  ;;  %v5018_v30 = vld [vmem:[#allocation4 + $0x3f0] sm:$0xff]  ;;  %v5009_v31 = vld [vmem:[#allocation4 + $0x3a8] sm:$0xff] }
 0x8f4   :  { %v5011_v32 = vld [vmem:[#allocation4 + $0x3b8] sm:$0xff]  ;;  %v5010_v33 = vld [vmem:[#allocation4 + $0x3b0] sm:$0xff]  ;;  %v5001_v34 = vld [vmem:[#allocation4 + $0x368] sm:$0xff] }
 0x8f5   :  { %v4835_v36 = vadd.f32 %v4819_v1, %v4263_v40  ;;  %5898 = vtanh.f32 %v4834_v37  ;;  %v4833_v44 = vadd.f32 %v4817_v22, %v4261_v43  ;;  %v5008_v1 = vld [vmem:[#allocation4 + $0x3a0] sm:$0xff]  ;;  %v5003_v37 = vld [vmem:[#allocation4 + $0x378] sm:$0xff]  ;;  %v4993_v40 = vld [vmem:[#allocation4 + $0x328] sm:$0xff] }
 0x8f6   :  { %5900 = vtanh.f32 %v4832_v21  ;;  %v5000_v22 = vld [vmem:[#allocation4 + $0x360] sm:$0xff]  ;;  %v5002_v21 = vld [vmem:[#allocation4 + $0x370] sm:$0xff] }
 0x8f7   :  { %5902 = vtanh.f32 %v4835_v36  ;;  %v4995_v36 = vld [vmem:[#allocation4 + $0x338] sm:$0xff]  ;;  %v4992_v43 = vld [vmem:[#allocation4 + $0x320] sm:$0xff] }
 0x8f8   :  { %5904 = vtanh.f32 %v4833_v44  ;;  %v4994_v44 = vld [vmem:[#allocation4 + $0x330] sm:$0xff] }
 0x902   :  { %v5899_v35 = vpop.eup %5898 }
 0x903   :  { %v5901_v41 = vpop.eup %5900  ;;  %v4850_v59 = vmul.f32 0.5, %v5899_v35  ;;  %v4970_v35 = vld [vmem:[#allocation4 + $0x270] sm:$0xff] }
 0x904   :  { %v5903_v42 = vpop.eup %5902  ;;  %v4848_v63 = vmul.f32 0.5, %v5901_v41  ;;  %v4961_v41 = vld [vmem:[#allocation4 + $0x228] sm:$0xff] }
 0x905   :  { %v5905_v48 = vpop.eup %5904  ;;  %v4851_v25 = vmul.f32 0.5, %v5903_v42  ;;  %v4856_v2 = vadd.f32 0.5, %v4850_v59  ;;  %v4960_v42 = vld [vmem:[#allocation4 + $0x220] sm:$0xff]  ;;  %v4953_v59 = vld [vmem:[#allocation4 + $0x1e8] sm:$0xff] }
 0x906   :  { %v4849_v4 = vmul.f32 0.5, %v5905_v48  ;;  %v4854_v0 = vadd.f32 0.5, %v4848_v63  ;;  %v4952_v48 = vld [vmem:[#allocation4 + $0x1e0] sm:$0xff]  ;;  %v4945_v63 = vld [vmem:[#allocation4 + $0x1a8] sm:$0xff] }
 0x907   :  { %v4857_v7 = vadd.f32 0.5, %v4851_v25  ;;  %v4866_v8 = vmul.f32 %v4862_v6, %v4856_v2  ;;  %v4947_v25 = vld [vmem:[#allocation4 + $0x1b8] sm:$0xff]  ;;  %v4946_v2 = vld [vmem:[#allocation4 + $0x1b0] sm:$0xff]  ;;  %v4936_v6 = vld [vmem:[#allocation4 + $0x160] sm:$0xff] }
 0x908   :  { %v4855_v9 = vadd.f32 0.5, %v4849_v4  ;;  %v4937_v4 = vld [vmem:[#allocation4 + $0x168] sm:$0xff] }
 0x909   :  { %v4867_v13 = vmul.f32 %v4863_v11, %v4857_v7  ;;  %v4938_v7 = vld [vmem:[#allocation4 + $0x170] sm:$0xff] }
 0x90a   :  { %v4930_v11 = vld [vmem:[#allocation4 + $0x130] sm:$0xff] }
 0x931   :  { %v4803_v45 = vpop.f32.mrf.mxu1  ;;  %v4732_v27 = vpop.f32.mrf.mxu0 }
 0x932   :  { %v4822_v46 = vrot.slane %v4803_v45, 4  ;;  %v4820_v55 = vrot.slane %v4732_v27, 4  ;;  %v4985_v45 = vld [vmem:[#allocation4 + $0x2e8] sm:$0xff] }
 0x933   :  { %v4805_v49 = vpop.f32.mrf.mxu1  ;;  %v4734_v53 = vpop.f32.mrf.mxu0  ;;  %v4977_v27 = vld [vmem:[#allocation4 + $0x2a8] sm:$0xff] }
 0x934   :  { %v4838_v50 = vadd.f32 %v4822_v46, %v4266_v47  ;;  %v4823_v51 = vrot.slane %v4805_v49, 4  ;;  %v4821_v57 = vrot.slane %v4734_v53, 4  ;;  %v4836_v61 = vadd.f32 %v4820_v55, %v4264_v58  ;;  %v4987_v46 = vld [vmem:[#allocation4 + $0x2f8] sm:$0xff]  ;;  %v4984_v47 = vld [vmem:[#allocation4 + $0x2e0] sm:$0xff]  ;;  %v4986_v49 = vld [vmem:[#allocation4 + $0x2f0] sm:$0xff] }
 0x935   :  { %v4971_v53 = vld [vmem:[#allocation4 + $0x278] sm:$0xff]  ;;  %v4968_v55 = vld [vmem:[#allocation4 + $0x260] sm:$0xff]  ;;  %v4962_v58 = vld [vmem:[#allocation4 + $0x230] sm:$0xff] }
 0x936   :  { %v4839_v39 = vadd.f32 %v4823_v51, %v4267_v38  ;;  %5906 = vtanh.f32 %v4838_v50  ;;  %v4837_v54 = vadd.f32 %v4821_v57, %v4265_v62  ;;  %v4979_v50 = vld [vmem:[#allocation4 + $0x2b8] sm:$0xff]  ;;  %v4976_v51 = vld [vmem:[#allocation4 + $0x2a0] sm:$0xff]  ;;  %v4978_v38 = vld [vmem:[#allocation4 + $0x2b0] sm:$0xff] }
 0x937   :  { %v4963_v57 = vld [vmem:[#allocation4 + $0x238] sm:$0xff]  ;;  %v4954_v62 = vld [vmem:[#allocation4 + $0x1f0] sm:$0xff] }
 0x938   :  { %5908 = vtanh.f32 %v4839_v39  ;;  %v4969_v39 = vld [vmem:[#allocation4 + $0x268] sm:$0xff] }
 0x939   :  { %5910 = vtanh.f32 %v4836_v61  ;;  %v4955_v61 = vld [vmem:[#allocation4 + $0x1f8] sm:$0xff] }
 0x93a   :  { %5912 = vtanh.f32 %v4837_v54  ;;  %v4944_v54 = vld [vmem:[#allocation4 + $0x1a0] sm:$0xff] }
 0x943   :  { %v5907_v56 = vpop.eup %5906 }
 0x944   :  { %v4868_v60 = vmul.f32 %v5907_v56, %v4854_v0  ;;  %v4939_v0 = vld [vmem:[#allocation4 + $0x178] sm:$0xff]  ;;  %v4929_v56 = vld [vmem:[#allocation4 + $0x128] sm:$0xff] }
 0x945   :  { %v5909_v12 = vpop.eup %5908 }
 0x946   :  { %v6287_v14 = vadd.f32 %v4868_v60, %v4866_v8  ;;  %v4869_v52 = vmul.f32 %v5909_v12, %v4855_v9  ;;  %v5911_v3 = vpop.eup %5910  ;;  %v4931_v8 = vld [vmem:[#allocation4 + $0x138] sm:$0xff]  ;;  %v4928_v9 = vld [vmem:[#allocation4 + $0x120] sm:$0xff]  ;;  %v4921_v60 = vld [vmem:[#allocation4 + $0xe8] sm:$0xff] }
 0x947   :  { %v5913_v16 = vpop.eup %5912  ;;  %v4852_v17 = vmul.f32 0.5, %v5911_v3  ;;  %v4923_v12 = vld [vmem:[#allocation4 + $0xf8] sm:$0xff]  ;;  %v4913_v3 = vld [vmem:[#allocation4 + $0xa8] sm:$0xff] }
 0x948   :  { %5914 = vtanh.f32 %v6287_v14  ;;  %v6290_v15 = vadd.f32 %v4869_v52, %v4867_v13  ;;  %v4853_v18 = vmul.f32 0.5, %v5913_v16  ;;  %v4920_v13 = vld [vmem:[#allocation4 + $0xe0] sm:$0xff]  ;;  %v4922_v52 = vld [vmem:[#allocation4 + $0xf0] sm:$0xff]  ;;  %v4915_v16 = vld [vmem:[#allocation4 + $0xb8] sm:$0xff] }
 0x949   :  { %v4858_v19 = vadd.f32 0.5, %v4852_v17  ;;  %v4912_v17 = vld [vmem:[#allocation4 + $0xa0] sm:$0xff] }
 0x94a   :  { %5916 = vtanh.f32 %v6290_v15  ;;  %v4859_v23 = vadd.f32 0.5, %v4853_v18  ;;  %v4914_v18 = vld [vmem:[#allocation4 + $0xb0] sm:$0xff] }
 0x955   :  { %v5915_v20 = vpop.eup %5914 }
 0x956   :  { %v4874_v5 = vmul.f32 %v5915_v20, %v4858_v19  ;;  %v4905_v19 = vld [vmem:[#allocation4 + $0x68] sm:$0xff]  ;;  %v4907_v20 = vld [vmem:[#allocation4 + $0x78] sm:$0xff] }
 0x957   :  { %v5917_v24 = vpop.eup %5916 }
 0x958   :  { %v4875_v26 = vmul.f32 %v5917_v24, %v4859_v23  ;;  %v6293_v28 = vrot.slane %v4874_v5, 4  ;;  %v4904_v23 = vld [vmem:[#allocation4 + $0x60] sm:$0xff]  ;;  %v4906_v5 = vld [vmem:[#allocation4 + $0x70] sm:$0xff]  ;;  %v4897_v24 = vld [vmem:[#allocation4 + $0x28] sm:$0xff] }
 0x95a   :  { %v4879_v29 = vrot.slane %v4875_v26, 4  ;;  %4882 = vst [vmem:[#allocation3 + $0x30] sm:$0xf] %v6293_v28  ;;  %v4899_v26 = vld [vmem:[#allocation4 + $0x38] sm:$0xff] }
 0x95c   :  { %4883 = vst [vmem:[#allocation3 + $0x10] sm:$0xf] %v4879_v29  ;;  %5212 = vmatprep.mubr.f32.mxu0 %v4879_v29  ;;  %5283 = vmatprep.mubr.f32.mxu1 %v4879_v29 }
 0x95d   :  { %5213 = vmatmul.mubr.f32.vlgmr.msra.gmra.mxu0 %v6293_v28  ;;  %5284 = vmatmul.mubr.f32.vlgmr.msra.gmra.mxu1 %v6293_v28 }
 0x95e   :  { %5291 = vmatpush1.msra.mxu0 %v5016_v10  ;;  %5362 = vmatpush1.msra.mxu1 %v5018_v30  ;;  %v4898_v10 = vld [vmem:[#allocation4 + $0x30] sm:$0xff]  ;;  %v5145_v30 = vld [vmem:[#allocation4 + $0x7e8] sm:$0xff] }
 0x95f   :  { %5292 = vmatprep.subr.mxu0 %v5009_v31  ;;  %5354 = vmatprep.mubr.f32.mxu0 %v4879_v29  ;;  %v5147_v31 = vld [vmem:[#allocation4 + $0x7f8] sm:$0xff] }
 0x960   :  { %5363 = vmatprep.subr.mxu1 %v5011_v32  ;;  %5425 = vmatprep.mubr.f32.mxu1 %v4879_v29  ;;  %v4896_v29 = vld [vmem:[#allocation4 + $0x20] sm:$0xff] }
 0x961   :  { %5293 = vmatpush1.msra.mxu0 %v5008_v1  ;;  %5364 = vmatpush1.msra.mxu1 %v5010_v33  ;;  %v5144_v32 = vld [vmem:[#allocation4 + $0x7e0] sm:$0xff]  ;;  %v5146_v1 = vld [vmem:[#allocation4 + $0x7f0] sm:$0xff]  ;;  %v5137_v33 = vld [vmem:[#allocation4 + $0x7a8] sm:$0xff] }
 0x962   :  { %5294 = vmatprep.subr.mxu0 %v5001_v34  ;;  %5365 = vmatprep.subr.mxu1 %v5003_v37  ;;  %v5139_v34 = vld [vmem:[#allocation4 + $0x7b8] sm:$0xff]  ;;  %v5136_v37 = vld [vmem:[#allocation4 + $0x7a0] sm:$0xff] }
 0x963   :  { %5295 = vmatpush1.msra.mxu0 %v5000_v22  ;;  %5366 = vmatpush1.msra.mxu1 %v5002_v21  ;;  %v5138_v22 = vld [vmem:[#allocation4 + $0x7b0] sm:$0xff]  ;;  %v5129_v21 = vld [vmem:[#allocation4 + $0x768] sm:$0xff] }
 0x964   :  { %5296 = vmatprep.subr.mxu0 %v4993_v40  ;;  %5367 = vmatprep.subr.mxu1 %v4995_v36  ;;  %v5131_v40 = vld [vmem:[#allocation4 + $0x778] sm:$0xff]  ;;  %v5128_v36 = vld [vmem:[#allocation4 + $0x760] sm:$0xff] }
 0x965   :  { %5297 = vmatpush1.msra.mxu0 %v4992_v43  ;;  %5368 = vmatpush1.msra.mxu1 %v4994_v44  ;;  %v5130_v43 = vld [vmem:[#allocation4 + $0x770] sm:$0xff]  ;;  %v5121_v44 = vld [vmem:[#allocation4 + $0x728] sm:$0xff] }
 0x966   :  { %5298 = vmatprep.subr.mxu0 %v4985_v45  ;;  %5369 = vmatprep.subr.mxu1 %v4987_v46  ;;  %v5123_v45 = vld [vmem:[#allocation4 + $0x738] sm:$0xff]  ;;  %v5120_v46 = vld [vmem:[#allocation4 + $0x720] sm:$0xff] }
 0x967   :  { %5299 = vmatpush1.msra.mxu0 %v4984_v47  ;;  %5370 = vmatpush1.msra.mxu1 %v4986_v49  ;;  %v5122_v47 = vld [vmem:[#allocation4 + $0x730] sm:$0xff]  ;;  %v5113_v49 = vld [vmem:[#allocation4 + $0x6e8] sm:$0xff] }
 0x968   :  { %5300 = vmatprep.subr.mxu0 %v4977_v27  ;;  %5371 = vmatprep.subr.mxu1 %v4979_v50  ;;  %v5115_v27 = vld [vmem:[#allocation4 + $0x6f8] sm:$0xff]  ;;  %v5112_v50 = vld [vmem:[#allocation4 + $0x6e0] sm:$0xff] }
 0x969   :  { %5301 = vmatpush1.msra.mxu0 %v4976_v51  ;;  %5372 = vmatpush1.msra.mxu1 %v4978_v38  ;;  %v5114_v51 = vld [vmem:[#allocation4 + $0x6f0] sm:$0xff]  ;;  %v5105_v38 = vld [vmem:[#allocation4 + $0x6a8] sm:$0xff] }
 0x96a   :  { %5302 = vmatprep.subr.mxu0 %v4969_v39  ;;  %5373 = vmatprep.subr.mxu1 %v4971_v53  ;;  %v5107_v39 = vld [vmem:[#allocation4 + $0x6b8] sm:$0xff]  ;;  %v5104_v53 = vld [vmem:[#allocation4 + $0x6a0] sm:$0xff] }
 0x96b   :  { %5303 = vmatpush1.msra.mxu0 %v4968_v55  ;;  %5374 = vmatpush1.msra.mxu1 %v4970_v35  ;;  %v5106_v55 = vld [vmem:[#allocation4 + $0x6b0] sm:$0xff]  ;;  %v5097_v35 = vld [vmem:[#allocation4 + $0x668] sm:$0xff] }
 0x96c   :  { %5304 = vmatprep.subr.mxu0 %v4961_v41  ;;  %5375 = vmatprep.subr.mxu1 %v4963_v57  ;;  %v5099_v41 = vld [vmem:[#allocation4 + $0x678] sm:$0xff]  ;;  %v5096_v57 = vld [vmem:[#allocation4 + $0x660] sm:$0xff] }
 0x96d   :  { %5305 = vmatpush1.msra.mxu0 %v4960_v42  ;;  %5376 = vmatpush1.msra.mxu1 %v4962_v58  ;;  %v5098_v42 = vld [vmem:[#allocation4 + $0x670] sm:$0xff]  ;;  %v5089_v58 = vld [vmem:[#allocation4 + $0x628] sm:$0xff] }
 0x96e   :  { %5306 = vmatprep.subr.mxu0 %v4953_v59  ;;  %5377 = vmatprep.subr.mxu1 %v4955_v61  ;;  %v5091_v59 = vld [vmem:[#allocation4 + $0x638] sm:$0xff]  ;;  %v5088_v61 = vld [vmem:[#allocation4 + $0x620] sm:$0xff] }
 0x96f   :  { %5307 = vmatpush1.msra.mxu0 %v4952_v48  ;;  %5378 = vmatpush1.msra.mxu1 %v4954_v62  ;;  %v5090_v48 = vld [vmem:[#allocation4 + $0x630] sm:$0xff]  ;;  %v5081_v62 = vld [vmem:[#allocation4 + $0x5e8] sm:$0xff] }
 0x970   :  { %5308 = vmatprep.subr.mxu0 %v4945_v63  ;;  %5379 = vmatprep.subr.mxu1 %v4947_v25  ;;  %v5083_v63 = vld [vmem:[#allocation4 + $0x5f8] sm:$0xff]  ;;  %v5080_v25 = vld [vmem:[#allocation4 + $0x5e0] sm:$0xff] }
 0x971   :  { %5309 = vmatpush1.msra.mxu0 %v4944_v54  ;;  %5380 = vmatpush1.msra.mxu1 %v4946_v2  ;;  %v5082_v54 = vld [vmem:[#allocation4 + $0x5f0] sm:$0xff]  ;;  %v5073_v2 = vld [vmem:[#allocation4 + $0x5a8] sm:$0xff] }
 0x972   :  { %5310 = vmatprep.subr.mxu0 %v4937_v4  ;;  %5381 = vmatprep.subr.mxu1 %v4939_v0  ;;  %v5075_v4 = vld [vmem:[#allocation4 + $0x5b8] sm:$0xff]  ;;  %v5072_v0 = vld [vmem:[#allocation4 + $0x5a0] sm:$0xff] }
 0x973   :  { %5311 = vmatpush1.msra.mxu0 %v4936_v6  ;;  %5382 = vmatpush1.msra.mxu1 %v4938_v7  ;;  %v5074_v6 = vld [vmem:[#allocation4 + $0x5b0] sm:$0xff]  ;;  %v5065_v7 = vld [vmem:[#allocation4 + $0x568] sm:$0xff] }
 0x974   :  { %5312 = vmatprep.subr.mxu0 %v4929_v56  ;;  %5383 = vmatprep.subr.mxu1 %v4931_v8  ;;  %v5067_v56 = vld [vmem:[#allocation4 + $0x578] sm:$0xff]  ;;  %v5064_v8 = vld [vmem:[#allocation4 + $0x560] sm:$0xff] }
 0x975   :  { %5313 = vmatpush1.msra.mxu0 %v4928_v9  ;;  %5384 = vmatpush1.msra.mxu1 %v4930_v11  ;;  %v5066_v9 = vld [vmem:[#allocation4 + $0x570] sm:$0xff]  ;;  %v5057_v11 = vld [vmem:[#allocation4 + $0x528] sm:$0xff] }
 0x976   :  { %5314 = vmatprep.subr.mxu0 %v4921_v60  ;;  %5385 = vmatprep.subr.mxu1 %v4923_v12  ;;  %v5059_v60 = vld [vmem:[#allocation4 + $0x538] sm:$0xff]  ;;  %v5056_v12 = vld [vmem:[#allocation4 + $0x520] sm:$0xff] }
 0x977   :  { %5315 = vmatpush1.msra.mxu0 %v4920_v13  ;;  %5386 = vmatpush1.msra.mxu1 %v4922_v52  ;;  %v5058_v13 = vld [vmem:[#allocation4 + $0x530] sm:$0xff]  ;;  %v5049_v52 = vld [vmem:[#allocation4 + $0x4e8] sm:$0xff] }
 0x978   :  { %5316 = vmatprep.subr.mxu0 %v4913_v3  ;;  %5387 = vmatprep.subr.mxu1 %v4915_v16  ;;  %v5051_v3 = vld [vmem:[#allocation4 + $0x4f8] sm:$0xff]  ;;  %v5048_v16 = vld [vmem:[#allocation4 + $0x4e0] sm:$0xff] }
 0x979   :  { %5317 = vmatpush1.msra.mxu0 %v4912_v17  ;;  %5388 = vmatpush1.msra.mxu1 %v4914_v18  ;;  %v5050_v17 = vld [vmem:[#allocation4 + $0x4f0] sm:$0xff]  ;;  %v5041_v18 = vld [vmem:[#allocation4 + $0x4a8] sm:$0xff] }
 0x97a   :  { %5318 = vmatprep.subr.mxu0 %v4905_v19  ;;  %5389 = vmatprep.subr.mxu1 %v4907_v20  ;;  %v5043_v19 = vld [vmem:[#allocation4 + $0x4b8] sm:$0xff]  ;;  %v5040_v20 = vld [vmem:[#allocation4 + $0x4a0] sm:$0xff] }
 0x97b   :  { %5319 = vmatpush1.msra.mxu0 %v4904_v23  ;;  %5390 = vmatpush1.msra.mxu1 %v4906_v5  ;;  %v5042_v23 = vld [vmem:[#allocation4 + $0x4b0] sm:$0xff]  ;;  %v5033_v5 = vld [vmem:[#allocation4 + $0x468] sm:$0xff] }
 0x97c   :  { %5320 = vmatprep.subr.mxu0 %v4897_v24  ;;  %5391 = vmatprep.subr.mxu1 %v4899_v26  ;;  %v5035_v24 = vld [vmem:[#allocation4 + $0x478] sm:$0xff]  ;;  %v5032_v26 = vld [vmem:[#allocation4 + $0x460] sm:$0xff] }
 0x97d   :  { %5321 = vmatpush1.msra.mxu0 %v4896_v29  ;;  %5392 = vmatpush1.msra.mxu1 %v4898_v10  ;;  %v5034_v29 = vld [vmem:[#allocation4 + $0x470] sm:$0xff]  ;;  %v5025_v10 = vld [vmem:[#allocation4 + $0x428] sm:$0xff] }
 0x97e   :  { %5322 = vmatprep.subr.mxu0 %v5145_v30  ;;  %5393 = vmatprep.subr.mxu1 %v5147_v31  ;;  %v5027_v30 = vld [vmem:[#allocation4 + $0x438] sm:$0xff]  ;;  %v5024_v31 = vld [vmem:[#allocation4 + $0x420] sm:$0xff] }
 0x97f   :  { %5323 = vmatpush2.msra.mxu0 %v5144_v32  ;;  %5394 = vmatpush2.msra.mxu1 %v5146_v1  ;;  %v5026_v32 = vld [vmem:[#allocation4 + $0x430] sm:$0xff]  ;;  %v5523_v1 = vld [vmem:[%s6420_s4 + $0xf8] sm:$0xff] }
 0x980   :  { %5324 = vmatprep.subr.mxu0 %v5137_v33  ;;  %5395 = vmatprep.subr.mxu1 %v5139_v34  ;;  %v5507_v33 = vld [vmem:[%s6420_s4 + $0x78] sm:$0xff]  ;;  %v5485_v34 = vld [vmem:[#allocation3 + $0x28] sm:$0xff] }
 0x981   :  { %5325 = vmatpush2.msra.mxu0 %v5136_v37  ;;  %5396 = vmatpush2.msra.mxu1 %v5138_v22  ;;  %v5522_v37 = vld [vmem:[%s6420_s4 + $0xf0] sm:$0xff] }
 0x982   :  { %5326 = vmatprep.subr.mxu0 %v5129_v21  ;;  %5397 = vmatprep.subr.mxu1 %v5131_v40  ;;  %v5506_v22 = vld [vmem:[%s6420_s4 + $0x70] sm:$0xff]  ;;  %v5521_v21 = vld [vmem:[%s6420_s4 + $0xe8] sm:$0xff]  ;;  %v5520_v40 = vld [vmem:[%s6420_s4 + $0xe0] sm:$0xff] }
 0x983   :  { %5327 = vmatpush2.msra.mxu0 %v5128_v36  ;;  %5398 = vmatpush2.msra.mxu1 %v5130_v43  ;;  %v5504_v36 = vld [vmem:[%s6420_s4 + $0x60] sm:$0xff]  ;;  %v5519_v43 = vld [vmem:[%s6420_s4 + $0xd8] sm:$0xff] }
 0x984   :  { %5328 = vmatprep.subr.mxu0 %v5121_v44  ;;  %5399 = vmatprep.subr.mxu1 %v5123_v45  ;;  %v5503_v44 = vld [vmem:[%s6420_s4 + $0x58] sm:$0xff]  ;;  %v5518_v45 = vld [vmem:[%s6420_s4 + $0xd0] sm:$0xff] }
 0x985   :  { %5329 = vmatpush2.msra.mxu0 %v5120_v46  ;;  %5400 = vmatpush2.msra.mxu1 %v5122_v47  ;;  %v5502_v46 = vld [vmem:[%s6420_s4 + $0x50] sm:$0xff]  ;;  %v5517_v47 = vld [vmem:[%s6420_s4 + $0xc8] sm:$0xff] }
 0x986   :  { %5330 = vmatprep.subr.mxu0 %v5113_v49  ;;  %5401 = vmatprep.subr.mxu1 %v5115_v27  ;;  %v5501_v49 = vld [vmem:[%s6420_s4 + $0x48] sm:$0xff]  ;;  %v5516_v27 = vld [vmem:[%s6420_s4 + $0xc0] sm:$0xff] }
 0x987   :  { %5331 = vmatpush2.msra.mxu0 %v5112_v50  ;;  %5402 = vmatpush2.msra.mxu1 %v5114_v51  ;;  %v5500_v50 = vld [vmem:[%s6420_s4 + $0x40] sm:$0xff]  ;;  %v5515_v51 = vld [vmem:[%s6420_s4 + $0xb8] sm:$0xff] }
 0x988   :  { %5332 = vmatprep.subr.mxu0 %v5105_v38  ;;  %5403 = vmatprep.subr.mxu1 %v5107_v39  ;;  %v5499_v38 = vld [vmem:[%s6420_s4 + $0x38] sm:$0xff]  ;;  %v5514_v39 = vld [vmem:[%s6420_s4 + $0xb0] sm:$0xff] }
 0x989   :  { %5333 = vmatpush2.msra.mxu0 %v5104_v53  ;;  %5404 = vmatpush2.msra.mxu1 %v5106_v55  ;;  %v5498_v53 = vld [vmem:[%s6420_s4 + $0x30] sm:$0xff]  ;;  %v5513_v55 = vld [vmem:[%s6420_s4 + $0xa8] sm:$0xff] }
 0x98a   :  { %5334 = vmatprep.subr.mxu0 %v5097_v35  ;;  %5405 = vmatprep.subr.mxu1 %v5099_v41  ;;  %v5497_v35 = vld [vmem:[%s6420_s4 + $0x28] sm:$0xff]  ;;  %v5512_v41 = vld [vmem:[%s6420_s4 + $0xa0] sm:$0xff] }
 0x98b   :  { %5335 = vmatpush2.msra.mxu0 %v5096_v57  ;;  %5406 = vmatpush2.msra.mxu1 %v5098_v42  ;;  %v5496_v57 = vld [vmem:[%s6420_s4 + $0x20] sm:$0xff]  ;;  %v5511_v42 = vld [vmem:[%s6420_s4 + $0x98] sm:$0xff] }
 0x98c   :  { %5336 = vmatprep.subr.mxu0 %v5089_v58  ;;  %5407 = vmatprep.subr.mxu1 %v5091_v59  ;;  %v5495_v58 = vld [vmem:[%s6420_s4 + $0x18] sm:$0xff]  ;;  %v5510_v59 = vld [vmem:[%s6420_s4 + $0x90] sm:$0xff] }
 0x98d   :  { %5337 = vmatpush2.msra.mxu0 %v5088_v61  ;;  %5408 = vmatpush2.msra.mxu1 %v5090_v48  ;;  %v5494_v61 = vld [vmem:[%s6420_s4 + $0x10] sm:$0xff]  ;;  %v5509_v48 = vld [vmem:[%s6420_s4 + $0x88] sm:$0xff] }
 0x98e   :  { %5338 = vmatprep.subr.mxu0 %v5081_v62  ;;  %5409 = vmatprep.subr.mxu1 %v5083_v63  ;;  %v5493_v62 = vld [vmem:[%s6420_s4 + $0x8] sm:$0xff]  ;;  %v5508_v63 = vld [vmem:[%s6420_s4 + $0x80] sm:$0xff] }
 0x98f   :  { %5339 = vmatpush2.msra.mxu0 %v5080_v25  ;;  %5410 = vmatpush2.msra.mxu1 %v5082_v54  ;;  %v5492_v25 = vld [vmem:[%s6420_s4] sm:$0xff]  ;;  %v5484_v54 = vld [vmem:[#allocation3 + $0x18] sm:$0xff] }
 0x990   :  { %5340 = vmatprep.subr.mxu0 %v5073_v2  ;;  %5411 = vmatprep.subr.mxu1 %v5075_v4  ;;  %v5487_v2 = vld [vmem:[#allocation3 + $0x8] sm:$0xff]  ;;  %v5486_v4 = vld [vmem:[#allocation3 + $0x38] sm:$0xff] }
 0x991   :  { %5341 = vmatpush2.msra.mxu0 %v5072_v0  ;;  %5412 = vmatpush2.msra.mxu1 %v5074_v6  ;;  %v5489_v0 = vld [vmem:[#allocation3 + $0x20] sm:$0xff] }
 0x992   :  { %5342 = vmatprep.subr.mxu0 %v5065_v7  ;;  %5413 = vmatprep.subr.mxu1 %v5067_v56  ;;  %v5488_v6 = vld [vmem:[#allocation3] sm:$0xff] }
 0x993   :  { %5343 = vmatpush2.msra.mxu0 %v5064_v8  ;;  %5414 = vmatpush2.msra.mxu1 %v5066_v9  ;;  %v4886_v8 = vld [vmem:[#allocation2 + $0x30] sm:$0xf] }
 0x994   :  { %5344 = vmatprep.subr.mxu0 %v5057_v11  ;;  %5415 = vmatprep.subr.mxu1 %v5059_v60  ;;  %v4884_v11 = vld [vmem:[#allocation2 + $0x58] sm:$0xf] }
 0x995   :  { %5345 = vmatpush2.msra.mxu0 %v5056_v12  ;;  %5416 = vmatpush2.msra.mxu1 %v5058_v13 }
 0x996   :  { %5346 = vmatprep.subr.mxu0 %v5049_v52  ;;  %5417 = vmatprep.subr.mxu1 %v5051_v3  ;;  %v4887_v52 = vld [vmem:[#allocation2 + $0x40] sm:$0xf] }
 0x997   :  { %5347 = vmatpush2.msra.mxu0 %v5048_v16  ;;  %5418 = vmatpush2.msra.mxu1 %v5050_v17  ;;  %v4885_v16 = vld [vmem:[#allocation2 + $0x78] sm:$0xf] }
 0x998   :  { %5348 = vmatprep.subr.mxu0 %v5041_v18  ;;  %5419 = vmatprep.subr.mxu1 %v5043_v19  ;;  %v4890_v18 = vld [vmem:[#allocation2 + $0xb8] sm:$0xf] }
 0x999   :  { %5349 = vmatpush2.msra.mxu0 %v5040_v20  ;;  %5420 = vmatpush2.msra.mxu1 %v5042_v23  ;;  %v4891_v23 = vld [vmem:[#allocation2 + $0x60] sm:$0xf] }
 0x99a   :  { %5350 = vmatprep.subr.mxu0 %v5033_v5  ;;  %5421 = vmatprep.subr.mxu1 %v5035_v24 }
 0x99b   :  { %5351 = vmatpush2.msra.mxu0 %v5032_v26  ;;  %5422 = vmatpush2.msra.mxu1 %v5034_v29 }
 0x99c   :  { %5352 = vmatprep.subr.mxu0 %v5025_v10  ;;  %5423 = vmatprep.subr.mxu1 %v5027_v30 }
 0x99d   :  { %5353 = vmatpush2.msra.mxu0 %v5024_v31  ;;  %5424 = vmatpush2.msra.mxu1 %v5026_v32  ;;  %v4888_v31 = vld [vmem:[#allocation2 + $0x28] sm:$0xf] }
 0x99e   :  { %5355 = vmatmul.mubr.f32.vlgmr.msra.gmra.mxu0 %v6293_v28  ;;  %5426 = vmatmul.mubr.f32.vlgmr.msra.gmra.mxu1 %v6293_v28  ;;  %v5505_v28 = vld [vmem:[%s6420_s4 + $0x68] sm:$0xff] }
 0x99f   :  { %5707 = vmatprep.subr.mxu0 %v5523_v1  ;;  %5595 = vmatprep.mubr.f32.mxu0 %v5485_v34 }
 0x9a0   :  { %5708 = vmatpush3.msra.mxu0 %v5507_v33 }
 0x9a1   :  { %5709 = vmatprep.subr.mxu0 %v5522_v37  ;;  %v4889_v37 = vld [vmem:[#allocation2] sm:$0xf] }
 0x9a2   :  { %5710 = vmatpush3.msra.mxu0 %v5506_v22 }
 0x9a3   :  { %5711 = vmatprep.subr.mxu0 %v5521_v21 }
 0x9a4   :  { %5712 = vmatpush3.msra.mxu0 %v5505_v28 }
 0x9a5   :  { %5713 = vmatprep.subr.mxu0 %v5520_v40 }
 0x9a6   :  { %5714 = vmatpush3.msra.mxu0 %v5504_v36 }
 0x9a7   :  { %5715 = vmatprep.subr.mxu0 %v5519_v43 }
 0x9a8   :  { %5716 = vmatpush3.msra.mxu0 %v5503_v44  ;;  %v5462_v44 = vrot.slane %v6287_v14, 4 }
 0x9a9   :  { %5717 = vmatprep.subr.mxu0 %v5518_v45 }
 0x9aa   :  { %5718 = vmatpush3.msra.mxu0 %v5502_v46 }
 0x9ab   :  { %5719 = vmatprep.subr.mxu0 %v5517_v47 }
 0x9ac   :  { %5720 = vmatpush3.msra.mxu0 %v5501_v49 }
 0x9ad   :  { %5721 = vmatprep.subr.mxu0 %v5516_v27  ;;  %v5463_v27 = vrot.slane %v6290_v15, 4  ;;  %v5706_v15 = vld [vmem:[%s6421_s5] ss:$0 sm:$0xff]  ;;  %s6002_s5 = smov [#allocation7]  }
 0x9ae   :  { %5722 = vmatpush3.msra.mxu0 %v5500_v50  ;;  %s5674_s28 = sshll.u32 %s6002_s5, 4  ;;  %s5675_s28 = int_to_ptr.vmem [resolvable:$true] %s5674_s28 }
 0x9af   :  { %5723 = vmatprep.subr.mxu0 %v5515_v51  ;;  %s5974_s29 = scalar_lea.vmem %s5675_s28, 512  ;;  %p5979_p6 = scmp.lt.s32.totalorder %s5675_s28, %s5675_s28 }
 0x9b0   :  { %5724 = vmatpush3.msra.mxu0 %v5499_v38  ;;  %p5975_p5 = scmp.ne.s32.totalorder %s5675_s28, %s5974_s29  ;;  %p5980_p7 = scmp.lt.s32.totalorder %s5974_s29, %s5974_s29 }
 0x9b1   :  { %5725 = vmatprep.subr.mxu0 %v5514_v39 }
 0x9b2   :  { %5726 = vmatpush3.msra.mxu0 %v5498_v53  ;;  %p5981_p8 = por %p5980_p7, %p5979_p6 }
 0x9b3   :  { %5727 = vmatprep.subr.mxu0 %v5513_v55 }
 0x9b4   :  { %5728 = vmatpush3.msra.mxu0 %v5497_v35  ;;  %p5982_p9 = pnand %p5981_p8, %p5975_p5 }
 0x9b5   :  { %5729 = vmatprep.subr.mxu0 %v5512_v41 }
 0x9b6   :  { %5730 = vmatpush3.msra.mxu0 %v5496_v57 }
 0x9b7   :  { %5731 = vmatprep.subr.mxu0 %v5511_v42 }
 0x9b8   :  { %5732 = vmatpush3.msra.mxu0 %v5495_v58 }
 0x9b9   :  { %5733 = vmatprep.subr.mxu0 %v5510_v59 }
 0x9ba   :  { %5734 = vmatpush3.msra.mxu0 %v5494_v61 }
 0x9bb   :  { %5735 = vmatprep.subr.mxu0 %v5509_v48 }
 0x9bc   :  { %5736 = vmatpush3.msra.mxu0 %v5493_v62 }
 0x9bd   :  { %5737 = vmatprep.subr.mxu0 %v5508_v63 }
 0x9be   :  { %5738 = vmatpush3.msra.mxu0 %v5492_v25 }
 0x9bf   :  { %5596 = vmatmul.mubr.f32.vlgmr.msra.gmra.mxu0 %v5484_v54 }
 0x9c0   :  { %5600 = vmatprep.mubr.f32.mxu0 %v5487_v2 }
 0x9c3   :  { %5601 = vmatmul.mubr.f32.gmra.mxu0 %v5486_v4 }
 0x9c4   :  { %5605 = vmatprep.mubr.f32.mxu0 %v5489_v0 }
 0x9c7   :  { %5606 = vmatmul.mubr.f32.gmra.mxu0 %v5488_v6 }
 0xa1d   :  { %v5285_v7 = vpop.f32.mrf.mxu1  ;;  %v5214_v56 = vpop.f32.mrf.mxu0 }
 0xa1e   :  { %v5434_v60 = vadd.f32 %v5285_v7, %v4886_v8  ;;  %v5432_v12 = vadd.f32 %v5214_v56, %v4884_v11 }
 0xa1f   :  { %v5287_v9 = vpop.f32.mrf.mxu1  ;;  %v5216_v13 = vpop.f32.mrf.mxu0 }
 0xa20   :  { %v5435_v3 = vadd.f32 %v5287_v9, %v4887_v52  ;;  %5918 = vtanh.f32 %v5434_v60  ;;  %v5433_v17 = vadd.f32 %v5216_v13, %v4885_v16 }
 0xa21   :  { %5920 = vtanh.f32 %v5432_v12 }
 0xa22   :  { %5922 = vtanh.f32 %v5435_v3 }
 0xa23   :  { %5924 = vtanh.f32 %v5433_v17 }
 0xa2d   :  { %v5919_v29 = vpop.eup %5918 }
 0xa2e   :  { %v5921_v10 = vpop.eup %5920  ;;  %v5450_v1 = vmul.f32 0.5, %v5919_v29 }
 0xa2f   :  { %v5923_v30 = vpop.eup %5922  ;;  %v5448_v22 = vmul.f32 0.5, %v5921_v10 }
 0xa30   :  { %v5925_v34 = vpop.eup %5924  ;;  %v5451_v21 = vmul.f32 0.5, %v5923_v30  ;;  %v5456_v40 = vadd.f32 0.5, %v5450_v1 }
 0xa31   :  { %v5449_v36 = vmul.f32 0.5, %v5925_v34  ;;  %v5454_v43 = vadd.f32 0.5, %v5448_v22 }
 0xa32   :  { %v5457_v45 = vadd.f32 0.5, %v5451_v21  ;;  %v5466_v47 = vmul.f32 %v5462_v44, %v5456_v40 }
 0xa33   :  { %v5455_v49 = vadd.f32 0.5, %v5449_v36 }
 0xa34   :  { %v5467_v38 = vmul.f32 %v5463_v27, %v5457_v45 }
 0xa5e   :  { %v5427_v19 = vpop.f32.mrf.mxu1  ;;  %v5356_v26 = vpop.f32.mrf.mxu0 }
 0xa5f   :  { %v5438_v20 = vadd.f32 %v5427_v19, %v4890_v18  ;;  %v5436_v33 = vadd.f32 %v5356_v26, %v4888_v31 }
 0xa60   :  { %v5429_v5 = vpop.f32.mrf.mxu1  ;;  %v5358_v32 = vpop.f32.mrf.mxu0 }
 0xa61   :  { %v5439_v24 = vadd.f32 %v5429_v5, %v4891_v23  ;;  %5926 = vtanh.f32 %v5438_v20  ;;  %v5437_v28 = vadd.f32 %v5358_v32, %v4889_v37 }
 0xa63   :  { %5928 = vtanh.f32 %v5439_v24 }
 0xa64   :  { %5930 = vtanh.f32 %v5436_v33 }
 0xa65   :  { %5932 = vtanh.f32 %v5437_v28 }
 0xa6e   :  { %v5927_v46 = vpop.eup %5926 }
 0xa6f   :  { %v5468_v50 = vmul.f32 %v5927_v46, %v5454_v43 }
 0xa70   :  { %v5929_v51 = vpop.eup %5928 }
 0xa71   :  { %v5470_v39 = vadd.f32 %v5468_v50, %v5466_v47  ;;  %v5469_v53 = vmul.f32 %v5929_v51, %v5455_v49  ;;  %v5931_v35 = vpop.eup %5930 }
 0xa72   :  { %v5933_v41 = vpop.eup %5932  ;;  %v5452_v57 = vmul.f32 0.5, %v5931_v35 }
 0xa73   :  { %5934 = vtanh.f32 %v5470_v39  ;;  %v5471_v55 = vadd.f32 %v5469_v53, %v5467_v38  ;;  %v5453_v42 = vmul.f32 0.5, %v5933_v41 }
 0xa74   :  { %v5458_v58 = vadd.f32 0.5, %v5452_v57 }
 0xa75   :  { %5936 = vtanh.f32 %v5471_v55  ;;  %v5459_v62 = vadd.f32 0.5, %v5453_v42 }
 0xa7f   :  { %v5739_v14 = vpop.f32.mrf.mxu0 }
 0xa80   :  { %v5935_v59 = vpop.eup %5934 }
 0xa81   :  { %v5740_v61 = vpop.f32.mrf.mxu0  ;;  %v5474_v48 = vmul.f32 %v5935_v59, %v5458_v58 }
 0xa82   :  { %v5741_v63 = vadd.f32 %v5740_v61, %v5739_v14  ;;  %v5937_v25 = vpop.eup %5936 }
 0xa83   :  { %v5742_v54 = vpop.f32.mrf.mxu0  ;;  %v5478_v2 = vrot.slane %v5474_v48, 4  ;;  %v5475_v4 = vmul.f32 %v5937_v25, %v5459_v62 }
 0xa84   :  { %v5598_v0 = vadd.f32 %v5741_v63, %v5706_v15 }
 0xa85   :  { %v5743_v6 = vpop.f32.mrf.mxu0  ;;  %5482 = vst [vmem:[#allocation3 + $0x30] sm:$0xf0] %v5478_v2  ;;  %v5479_v7 = vrot.slane %v5475_v4, 4 }
 0xa86   :  { %v5744_v56 = vadd.f32 %v5743_v6, %v5742_v54  ;;  %v5617_v8 = vsel %vm5616_vm1, %v5598_v0, -inf }
 0xa87   :  { %v5745_v9 = vpop.f32.mrf.mxu0  ;;  %5618 = vmax.xlane.f32.xlu0 %v5617_v8  ;;  %5483 = vst [vmem:[#allocation3 + $0x10] sm:$0xf0] %v5479_v7 }
 0xa88   :  { %v5603_v11 = vadd.f32 %v5744_v56, %v5706_v15 }
 0xa89   :  { %v5746_v60 = vpop.f32.mrf.mxu0 }
 0xa8a   :  { %v5747_v12 = vadd.f32 %v5746_v60, %v5745_v9  ;;  %v5620_v13 = vsel %vm5616_vm1, %v5603_v11, -inf }
 0xa8b   :  { %5621 = vmax.xlane.f32.xlu0 %v5620_v13 }
 0xa8c   :  { %v5608_v52 = vadd.f32 %v5747_v12, %v5706_v15  ;;  %v5490_v17 = vld [vmem:[#allocation3 + $0x30] sm:$0xff] }
 0xa8e   :  { %v5623_v3 = vsel %vm5616_vm1, %v5608_v52, -inf  ;;  %v5491_v16 = vld [vmem:[#allocation3 + $0x10] sm:$0xff] }
 0xa8f   :  { %5624 = vmax.xlane.f32.xlu1 %v5623_v3  ;;  %5610 = vmatprep.mubr.f32.mxu0 %v5491_v16 }
 0xa90   :  { %5611 = vmatmul.mubr.f32.gmra.mxu0 %v5490_v17 }
 0xb10   :  { %v5619_v18 = vpop.xlane.xlu0 %5618 }
 0xb11   :  { %v5629_v19 = vsub.f32 %v5598_v0, %v5619_v18 }
 0xb13   :  { %v5633_v20 = vmul.f32 1.442695, %v5629_v19 }
 0xb14   :  { %v5622_v31 = vpop.xlane.xlu0 %5621 }
 0xb15   :  { %5938 = vpow2.f32 %v5633_v20  ;;  %v5630_v32 = vsub.f32 %v5603_v11, %v5622_v31 }
 0xb17   :  { %v5635_v1 = vmul.f32 1.442695, %v5630_v32 }
 0xb18   :  { %v5625_v23 = vpop.xlane.xlu1 %5624 }
 0xb19   :  { %v5631_v5 = vsub.f32 %v5608_v52, %v5625_v23 }
 0xb1b   :  { %v5637_v24 = vmul.f32 1.442695, %v5631_v5 }
 0xb1d   :  { %5940 = vpow2.f32 %v5637_v24 }
 0xb1e   :  { %5942 = vpow2.f32 %v5635_v1 }
 0xb22   :  { %v5939_v26 = vpop.eup %5938 }
 0xb23   :  { %v5641_v29 = vsel %vm5616_vm1, %v5939_v26, 0.0 }
 0xb24   :  { %5642 = vadd.xlane.f32.xlu0 %v5641_v29 }
 0xb2a   :  { %v5941_v10 = vpop.eup %5940 }
 0xb2b   :  { %v5647_v30 = vsel %vm5616_vm1, %v5941_v10, 0.0  ;;  %v5943_v28 = vpop.eup %5942 }
 0xb2c   :  { %5648 = vadd.xlane.f32.xlu0 %v5647_v30  ;;  %v5644_v40 = vsel %vm5616_vm1, %v5943_v28, 0.0 }
 0xb50   :  { %v5748_v33 = vpop.f32.mrf.mxu0 }
 0xb52   :  { %v5749_v34 = vpop.f32.mrf.mxu0 }
 0xb53   :  { %v5750_v37 = vadd.f32 %v5749_v34, %v5748_v33 }
 0xb55   :  { %v5613_v22 = vadd.f32 %v5750_v37, %v5706_v15 }
 0xb57   :  { %v5626_v21 = vsel %vm5616_vm1, %v5613_v22, -inf }
 0xb58   :  { %5627 = vmax.xlane.f32.xlu1 %v5626_v21 }
 0xb5c   :  { %5645 = vadd.xlane.f32.xlu1 %v5644_v40 }
 0xbad   :  { %v5643_v36 = vpop.xlane.xlu0 %5642 }
 0xbae   :  { %5944 = vlog2.f32 %v5643_v36 }
 0xbb5   :  { %v5649_v43 = vpop.xlane.xlu0 %5648 }
 0xbb6   :  { %5946 = vlog2.f32 %v5649_v43 }
 0xbbb   :  { %v5945_v44 = vpop.eup %5944 }
 0xbbc   :  { %v5654_v45 = vmul.f32 0.6931472, %v5945_v44 }
 0xbbe   :  { %v5661_v46 = vsub.f32 %v5629_v19, %v5654_v45 }
 0xbc0   :  { %5665 = vst.msk [vmem:[#allocation7] sm:$0xff] %vm5616_vm1, %v5661_v46 }
 0xbc3   :  { %v5947_v47 = vpop.eup %5946 }
 0xbc4   :  { %v5658_v49 = vmul.f32 0.6931472, %v5947_v47 }
 0xbc6   :  { %v5663_v27 = vsub.f32 %v5631_v5, %v5658_v49 }
 0xbc8   :  { %5667 = vst.msk [vmem:[#allocation7 + $0x10] sm:$0xff] %vm5616_vm1, %v5663_v27 }
 0xbe1   :  { %v5628_v50 = vpop.xlane.xlu1 %5627 }
 0xbe2   :  { %v5632_v51 = vsub.f32 %v5613_v22, %v5628_v50 }
 0xbe4   :  { %v5639_v38 = vmul.f32 1.442695, %v5632_v51 }
 0xbe5   :  { %v5646_v39 = vpop.xlane.xlu1 %5645 }
 0xbe6   :  { %5948 = vpow2.f32 %v5639_v38 }
 0xbe7   :  { %5950 = vlog2.f32 %v5646_v39 }
 0xbf3   :  { %v5949_v53 = vpop.eup %5948 }
 0xbf4   :  { %v5951_v55 = vpop.eup %5950  ;;  %v5650_v35 = vsel %vm5616_vm1, %v5949_v53, 0.0 }
 0xbf5   :  { %v5656_v41 = vmul.f32 0.6931472, %v5951_v55  ;;  %5651 = vadd.xlane.f32.xlu1 %v5650_v35 }
 0xbf7   :  { %v5662_v57 = vsub.f32 %v5630_v32, %v5656_v41 }
 0xbf9   :  { %5666 = vst.msk [vmem:[#allocation7 + $0x8] sm:$0xff] %vm5616_vm1, %v5662_v57 }
 0xc7e   :  { %v5652_v42 = vpop.xlane.xlu1 %5651 }
 0xc7f   :  { %5952 = vlog2.f32 %v5652_v42 }
 0xc8c   :  { %v5953_v14 = vpop.eup %5952 }
 0xc8d   :  { %v5660_v58 = vmul.f32 0.6931472, %v5953_v14 }
 0xc8f   :  { %v5664_v59 = vsub.f32 %v5632_v51, %v5660_v58 }
 0xc91   :  { %5668 = vst.msk [vmem:[#allocation7 + $0x18] sm:$0xff] %vm5616_vm1, %v5664_v59 }
 0xc92   :  { %5985 = shalt.err (!%p5982_p9)
}
 0xc93   :  { %s6003_s30 = smov 128   ;;  %s6004_s7 = smov 8  }
 0xc94   :  { %5680 = dma.vmem_to_hbm [thread:$0]  %s5675_s28, 512, %s6422_s6, [#allocation6], %s6003_s30, %s6003_s30, %s6004_s7  }
 0xc95   :  { %5996 = dma.done.wait [#allocation6], 512  }
 0xc96   :  { %5997 = vsyncadd [#allocation6], 4294966784 }
 0xc97   :  { %5684 = vsyncpa [#allocation5], 1 }
 0xc98   :  { %5685 = vsyncpa [#allocation6], 1 }

</bundles_post_ra>
